<compile_context>
chip_gen: v5e
topology: v5e:2x2
jax: 0.10.0
libtpu: 0.0.40
codegen_flags: <defaults>
</compile_context>

<pallas_src>
import functools

import jax
import jax.numpy as jnp
from jax.experimental import pallas as pl
from jax.experimental.pallas import tpu as pltpu


def _round_up(n, m):
    return ((n + m - 1) // m) * m


def _wta_kernel(x_ref, *rest, WB, N, C, num_heads, head_dim,
                has_bias, has_post, has_keep):
    # Unpack optional refs (order: bias, post, keep — only those actually passed).
    idx = 0
    bias_ref = post_ref = keep_ref = None
    if has_bias:
        bias_ref = rest[idx]
        idx += 1
    if has_post:
        post_ref = rest[idx]
        idx += 1
    if has_keep:
        keep_ref = rest[idx]
        idx += 1
    wqkv_ref, bqkv_ref, wproj_ref, bproj_ref, o_ref = rest[idx:]

    f32 = jnp.float32
    bf16 = jnp.bfloat16
    WBN = WB * N

    # Fused qkv projection over all WB windows at once: (WB*N, C) @ (C, 3C) on the MXU.
    x = x_ref[...].reshape(WBN, C).astype(bf16)
    qkv = jnp.dot(x, wqkv_ref[...], preferred_element_type=f32) + bqkv_ref[...]
    qkv = qkv.reshape(WB, N, 3 * C)  # qk scale already folded into wqkv/bqkv.

    # Hoisted per-block reads (shared by every head).
    if has_bias:
        bias = bias_ref[...].astype(f32)   # (WB, N, N): host-precomputed, convert once
    if has_post:
        post = post_ref[...]               # (WB, N, N) bf16 (already includes keep if masked)

    out = jnp.zeros((WBN, C), f32)
    for h in range(num_heads):  # small static loop; each step batched over WB windows
        lo = h * head_dim
        q = qkv[:, :, lo:lo + head_dim].astype(bf16)                   # (WB, N, hd)
        k = qkv[:, :, C + lo:C + lo + head_dim].astype(bf16)           # (WB, N, hd)
        v = qkv[:, :, 2 * C + lo:2 * C + lo + head_dim].astype(bf16)   # (WB, N, hd)

        # Batched q @ k^T with last-dim contraction (no explicit transpose).
        attn = jnp.einsum("wnd,wmd->wnm", q, k, preferred_element_type=f32)  # (WB, N, N)
        if has_bias:
            attn = attn + bias             # finite -1e30 bias; exp underflows to exact 0

        # Softmax over keys; divide goes to the EUP via approx reciprocal (f32 math).
        m = jnp.max(attn, axis=-1, keepdims=True)
        e = jnp.exp(attn - m)
        s = jnp.sum(e, axis=-1, keepdims=True)
        p = (e * pl.reciprocal(s, approx=True)).astype(bf16)
        if has_post:
            p = p * post                   # single bf16 VPU pass: keep*group_prob fused
        # attn_drop is identity (p = 0.0)

        pv = jnp.einsum("wnm,wmd->wnd", p, v, preferred_element_type=f32)   # (WB, N, hd)
        # Head recombination folded into the projection: out += pv_h @ Wproj[h*hd:(h+1)*hd]
        out = out + jnp.dot(pv.reshape(WBN, head_dim).astype(bf16), wproj_ref[h],
                            preferred_element_type=f32)

    if has_keep:
        # Fully-masked query rows -> zero attention output (matches torch's -inf softmax
        # -> nan_to_num -> 0). Applied once post-proj on the small (WBN, C) tensor instead
        # of per head on (WB, N, N); exact because proj mixes features, not rows.
        out = out * keep_ref[...].reshape(WBN, 1)
    out = out + bproj_ref[...]             # proj bias is added regardless (as in torch)
    # proj_drop is identity.
    o_ref[...] = out.reshape(WB, N, C).astype(o_ref.dtype)


def prepare_params(params, num_heads, qk_scale=None):
    """One-time parameter prep: fold the qk scale into W_qkv / b_qkv, cast matmul weights
    to bf16, and split W_proj per head so the kernel can accumulate per-head projections."""
    C = params["wqkv"].shape[0]
    head_dim = C // num_heads
    scale = float(qk_scale) if qk_scale is not None else head_dim ** (-0.5)
    col_scale = jnp.concatenate(
        [jnp.full((C,), scale, jnp.float32), jnp.ones((2 * C,), jnp.float32)]
    )
    return {
        "wqkv": (params["wqkv"].astype(jnp.float32) * col_scale[None, :]).astype(jnp.bfloat16),
        "bqkv": (params["bqkv"].astype(jnp.float32) * col_scale).reshape(1, 3 * C),
        "wproj": params["wproj"].astype(jnp.bfloat16).reshape(num_heads, head_dim, C),
        "bproj": params["bproj"].astype(jnp.float32).reshape(1, C),
    }


def window_tree_attention(x, params, num_heads, mask=None, group_prob=None,
                          window_batch=64):
    """x: (B_, N, C) float32; mask/group_prob: (B_, N, N) or None; params from prepare_params."""
    B_, N, C = x.shape
    head_dim = C // num_heads
    f32, bf16 = jnp.float32, jnp.bfloat16

    # --- Host-side precompute (halves the largest HBM streams, removes in-kernel mask math).
    bias = post = keep = None
    if mask is not None:
        masked = (mask != 0)                                               # bool, torch-style
        bias = jnp.where(masked, -1e30, 0.0).astype(bf16)                  # (B_, N, N) bf16
        keep_f = jnp.any(~masked, axis=-1, keepdims=True).astype(f32)      # 0.0 iff row fully masked
        if group_prob is not None:
            post = (keep_f * group_prob.astype(f32)).astype(bf16)          # fused keep*gp, bf16
        else:
            keep = keep_f                                                  # tiny (B_, N, 1) f32
    elif group_prob is not None:
        post = group_prob.astype(bf16)

    # --- Window-batch: large MXU M-dim, but keep grid >= 2 so v7x can use both TensorCores.
    WB = max(1, min(window_batch, B_))
    if B_ >= 2:
        WB = min(WB, -(-B_ // 2))  # cdiv(B_, 2)
    pad = (-B_) % WB
    if pad:
        padw = ((0, pad), (0, 0), (0, 0))
        x = jnp.pad(x, padw)
        if bias is not None:
            bias = jnp.pad(bias, padw)
        if post is not None:
            post = jnp.pad(post, padw)
        if keep is not None:
            keep = jnp.pad(keep, padw)
    Bp = B_ + pad

    has_bias = bias is not None
    has_post = post is not None
    has_keep = keep is not None

    kernel = functools.partial(
        _wta_kernel, WB=WB, N=N, C=C, num_heads=num_heads, head_dim=head_dim,
        has_bias=has_bias, has_post=has_post, has_keep=has_keep,
    )

    inputs = [x]
    in_specs = [pl.BlockSpec((WB, N, C), lambda i: (i, 0, 0))]
    if has_bias:
        # TODO(synk): if a v5e profile shows exposed DMA on this stream, add
        # pipeline_mode=pl.Buffered(3) to the bias/post BlockSpecs.
        inputs.append(bias)
        in_specs.append(pl.BlockSpec((WB, N, N), lambda i: (i, 0, 0)))
    if has_post:
        inputs.append(post)
        in_specs.append(pl.BlockSpec((WB, N, N), lambda i: (i, 0, 0)))
    if has_keep:
        inputs.append(keep)
        in_specs.append(pl.BlockSpec((WB, N, 1), lambda i: (i, 0, 0)))
    inputs += [params["wqkv"], params["bqkv"], params["wproj"], params["bproj"]]
    in_specs += [
        pl.BlockSpec((C, 3 * C), lambda i: (0, 0)),
        pl.BlockSpec((1, 3 * C), lambda i: (0, 0)),
        pl.BlockSpec((num_heads, head_dim, C), lambda i: (0, 0, 0)),
        pl.BlockSpec((1, C), lambda i: (0, 0)),
    ]

    # --- Advisory cost estimate + scoped-VMEM budget (kernel is memory/VPU-bound; MXU
    #     contraction depth is model-intrinsic at C=32/hd=8, so no MXU micro-tuning).
    flops = Bp * (2 * N * C * 3 * C + 4 * N * N * C + 2 * N * C * C)
    transcendentals = Bp * num_heads * N * N
    bytes_accessed = (sum(int(a.size) * a.dtype.itemsize for a in inputs)
                      + Bp * N * C * x.dtype.itemsize)
    lane = lambda n: _round_up(n, 128)
    block_vmem = 2 * (2 * WB * N * lane(C) * 4)              # x + out blocks, double-buffered
    if has_bias:
        block_vmem += 2 * WB * N * lane(N) * 2
    if has_post:
        block_vmem += 2 * WB * N * lane(N) * 2
    if has_keep:
        block_vmem += 2 * WB * N * lane(1) * 4
    interm_vmem = (WB * N * lane(3 * C) * 4                  # qkv
                   + 6 * WB * N * lane(N) * 4                # attn / e / p working set
                   + 2 * WB * N * lane(C) * 4)               # accumulator / staging
    vmem_limit = int(min(max(2 * (block_vmem + interm_vmem), 32 * 2 ** 20), 48 * 2 ** 20))

    out = pl.pallas_call(
        kernel,
        out_shape=jax.ShapeDtypeStruct((Bp, N, C), x.dtype),
        grid_spec=pltpu.PrefetchScalarGridSpec(
            num_scalar_prefetch=0,
            grid=(Bp // WB,),
            in_specs=in_specs,
            out_specs=pl.BlockSpec((WB, N, C), lambda i: (i, 0, 0)),
        ),
        compiler_params=pltpu.CompilerParams(
            dimension_semantics=("parallel",),   # windows independent -> shard across TCs
            vmem_limit_bytes=vmem_limit,
        ),
        cost_estimate=pl.CostEstimate(
            flops=flops, transcendentals=transcendentals, bytes_accessed=bytes_accessed),
    )(*inputs)
    return out[:B_] if pad else out


def _reference(x, params, num_heads, mask, group_prob):
    """Pure-JAX f32 reference matching the PyTorch forward (incl. -inf mask -> nan -> 0)."""
    B_, N, C = x.shape
    hd = C // num_heads
    scale = hd ** (-0.5)
    qkv = x @ params["wqkv"] + params["bqkv"]
    qkv = qkv.reshape(B_, N, 3, num_heads, hd).transpose(2, 0, 3, 1, 4)
    q, k, v = qkv[0] * scale, qkv[1], qkv[2]
    attn = jnp.einsum("bhqd,bhkd->bhqk", q, k)
    if mask is not None:
        attn = jnp.where(mask[:, None, :, :] != 0, -jnp.inf, attn)
    m = jnp.max(attn, axis=-1, keepdims=True)
    e = jnp.exp(attn - m)
    p = e / jnp.sum(e, axis=-1, keepdims=True)
    p = jnp.where(jnp.isnan(p), 0.0, p)
    if group_prob is not None:
        p = p * group_prob[:, None, :, :]
    out = jnp.einsum("bhqk,bhkd->bhqd", p, v).transpose(0, 2, 1, 3).reshape(B_, N, C)
    return out @ params["wproj"] + params["bproj"]


if __name__ == "__main__":
    # 2 images of a 16x16 feature map, 4x4 windows -> 16 windows/image, 16 tokens/window,
    # dim=32, 4 heads => B_ = 32 windows, N = 16, C = 32.
    B, H_img, W_img, win = 2, 16, 16, 4
    C, H = 32, 4
    N = win * win
    nW = (H_img // win) * (W_img // win)
    B_ = B * nW

    key = jax.random.PRNGKey(0)
    k0, k1, k2, k3, k4, k5, k6 = jax.random.split(key, 7)

    x = jax.random.normal(k0, (B_, N, C), jnp.float32)
    raw_params = {
        "wqkv": 0.02 * jax.random.normal(k1, (C, 3 * C), jnp.float32),
        "bqkv": 0.02 * jax.random.normal(k2, (3 * C,), jnp.float32),
        "wproj": 0.02 * jax.random.normal(k3, (C, C), jnp.float32),
        "bproj": 0.02 * jax.random.normal(k4, (C,), jnp.float32),
    }
    # Boolean-style mask (nonzero entries masked, like masked_fill_(mask.bool(), -inf)).
    mask = jnp.where(jax.random.uniform(k5, (B_, N, N)) > 0.7, -100.0, 0.0).astype(jnp.float32)
    mask = mask.at[0, 0, :].set(-100.0)  # one fully-masked row to exercise the nan->0 path
    group_prob = jax.nn.softmax(jax.random.normal(k6, (B_, N, N), jnp.float32), axis=-1)

    params = prepare_params(raw_params, num_heads=H)

    # Masked + group_prob path (fused keep*gp post-scale in bf16).
    out = jax.block_until_ready(
        window_tree_attention(x, params, num_heads=H, mask=mask, group_prob=group_prob))
    ref = _reference(x, raw_params, H, mask, group_prob)
    assert out.shape == (B_, N, C)
    assert jnp.allclose(out, ref, atol=3e-3, rtol=3e-2), float(jnp.max(jnp.abs(out - ref)))

    # Mask-only path (exercises the post-proj "keep" row zeroing).
    out1 = jax.block_until_ready(
        window_tree_attention(x, params, num_heads=H, mask=mask))
    ref1 = _reference(x, raw_params, H, mask, None)
    assert jnp.allclose(out1, ref1, atol=3e-3, rtol=3e-2), float(jnp.max(jnp.abs(out1 - ref1)))

    # No-mask / no-group_prob variant (those inputs are skipped entirely, not materialized).
    out2 = jax.block_until_ready(window_tree_attention(x, params, num_heads=H))
    ref2 = _reference(x, raw_params, H, None, None)
    assert jnp.allclose(out2, ref2, atol=3e-3, rtol=3e-2), float(jnp.max(jnp.abs(out2 - ref2)))

    print("KERNEL_OK")
</pallas_src>

<mosaic_0001>
module attributes {stable_mosaic.version = 11 : i64} {
  func.func @_wta_kernel(%arg0: i32, %arg1: memref<16x16x32xf32, #tpu.memory_space<vmem>>, %arg2: memref<16x16x16xbf16, #tpu.memory_space<vmem>>, %arg3: memref<16x16x16xbf16, #tpu.memory_space<vmem>>, %arg4: memref<32x96xbf16, #tpu.memory_space<vmem>>, %arg5: memref<1x96xf32, #tpu.memory_space<vmem>>, %arg6: memref<4x8x32xbf16, #tpu.memory_space<vmem>>, %arg7: memref<1x32xf32, #tpu.memory_space<vmem>>, %arg8: memref<16x16x32xf32, #tpu.memory_space<vmem>>) attributes {dimension_semantics = [#tpu.dimension_semantics<parallel>], iteration_bounds = array<i64: 2>, scalar_prefetch = 0 : i64, scratch_operands = 0 : i64, tpu.core_type = #tpu.core_type<tc>, window_params = [{transform_indices = @transform_0, window_bounds = array<i64: 16, 16, 32>}, {transform_indices = @transform_1, window_bounds = array<i64: 16, 16, 16>}, {transform_indices = @transform_2, window_bounds = array<i64: 16, 16, 16>}, {pipeline_mode = #tpu.pipeline_mode<synchronous>, transform_indices = @transform_3, window_bounds = array<i64: 32, 96>}, {pipeline_mode = #tpu.pipeline_mode<synchronous>, transform_indices = @transform_4, window_bounds = array<i64: 1, 96>}, {pipeline_mode = #tpu.pipeline_mode<synchronous>, transform_indices = @transform_5, window_bounds = array<i64: 4, 8, 32>}, {pipeline_mode = #tpu.pipeline_mode<synchronous>, transform_indices = @transform_6, window_bounds = array<i64: 1, 32>}, {transform_indices = @transform_7, window_bounds = array<i64: 16, 16, 32>}]} {
    %c0 = arith.constant 0 : index
    %c0_0 = arith.constant 0 : index
    %c0_1 = arith.constant 0 : index
    %0 = vector.load %arg1[%c0, %c0_0, %c0_1] : memref<16x16x32xf32, #tpu.memory_space<vmem>>, vector<16x16x32xf32>
    %1 = vector.shape_cast %0 : vector<16x16x32xf32> to vector<256x32xf32>
    %2 = arith.truncf %1 : vector<256x32xf32> to vector<256x32xbf16>
    %c0_2 = arith.constant 0 : index
    %c0_3 = arith.constant 0 : index
    %3 = vector.load %arg4[%c0_2, %c0_3] : memref<32x96xbf16, #tpu.memory_space<vmem>>, vector<32x96xbf16>
    %cst = arith.constant dense<0.000000e+00> : vector<256x96xf32>
    %4 = tpu.matmul %2, %3, %cst {dimension_numbers = #tpu.dot_dimension_numbers<[1], [0], [0], [1], [0, 0, 1, 1], [], []>} : vector<256x32xbf16>, vector<32x96xbf16>, vector<256x96xf32> -> vector<256x96xf32>
    %c0_4 = arith.constant 0 : index
    %c0_5 = arith.constant 0 : index
    %5 = vector.load %arg5[%c0_4, %c0_5] : memref<1x96xf32, #tpu.memory_space<vmem>>, vector<1x96xf32>
    %6 = vector.broadcast %5 : vector<1x96xf32> to vector<256x96xf32>
    %7 = arith.addf %4, %6 : vector<256x96xf32>
    %8 = vector.shape_cast %7 : vector<256x96xf32> to vector<16x16x96xf32>
    %c0_6 = arith.constant 0 : index
    %c0_7 = arith.constant 0 : index
    %c0_8 = arith.constant 0 : index
    %9 = vector.load %arg2[%c0_6, %c0_7, %c0_8] : memref<16x16x16xbf16, #tpu.memory_space<vmem>>, vector<16x16x16xbf16>
    %10 = arith.extf %9 : vector<16x16x16xbf16> to vector<16x16x16xf32>
    %c0_9 = arith.constant 0 : index
    %c0_10 = arith.constant 0 : index
    %c0_11 = arith.constant 0 : index
    %11 = vector.load %arg3[%c0_9, %c0_10, %c0_11] : memref<16x16x16xbf16, #tpu.memory_space<vmem>>, vector<16x16x16xbf16>
    %cst_12 = arith.constant 0.000000e+00 : f32
    %12 = vector.broadcast %cst_12 : f32 to vector<256x32xf32>
    %13 = vector.extract_strided_slice %8 {offsets = [0, 0, 0], sizes = [16, 16, 8], strides = [1, 1, 1]} : vector<16x16x96xf32> to vector<16x16x8xf32>
    %14 = arith.truncf %13 : vector<16x16x8xf32> to vector<16x16x8xbf16>
    %15 = vector.extract_strided_slice %8 {offsets = [0, 0, 32], sizes = [16, 16, 8], strides = [1, 1, 1]} : vector<16x16x96xf32> to vector<16x16x8xf32>
    %16 = arith.truncf %15 : vector<16x16x8xf32> to vector<16x16x8xbf16>
    %17 = vector.extract_strided_slice %8 {offsets = [0, 0, 64], sizes = [16, 16, 8], strides = [1, 1, 1]} : vector<16x16x96xf32> to vector<16x16x8xf32>
    %18 = arith.truncf %17 : vector<16x16x8xf32> to vector<16x16x8xbf16>
    "tpu.trace_start"() <{level = 10 : i32, message = "wnd,wmd->wnm"}> : () -> ()
    %cst_13 = arith.constant dense<0.000000e+00> : vector<16x16x16xf32>
    %19 = tpu.matmul %14, %16, %cst_13 {dimension_numbers = #tpu.dot_dimension_numbers<[2], [2], [1], [1], [0, 0, 0, 1, 1, 1], [0], [0]>} : vector<16x16x8xbf16>, vector<16x16x8xbf16>, vector<16x16x16xf32> -> vector<16x16x16xf32>
    "tpu.trace_stop"() : () -> ()
    %20 = arith.addf %19, %10 : vector<16x16x16xf32>
    %cst_14 = arith.constant dense<0xFF800000> : vector<16x16xf32>
    %21 = vector.multi_reduction <maximumf>, %20, %cst_14 [2] : vector<16x16x16xf32> to vector<16x16xf32>
    %22 = vector.shape_cast %21 : vector<16x16xf32> to vector<16x16x1xf32>
    %23 = vector.broadcast %22 : vector<16x16x1xf32> to vector<16x16x16xf32>
    %24 = arith.subf %20, %23 : vector<16x16x16xf32>
    %25 = math.exp %24 : vector<16x16x16xf32>
    %cst_15 = arith.constant dense<0.000000e+00> : vector<16x16xf32>
    %26 = vector.multi_reduction <add>, %25, %cst_15 [2] : vector<16x16x16xf32> to vector<16x16xf32>
    %27 = vector.shape_cast %26 : vector<16x16xf32> to vector<16x16x1xf32>
    %28 = tpu.reciprocal %27 {approx = true} : vector<16x16x1xf32> -> vector<16x16x1xf32>
    %29 = vector.broadcast %28 : vector<16x16x1xf32> to vector<16x16x16xf32>
    %30 = arith.mulf %25, %29 : vector<16x16x16xf32>
    %31 = arith.truncf %30 : vector<16x16x16xf32> to vector<16x16x16xbf16>
    %32 = arith.mulf %31, %11 : vector<16x16x16xbf16>
    "tpu.trace_start"() <{level = 10 : i32, message = "wnm,wmd->wnd"}> : () -> ()
    %cst_16 = arith.constant dense<0.000000e+00> : vector<16x16x8xf32>
    %33 = tpu.matmul %32, %18, %cst_16 {dimension_numbers = #tpu.dot_dimension_numbers<[2], [1], [1], [2], [0, 0, 0, 1, 1, 2], [0], [0]>} : vector<16x16x16xbf16>, vector<16x16x8xbf16>, vector<16x16x8xf32> -> vector<16x16x8xf32>
    "tpu.trace_stop"() : () -> ()
    %34 = vector.shape_cast %33 : vector<16x16x8xf32> to vector<256x8xf32>
    %35 = arith.truncf %34 : vector<256x8xf32> to vector<256x8xbf16>
    %c0_17 = arith.constant 0 : index
    %c0_18 = arith.constant 0 : index
    %c0_19 = arith.constant 0 : index
    %36 = vector.load %arg6[%c0_17, %c0_18, %c0_19] : memref<4x8x32xbf16, #tpu.memory_space<vmem>>, vector<1x8x32xbf16>
    %37 = vector.shape_cast %36 : vector<1x8x32xbf16> to vector<8x32xbf16>
    %cst_20 = arith.constant dense<0.000000e+00> : vector<256x32xf32>
    %38 = tpu.matmul %35, %37, %cst_20 {dimension_numbers = #tpu.dot_dimension_numbers<[1], [0], [0], [1], [0, 0, 1, 1], [], []>} : vector<256x8xbf16>, vector<8x32xbf16>, vector<256x32xf32> -> vector<256x32xf32>
    %39 = arith.addf %12, %38 : vector<256x32xf32>
    %40 = vector.extract_strided_slice %8 {offsets = [0, 0, 8], sizes = [16, 16, 8], strides = [1, 1, 1]} : vector<16x16x96xf32> to vector<16x16x8xf32>
    %41 = arith.truncf %40 : vector<16x16x8xf32> to vector<16x16x8xbf16>
    %42 = vector.extract_strided_slice %8 {offsets = [0, 0, 40], sizes = [16, 16, 8], strides = [1, 1, 1]} : vector<16x16x96xf32> to vector<16x16x8xf32>
    %43 = arith.truncf %42 : vector<16x16x8xf32> to vector<16x16x8xbf16>
    %44 = vector.extract_strided_slice %8 {offsets = [0, 0, 72], sizes = [16, 16, 8], strides = [1, 1, 1]} : vector<16x16x96xf32> to vector<16x16x8xf32>
    %45 = arith.truncf %44 : vector<16x16x8xf32> to vector<16x16x8xbf16>
    "tpu.trace_start"() <{level = 10 : i32, message = "wnd,wmd->wnm"}> : () -> ()
    %cst_21 = arith.constant dense<0.000000e+00> : vector<16x16x16xf32>
    %46 = tpu.matmul %41, %43, %cst_21 {dimension_numbers = #tpu.dot_dimension_numbers<[2], [2], [1], [1], [0, 0, 0, 1, 1, 1], [0], [0]>} : vector<16x16x8xbf16>, vector<16x16x8xbf16>, vector<16x16x16xf32> -> vector<16x16x16xf32>
    "tpu.trace_stop"() : () -> ()
    %47 = arith.addf %46, %10 : vector<16x16x16xf32>
    %cst_22 = arith.constant dense<0xFF800000> : vector<16x16xf32>
    %48 = vector.multi_reduction <maximumf>, %47, %cst_22 [2] : vector<16x16x16xf32> to vector<16x16xf32>
    %49 = vector.shape_cast %48 : vector<16x16xf32> to vector<16x16x1xf32>
    %50 = vector.broadcast %49 : vector<16x16x1xf32> to vector<16x16x16xf32>
    %51 = arith.subf %47, %50 : vector<16x16x16xf32>
    %52 = math.exp %51 : vector<16x16x16xf32>
    %cst_23 = arith.constant dense<0.000000e+00> : vector<16x16xf32>
    %53 = vector.multi_reduction <add>, %52, %cst_23 [2] : vector<16x16x16xf32> to vector<16x16xf32>
    %54 = vector.shape_cast %53 : vector<16x16xf32> to vector<16x16x1xf32>
    %55 = tpu.reciprocal %54 {approx = true} : vector<16x16x1xf32> -> vector<16x16x1xf32>
    %56 = vector.broadcast %55 : vector<16x16x1xf32> to vector<16x16x16xf32>
    %57 = arith.mulf %52, %56 : vector<16x16x16xf32>
    %58 = arith.truncf %57 : vector<16x16x16xf32> to vector<16x16x16xbf16>
    %59 = arith.mulf %58, %11 : vector<16x16x16xbf16>
    "tpu.trace_start"() <{level = 10 : i32, message = "wnm,wmd->wnd"}> : () -> ()
    %cst_24 = arith.constant dense<0.000000e+00> : vector<16x16x8xf32>
    %60 = tpu.matmul %59, %45, %cst_24 {dimension_numbers = #tpu.dot_dimension_numbers<[2], [1], [1], [2], [0, 0, 0, 1, 1, 2], [0], [0]>} : vector<16x16x16xbf16>, vector<16x16x8xbf16>, vector<16x16x8xf32> -> vector<16x16x8xf32>
    "tpu.trace_stop"() : () -> ()
    %61 = vector.shape_cast %60 : vector<16x16x8xf32> to vector<256x8xf32>
    %62 = arith.truncf %61 : vector<256x8xf32> to vector<256x8xbf16>
    %c1 = arith.constant 1 : index
    %c0_25 = arith.constant 0 : index
    %c0_26 = arith.constant 0 : index
    %63 = vector.load %arg6[%c1, %c0_25, %c0_26] : memref<4x8x32xbf16, #tpu.memory_space<vmem>>, vector<1x8x32xbf16>
    %64 = vector.shape_cast %63 : vector<1x8x32xbf16> to vector<8x32xbf16>
    %cst_27 = arith.constant dense<0.000000e+00> : vector<256x32xf32>
    %65 = tpu.matmul %62, %64, %cst_27 {dimension_numbers = #tpu.dot_dimension_numbers<[1], [0], [0], [1], [0, 0, 1, 1], [], []>} : vector<256x8xbf16>, vector<8x32xbf16>, vector<256x32xf32> -> vector<256x32xf32>
    %66 = arith.addf %39, %65 : vector<256x32xf32>
    %67 = vector.extract_strided_slice %8 {offsets = [0, 0, 16], sizes = [16, 16, 8], strides = [1, 1, 1]} : vector<16x16x96xf32> to vector<16x16x8xf32>
    %68 = arith.truncf %67 : vector<16x16x8xf32> to vector<16x16x8xbf16>
    %69 = vector.extract_strided_slice %8 {offsets = [0, 0, 48], sizes = [16, 16, 8], strides = [1, 1, 1]} : vector<16x16x96xf32> to vector<16x16x8xf32>
    %70 = arith.truncf %69 : vector<16x16x8xf32> to vector<16x16x8xbf16>
    %71 = vector.extract_strided_slice %8 {offsets = [0, 0, 80], sizes = [16, 16, 8], strides = [1, 1, 1]} : vector<16x16x96xf32> to vector<16x16x8xf32>
    %72 = arith.truncf %71 : vector<16x16x8xf32> to vector<16x16x8xbf16>
    "tpu.trace_start"() <{level = 10 : i32, message = "wnd,wmd->wnm"}> : () -> ()
    %cst_28 = arith.constant dense<0.000000e+00> : vector<16x16x16xf32>
    %73 = tpu.matmul %68, %70, %cst_28 {dimension_numbers = #tpu.dot_dimension_numbers<[2], [2], [1], [1], [0, 0, 0, 1, 1, 1], [0], [0]>} : vector<16x16x8xbf16>, vector<16x16x8xbf16>, vector<16x16x16xf32> -> vector<16x16x16xf32>
    "tpu.trace_stop"() : () -> ()
    %74 = arith.addf %73, %10 : vector<16x16x16xf32>
    %cst_29 = arith.constant dense<0xFF800000> : vector<16x16xf32>
    %75 = vector.multi_reduction <maximumf>, %74, %cst_29 [2] : vector<16x16x16xf32> to vector<16x16xf32>
    %76 = vector.shape_cast %75 : vector<16x16xf32> to vector<16x16x1xf32>
    %77 = vector.broadcast %76 : vector<16x16x1xf32> to vector<16x16x16xf32>
    %78 = arith.subf %74, %77 : vector<16x16x16xf32>
    %79 = math.exp %78 : vector<16x16x16xf32>
    %cst_30 = arith.constant dense<0.000000e+00> : vector<16x16xf32>
    %80 = vector.multi_reduction <add>, %79, %cst_30 [2] : vector<16x16x16xf32> to vector<16x16xf32>
    %81 = vector.shape_cast %80 : vector<16x16xf32> to vector<16x16x1xf32>
    %82 = tpu.reciprocal %81 {approx = true} : vector<16x16x1xf32> -> vector<16x16x1xf32>
    %83 = vector.broadcast %82 : vector<16x16x1xf32> to vector<16x16x16xf32>
    %84 = arith.mulf %79, %83 : vector<16x16x16xf32>
    %85 = arith.truncf %84 : vector<16x16x16xf32> to vector<16x16x16xbf16>
    %86 = arith.mulf %85, %11 : vector<16x16x16xbf16>
    "tpu.trace_start"() <{level = 10 : i32, message = "wnm,wmd->wnd"}> : () -> ()
    %cst_31 = arith.constant dense<0.000000e+00> : vector<16x16x8xf32>
    %87 = tpu.matmul %86, %72, %cst_31 {dimension_numbers = #tpu.dot_dimension_numbers<[2], [1], [1], [2], [0, 0, 0, 1, 1, 2], [0], [0]>} : vector<16x16x16xbf16>, vector<16x16x8xbf16>, vector<16x16x8xf32> -> vector<16x16x8xf32>
    "tpu.trace_stop"() : () -> ()
    %88 = vector.shape_cast %87 : vector<16x16x8xf32> to vector<256x8xf32>
    %89 = arith.truncf %88 : vector<256x8xf32> to vector<256x8xbf16>
    %c2 = arith.constant 2 : index
    %c0_32 = arith.constant 0 : index
    %c0_33 = arith.constant 0 : index
    %90 = vector.load %arg6[%c2, %c0_32, %c0_33] : memref<4x8x32xbf16, #tpu.memory_space<vmem>>, vector<1x8x32xbf16>
    %91 = vector.shape_cast %90 : vector<1x8x32xbf16> to vector<8x32xbf16>
    %cst_34 = arith.constant dense<0.000000e+00> : vector<256x32xf32>
    %92 = tpu.matmul %89, %91, %cst_34 {dimension_numbers = #tpu.dot_dimension_numbers<[1], [0], [0], [1], [0, 0, 1, 1], [], []>} : vector<256x8xbf16>, vector<8x32xbf16>, vector<256x32xf32> -> vector<256x32xf32>
    %93 = arith.addf %66, %92 : vector<256x32xf32>
    %94 = vector.extract_strided_slice %8 {offsets = [0, 0, 24], sizes = [16, 16, 8], strides = [1, 1, 1]} : vector<16x16x96xf32> to vector<16x16x8xf32>
    %95 = arith.truncf %94 : vector<16x16x8xf32> to vector<16x16x8xbf16>
    %96 = vector.extract_strided_slice %8 {offsets = [0, 0, 56], sizes = [16, 16, 8], strides = [1, 1, 1]} : vector<16x16x96xf32> to vector<16x16x8xf32>
    %97 = arith.truncf %96 : vector<16x16x8xf32> to vector<16x16x8xbf16>
    %98 = vector.extract_strided_slice %8 {offsets = [0, 0, 88], sizes = [16, 16, 8], strides = [1, 1, 1]} : vector<16x16x96xf32> to vector<16x16x8xf32>
    %99 = arith.truncf %98 : vector<16x16x8xf32> to vector<16x16x8xbf16>
    "tpu.trace_start"() <{level = 10 : i32, message = "wnd,wmd->wnm"}> : () -> ()
    %cst_35 = arith.constant dense<0.000000e+00> : vector<16x16x16xf32>
    %100 = tpu.matmul %95, %97, %cst_35 {dimension_numbers = #tpu.dot_dimension_numbers<[2], [2], [1], [1], [0, 0, 0, 1, 1, 1], [0], [0]>} : vector<16x16x8xbf16>, vector<16x16x8xbf16>, vector<16x16x16xf32> -> vector<16x16x16xf32>
    "tpu.trace_stop"() : () -> ()
    %101 = arith.addf %100, %10 : vector<16x16x16xf32>
    %cst_36 = arith.constant dense<0xFF800000> : vector<16x16xf32>
    %102 = vector.multi_reduction <maximumf>, %101, %cst_36 [2] : vector<16x16x16xf32> to vector<16x16xf32>
    %103 = vector.shape_cast %102 : vector<16x16xf32> to vector<16x16x1xf32>
    %104 = vector.broadcast %103 : vector<16x16x1xf32> to vector<16x16x16xf32>
    %105 = arith.subf %101, %104 : vector<16x16x16xf32>
    %106 = math.exp %105 : vector<16x16x16xf32>
    %cst_37 = arith.constant dense<0.000000e+00> : vector<16x16xf32>
    %107 = vector.multi_reduction <add>, %106, %cst_37 [2] : vector<16x16x16xf32> to vector<16x16xf32>
    %108 = vector.shape_cast %107 : vector<16x16xf32> to vector<16x16x1xf32>
    %109 = tpu.reciprocal %108 {approx = true} : vector<16x16x1xf32> -> vector<16x16x1xf32>
    %110 = vector.broadcast %109 : vector<16x16x1xf32> to vector<16x16x16xf32>
    %111 = arith.mulf %106, %110 : vector<16x16x16xf32>
    %112 = arith.truncf %111 : vector<16x16x16xf32> to vector<16x16x16xbf16>
    %113 = arith.mulf %112, %11 : vector<16x16x16xbf16>
    "tpu.trace_start"() <{level = 10 : i32, message = "wnm,wmd->wnd"}> : () -> ()
    %cst_38 = arith.constant dense<0.000000e+00> : vector<16x16x8xf32>
    %114 = tpu.matmul %113, %99, %cst_38 {dimension_numbers = #tpu.dot_dimension_numbers<[2], [1], [1], [2], [0, 0, 0, 1, 1, 2], [0], [0]>} : vector<16x16x16xbf16>, vector<16x16x8xbf16>, vector<16x16x8xf32> -> vector<16x16x8xf32>
    "tpu.trace_stop"() : () -> ()
    %115 = vector.shape_cast %114 : vector<16x16x8xf32> to vector<256x8xf32>
    %116 = arith.truncf %115 : vector<256x8xf32> to vector<256x8xbf16>
    %c3 = arith.constant 3 : index
    %c0_39 = arith.constant 0 : index
    %c0_40 = arith.constant 0 : index
    %117 = vector.load %arg6[%c3, %c0_39, %c0_40] : memref<4x8x32xbf16, #tpu.memory_space<vmem>>, vector<1x8x32xbf16>
    %118 = vector.shape_cast %117 : vector<1x8x32xbf16> to vector<8x32xbf16>
    %cst_41 = arith.constant dense<0.000000e+00> : vector<256x32xf32>
    %119 = tpu.matmul %116, %118, %cst_41 {dimension_numbers = #tpu.dot_dimension_numbers<[1], [0], [0], [1], [0, 0, 1, 1], [], []>} : vector<256x8xbf16>, vector<8x32xbf16>, vector<256x32xf32> -> vector<256x32xf32>
    %120 = arith.addf %93, %119 : vector<256x32xf32>
    %c0_42 = arith.constant 0 : index
    %c0_43 = arith.constant 0 : index
    %121 = vector.load %arg7[%c0_42, %c0_43] : memref<1x32xf32, #tpu.memory_space<vmem>>, vector<1x32xf32>
    %122 = vector.broadcast %121 : vector<1x32xf32> to vector<256x32xf32>
    %123 = arith.addf %120, %122 : vector<256x32xf32>
    %124 = vector.shape_cast %123 : vector<256x32xf32> to vector<16x16x32xf32>
    %c0_44 = arith.constant 0 : index
    %c0_45 = arith.constant 0 : index
    %c0_46 = arith.constant 0 : index
    %125 = vector.load %arg8[%c0_44, %c0_45, %c0_46] : memref<16x16x32xf32, #tpu.memory_space<vmem>>, vector<16x16x32xf32>
    tpu.vector_store %arg8[%c0_44, %c0_45, %c0_46], %124 {strides = array<i32>} : memref<16x16x32xf32, #tpu.memory_space<vmem>>, vector<16x16x32xf32>,
    return
  }
  func.func @transform_0(%arg0: i32) -> (i32, i32, i32) {
    %c0_i32 = arith.constant 0 : i32
    %c0_i32_0 = arith.constant 0 : i32
    %c0_i32_1 = arith.constant 0 : i32
    return %arg0, %c0_i32, %c0_i32_0 : i32, i32, i32
  }
  func.func @transform_1(%arg0: i32) -> (i32, i32, i32) {
    %c0_i32 = arith.constant 0 : i32
    %c0_i32_0 = arith.constant 0 : i32
    %c0_i32_1 = arith.constant 0 : i32
    return %arg0, %c0_i32, %c0_i32_0 : i32, i32, i32
  }
  func.func @transform_2(%arg0: i32) -> (i32, i32, i32) {
    %c0_i32 = arith.constant 0 : i32
    %c0_i32_0 = arith.constant 0 : i32
    %c0_i32_1 = arith.constant 0 : i32
    return %arg0, %c0_i32, %c0_i32_0 : i32, i32, i32
  }
  func.func @transform_3(%arg0: i32) -> (i32, i32) {
    %c0_i32 = arith.constant 0 : i32
    %c0_i32_0 = arith.constant 0 : i32
    %c0_i32_1 = arith.constant 0 : i32
    return %c0_i32, %c0_i32_0 : i32, i32
  }
  func.func @transform_4(%arg0: i32) -> (i32, i32) {
    %c0_i32 = arith.constant 0 : i32
    %c0_i32_0 = arith.constant 0 : i32
    %c0_i32_1 = arith.constant 0 : i32
    return %c0_i32, %c0_i32_0 : i32, i32
  }
  func.func @transform_5(%arg0: i32) -> (i32, i32, i32) {
    %c0_i32 = arith.constant 0 : i32
    %c0_i32_0 = arith.constant 0 : i32
    %c0_i32_1 = arith.constant 0 : i32
    %c0_i32_2 = arith.constant 0 : i32
    return %c0_i32, %c0_i32_0, %c0_i32_1 : i32, i32, i32
  }
  func.func @transform_6(%arg0: i32) -> (i32, i32) {
    %c0_i32 = arith.constant 0 : i32
    %c0_i32_0 = arith.constant 0 : i32
    %c0_i32_1 = arith.constant 0 : i32
    return %c0_i32, %c0_i32_0 : i32, i32
  }
  func.func @transform_7(%arg0: i32) -> (i32, i32, i32) {
    %c0_i32 = arith.constant 0 : i32
    %c0_i32_0 = arith.constant 0 : i32
    %c0_i32_1 = arith.constant 0 : i32
    return %arg0, %c0_i32, %c0_i32_0 : i32, i32, i32
  }
}

</mosaic_0001>

<bundles_post_ra>
// kernel: tpu_custom_call.1
= control target key start
LH: loop header
LB: loop body
LE: loop exit
PB: predicated region body
PF: predicated region fallthrough
CT: control target
= control target key end

     0   :  { %12 = vsyncpa [#allocation3], 0  ;;  %s11462_s0 = inlined_call_operand.vmem [shape: f32[32,16,32], index: 0, kind: input, shape index: {}]   ;;  %s11463_s1 = inlined_call_operand.vmem [shape: bf16[32,16,16], index: 1, kind: input, shape index: {}]   ;;  %s11464_s2 = inlined_call_operand.vmem [shape: bf16[32,16,16], index: 2, kind: input, shape index: {}]   ;;  %s11465_s3 = inlined_call_operand.vmem [shape: bf16[32,96], index: 3, kind: input, shape index: {}]   ;;  %s11466_s4 = inlined_call_operand.vmem [shape: f32[1,96], index: 4, kind: input, shape index: {}]   ;;  %s11467_s5 = inlined_call_operand.vmem [shape: bf16[4,8,32], index: 5, kind: input, shape index: {}]   ;;  %s11468_s6 = inlined_call_operand.vmem [shape: f32[1,32], index: 6, kind: input, shape index: {}]   ;;  %s11469_s7 = inlined_call_operand.hbm [shape: f32[32,16,32], index: 7, kind: output, shape index: {}]  }
   0x1   :  { %14 = vsyncpa [#allocation3 + $0x1], 0  ;;  %s7762_s24 = smov 0   ;;  %s7764_s25 = smov 0  }
   0x2   :  { %s7766_s26 = smov 0   ;;  %s7768_s27 = smov 0  }
   0x3 LB: > { %s7783_s28 = sadd.s32 4294967295, %s7707_s27   ;;  %s6673_s29 = sadd.s32 4294967294, %s7707_s27   ;;  %s7707_s27 = sphi %s7768_s27, %s12348_s27   ;;  %s7703_s26 = sphi %s7766_s26, %s12347_s26   ;;  %s7699_s25 = sphi %s7764_s25, %s12346_s25   ;;  %s7695_s24 = sphi %s7762_s24, %s12345_s24  }
   0x4   : > { %s7787_s30 = sadd.s32 1, %s7707_s27   ;;  %s189_s8 = sadd.s32 1, %s7703_s26 }
   0x5   : > { %s186_s9 = ssub.s32 %s7707_s27, %s7787_s30  ;;  %p199_p0 = scmp.ne.s32.totalorder %s7703_s26, %s7699_s25 }
   0x6   : > { %p187_p1 = scmp.eq.s32.totalorder %s186_s9, 0  ;;  %p200_p2 = scmp.eq.s32.totalorder %s7783_s28, 1 }
   0x7   : > { %p205_p3 = scmp.ne.s32.totalorder %s7699_s25, %s7695_s24  ;;  %p206_p4 = scmp.eq.s32.totalorder %s6673_s29, 1 }
   0x8   : > { %s7798_s10 = scalar_select %p187_p1, %s7703_s26, %s189_s8  }
   0x9   : > { %p7800_p5 = por %p200_p2, %p199_p0  ;;  %p7804_p6 = por %p206_p4, %p205_p3 }
   0xa   : > { %p6676_p7 = scmp.ge.s32.totalorder %s7707_s27, 1  ;;  %p266_p8 = scmp.lt.s32.totalorder %s7707_s27, 3 }
   0xc   : > { %p267_p9 = pnand %p6676_p7, %p266_p8 }
   0xe   : > { %270 = sbr.rel (%p267_p9) target bundleno = 3281 (0xcd1), region = 48 }
  0x13   : > { %v6916_v0 = vld [vmem:[%s11465_s3 + $0x8] sm:$0xff]  ;;  %s6678_s15 = sshll.u32 %s7783_s28, 4  ;;  %v6915_v1 = vld [vmem:[%s11465_s3] sm:$0xff]  ;;  %vm402_vm0 = vcmask 261120   ;;  %s7709_s29 = smov 88   ;;  %vm675_vm1 = vcmask 64512  }
  0x14   : > { %p312_p10 = scmp.lt.s32.totalorder %s6678_s15, 31  ;;  %457 = vmatpush.bf16.msra.mxu0 %v6916_v0  ;;  %v7854_v30 = vld [vmem:[%s11466_s4] ss:$0 sm:$0xff]  ;;  %s7710_s8 = smov 64   ;;  %vm1101_vm2 = vcmask 130048   ;;  %vm3361_vm3 = vcmask 1043456  }
  0x15   : > { %s7711_s9 = smov 96   ;;  %s7712_s13 = smov 120  }
  0x16   : > { %s12350_s15 = smov (!%p312_p10, %s6678_s15), 31  ;;  %s7713_s14 = smov 112  }
  0x17   : > { %s6912_s18 = sshll.u32 %s12350_s15, 4  ;;  %s7714_s16 = smov 80  }
  0x18   : > { %458 = vmatpush.bf16.msra.mxu0 %v6915_v1  ;;  %s7823_s21 = scalar_lea.vmem %s11462_s0, %s6912_s18  ;;  %s7715_s17 = smov 56  }
  0x19   : > { %v334_v2 = vld [vmem:[%s7823_s21] sm:$0xff]  ;;  %v335_v3 = vld [vmem:[%s7823_s21 + $0x8] sm:$0xff]  ;;  %v336_v5 = vld [vmem:[%s7823_s21 + $0x10] sm:$0xff]  ;;  %s6913_s18 = sshll.u32 %s12350_s15, 3  ;;  %s7716_s15 = smov 48  }
  0x1a   : > { %v366_v4 = vpack.c.bf16 %v335_v3, %v334_v2  ;;  %v337_v6 = vld [vmem:[%s7823_s21 + $0x18] sm:$0xff]  ;;  %v338_v8 = vld [vmem:[%s7823_s21 + $0x20] sm:$0xff]  ;;  %v339_v9 = vld [vmem:[%s7823_s21 + $0x28] sm:$0xff]  ;;  %s7719_s20 = smov 40   ;;  %s308_s23 = sand.u32 1, %s7699_s25  }
  0x1b   : > { %v367_v7 = vpack.c.bf16 %v337_v6, %v336_v5  ;;  %v368_v10 = vpack.c.bf16 %v339_v9, %v338_v8  ;;  %v340_v11 = vld [vmem:[%s7823_s21 + $0x30] sm:$0xff]  ;;  %v341_v12 = vld [vmem:[%s7823_s21 + $0x38] sm:$0xff]  ;;  %v342_v14 = vld [vmem:[%s7823_s21 + $0x40] sm:$0xff]  ;;  %s6571_s19 = scalar_lea.sflag [#allocation3], %s308_s23 }
  0x1c   : > { %6695 = vmatmul.msk.bf16.vlgmr.msra.gmra.mxu0 %vm402_vm0, %v366_v4  ;;  %v369_v13 = vpack.c.bf16 %v341_v12, %v340_v11  ;;  %v343_v15 = vld [vmem:[%s7823_s21 + $0x48] sm:$0xff]  ;;  %v344_v17 = vld [vmem:[%s7823_s21 + $0x50] sm:$0xff]  ;;  %v345_v18 = vld [vmem:[%s7823_s21 + $0x58] sm:$0xff] }
  0x1d   : > { %v370_v16 = vpack.c.bf16 %v343_v15, %v342_v14  ;;  %v371_v19 = vpack.c.bf16 %v345_v18, %v344_v17  ;;  %v346_v20 = vld [vmem:[%s7823_s21 + $0x60] sm:$0xff]  ;;  %v347_v21 = vld [vmem:[%s7823_s21 + $0x68] sm:$0xff]  ;;  %v348_v23 = vld [vmem:[%s7823_s21 + $0x70] sm:$0xff] }
  0x1e   : > { %v372_v22 = vpack.c.bf16 %v347_v21, %v346_v20  ;;  %v349_v24 = vld [vmem:[%s7823_s21 + $0x78] sm:$0xff]  ;;  %v350_v26 = vld [vmem:[%s7823_s21 + $0x80] sm:$0xff]  ;;  %v351_v27 = vld [vmem:[%s7823_s21 + $0x88] sm:$0xff] }
  0x1f   : > { %v373_v25 = vpack.c.bf16 %v349_v24, %v348_v23  ;;  %v374_v28 = vpack.c.bf16 %v351_v27, %v350_v26  ;;  %v352_v36 = vld [vmem:[%s7823_s21 + $0x90] sm:$0xff]  ;;  %v353_v37 = vld [vmem:[%s7823_s21 + $0x98] sm:$0xff]  ;;  %v354_v48 = vld [vmem:[%s7823_s21 + $0xa0] sm:$0xff] }
  0x20   : > { %v375_v41 = vpack.c.bf16 %v353_v37, %v352_v36  ;;  %v355_v49 = vld [vmem:[%s7823_s21 + $0xa8] sm:$0xff]  ;;  %v356_v60 = vld [vmem:[%s7823_s21 + $0xb0] sm:$0xff]  ;;  %v357_v61 = vld [vmem:[%s7823_s21 + $0xb8] sm:$0xff] }
  0x21   : > { %v376_v53 = vpack.c.bf16 %v355_v49, %v354_v48  ;;  %v377_v1 = vpack.c.bf16 %v357_v61, %v356_v60  ;;  %v358_v8 = vld [vmem:[%s7823_s21 + $0xc0] sm:$0xff]  ;;  %v359_v9 = vld [vmem:[%s7823_s21 + $0xc8] sm:$0xff]  ;;  %v360_v20 = vld [vmem:[%s7823_s21 + $0xd0] sm:$0xff] }
  0x22   : > { %v361_v21 = vld [vmem:[%s7823_s21 + $0xd8] sm:$0xff] }
  0x2c   : > { %6696 = vmatmul.msk.bf16.gmra.mxu0 %vm402_vm0, %v367_v7 }
  0x3c   : > { %6697 = vmatmul.msk.bf16.gmra.mxu0 %vm402_vm0, %v368_v10 }
  0x4c   : > { %6698 = vmatmul.msk.bf16.gmra.mxu0 %vm402_vm0, %v369_v13  ;;  %v378_v13 = vpack.c.bf16 %v359_v9, %v358_v8 }
  0x5c   : > { %6699 = vmatmul.msk.bf16.gmra.mxu0 %vm402_vm0, %v370_v16 }
  0x6c   : > { %6700 = vmatmul.msk.bf16.gmra.mxu0 %vm402_vm0, %v371_v19 }
  0x7c   : > { %6701 = vmatmul.msk.bf16.gmra.mxu0 %vm402_vm0, %v372_v22 }
  0x8c   : > { %6702 = vmatmul.msk.bf16.gmra.mxu0 %vm402_vm0, %v373_v25  ;;  %v379_v25 = vpack.c.bf16 %v361_v21, %v360_v20 }
  0x99   : > { %v460_v29 = vpop.f32.mrf.mxu0 }
  0x9a   : > { %v461_v31 = vadd.f32 %v7854_v30, %v460_v29 }
  0x9c   : > { %6703 = vmatmul.msk.bf16.gmra.mxu0 %vm402_vm0, %v374_v28  ;;  %v636_v33 = vpack.c.bf16 %v461_v31, %v461_v31 }
  0x9e   : > { %v670_v38 = vunpack.c.l.b16 %v636_v33  ;;  %v362_v33 = vld [vmem:[%s7823_s21 + $0xe0] sm:$0xff] }
  0xa1   : > { %v462_v32 = vpop.f32.mrf.mxu0 }
  0xa2   : > { %v463_v34 = vadd.f32 %v7854_v30, %v462_v32 }
  0xa4   : > { %v637_v35 = vpack.c.bf16 %v463_v34, %v463_v34  ;;  %v363_v34 = vld [vmem:[%s7823_s21 + $0xe8] sm:$0xff] }
  0xa6   : > { %v671_v39 = vunpack.c.l.b16 %v637_v35 }
  0xa8   : > { %v7861_v40 = vpack.c.b16 %v671_v39, %v670_v38  ;;  %v380_v38 = vpack.c.bf16 %v363_v34, %v362_v33 }
  0xa9   : > { %v465_v42 = vpop.f32.mrf.mxu0 }
  0xaa   : > { %11654 = vst [vmem:[#allocation5_spill] sm:$0xff] %v7861_v40  ;;  %2033 = vrot.lane.b32.xlu1 %v7861_v40, %s7709_s29  ;;  %1619 = vrot.lane.b32.xlu2 %v7861_v40, %s7710_s8  ;;  %v466_v43 = vadd.f32 %v7854_v30, %v465_v42 }
  0xab   : > { %673 = vrot.lane.b32.xlu0 %v7861_v40, %s7711_s9 }
  0xac   : > { %6704 = vmatmul.msk.bf16.gmra.mxu0 %vm402_vm0, %v375_v41  ;;  %v638_v45 = vpack.c.bf16 %v466_v43, %v466_v43 }
  0xae   : > { %v698_v50 = vunpack.c.l.b16 %v638_v45 }
  0xb1   : > { %v467_v44 = vpop.f32.mrf.mxu0 }
  0xb2   : > { %v468_v46 = vadd.f32 %v7854_v30, %v467_v44  ;;  %2031 = vrot.lane.b32.xlu1 %v7861_v40, %s7712_s13  ;;  %3594 = vrot.lane.b32.xlu2 %v7861_v40, %s7713_s14 }
  0xb4   : > { %v639_v47 = vpack.c.bf16 %v468_v46, %v468_v46  ;;  %v364_v46 = vld [vmem:[%s7823_s21 + $0xf0] sm:$0xff] }
  0xb6   : > { %v699_v51 = vunpack.c.l.b16 %v639_v47  ;;  %v365_v47 = vld [vmem:[%s7823_s21 + $0xf8] sm:$0xff]  ;;  %s8203_s21 = scalar_lea.vmem %s11463_s1, %s6913_s18 }
  0xb8   : > { %v7878_v52 = vpack.c.b16 %v699_v51, %v698_v50  ;;  %v381_v51 = vpack.c.bf16 %v365_v47, %v364_v46 }
  0xb9   : > { %v470_v54 = vpop.f32.mrf.mxu0 }
  0xba   : > { %11655 = vst [vmem:[#allocation6_spill] sm:$0xff] %v7878_v52  ;;  %3596 = vrot.lane.b32.xlu1 %v7861_v40, %s7714_s16  ;;  %701 = vrot.lane.b32.xlu0 %v7878_v52, %s7711_s9  ;;  %v471_v55 = vadd.f32 %v7854_v30, %v470_v54 }
  0xbc   : > { %6705 = vmatmul.msk.bf16.gmra.mxu0 %vm402_vm0, %v376_v53  ;;  %v640_v57 = vpack.c.bf16 %v471_v55, %v471_v55 }
  0xbe   : > { %v725_v62 = vunpack.c.l.b16 %v640_v57 }
  0xc1   : > { %v472_v56 = vpop.f32.mrf.mxu0 }
  0xc2   : > { %v473_v58 = vadd.f32 %v7854_v30, %v472_v56  ;;  %1644 = vrot.lane.b32.xlu1 %v7878_v52, %s7710_s8  ;;  %2057 = vrot.lane.b32.xlu0 %v7878_v52, %s7709_s29 }
  0xc4   : > { %v641_v59 = vpack.c.bf16 %v473_v58, %v473_v58 }
  0xc6   : > { %v726_v63 = vunpack.c.l.b16 %v641_v59 }
  0xc8   : > { %v7893_v0 = vpack.c.b16 %v726_v63, %v725_v62 }
  0xc9   : > { %v475_v2 = vpop.f32.mrf.mxu0 }
  0xca   : > { %11656 = vst [vmem:[#allocation7_spill] sm:$0xff] %v7893_v0  ;;  %2055 = vrot.lane.b32.xlu1 %v7878_v52, %s7712_s13  ;;  %2081 = vrot.lane.b32.xlu2 %v7893_v0, %s7709_s29  ;;  %v476_v3 = vadd.f32 %v7854_v30, %v475_v2 }
  0xcb   : > { %1669 = vrot.lane.b32.xlu0 %v7893_v0, %s7710_s8 }
  0xcc   : > { %6706 = vmatmul.msk.bf16.gmra.mxu0 %vm402_vm0, %v377_v1  ;;  %v642_v5 = vpack.c.bf16 %v476_v3, %v476_v3 }
  0xce   : > { %v752_v10 = vunpack.c.l.b16 %v642_v5 }
  0xd1   : > { %v477_v4 = vpop.f32.mrf.mxu0 }
  0xd2   : > { %v478_v6 = vadd.f32 %v7854_v30, %v477_v4  ;;  %728 = vrot.lane.b32.xlu1 %v7893_v0, %s7711_s9  ;;  %2079 = vrot.lane.b32.xlu2 %v7893_v0, %s7712_s13 }
  0xd3   : > { %2950 = vrot.lane.b32.xlu0 %v7893_v0, %s7715_s17 }
  0xd4   : > { %v643_v7 = vpack.c.bf16 %v478_v6, %v478_v6 }
  0xd6   : > { %v753_v11 = vunpack.c.l.b16 %v643_v7 }
  0xd8   : > { %v7912_v12 = vpack.c.b16 %v753_v11, %v752_v10 }
  0xd9   : > { %v480_v14 = vpop.f32.mrf.mxu0 }
  0xda   : > { %11657 = vst [vmem:[#allocation8_spill] sm:$0xff] %v7912_v12  ;;  %755 = vrot.lane.b32.xlu1 %v7912_v12, %s7711_s9  ;;  %2105 = vrot.lane.b32.xlu2 %v7912_v12, %s7709_s29  ;;  %v481_v15 = vadd.f32 %v7854_v30, %v480_v14 }
  0xdb   : > { %1694 = vrot.lane.b32.xlu0 %v7912_v12, %s7710_s8 }
  0xdc   : > { %6707 = vmatmul.msk.bf16.gmra.mxu0 %vm402_vm0, %v378_v13  ;;  %v644_v17 = vpack.c.bf16 %v481_v15, %v481_v15 }
  0xde   : > { %v779_v22 = vunpack.c.l.b16 %v644_v17 }
  0xe1   : > { %v482_v16 = vpop.f32.mrf.mxu0 }
  0xe2   : > { %v483_v18 = vadd.f32 %v7854_v30, %v482_v16  ;;  %2975 = vrot.lane.b32.xlu1 %v7912_v12, %s7715_s17 }
  0xe3   : > { %2103 = vrot.lane.b32.xlu0 %v7912_v12, %s7712_s13 }
  0xe4   : > { %v645_v19 = vpack.c.bf16 %v483_v18, %v483_v18 }
  0xe6   : > { %v780_v23 = vunpack.c.l.b16 %v645_v19 }
  0xe8   : > { %v7929_v24 = vpack.c.b16 %v780_v23, %v779_v22 }
  0xe9   : > { %v485_v26 = vpop.f32.mrf.mxu0 }
  0xea   : > { %11658 = vst [vmem:[#allocation9_spill] sm:$0xff] %v7929_v24  ;;  %782 = vrot.lane.b32.xlu2 %v7929_v24, %s7711_s9  ;;  %v486_v27 = vadd.f32 %v7854_v30, %v485_v26 }
  0xec   : > { %6708 = vmatmul.msk.bf16.gmra.mxu0 %vm402_vm0, %v379_v25  ;;  %v646_v29 = vpack.c.bf16 %v486_v27, %v486_v27 }
  0xee   : > { %v806_v35 = vunpack.c.l.b16 %v646_v29 }
  0xf1   : > { %v487_v28 = vpop.f32.mrf.mxu0 }
  0xf2   : > { %v488_v31 = vadd.f32 %v7854_v30, %v487_v28  ;;  %1719 = vrot.lane.b32.xlu2 %v7929_v24, %s7710_s8 }
  0xf4   : > { %v647_v32 = vpack.c.bf16 %v488_v31, %v488_v31 }
  0xf6   : > { %v807_v36 = vunpack.c.l.b16 %v647_v32 }
  0xf8   : > { %v7940_v37 = vpack.c.b16 %v807_v36, %v806_v35 }
  0xf9   : > { %v490_v39 = vpop.f32.mrf.mxu0 }
  0xfa   : > { %11659 = vst [vmem:[#allocation10_spill] sm:$0xff] %v7940_v37  ;;  %2153 = vrot.lane.b32.xlu1 %v7940_v37, %s7709_s29  ;;  %2129 = vrot.lane.b32.xlu2 %v7929_v24, %s7709_s29  ;;  %v491_v41 = vadd.f32 %v7854_v30, %v490_v39 }
  0xfb   : > { %1744 = vrot.lane.b32.xlu0 %v7940_v37, %s7710_s8 }
  0xfc   : > { %6709 = vmatmul.msk.bf16.gmra.mxu0 %vm402_vm0, %v380_v38  ;;  %v648_v43 = vpack.c.bf16 %v491_v41, %v491_v41 }
  0xfe   : > { %v833_v48 = vunpack.c.l.b16 %v648_v43 }
 0x101   : > { %v492_v42 = vpop.f32.mrf.mxu0 }
 0x102   : > { %v493_v44 = vadd.f32 %v7854_v30, %v492_v42  ;;  %2151 = vrot.lane.b32.xlu1 %v7940_v37, %s7712_s13  ;;  %2127 = vrot.lane.b32.xlu2 %v7929_v24, %s7712_s13 }
 0x104   : > { %v649_v45 = vpack.c.bf16 %v493_v44, %v493_v44  ;;  %v7972_v59 = vpop.permute.xlu2 %1619 }
 0x106   : > { %v834_v49 = vunpack.c.l.b16 %v649_v45 }
 0x108   : > { %v7957_v50 = vpack.c.b16 %v834_v49, %v833_v48 }
 0x109   : > { %v495_v53 = vpop.f32.mrf.mxu0 }
 0x10a   : > { %11660 = vst [vmem:[#allocation11_spill] sm:$0xff] %v7957_v50  ;;  %1769 = vrot.lane.b32.xlu1 %v7957_v50, %s7710_s8  ;;  %809 = vrot.lane.b32.xlu2 %v7940_v37, %s7711_s9  ;;  %v496_v54 = vadd.f32 %v7854_v30, %v495_v53 }
 0x10b   : > { %836 = vrot.lane.b32.xlu0 %v7957_v50, %s7711_s9 }
 0x10c   : > { %6710 = vmatmul.msk.bf16.gmra.mxu0 %vm402_vm0, %v381_v51  ;;  %v650_v56 = vpack.c.bf16 %v496_v54, %v496_v54  ;;  %v7986_v5 = vpop.permute.xlu2 %3594 }
 0x10d   : > { %11663 = vst [vmem:[#allocation14_spill] sm:$0xff] %v7986_v5 }
 0x10e   : > { %v860_v60 = vunpack.c.l.b16 %v650_v56 }
 0x111   : > { %v497_v55 = vpop.f32.mrf.mxu0 }
 0x112   : > { %v498_v57 = vadd.f32 %v7854_v30, %v497_v55  ;;  %3050 = vrot.lane.b32.xlu2 %v7957_v50, %s7715_s17 }
 0x113   : > { %2177 = vrot.lane.b32.xlu0 %v7957_v50, %s7709_s29 }
 0x114   : > { %v651_v58 = vpack.c.bf16 %v498_v57, %v498_v57 }
 0x116   : > { %v861_v61 = vunpack.c.l.b16 %v651_v58 }
 0x118   : > { %v7974_v62 = vpack.c.b16 %v861_v61, %v860_v60 }
 0x119   : > { %v500_v63 = vpop.f32.mrf.mxu0 }
 0x11a   : > { %11661 = vst [vmem:[#allocation12_spill] sm:$0xff] %v7974_v62  ;;  %863 = vrot.lane.b32.xlu1 %v7974_v62, %s7711_s9  ;;  %2201 = vrot.lane.b32.xlu2 %v7974_v62, %s7709_s29  ;;  %v501_v3 = vadd.f32 %v7854_v30, %v500_v63 }
 0x11b   : > { %2175 = vrot.lane.b32.xlu0 %v7957_v50, %s7712_s13 }
 0x11c   : > { %v7982_v1 = vpop.permute.xlu1 %2033  ;;  %v652_v7 = vpack.c.bf16 %v501_v3, %v501_v3 }
 0x11d   : > { %11662 = vst [vmem:[#allocation13_spill] sm:$0xff] %v7982_v1  ;;  %v674_v2 = vpop.permute.xlu0 %673 }
 0x11e   : > { %v680_v4 = vsel %vm675_vm1, %v674_v2, 0  ;;  %v887_v11 = vunpack.c.l.b16 %v652_v7 }
 0x11f   : > { %689 = vmatpush.bf16.xpose.msra.mxu1 %v680_v4 }
 0x121   : > { %v502_v6 = vpop.f32.mrf.mxu0 }
 0x122   : > { %v503_v8 = vadd.f32 %v7854_v30, %v502_v6  ;;  %1794 = vrot.lane.b32.xlu1 %v7974_v62, %s7710_s8  ;;  %2199 = vrot.lane.b32.xlu2 %v7974_v62, %s7712_s13 }
 0x123   : > { %3075 = vrot.lane.b32.xlu0 %v7974_v62, %s7715_s17 }
 0x124   : > { %v653_v9 = vpack.c.bf16 %v503_v8, %v503_v8  ;;  %v7995_v10 = vpop.permute.xlu1 %2031  ;;  %v8001_v15 = vpop.permute.xlu2 %2081 }
 0x125   : > { %11664 = vst [vmem:[#allocation15_spill] sm:$0xff] %v7995_v10 }
 0x126   : > { %v888_v13 = vunpack.c.l.b16 %v653_v9  ;;  %6711 = vmatmul.msk.bf16.vlgmr.msra.gmra.mxu1 %vm675_vm1, %v7861_v40  ;;  %11666 = vst [vmem:[#allocation17_spill] sm:$0xff] %v8001_v15 }
 0x128   : > { %v7999_v14 = vpack.c.b16 %v888_v13, %v887_v11 }
 0x129   : > { %v505_v16 = vpop.f32.mrf.mxu0 }
 0x12a   : > { %11665 = vst [vmem:[#allocation16_spill] sm:$0xff] %v7999_v14  ;;  %1819 = vrot.lane.b32.xlu1 %v7999_v14, %s7710_s8  ;;  %890 = vrot.lane.b32.xlu2 %v7999_v14, %s7711_s9  ;;  %v506_v19 = vadd.f32 %v7854_v30, %v505_v16 }
 0x12c   : > { %v8007_v17 = vpop.permute.xlu1 %3596  ;;  %v702_v18 = vpop.permute.xlu0 %701  ;;  %v654_v22 = vpack.c.bf16 %v506_v19, %v506_v19 }
 0x12d   : > { %11667 = vst [vmem:[#allocation18_spill] sm:$0xff] %v8007_v17  ;;  %v707_v20 = vsel %vm675_vm1, %v702_v18, 0  ;;  %v8011_v23 = vpop.permute.xlu2 %2079 }
 0x12e   : > { %716 = vmatpush.bf16.xpose.msra.mxu2 %v707_v20  ;;  %11668 = vst [vmem:[#allocation19_spill] sm:$0xff] %v8011_v23  ;;  %v914_v28 = vunpack.c.l.b16 %v654_v22  ;;  %v7050_v23 = vld [vmem:[%s8203_s21 + $0x20] sm:$0xff]  }
 0x131   : > { %v507_v21 = vpop.f32.mrf.mxu0 }
 0x132   : > { %v508_v25 = vadd.f32 %v7854_v30, %v507_v21  ;;  %2225 = vrot.lane.b32.xlu1 %v7999_v14, %s7709_s29 }
 0x134   : > { %v655_v26 = vpack.c.bf16 %v508_v25, %v508_v25  ;;  %v8016_v27 = vpop.permute.xlu1 %1644  ;;  %v8038_v44 = vpop.permute.xlu0 %2057 }
 0x135   : > { %6712 = vmatmul.msk.bf16.vlgmr.msra.gmra.mxu2 %vm675_vm1, %v7878_v52  ;;  %v8028_v33 = vpop.permute.xlu2 %2105  ;;  %11672 = vst [vmem:[#allocation23_spill] sm:$0xff] %v8038_v44 }
 0x136   : > { %v915_v29 = vunpack.c.l.b16 %v655_v26  ;;  %11670 = vst [vmem:[#allocation21_spill] sm:$0xff] %v8028_v33 }
 0x138   : > { %v8020_v31 = vpack.c.b16 %v915_v29, %v914_v28 }
 0x139   : > { %v510_v32 = vpop.f32.mrf.mxu0 }
 0x13a   : > { %11669 = vst [vmem:[#allocation20_spill] sm:$0xff] %v8020_v31  ;;  %2223 = vrot.lane.b32.xlu1 %v7999_v14, %s7712_s13  ;;  %1844 = vrot.lane.b32.xlu2 %v8020_v31, %s7710_s8  ;;  %v511_v35 = vadd.f32 %v7854_v30, %v510_v32 }
 0x13b   : > { %917 = vrot.lane.b32.xlu0 %v8020_v31, %s7711_s9 }
 0x13c   : > { %v8030_v34 = vpop.permute.xlu1 %2055  ;;  %v656_v38 = vpack.c.bf16 %v511_v35, %v511_v35 }
 0x13d   : > { %11671 = vst [vmem:[#allocation22_spill] sm:$0xff] %v8030_v34  ;;  %v8058_v57 = vpop.permute.xlu0 %1669 }
 0x13e   : > { %v941_v47 = vunpack.c.l.b16 %v656_v38 }
 0x141   : > { %v512_v36 = vpop.f32.mrf.mxu0 }
 0x142   : > { %v513_v39 = vadd.f32 %v7854_v30, %v512_v36  ;;  %2247 = vrot.lane.b32.xlu1 %v8020_v31, %s7712_s13 }
 0x143   : > { %2249 = vrot.lane.b32.xlu0 %v8020_v31, %s7709_s29 }
 0x144   : > { %v657_v41 = vpack.c.bf16 %v513_v39, %v513_v39  ;;  %v729_v42 = vpop.permute.xlu1 %728  ;;  %v783_v43 = vpop.permute.xlu2 %782 }
 0x145   : > { %v734_v45 = vsel %vm675_vm1, %v729_v42, 0  ;;  %v788_v46 = vsel %vm675_vm1, %v783_v43, 0  ;;  %v8071_v7 = vpop.permute.xlu0 %2950 }
 0x146   : > { %v942_v48 = vunpack.c.l.b16 %v657_v41  ;;  %743 = vmatpush.bf16.xpose.msra.mxu3 %v734_v45  ;;  %797 = vmatpush.bf16.xpose.msrb.mxu2 %v788_v46  ;;  %11676 = vst [vmem:[#allocation27_spill] sm:$0xff] %v8071_v7 }
 0x148   : > { %v8042_v49 = vpack.c.b16 %v942_v48, %v941_v47 }
 0x149   : > { %v515_v51 = vpop.f32.mrf.mxu0 }
 0x14a   : > { %11673 = vst [vmem:[#allocation24_spill] sm:$0xff] %v8042_v49  ;;  %944 = vrot.lane.b32.xlu1 %v8042_v49, %s7711_s9  ;;  %3150 = vrot.lane.b32.xlu2 %v8042_v49, %s7715_s17  ;;  %v516_v56 = vadd.f32 %v7854_v30, %v515_v51 }
 0x14b   : > { %1869 = vrot.lane.b32.xlu0 %v8042_v49, %s7710_s8 }
 0x14c   : > { %v756_v53 = vpop.permute.xlu1 %755  ;;  %v8050_v54 = vpop.permute.xlu2 %1719  ;;  %v658_v60 = vpack.c.bf16 %v516_v56, %v516_v56 }
 0x14d   : > { %6713 = vmatmul.msk.bf16.vlgmr.msra.gmra.mxu3 %vm675_vm1, %v7893_v0  ;;  %6715 = vmatmul.msk.bf16.vlgmr.msrb.gmra.mxu2 %vm675_vm1, %v7929_v24  ;;  %v761_v55 = vsel %vm675_vm1, %v756_v53, 0  ;;  %v8085_v19 = vpop.permute.xlu0 %1694 }
 0x14e   : > { %770 = vmatpush.bf16.xpose.msrb.mxu1 %v761_v55  ;;  %v968_v3 = vunpack.c.l.b16 %v658_v60 }
 0x151   : > { %v517_v58 = vpop.f32.mrf.mxu0 }
 0x152   : > { %v518_v61 = vadd.f32 %v7854_v30, %v517_v58  ;;  %2273 = vrot.lane.b32.xlu1 %v8042_v49, %s7709_s29 }
 0x153   : > { %2271 = vrot.lane.b32.xlu0 %v8042_v49, %s7712_s13 }
 0x154   : > { %v659_v63 = vpack.c.bf16 %v518_v61, %v518_v61  ;;  %v8065_v2 = vpop.permute.xlu2 %2129  ;;  %v8088_v28 = vpop.permute.xlu1 %2975 }
 0x155   : > { %11674 = vst [vmem:[#allocation25_spill] sm:$0xff] %v8065_v2  ;;  %6714 = vmatmul.msk.bf16.vlgmr.msrb.gmra.mxu1 %vm675_vm1, %v7912_v12  ;;  %v8098_v36 = vpop.permute.xlu0 %2103 }
 0x156   : > { %v969_v4 = vunpack.c.l.b16 %v659_v63  ;;  %11678 = vst [vmem:[#allocation29_spill] sm:$0xff] %v8088_v28 }
 0x157   : > { %11681 = vst [vmem:[#allocation32_spill] sm:$0xff] %v8098_v36 }
 0x158   : > { %v8069_v6 = vpack.c.b16 %v969_v4, %v968_v3 }
 0x159   : > { %v520_v8 = vpop.f32.mrf.mxu0 }
 0x15a   : > { %11675 = vst [vmem:[#allocation26_spill] sm:$0xff] %v8069_v6  ;;  %1894 = vrot.lane.b32.xlu1 %v8069_v6, %s7710_s8  ;;  %971 = vrot.lane.b32.xlu2 %v8069_v6, %s7711_s9  ;;  %v521_v11 = vadd.f32 %v7854_v30, %v520_v8 }
 0x15b   : > { %2297 = vrot.lane.b32.xlu0 %v8069_v6, %s7709_s29 }
 0x15c   : > { %v8079_v9 = vpop.permute.xlu2 %2127  ;;  %v660_v16 = vpack.c.bf16 %v521_v11, %v521_v11 }
 0x15d   : > { %11677 = vst [vmem:[#allocation28_spill] sm:$0xff] %v8079_v9 }
 0x15e   : > { %v995_v25 = vunpack.c.l.b16 %v660_v16 }
 0x161   : > { %v522_v13 = vpop.f32.mrf.mxu0 }
 0x162   : > { %v523_v18 = vadd.f32 %v7854_v30, %v522_v13  ;;  %2295 = vrot.lane.b32.xlu2 %v8069_v6, %s7712_s13 }
 0x164   : > { %v661_v20 = vpack.c.bf16 %v523_v18, %v523_v18  ;;  %v810_v21 = vpop.permute.xlu2 %809 }
 0x165   : > { %v815_v22 = vsel %vm675_vm1, %v810_v21, 0 }
 0x166   : > { %v996_v26 = vunpack.c.l.b16 %v661_v20  ;;  %824 = vmatpush.bf16.xpose.msrb.mxu3 %v815_v22 }
 0x168   : > { %v8090_v29 = vpack.c.b16 %v996_v26, %v995_v25 }
 0x169   : > { %v525_v32 = vpop.f32.mrf.mxu0 }
 0x16a   : > { %11679 = vst [vmem:[#allocation30_spill] sm:$0xff] %v8090_v29  ;;  %3175 = vrot.lane.b32.xlu2 %v8069_v6, %s7715_s17  ;;  %998 = vrot.lane.b32.xlu0 %v8090_v29, %s7711_s9  ;;  %v526_v38 = vadd.f32 %v7854_v30, %v525_v32 }
 0x16c   : > { %v8096_v35 = vpop.permute.xlu2 %3050  ;;  %v8103_v39 = vpop.permute.xlu1 %2153  ;;  %v662_v42 = vpack.c.bf16 %v526_v38, %v526_v38 }
 0x16d   : > { %11680 = vst [vmem:[#allocation31_spill] sm:$0xff] %v8096_v35  ;;  %6716 = vmatmul.msk.bf16.vlgmr.msrb.gmra.mxu3 %vm675_vm1, %v7940_v37  ;;  %v8112_v47 = vpop.permute.xlu0 %1744 }
 0x16e   : > { %11682 = vst [vmem:[#allocation33_spill] sm:$0xff] %v8103_v39  ;;  %v1022_v48 = vunpack.c.l.b16 %v662_v42 }
 0x171   : > { %v527_v41 = vpop.f32.mrf.mxu0 }
 0x172   : > { %v528_v43 = vadd.f32 %v7854_v30, %v527_v41  ;;  %2321 = vrot.lane.b32.xlu2 %v8090_v29, %s7709_s29  ;;  %1919 = vrot.lane.b32.xlu0 %v8090_v29, %s7710_s8 }
 0x174   : > { %v663_v45 = vpack.c.bf16 %v528_v43, %v528_v43  ;;  %v8110_v46 = vpop.permute.xlu2 %2201  ;;  %v8116_v56 = vpop.permute.xlu1 %2151 }
 0x175   : > { %11683 = vst [vmem:[#allocation34_spill] sm:$0xff] %v8110_v46 }
 0x176   : > { %v1023_v51 = vunpack.c.l.b16 %v663_v45  ;;  %11685 = vst [vmem:[#allocation36_spill] sm:$0xff] %v8116_v56 }
 0x178   : > { %v8114_v53 = vpack.c.b16 %v1023_v51, %v1022_v48 }
 0x179   : > { %v530_v55 = vpop.f32.mrf.mxu0 }
 0x17a   : > { %11684 = vst [vmem:[#allocation35_spill] sm:$0xff] %v8114_v53  ;;  %1025 = vrot.lane.b32.xlu1 %v8114_v53, %s7711_s9  ;;  %1944 = vrot.lane.b32.xlu2 %v8114_v53, %s7710_s8  ;;  %v531_v61 = vadd.f32 %v7854_v30, %v530_v55 }
 0x17b   : > { %2319 = vrot.lane.b32.xlu0 %v8090_v29, %s7712_s13 }
 0x17c   : > { %v8124_v58 = vpop.permute.xlu2 %2199  ;;  %v664_v4 = vpack.c.bf16 %v531_v61, %v531_v61  ;;  %v8133_v11 = vpop.permute.xlu1 %1769 }
 0x17d   : > { %11686 = vst [vmem:[#allocation37_spill] sm:$0xff] %v8124_v58  ;;  %v837_v60 = vpop.permute.xlu0 %836 }
 0x17e   : > { %v842_v63 = vsel %vm675_vm1, %v837_v60, 0  ;;  %v1049_v20 = vunpack.c.l.b16 %v664_v4 }
 0x17f   : > { %851 = vmatpush.bf16.xpose.msra.mxu1 %v842_v63 }
 0x181   : > { %v532_v3 = vpop.f32.mrf.mxu0 }
 0x182   : > { %v533_v8 = vadd.f32 %v7854_v30, %v532_v3  ;;  %2343 = vrot.lane.b32.xlu2 %v8114_v53, %s7712_s13 }
 0x183   : > { %2345 = vrot.lane.b32.xlu0 %v8114_v53, %s7709_s29 }
 0x184   : > { %v665_v13 = vpack.c.bf16 %v533_v8, %v533_v8  ;;  %v891_v16 = vpop.permute.xlu2 %890 }
 0x185   : > { %v896_v18 = vsel %vm675_vm1, %v891_v16, 0  ;;  %v8148_v42 = vpop.permute.xlu0 %2177 }
 0x186   : > { %v1050_v21 = vunpack.c.l.b16 %v665_v13  ;;  %6717 = vmatmul.msk.bf16.vlgmr.msra.gmra.mxu1 %vm675_vm1, %v7957_v50  ;;  %905 = vmatpush.bf16.xpose.msra.mxu3 %v896_v18  ;;  %11688 = vst [vmem:[#allocation39_spill] sm:$0xff] %v8148_v42 }
 0x188   : > { %v8138_v22 = vpack.c.b16 %v1050_v21, %v1049_v20 }
 0x189   : > { %v535_v25 = vpop.f32.mrf.mxu0 }
 0x18a   : > { %11687 = vst [vmem:[#allocation38_spill] sm:$0xff] %v8138_v22  ;;  %2369 = vrot.lane.b32.xlu1 %v8138_v22, %s7709_s29  ;;  %1052 = vrot.lane.b32.xlu2 %v8138_v22, %s7711_s9  ;;  %v536_v26 = vadd.f32 %v7854_v30, %v535_v25 }
 0x18c   : > { %v864_v32 = vpop.permute.xlu1 %863  ;;  %v666_v41 = vpack.c.bf16 %v536_v26, %v536_v26 }
 0x18d   : > { %v869_v38 = vsel %vm675_vm1, %v864_v32, 0  ;;  %6719 = vmatmul.msk.bf16.vlgmr.msra.gmra.mxu3 %vm675_vm1, %v7999_v14 }
 0x18e   : > { %878 = vmatpush.bf16.xpose.msra.mxu2 %v869_v38  ;;  %v1076_v48 = vunpack.c.l.b16 %v666_v41 }
 0x191   : > { %v537_v43 = vpop.f32.mrf.mxu0 }
 0x192   : > { %v538_v45 = vadd.f32 %v7854_v30, %v537_v43  ;;  %3250 = vrot.lane.b32.xlu1 %v8138_v22, %s7715_s17  ;;  %1969 = vrot.lane.b32.xlu2 %v8138_v22, %s7710_s8  ;;  %v8165_v30 = vpop.permute.xlu0 %2175 }
 0x193   : > { %11690 = vst [vmem:[#allocation41_spill] sm:$0xff] %v8165_v30 }
 0x194   : > { %v667_v51 = vpack.c.bf16 %v538_v45, %v538_v45  ;;  %v8155_v55 = vpop.permute.xlu1 %1794  ;;  %v8177_v3 = vpop.permute.xlu2 %1844 }
 0x195   : > { %6718 = vmatmul.msk.bf16.vlgmr.msra.gmra.mxu2 %vm675_vm1, %v7974_v62 }
 0x196   : > { %v1077_v60 = vunpack.c.l.b16 %v667_v51  ;;  %v6920_v51 = vld [vmem:[%s8203_s21] sm:$0xff]  }
 0x198   : > { %v8159_v61 = vpack.c.b16 %v1077_v60, %v1076_v48 }
 0x19a   : > { %11689 = vst [vmem:[#allocation40_spill] sm:$0xff] %v8159_v61  ;;  %1994 = vrot.lane.b32.xlu1 %v8159_v61, %s7710_s8  ;;  %2367 = vrot.lane.b32.xlu2 %v8138_v22, %s7712_s13  ;;  %v8181_v8 = vpop.permute.xlu0 %3075  ;;  %s7717_s8 = smov 72  }
 0x19b   : > { %1079 = vrot.lane.b32.xlu0 %v8159_v61, %s7711_s9  ;;  %11692 = vst [vmem:[#allocation43_spill] sm:$0xff] %v8181_v8  ;;  %s7718_s9 = smov 104  }
 0x19c   : > { %v8169_v63 = vpop.permute.xlu1 %1819 }
 0x1a2   : > { %2393 = vrot.lane.b32.xlu1 %v8159_v61, %s7709_s29  ;;  %2391 = vrot.lane.b32.xlu2 %v8159_v61, %s7712_s13  ;;  %s8598_s29 = scalar_lea.vmem %s11464_s2, %s6913_s18  ;;  %s6918_s13 = sshll.u32 %s7783_s28, 8 }
 0x1a3   : > { %3275 = vrot.lane.b32.xlu0 %v8159_v61, %s7715_s17  ;;  %v691_v38 = vpop.f32.mrf.mxu1 }
 0x1a4   : > { %v8179_v4 = vpop.permute.xlu1 %2225  ;;  %v8183_v13 = vpop.permute.xlu2 %3150 }
 0x1a5   : > { %11691 = vst [vmem:[#allocation42_spill] sm:$0xff] %v8179_v4 }
 0x1a6   : > { %11693 = vst [vmem:[#allocation44_spill] sm:$0xff] %v8183_v13 }
 0x1ac   : > { %v8185_v16 = vpop.permute.xlu1 %2223 }
 0x1ad   : > { %11694 = vst [vmem:[#allocation45_spill] sm:$0xff] %v8185_v16  ;;  %v918_v18 = vpop.permute.xlu0 %917 }
 0x1ae   : > { %v923_v20 = vsel %vm675_vm1, %v918_v18, 0  ;;  %v7047_v18 = vld [vmem:[%s8203_s21 + $0x8] sm:$0xff]  }
 0x1af   : > { %932 = vmatpush.bf16.xpose.msrb.mxu1 %v923_v20  ;;  %v8212_v20 = vunpack.c.h.bf16 %v6920_v51  ;;  %v8216_v5 = vunpack.c.l.bf16 %v7047_v18 }
 0x1b1   : > { %11698 = vst [vmem:[#allocation49_spill] sm:$0xff] %v8212_v20 }
 0x1b2   : > { %11700 = vst [vmem:[#allocation51_spill] sm:$0xff] %v8216_v5 }
 0x1b4   : > { %v8188_v21 = vpop.permute.xlu1 %2247  ;;  %v972_v25 = vpop.permute.xlu2 %971 }
 0x1b5   : > { %11695 = vst [vmem:[#allocation46_spill] sm:$0xff] %v8188_v21  ;;  %v977_v26 = vsel %vm675_vm1, %v972_v25, 0  ;;  %v8191_v32 = vpop.permute.xlu0 %2249  ;;  %v8214_v25 = vunpack.c.l.bf16 %v6920_v51  ;;  %v8231_v51 = vunpack.c.h.bf16 %v7047_v18 }
 0x1b6   : > { %11696 = vst [vmem:[#allocation47_spill] sm:$0xff] %v8191_v32  ;;  %6720 = vmatmul.msk.bf16.vlgmr.msrb.gmra.mxu1 %vm675_vm1, %v8020_v31  ;;  %986 = vmatpush.bf16.xpose.msrb.mxu3 %v977_v26  ;;  %v693_v26 = vpop.f32.mrf.mxu1 }
 0x1b7   : > { %11699 = vst [vmem:[#allocation50_spill] sm:$0xff] %v8214_v25 }
 0x1b8   : > { %v718_v48 = vpop.f32.mrf.mxu2  ;;  %11702 = vst [vmem:[#allocation53_spill] sm:$0xff] %v8231_v51 }
 0x1b9   : > { %v8229_v13 = vadd.f32 %v8216_v5, %v718_v48 }
 0x1bb   : > { %v1108_v48 = vsel %vm1101_vm2, %v8229_v13, -inf }
 0x1bc   : > { %v945_v41 = vpop.permute.xlu1 %944  ;;  %v8196_v43 = vpop.permute.xlu2 %2295 }
 0x1bd   : > { %11697 = vst [vmem:[#allocation48_spill] sm:$0xff] %v8196_v43  ;;  %v950_v45 = vsel %vm675_vm1, %v945_v41, 0  ;;  %6722 = vmatmul.msk.bf16.vlgmr.msrb.gmra.mxu3 %vm675_vm1, %v8069_v6  ;;  %v8209_v60 = vpop.permute.xlu0 %1869  ;;  %v8223_v41 = vadd.f32 %v8212_v20, %v693_v26  ;;  %v7048_v43 = vld [vmem:[%s8203_s21 + $0x10] sm:$0xff]  }
 0x1be   : > { %959 = vmatpush.bf16.xpose.msrb.mxu2 %v950_v45  ;;  %v8226_v45 = vadd.f32 %v8214_v25, %v691_v38  ;;  %v8244_v18 = vunpack.c.l.bf16 %v7048_v43 }
 0x1c0   : > { %v720_v35 = vpop.f32.mrf.mxu2  ;;  %v1102_v26 = vsel %vm1101_vm2, %v8226_v45, -inf  ;;  %11705 = vst [vmem:[#allocation56_spill] sm:$0xff] %v8244_v18 }
 0x1c1   : > { %v8247_v5 = vadd.f32 %v8231_v51, %v720_v35  ;;  %v8261_v35 = vunpack.c.h.bf16 %v7048_v43  ;;  %v8263_v51 = vunpack.c.h.bf16 %v7050_v23 }
 0x1c3   : > { %v1111_v56 = vsel %vm1101_vm2, %v8247_v5, -inf  ;;  %11707 = vst [vmem:[#allocation58_spill] sm:$0xff] %v8261_v35 }
 0x1c4   : > { %v8218_v17 = vpop.permute.xlu2 %3175  ;;  %11708 = vst [vmem:[#allocation59_spill] sm:$0xff] %v8263_v51 }
 0x1c5   : > { %11701 = vst [vmem:[#allocation52_spill] sm:$0xff] %v8218_v17  ;;  %6721 = vmatmul.msk.bf16.vlgmr.msrb.gmra.mxu2 %vm675_vm1, %v8042_v49  ;;  %v8233_v7 = vpop.permute.xlu0 %2271  ;;  %v1105_v17 = vsel %vm1101_vm2, %v8223_v41, -inf }
 0x1c6   : > { %11703 = vst [vmem:[#allocation54_spill] sm:$0xff] %v8233_v7 }
 0x1cb   : > { %1106 = vmax.xlane.f32.xlu2 %v1105_v17 }
 0x1cc   : > { %v8240_v38 = vpop.permute.xlu2 %2321  ;;  %1103 = vmax.xlane.f32.xlu1 %v1102_v26 }
 0x1cd   : > { %11704 = vst [vmem:[#allocation55_spill] sm:$0xff] %v8240_v38  ;;  %1109 = vmax.xlane.f32.xlu0 %v1108_v48  ;;  %v8256_v48 = vpop.permute.xlu0 %2297 }
 0x1ce   : > { %11706 = vst [vmem:[#allocation57_spill] sm:$0xff] %v8256_v48  ;;  %v8274_v48 = vpop.permute.xlu1 %2273 }
 0x1cf   : > { %11710 = vst [vmem:[#allocation61_spill] sm:$0xff] %v8274_v48 }
 0x1d0   : > { %v745_v20 = vpop.f32.mrf.mxu3  ;;  %v799_v25 = vpop.f32.mrf.mxu2 }
 0x1d1   : > { %v8250_v17 = vadd.f32 %v8244_v18, %v745_v20  ;;  %v7049_v20 = vld [vmem:[%s8203_s21 + $0x18] sm:$0xff]  }
 0x1d2   : > { %v772_v16 = vpop.f32.mrf.mxu1  ;;  %v8266_v18 = vunpack.c.h.bf16 %v7049_v20  ;;  %v8276_v58 = vunpack.c.l.bf16 %v7049_v20 }
 0x1d3   : > { %1112 = vmax.xlane.f32.xlu2 %v1111_v56  ;;  %v1114_v26 = vsel %vm1101_vm2, %v8250_v17, -inf }
 0x1d4   : > { %v8259_v4 = vpop.permute.xlu2 %1944  ;;  %11709 = vst [vmem:[#allocation60_spill] sm:$0xff] %v8266_v18  ;;  %v8293_v20 = vadd.f32 %v8276_v58, %v772_v16  ;;  %v7051_v16 = vld [vmem:[%s8203_s21 + $0x28] sm:$0xff]  }
 0x1d5   : > { %1115 = vmax.xlane.f32.xlu0 %v1114_v26  ;;  %11711 = vst [vmem:[#allocation62_spill] sm:$0xff] %v8276_v58 }
 0x1d8   : > { %v747_v8 = vpop.f32.mrf.mxu3  ;;  %v801_v39 = vpop.f32.mrf.mxu2 }
 0x1d9   : > { %v8269_v56 = vadd.f32 %v8261_v35, %v747_v8  ;;  %v8272_v7 = vadd.f32 %v8263_v51, %v801_v39  ;;  %v8287_v39 = vunpack.c.l.bf16 %v7050_v23  ;;  %v8300_v23 = vpop.permute.xlu1 %1894 }
 0x1da   : > { %v774_v28 = vpop.f32.mrf.mxu1 }
 0x1db   : > { %v8279_v43 = vadd.f32 %v8266_v18, %v774_v28  ;;  %v1117_v26 = vsel %vm1101_vm2, %v8269_v56, -inf  ;;  %v1129_v21 = vsel %vm1101_vm2, %v8272_v7, -inf  ;;  %11713 = vst [vmem:[#allocation64_spill] sm:$0xff] %v8287_v39  ;;  %v8296_v51 = vadd.f32 %v8287_v39, %v799_v25 }
 0x1dc   : > { %v8285_v9 = vpop.permute.xlu2 %2343  ;;  %1118 = vmax.xlane.f32.xlu1 %v1117_v26  ;;  %v999_v8 = vpop.permute.xlu0 %998  ;;  %v1120_v26 = vsel %vm1101_vm2, %v8293_v20, -inf }
 0x1dd   : > { %11712 = vst [vmem:[#allocation63_spill] sm:$0xff] %v8285_v9  ;;  %1130 = vmax.xlane.f32.xlu0 %v1129_v21  ;;  %v1004_v35 = vsel %vm675_vm1, %v999_v8, 0  ;;  %v1123_v28 = vsel %vm1101_vm2, %v8279_v43, -inf }
 0x1de   : > { %1124 = vmax.xlane.f32.xlu2 %v1123_v28  ;;  %1013 = vmatpush.bf16.xpose.msra.mxu1 %v1004_v35  ;;  %v1126_v35 = vsel %vm1101_vm2, %v8296_v51, -inf }
 0x1e4   : > { %v1053_v21 = vpop.permute.xlu2 %1052  ;;  %1121 = vmax.xlane.f32.xlu1 %v1120_v26  ;;  %v8312_v26 = vunpack.c.l.bf16 %v7051_v16 }
 0x1e5   : > { %v1058_v8 = vsel %vm675_vm1, %v1053_v21, 0  ;;  %6723 = vmatmul.msk.bf16.vlgmr.msra.gmra.mxu1 %vm675_vm1, %v8090_v29 }
 0x1e6   : > { %1067 = vmatpush.bf16.xpose.msra.mxu3 %v1058_v8  ;;  %1127 = vmax.xlane.f32.xlu2 %v1126_v35  ;;  %11714 = vst [vmem:[#allocation65_spill] sm:$0xff] %v8312_v26  ;;  %v8316_v8 = vpop.permute.xlu0 %1919 }
 0x1ec   : > { %v1026_v25 = vpop.permute.xlu1 %1025 }
 0x1ed   : > { %v1031_v28 = vsel %vm675_vm1, %v1026_v25, 0  ;;  %6725 = vmatmul.msk.bf16.vlgmr.msra.gmra.mxu3 %vm675_vm1, %v8138_v22  ;;  %v8325_v25 = vunpack.c.h.bf16 %v7051_v16 }
 0x1ee   : > { %1657 = vmatpush.bf16.msrb.mxu3 %v8016_v27  ;;  %1040 = vmatpush.bf16.xpose.msra.mxu2 %v1031_v28  ;;  %v8331_v28 = vpop.permute.xlu0 %2319 }
 0x1ef   : > { %11715 = vst [vmem:[#allocation66_spill] sm:$0xff] %v8325_v25 }
 0x1f0   : > { %v826_v21 = vpop.f32.mrf.mxu3  ;;  %11716 = vst [vmem:[#allocation67_spill] sm:$0xff] %v8331_v28 }
 0x1f1   : > { %v8319_v27 = vadd.f32 %v8312_v26, %v826_v21  ;;  %v7052_v26 = vld [vmem:[%s8203_s21 + $0x30] sm:$0xff]  }
 0x1f2   : > { %1732 = vmatpush.bf16.msra.mxu3 %v8050_v54 }
 0x1f3   : > { %v1132_v35 = vsel %vm1101_vm2, %v8319_v27, -inf }
 0x1f4   : > { %1133 = vmax.xlane.f32.xlu0 %v1132_v35  ;;  %v8336_v35 = vunpack.c.l.bf16 %v7052_v26 }
 0x1f5   : > { %6724 = vmatmul.msk.bf16.vlgmr.msra.gmra.mxu2 %vm675_vm1, %v8114_v53 }
 0x1f6   : > { %1632 = vmatpush.bf16.msrb.mxu2 %v7972_v59  ;;  %11717 = vst [vmem:[#allocation68_spill] sm:$0xff] %v8336_v35  ;;  %v8341_v18 = vpop.permute.xlu0 %2345 }
 0x1f7   : > { %11718 = vst [vmem:[#allocation69_spill] sm:$0xff] %v8341_v18 }
 0x1f8   : > { %v828_v54 = vpop.f32.mrf.mxu3 }
 0x1f9   : > { %v8329_v59 = vadd.f32 %v8325_v25, %v828_v54  ;;  %v8345_v54 = vunpack.c.h.bf16 %v7052_v26  ;;  %v7054_v26 = vld [vmem:[%s8203_s21 + $0x40] sm:$0xff]  }
 0x1fa   : > { %1707 = vmatpush.bf16.msra.mxu2 %v8085_v19 }
 0x1fb   : > { %v1135_v21 = vsel %vm1101_vm2, %v8329_v59, -inf  ;;  %11719 = vst [vmem:[#allocation70_spill] sm:$0xff] %v8345_v54 }
 0x1fc   : > { %1136 = vmax.xlane.f32.xlu1 %v1135_v21 }
 0x203   : > { %v853_v39 = vpop.f32.mrf.mxu1 }
 0x204   : > { %v8339_v16 = vadd.f32 %v8336_v35, %v853_v39  ;;  %v7053_v35 = vld [vmem:[%s8203_s21 + $0x38] sm:$0xff]  }
 0x205   : > { %v8355_v28 = vunpack.c.l.bf16 %v7053_v35 }
 0x206   : > { %v1138_v19 = vsel %vm1101_vm2, %v8339_v16, -inf }
 0x207   : > { %1139 = vmax.xlane.f32.xlu1 %v1138_v19  ;;  %11720 = vst [vmem:[#allocation71_spill] sm:$0xff] %v8355_v28  ;;  %v8361_v19 = vpop.permute.xlu1 %2369 }
 0x208   : > { %11721 = vst [vmem:[#allocation72_spill] sm:$0xff] %v8361_v19  ;;  %v8378_v19 = vpop.permute.xlu2 %1969 }
 0x209   : > { %11724 = vst [vmem:[#allocation75_spill] sm:$0xff] %v8378_v19 }
 0x20b   : > { %v855_v25 = vpop.f32.mrf.mxu1 }
 0x20c   : > { %v8348_v21 = vadd.f32 %v8345_v54, %v855_v25  ;;  %v8366_v54 = vunpack.c.l.bf16 %v7054_v26 }
 0x20d   : > { %v1080_v58 = vpop.permute.xlu0 %1079 }
 0x20e   : > { %v1085_v9 = vsel %vm675_vm1, %v1080_v58, 0  ;;  %v1141_v39 = vsel %vm1101_vm2, %v8348_v21, -inf  ;;  %11722 = vst [vmem:[#allocation73_spill] sm:$0xff] %v8366_v54 }
 0x20f   : > { %1142 = vmax.xlane.f32.xlu2 %v1141_v39  ;;  %1094 = vmatpush.bf16.xpose.msrb.mxu1 %v1085_v9  ;;  %v8370_v39 = vunpack.c.h.bf16 %v7053_v35 }
 0x210   : > { %v907_v9 = vpop.f32.mrf.mxu3  ;;  %v8386_v35 = vpop.permute.xlu2 %2367 }
 0x211   : > { %11723 = vst [vmem:[#allocation74_spill] sm:$0xff] %v8370_v39  ;;  %v8373_v18 = vadd.f32 %v8366_v54, %v907_v9 }
 0x212   : > { %11726 = vst [vmem:[#allocation77_spill] sm:$0xff] %v8386_v35 }
 0x213   : > { %v1150_v30 = vsel %vm1101_vm2, %v8373_v18, -inf }
 0x215   : > { %v8394_v54 = vpop.permute.xlu0 %3275 }
 0x216   : > { %6726 = vmatmul.msk.bf16.vlgmr.msrb.gmra.mxu1 %vm675_vm1, %v8159_v61  ;;  %11730 = vst [vmem:[#allocation81_spill] sm:$0xff] %v8394_v54 }
 0x217   : > { %1682 = vmatpush.bf16.msra.mxu1 %v8058_v57 }
 0x218   : > { %v880_v25 = vpop.f32.mrf.mxu2  ;;  %v8390_v9 = vpop.permute.xlu2 %2391 }
 0x219   : > { %v8364_v58 = vadd.f32 %v8355_v28, %v880_v25  ;;  %v8380_v25 = vpop.permute.xlu1 %3250  ;;  %11728 = vst [vmem:[#allocation79_spill] sm:$0xff] %v8390_v9  ;;  %v7055_v9 = vld [vmem:[%s8203_s21 + $0x48] sm:$0xff]  }
 0x21a   : > { %11725 = vst [vmem:[#allocation76_spill] sm:$0xff] %v8380_v25 }
 0x21b   : > { %1757 = vmatpush.bf16.msrb.mxu1 %v8112_v47  ;;  %v1144_v57 = vsel %vm1101_vm2, %v8364_v58, -inf }
 0x21c   : > { %1145 = vmax.xlane.f32.xlu2 %v1144_v57 }
 0x220   : > { %v882_v47 = vpop.f32.mrf.mxu2 }
 0x221   : > { %v8376_v48 = vadd.f32 %v8370_v39, %v882_v47  ;;  %v8388_v57 = vpop.permute.xlu1 %1994 }
 0x222   : > { %11727 = vst [vmem:[#allocation78_spill] sm:$0xff] %v8388_v57 }
 0x223   : > { %v1147_v28 = vsel %vm1101_vm2, %v8376_v48, -inf }
 0x224   : > { %1148 = vmax.xlane.f32.xlu0 %v1147_v28  ;;  %1151 = vmax.xlane.f32.xlu2 %v1150_v30 }
 0x229   : > { %v8392_v47 = vpop.permute.xlu1 %2393 }
 0x22a   : > { %11729 = vst [vmem:[#allocation80_spill] sm:$0xff] %v8392_v47 }
 0x233   : > { %v934_v36 = vpop.f32.mrf.mxu1 }
 0x23e   : > { %v1107_v25 = vpop.xlane.xlu2 %1106 }
 0x23f   : > { %v1199_v39 = vsub.f32 %v8223_v41, %v1107_v25  ;;  %v1104_v38 = vpop.xlane.xlu1 %1103  ;;  %v8404_v41 = vunpack.c.l.bf16 %v7055_v9  ;;  %v8415_v25 = vunpack.c.h.bf16 %v7055_v9 }
 0x240   : > { %v1198_v34 = vsub.f32 %v8226_v45, %v1104_v38  ;;  %v1110_v46 = vpop.xlane.xlu0 %1109 }
 0x241   : > { %v1232_v28 = vmul.f32 1.442695, %v1199_v39  ;;  %v1200_v30 = vsub.f32 %v8229_v13, %v1110_v46  ;;  %11731 = vst [vmem:[#allocation82_spill] sm:$0xff] %v8404_v41  ;;  %v8411_v46 = vunpack.c.h.bf16 %v7054_v26  ;;  %v909_v39 = vpop.f32.mrf.mxu3 }
 0x242   : > { %v1230_v35 = vmul.f32 1.442695, %v1198_v34  ;;  %11733 = vst [vmem:[#allocation84_spill] sm:$0xff] %v8415_v25 }
 0x243   : > { %7133 = vpow2.f32 %v1232_v28  ;;  %v1234_v32 = vmul.f32 1.442695, %v1200_v30  ;;  %11732 = vst [vmem:[#allocation83_spill] sm:$0xff] %v8411_v46  ;;  %v8423_v26 = vadd.f32 %v8411_v46, %v909_v39 }
 0x244   : > { %7135 = vpow2.f32 %v1230_v35  ;;  %v936_v35 = vpop.f32.mrf.mxu1 }
 0x245   : > { %7137 = vpow2.f32 %v1234_v32  ;;  %v8427_v42 = vadd.f32 %v8415_v25, %v936_v35  ;;  %v1153_v39 = vsel %vm1101_vm2, %v8423_v26, -inf }
 0x246   : > { %v1113_v47 = vpop.xlane.xlu2 %1112 }
 0x247   : > { %v1201_v45 = vsub.f32 %v8247_v5, %v1113_v47  ;;  %v8420_v47 = vadd.f32 %v8404_v41, %v934_v36 }
 0x248   : > { %v961_v13 = vpop.f32.mrf.mxu2  ;;  %v1116_v30 = vpop.xlane.xlu0 %1115 }
 0x249   : > { %v8400_v2 = vpop.eup %7133  ;;  %v1236_v28 = vmul.f32 1.442695, %v1201_v45  ;;  %v1202_v33 = vsub.f32 %v8250_v17, %v1116_v30  ;;  %v1156_v36 = vsel %vm1101_vm2, %v8420_v47, -inf }
 0x24a   : > { %v8402_v54 = vpop.eup %7135  ;;  %v1297_v38 = vsel %vm1101_vm2, %v8400_v2, 0.0 }
 0x24b   : > { %v8409_v34 = vpop.eup %7137  ;;  %1298 = vadd.xlane.f32.xlu1 %v1297_v38  ;;  %v1294_v32 = vsel %vm1101_vm2, %v8402_v54, 0.0  ;;  %v7056_v38 = vld [vmem:[%s8203_s21 + $0x50] sm:$0xff]   ;;  %7139 = vpow2.f32 %v1236_v28  ;;  %v1238_v17 = vmul.f32 1.442695, %v1202_v33 }
 0x24c   : > { %1295 = vadd.xlane.f32.xlu0 %v1294_v32  ;;  %v1300_v5 = vsel %vm1101_vm2, %v8409_v34, 0.0  ;;  %v8438_v46 = vunpack.c.h.bf16 %v7056_v38 }
 0x24d   : > { %1301 = vadd.xlane.f32.xlu2 %v1300_v5  ;;  %v8431_v5 = vunpack.c.l.bf16 %v7056_v38 }
 0x24e   : > { %11735 = vst [vmem:[#allocation86_spill] sm:$0xff] %v8438_v46 }
 0x24f   : > { %v1119_v10 = vpop.xlane.xlu1 %1118  ;;  %11734 = vst [vmem:[#allocation85_spill] sm:$0xff] %v8431_v5  ;;  %v8443_v28 = vadd.f32 %v8431_v5, %v961_v13 }
 0x250   : > { %v1203_v9 = vsub.f32 %v8269_v56, %v1119_v10  ;;  %v1159_v10 = vsel %vm1101_vm2, %v8427_v42, -inf  ;;  %v963_v35 = vpop.f32.mrf.mxu2 }
 0x251   : > { %v1125_v32 = vpop.xlane.xlu2 %1124 }
 0x252   : > { %v1205_v45 = vsub.f32 %v8279_v43, %v1125_v32  ;;  %v1240_v56 = vmul.f32 1.442695, %v1203_v9  ;;  %v8445_v43 = vpop.eup %7139  ;;  %v8448_v32 = vadd.f32 %v8438_v46, %v963_v35  ;;  %v1162_v9 = vsel %vm1101_vm2, %v8443_v28, -inf  ;;  %v7057_v35 = vld [vmem:[%s8203_s21 + $0x58] sm:$0xff]  }
 0x253   : > { %1157 = vmax.xlane.f32.xlu1 %v1156_v36  ;;  %v1303_v13 = vsel %vm1101_vm2, %v8445_v43, 0.0 }
 0x254   : > { %1154 = vmax.xlane.f32.xlu0 %v1153_v39  ;;  %v1244_v30 = vmul.f32 1.442695, %v1205_v45  ;;  %7141 = vpow2.f32 %v1240_v56  ;;  %v1165_v45 = vsel %vm1101_vm2, %v8448_v32, -inf }
 0x255   : > { %1160 = vmax.xlane.f32.xlu2 %v1159_v10  ;;  %7143 = vpow2.f32 %v1238_v17 }
 0x256   : > { %7145 = vpow2.f32 %v1244_v30 }
 0x257   : > { %v1122_v25 = vpop.xlane.xlu1 %1121 }
 0x258   : > { %v1204_v38 = vsub.f32 %v8293_v20, %v1122_v25  ;;  %v1131_v25 = vpop.xlane.xlu0 %1130 }
 0x259   : > { %v1128_v36 = vpop.xlane.xlu2 %1127  ;;  %v1207_v41 = vsub.f32 %v8272_v7, %v1131_v25 }
 0x25a   : > { %v1206_v33 = vsub.f32 %v8296_v51, %v1128_v36  ;;  %v1242_v39 = vmul.f32 1.442695, %v1204_v38  ;;  %v8458_v20 = vpop.eup %7141  ;;  %v988_v51 = vpop.f32.mrf.mxu3  ;;  %v8467_v36 = vunpack.c.l.bf16 %v7057_v35 }
 0x25b   : > { %1163 = vmax.xlane.f32.xlu1 %v1162_v9  ;;  %v8460_v56 = vpop.eup %7143  ;;  %v1309_v30 = vsel %vm1101_vm2, %v8458_v20, 0.0  ;;  %v1248_v7 = vmul.f32 1.442695, %v1207_v41 }
 0x25c   : > { %1304 = vadd.xlane.f32.xlu0 %v1303_v13  ;;  %v1246_v10 = vmul.f32 1.442695, %v1206_v33  ;;  %v8463_v17 = vpop.eup %7145  ;;  %7147 = vpow2.f32 %v1242_v39  ;;  %11736 = vst [vmem:[#allocation87_spill] sm:$0xff] %v8467_v36  ;;  %v1306_v38 = vsel %vm1101_vm2, %v8460_v56, 0.0  ;;  %v8476_v13 = vadd.f32 %v8467_v36, %v988_v51  ;;  %v7058_v39 = vld [vmem:[%s8203_s21 + $0x60] sm:$0xff]  }
 0x25d   : > { %1166 = vmax.xlane.f32.xlu2 %v1165_v45  ;;  %v1315_v9 = vsel %vm1101_vm2, %v8463_v17, 0.0  ;;  %v8487_v40 = vunpack.c.l.bf16 %v7058_v39 }
 0x25e   : > { %7149 = vpow2.f32 %v1246_v10  ;;  %v1168_v51 = vsel %vm1101_vm2, %v8476_v13, -inf }
 0x25f   : > { %11738 = vst [vmem:[#allocation89_spill] sm:$0xff] %v8487_v40 }
 0x262   : > { %v8473_v33 = vpop.eup %7147  ;;  %v1015_v10 = vpop.f32.mrf.mxu1 }
 0x263   : > { %1310 = vadd.xlane.f32.xlu1 %v1309_v30  ;;  %v8482_v30 = vunpack.c.h.bf16 %v7057_v35 }
 0x264   : > { %1307 = vadd.xlane.f32.xlu0 %v1306_v38  ;;  %v8480_v5 = vpop.eup %7149  ;;  %v1312_v38 = vsel %vm1101_vm2, %v8473_v33, 0.0 }
 0x265   : > { %1316 = vadd.xlane.f32.xlu2 %v1315_v9  ;;  %11737 = vst [vmem:[#allocation88_spill] sm:$0xff] %v8482_v30  ;;  %v990_v9 = vpop.f32.mrf.mxu3 }
 0x266   : > { %v8494_v35 = vadd.f32 %v8482_v30, %v990_v9 }
 0x267   : > { %v1134_v45 = vpop.xlane.xlu0 %1133 }
 0x268   : > { %v1208_v46 = vsub.f32 %v8319_v27, %v1134_v45  ;;  %v1318_v27 = vsel %vm1101_vm2, %v8480_v5, 0.0  ;;  %v8501_v45 = vunpack.c.h.bf16 %v7058_v39  ;;  %v7059_v39 = vld [vmem:[%s8203_s21 + $0x68] sm:$0xff]  }
 0x269   : > { %v8518_v30 = vunpack.c.l.bf16 %v7059_v39 }
 0x26a   : > { %v1250_v61 = vmul.f32 1.442695, %v1208_v46  ;;  %v8497_v46 = vadd.f32 %v8487_v40, %v1015_v10  ;;  %11739 = vst [vmem:[#allocation90_spill] sm:$0xff] %v8501_v45 }
 0x26b   : > { %1313 = vadd.xlane.f32.xlu1 %v1312_v38  ;;  %v1017_v38 = vpop.f32.mrf.mxu1  ;;  %11740 = vst [vmem:[#allocation91_spill] sm:$0xff] %v8518_v30 }
 0x26c   : > { %7151 = vpow2.f32 %v1250_v61  ;;  %1169 = vmax.xlane.f32.xlu0 %v1168_v51  ;;  %v1171_v61 = vsel %vm1101_vm2, %v8494_v35, -inf  ;;  %v1174_v51 = vsel %vm1101_vm2, %v8497_v46, -inf  ;;  %v8510_v41 = vadd.f32 %v8501_v45, %v1017_v38 }
 0x26d   : > { %1319 = vadd.xlane.f32.xlu2 %v1318_v27  ;;  %7153 = vpow2.f32 %v1248_v7 }
 0x26f   : > { %v1137_v10 = vpop.xlane.xlu1 %1136 }
 0x270   : > { %v1209_v40 = vsub.f32 %v8329_v59, %v1137_v10 }
 0x272   : > { %v8499_v25 = vpop.eup %7151  ;;  %v1252_v38 = vmul.f32 1.442695, %v1209_v40 }
 0x273   : > { %1172 = vmax.xlane.f32.xlu1 %v1171_v61  ;;  %v1324_v9 = vsel %vm1101_vm2, %v8499_v25, 0.0  ;;  %v8512_v27 = vpop.eup %7153  ;;  %v1177_v61 = vsel %vm1101_vm2, %v8510_v41, -inf }
 0x274   : > { %1175 = vmax.xlane.f32.xlu0 %v1174_v51  ;;  %v1321_v51 = vsel %vm1101_vm2, %v8512_v27, 0.0  ;;  %7155 = vpow2.f32 %v1252_v38 }
 0x275   : > { %1325 = vadd.xlane.f32.xlu2 %v1324_v9  ;;  %v8522_v9 = vunpack.c.h.bf16 %v7059_v39 }
 0x277   : > { %11741 = vst [vmem:[#allocation92_spill] sm:$0xff] %v8522_v9 }
 0x278   : > { %v1042_v7 = vpop.f32.mrf.mxu2 }
 0x279   : > { %v8525_v45 = vadd.f32 %v8518_v30, %v1042_v7  ;;  %v1069_v7 = vpop.f32.mrf.mxu3 }
 0x27a   : > { %v1140_v36 = vpop.xlane.xlu1 %1139 }
 0x27b   : > { %1178 = vmax.xlane.f32.xlu1 %v1177_v61  ;;  %v1210_v10 = vsub.f32 %v8339_v16, %v1140_v36  ;;  %v1180_v40 = vsel %vm1101_vm2, %v8525_v45, -inf  ;;  %v7060_v36 = vld [vmem:[%s8203_s21 + $0x70] sm:$0xff]  }
 0x27c   : > { %1322 = vadd.xlane.f32.xlu0 %v1321_v51  ;;  %v8543_v38 = vunpack.c.h.bf16 %v7060_v36 }
 0x27d   : > { %v1254_v30 = vmul.f32 1.442695, %v1210_v10 }
 0x27e   : > { %11742 = vst [vmem:[#allocation93_spill] sm:$0xff] %v8543_v38 }
 0x280   : > { %v1044_v53 = vpop.f32.mrf.mxu2 }
 0x281   : > { %v8528_v59 = vadd.f32 %v8522_v9, %v1044_v53  ;;  %v8536_v53 = vpop.eup %7155  ;;  %v7061_v9 = vld [vmem:[%s8203_s21 + $0x78] sm:$0xff]  }
 0x282   : > { %v1143_v61 = vpop.xlane.xlu2 %1142  ;;  %v1327_v16 = vsel %vm1101_vm2, %v8536_v53, 0.0  ;;  %v8558_v44 = vunpack.c.l.bf16 %v7061_v9 }
 0x283   : > { %v1211_v29 = vsub.f32 %v8348_v21, %v1143_v61  ;;  %v1183_v39 = vsel %vm1101_vm2, %v8528_v59, -inf }
 0x284   : > { %1184 = vmax.xlane.f32.xlu1 %v1183_v39  ;;  %1181 = vmax.xlane.f32.xlu0 %v1180_v40  ;;  %v1071_v39 = vpop.f32.mrf.mxu3  ;;  %11745 = vst [vmem:[#allocation96_spill] sm:$0xff] %v8558_v44 }
 0x285   : > { %v1256_v51 = vmul.f32 1.442695, %v1211_v29 }
 0x287   : > { %7157 = vpow2.f32 %v1256_v51 }
 0x288   : > { %7159 = vpow2.f32 %v1254_v30  ;;  %v8551_v30 = vadd.f32 %v8543_v38, %v1071_v39 }
 0x28a   : > { %11743 = vst [vmem:[#allocation94_spill] sm:$0xff] %v8551_v30 }
 0x28c   : > { %1328 = vadd.xlane.f32.xlu1 %v1327_v16  ;;  %v8553_v16 = vunpack.c.l.bf16 %v7060_v36 }
 0x28d   : > { %v8540_v21 = vpop.eup %7157 }
 0x28e   : > { %v1333_v61 = vsel %vm1101_vm2, %v8540_v21, 0.0  ;;  %v8547_v10 = vpop.eup %7159  ;;  %11744 = vst [vmem:[#allocation95_spill] sm:$0xff] %v8553_v16 }
 0x28f   : > { %1334 = vadd.xlane.f32.xlu0 %v1333_v61  ;;  %v1146_v29 = vpop.xlane.xlu2 %1145  ;;  %v1330_v22 = vsel %vm1101_vm2, %v8547_v10, 0.0  ;;  %v1189_v61 = vsel %vm1101_vm2, %v8551_v30, -inf }
 0x290   : > { %v1212_v40 = vsub.f32 %v8364_v58, %v1146_v29  ;;  %v8563_v58 = vadd.f32 %v8553_v16, %v1069_v7 }
 0x292   : > { %v1258_v51 = vmul.f32 1.442695, %v1212_v40  ;;  %v1186_v6 = vsel %vm1101_vm2, %v8563_v58, -inf }
 0x293   : > { %v1096_v15 = vpop.f32.mrf.mxu1 }
 0x294   : > { %7161 = vpow2.f32 %v1258_v51  ;;  %1331 = vadd.xlane.f32.xlu1 %v1330_v22  ;;  %v8569_v40 = vadd.f32 %v8558_v44, %v1096_v15  ;;  %v8571_v22 = vunpack.c.h.bf16 %v7061_v9 }
 0x296   : > { %11746 = vst [vmem:[#allocation97_spill] sm:$0xff] %v8569_v40  ;;  %v1192_v15 = vsel %vm1101_vm2, %v8569_v40, -inf }
 0x297   : > { %1190 = vmax.xlane.f32.xlu0 %v1189_v61  ;;  %v1149_v39 = vpop.xlane.xlu0 %1148  ;;  %v1152_v38 = vpop.xlane.xlu2 %1151  ;;  %11747 = vst [vmem:[#allocation98_spill] sm:$0xff] %v8571_v22 }
 0x298   : > { %v1213_v36 = vsub.f32 %v8376_v48, %v1149_v39  ;;  %v1214_v48 = vsub.f32 %v8373_v18, %v1152_v38 }
 0x29a   : > { %v8566_v29 = vpop.eup %7161  ;;  %v1260_v51 = vmul.f32 1.442695, %v1213_v36  ;;  %v1262_v9 = vmul.f32 1.442695, %v1214_v48 }
 0x29b   : > { %v1336_v7 = vsel %vm1101_vm2, %v8566_v29, 0.0  ;;  %v1098_v16 = vpop.f32.mrf.mxu1 }
 0x29c   : > { %1187 = vmax.xlane.f32.xlu1 %v1186_v6  ;;  %1337 = vadd.xlane.f32.xlu2 %v1336_v7  ;;  %7163 = vpow2.f32 %v1260_v51  ;;  %v8581_v61 = vadd.f32 %v8571_v22, %v1098_v16 }
 0x29d   : > { %7165 = vpow2.f32 %v1262_v9 }
 0x29e   : > { %11748 = vst [vmem:[#allocation99_spill] sm:$0xff] %v8581_v61  ;;  %v1195_v36 = vsel %vm1101_vm2, %v8581_v61, -inf }
 0x29f   : > { %1193 = vmax.xlane.f32.xlu0 %v1192_v15  ;;  %v6984_v15 = vld [vmem:[%s8598_s29] sm:$0xff]  }
 0x2a0   : > { %v8603_v22 = vunpack.c.h.bf16 %v6984_v15  ;;  %v8606_v57 = vunpack.c.l.bf16 %v6984_v15 }
 0x2a2   : > { %v8583_v39 = vpop.eup %7163  ;;  %11750 = vst [vmem:[#allocation101_spill] sm:$0xff] %v8603_v22 }
 0x2a3   : > { %v1339_v6 = vsel %vm1101_vm2, %v8583_v39, 0.0  ;;  %v8589_v18 = vpop.eup %7165 }
 0x2a4   : > { %1196 = vmax.xlane.f32.xlu1 %v1195_v36  ;;  %11749 = vst [vmem:[#allocation100_spill] sm:$0xff] %v8589_v18  ;;  %v1342_v38 = vsel %vm1101_vm2, %v8589_v18, 0.0 }
 0x2a7   : > { %1340 = vadd.xlane.f32.xlu0 %v1339_v6 }
 0x2af   : > { %1343 = vadd.xlane.f32.xlu0 %v1342_v38 }
 0x2be   : > { %v1299_v16 = vpop.xlane.xlu1 %1298 }
 0x2bf   : > { %7167 = vrcp.f32 %v1299_v16  ;;  %v1296_v51 = vpop.xlane.xlu0 %1295 }
 0x2c0   : > { %v1302_v7 = vpop.xlane.xlu2 %1301  ;;  %7169 = vrcp.f32 %v1296_v51 }
 0x2c1   : > { %7171 = vrcp.f32 %v1302_v7 }
 0x2c5   : > { %v7168_v48 = vpop.eup %7167 }
 0x2c6   : > { %v7170_v9 = vpop.eup %7169  ;;  %v1423_v36 = vmul.f32 %v7168_v48, %v8400_v2  ;;  %v1158_v6 = vpop.xlane.xlu1 %1157 }
 0x2c7   : > { %v1422_v38 = vmul.f32 %v7170_v9, %v8402_v54  ;;  %v1155_v16 = vpop.xlane.xlu0 %1154  ;;  %v7172_v52 = vpop.eup %7171  ;;  %v1216_v19 = vsub.f32 %v8420_v47, %v1158_v6 }
 0x2c8   : > { %v1455_v51 = vpack.c.bf16 %v1423_v36, %v1423_v36  ;;  %v1161_v44 = vpop.xlane.xlu2 %1160  ;;  %v1215_v61 = vsub.f32 %v8423_v26, %v1155_v16  ;;  %v1424_v54 = vmul.f32 %v7172_v52, %v8409_v34  ;;  %v7062_v52 = vld [vmem:[%s8598_s29 + $0x8] sm:$0xff]  }
 0x2c9   : > { %v1454_v1 = vpack.c.bf16 %v1422_v38, %v1422_v38  ;;  %v1266_v36 = vmul.f32 1.442695, %v1216_v19  ;;  %v1217_v34 = vsub.f32 %v8427_v42, %v1161_v44 }
 0x2ca   : > { %v1487_v7 = vunpack.c.l.bf16 %v1455_v51  ;;  %v1264_v30 = vmul.f32 1.442695, %v1215_v61  ;;  %v1456_v47 = vpack.c.bf16 %v1424_v54, %v1424_v54 }
 0x2cb   : > { %v1486_v18 = vunpack.c.l.bf16 %v1454_v1 }
 0x2cc   : > { %v1551_v2 = vmul.f32 %v8603_v22, %v1487_v7  ;;  %7173 = vpow2.f32 %v1264_v30  ;;  %v8620_v7 = vunpack.c.l.bf16 %v7062_v52 }
 0x2cd   : > { %v1550_v48 = vmul.f32 %v8606_v57, %v1486_v18 }
 0x2ce   : > { %v1583_v9 = vpack.c.bf16 %v1551_v2, %v1551_v2  ;;  %v1164_v26 = vpop.xlane.xlu1 %1163  ;;  %11751 = vst [vmem:[#allocation102_spill] sm:$0xff] %v8620_v7  ;;  %v1488_v2 = vunpack.c.l.bf16 %v1456_v47 }
 0x2cf   : > { %v1582_v15 = vpack.c.bf16 %v1550_v48, %v1550_v48  ;;  %v1218_v38 = vsub.f32 %v8443_v28, %v1164_v26  ;;  %v1305_v16 = vpop.xlane.xlu0 %1304 }
 0x2d0   : > { %v1617_v51 = vunpack.c.l.b16 %v1583_v9  ;;  %v1167_v40 = vpop.xlane.xlu2 %1166  ;;  %7175 = vrcp.f32 %v1305_v16  ;;  %v1552_v26 = vmul.f32 %v8620_v7, %v1488_v2 }
 0x2d1   : > { %v1616_v1 = vunpack.c.l.b16 %v1582_v15  ;;  %v1270_v61 = vmul.f32 1.442695, %v1218_v38  ;;  %v1219_v30 = vsub.f32 %v8448_v32, %v1167_v40  ;;  %7177 = vpow2.f32 %v1266_v36 }
 0x2d2   : > { %v8614_v6 = vpop.eup %7173  ;;  %v1268_v40 = vmul.f32 1.442695, %v1217_v34  ;;  %v8630_v15 = vunpack.c.h.bf16 %v7062_v52  ;;  %v7063_v52 = vld [vmem:[%s8598_s29 + $0x10] sm:$0xff]  }
 0x2d3   : > { %7179 = vpow2.f32 %v1270_v61  ;;  %v1272_v19 = vmul.f32 1.442695, %v1219_v30  ;;  %v1345_v28 = vsel %vm1101_vm2, %v8614_v6, 0.0  ;;  %v1618_v18 = vpack.c.b16 %v1617_v51, %v1616_v1 }
 0x2d4   : > { %1346 = vadd.xlane.f32.xlu2 %v1345_v28  ;;  %11752 = vst [vmem:[#allocation103_spill] sm:$0xff] %v8630_v15  ;;  %v1584_v61 = vpack.c.bf16 %v1552_v26, %v1552_v26 }
 0x2d5   : > { %7181 = vpow2.f32 %v1272_v19  ;;  %6727 = vmatmul.msk.bf16.vlgmr.msrb.gmra.mxu2 %vm1101_vm2, %v1618_v18 }
 0x2d6   : > { %v7176_v32 = vpop.eup %7175  ;;  %1782 = vmatpush.bf16.msrb.mxu2 %v8133_v11  ;;  %v1311_v54 = vpop.xlane.xlu1 %1310 }
 0x2d7   : > { %v1425_v44 = vmul.f32 %v7176_v32, %v8445_v43  ;;  %7183 = vrcp.f32 %v1311_v54  ;;  %v1308_v42 = vpop.xlane.xlu0 %1307  ;;  %v8625_v48 = vpop.eup %7177 }
 0x2d8   : > { %v1317_v9 = vpop.xlane.xlu2 %1316  ;;  %7185 = vrcp.f32 %v1308_v42  ;;  %v1348_v51 = vsel %vm1101_vm2, %v8625_v48, 0.0 }
 0x2d9   : > { %v8627_v36 = vpop.eup %7179  ;;  %v1457_v38 = vpack.c.bf16 %v1425_v44, %v1425_v44  ;;  %7187 = vrcp.f32 %v1317_v9  ;;  %v8646_v44 = vunpack.c.h.bf16 %v7063_v52 }
 0x2da   : > { %7189 = vpow2.f32 %v1268_v40  ;;  %v1354_v11 = vsel %vm1101_vm2, %v8627_v36, 0.0 }
 0x2db   : > { %v8634_v43 = vpop.eup %7181  ;;  %v1489_v16 = vunpack.c.l.bf16 %v1457_v38  ;;  %1355 = vadd.xlane.f32.xlu1 %v1354_v11  ;;  %11753 = vst [vmem:[#allocation104_spill] sm:$0xff] %v8646_v44  ;;  %v1641_v11 = vunpack.c.l.b16 %v1584_v61 }
 0x2dc   : > { %v1357_v47 = vsel %vm1101_vm2, %v8634_v43, 0.0  ;;  %1349 = vadd.xlane.f32.xlu2 %v1348_v51  ;;  %v8651_v51 = vunpack.c.l.bf16 %v7063_v52 }
 0x2dd   : > { %v7184_v1 = vpop.eup %7183  ;;  %v1553_v30 = vmul.f32 %v8630_v15, %v1489_v16  ;;  %1358 = vadd.xlane.f32.xlu0 %v1357_v47 }
 0x2de   : > { %v7186_v34 = vpop.eup %7185  ;;  %v1427_v19 = vmul.f32 %v7184_v1, %v8458_v20  ;;  %v1314_v28 = vpop.xlane.xlu1 %1313  ;;  %v7064_v20 = vld [vmem:[%s8598_s29 + $0x18] sm:$0xff]   ;;  %11754 = vst [vmem:[#allocation105_spill] sm:$0xff] %v8651_v51 }
 0x2df   : > { %v7188_v18 = vpop.eup %7187  ;;  %v1585_v2 = vpack.c.bf16 %v1553_v30, %v1553_v30  ;;  %v1426_v32 = vmul.f32 %v7186_v34, %v8460_v56  ;;  %7191 = vrcp.f32 %v1314_v28  ;;  %v1170_v40 = vpop.xlane.xlu0 %1169 }
 0x2e0   : > { %v8644_v54 = vpop.eup %7189  ;;  %v1459_v42 = vpack.c.bf16 %v1427_v19, %v1427_v19  ;;  %v1429_v9 = vmul.f32 %v7188_v18, %v8463_v17  ;;  %v1320_v26 = vpop.xlane.xlu2 %1319  ;;  %v1220_v38 = vsub.f32 %v8476_v13, %v1170_v40  ;;  %v8656_v18 = vunpack.c.h.bf16 %v7064_v20 }
 0x2e1   : > { %v1642_v16 = vunpack.c.l.b16 %v1585_v2  ;;  %v1458_v47 = vpack.c.bf16 %v1426_v32, %v1426_v32  ;;  %7193 = vrcp.f32 %v1320_v26  ;;  %v1351_v28 = vsel %vm1101_vm2, %v8644_v54, 0.0 }
 0x2e2   : > { %v1491_v1 = vunpack.c.l.bf16 %v1459_v42  ;;  %v1461_v56 = vpack.c.bf16 %v1429_v9, %v1429_v9  ;;  %v1274_v30 = vmul.f32 1.442695, %v1220_v38 }
 0x2e3   : > { %v1490_v34 = vunpack.c.l.bf16 %v1458_v47  ;;  %v1643_v19 = vpack.c.b16 %v1642_v16, %v1641_v11  ;;  %v8664_v16 = vunpack.c.l.bf16 %v7064_v20 }
 0x2e4   : > { %v1555_v17 = vmul.f32 %v8646_v44, %v1491_v1  ;;  %v1493_v13 = vunpack.c.l.bf16 %v1461_v56  ;;  %7195 = vpow2.f32 %v1274_v30  ;;  %1352 = vadd.xlane.f32.xlu2 %v1351_v28 }
 0x2e5   : > { %v7192_v61 = vpop.eup %7191  ;;  %v1554_v52 = vmul.f32 %v8651_v51, %v1490_v34  ;;  %6728 = vmatmul.msk.bf16.vlgmr.msrb.gmra.mxu3 %vm1101_vm2, %v1643_v19 }
 0x2e6   : > { %v1587_v2 = vpack.c.bf16 %v1555_v17, %v1555_v17  ;;  %v1428_v32 = vmul.f32 %v7192_v61, %v8473_v33  ;;  %1807 = vmatpush.bf16.msrb.mxu3 %v8155_v55  ;;  %v1173_v40 = vpop.xlane.xlu1 %1172  ;;  %v1557_v11 = vmul.f32 %v8656_v18, %v1493_v13 }
 0x2e7   : > { %v1586_v42 = vpack.c.bf16 %v1554_v52, %v1554_v52  ;;  %v1221_v9 = vsub.f32 %v8494_v35, %v1173_v40  ;;  %v1176_v26 = vpop.xlane.xlu0 %1175  ;;  %v7194_v1 = vpop.eup %7193 }
 0x2e8   : > { %v1667_v38 = vunpack.c.l.b16 %v1587_v2  ;;  %v1460_v47 = vpack.c.bf16 %v1428_v32, %v1428_v32  ;;  %v1222_v34 = vsub.f32 %v8497_v46, %v1176_v26  ;;  %v1589_v17 = vpack.c.bf16 %v1557_v11, %v1557_v11  ;;  %v1326_v26 = vpop.xlane.xlu2 %1325  ;;  %v7065_v11 = vld [vmem:[%s8598_s29 + $0x20] sm:$0xff]  }
 0x2e9   : > { %v1666_v56 = vunpack.c.l.b16 %v1586_v42  ;;  %v1276_v30 = vmul.f32 1.442695, %v1221_v9  ;;  %v1430_v20 = vmul.f32 %v7194_v1, %v8480_v5 }
 0x2ea   : > { %v8667_v28 = vpop.eup %7195  ;;  %v1492_v33 = vunpack.c.l.bf16 %v1460_v47  ;;  %v1278_v55 = vmul.f32 1.442695, %v1222_v34  ;;  %v1692_v32 = vunpack.c.l.b16 %v1589_v17  ;;  %v8696_v17 = vunpack.c.h.bf16 %v7065_v11 }
 0x2eb   : > { %7197 = vpow2.f32 %v1276_v30  ;;  %v1360_v35 = vsel %vm1101_vm2, %v8667_v28, 0.0  ;;  %v1668_v19 = vpack.c.b16 %v1667_v38, %v1666_v56  ;;  %v1462_v9 = vpack.c.bf16 %v1430_v20, %v1430_v20 }
 0x2ec   : > { %v1556_v13 = vmul.f32 %v8664_v16, %v1492_v33  ;;  %1361 = vadd.xlane.f32.xlu0 %v1360_v35  ;;  %7199 = vpow2.f32 %v1278_v55  ;;  %11756 = vst [vmem:[#allocation107_spill] sm:$0xff] %v8696_v17 }
 0x2ed   : > { %6729 = vmatmul.msk.bf16.vlgmr.msra.gmra.mxu1 %vm1101_vm2, %v1668_v19  ;;  %v1494_v56 = vunpack.c.l.bf16 %v1462_v9 }
 0x2ee   : > { %v1588_v46 = vpack.c.bf16 %v1556_v13, %v1556_v13  ;;  %1832 = vmatpush.bf16.msra.mxu1 %v8169_v63  ;;  %v1179_v61 = vpop.xlane.xlu1 %1178 }
 0x2ef   : > { %v1223_v52 = vsub.f32 %v8510_v41, %v1179_v61  ;;  %v1323_v2 = vpop.xlane.xlu0 %1322  ;;  %v8688_v41 = vunpack.c.l.bf16 %v7065_v11 }
 0x2f0   : > { %v1691_v40 = vunpack.c.l.b16 %v1588_v46  ;;  %7201 = vrcp.f32 %v1323_v2 }
 0x2f1   : > { %v8676_v42 = vpop.eup %7197  ;;  %v1280_v38 = vmul.f32 1.442695, %v1223_v52  ;;  %11755 = vst [vmem:[#allocation106_spill] sm:$0xff] %v8688_v41  ;;  %v1558_v19 = vmul.f32 %v8688_v41, %v1494_v56 }
 0x2f2   : > { %v1693_v5 = vpack.c.b16 %v1692_v32, %v1691_v40  ;;  %v1363_v47 = vsel %vm1101_vm2, %v8676_v42, 0.0  ;;  %v8681_v1 = vpop.eup %7199 }
 0x2f3   : > { %7203 = vpow2.f32 %v1280_v38  ;;  %v1366_v63 = vsel %vm1101_vm2, %v8681_v1, 0.0 }
 0x2f4   : > { %7205 = vrcp.f32 %v1326_v26  ;;  %3642 = vrot.lane.b32.xlu1 %v7893_v0, %s7713_s14  ;;  %6730 = vmatmul.msk.bf16.vlgmr.msra.gmra.mxu2 %vm1101_vm2, %v1693_v5  ;;  %v7066_v5 = vld [vmem:[%s8598_s29 + $0x28] sm:$0xff]  }
 0x2f5   : > { %1857 = vmatpush.bf16.msra.mxu2 %v8177_v3  ;;  %1364 = vadd.xlane.f32.xlu0 %v1363_v47 }
 0x2f6   : > { %v7202_v30 = vpop.eup %7201  ;;  %1367 = vadd.xlane.f32.xlu2 %v1366_v63 }
 0x2f7   : > { %v1431_v34 = vmul.f32 %v7202_v30, %v8512_v27  ;;  %v1185_v33 = vpop.xlane.xlu1 %1184  ;;  %v8698_v61 = vpop.xlane.xlu0 %1181  ;;  %v1590_v27 = vpack.c.bf16 %v1558_v19, %v1558_v19 }
 0x2f8   : > { %v1225_v55 = vsub.f32 %v8528_v59, %v1185_v33 }
 0x2f9   : > { %v8693_v35 = vpop.eup %7203  ;;  %v1463_v13 = vpack.c.bf16 %v1431_v34, %v1431_v34  ;;  %v1716_v9 = vunpack.c.l.b16 %v1590_v27 }
 0x2fa   : > { %v7206_v20 = vpop.eup %7205  ;;  %v1284_v46 = vmul.f32 1.442695, %v1225_v55  ;;  %v1369_v52 = vsel %vm1101_vm2, %v8693_v35, 0.0 }
 0x2fb   : > { %v1495_v3 = vunpack.c.l.bf16 %v1463_v13  ;;  %v1432_v59 = vmul.f32 %v7206_v20, %v8499_v25  ;;  %v8713_v25 = vunpack.c.l.bf16 %v7066_v5  ;;  %v8719_v20 = vunpack.c.h.bf16 %v7066_v5 }
 0x2fc   : > { %7207 = vpow2.f32 %v1284_v46  ;;  %3668 = vrot.lane.b32.xlu1 %v7912_v12, %s7714_s16 }
 0x2fd   : > { %v1559_v2 = vmul.f32 %v8696_v17, %v1495_v3  ;;  %v1464_v26 = vpack.c.bf16 %v1432_v59, %v1432_v59  ;;  %11757 = vst [vmem:[#allocation108_spill] sm:$0xff] %v8713_v25  ;;  %v7067_v3 = vld [vmem:[%s8598_s29 + $0x30] sm:$0xff]  }
 0x2fe   : > { %1370 = vadd.xlane.f32.xlu2 %v1369_v52  ;;  %11758 = vst [vmem:[#allocation109_spill] sm:$0xff] %v8719_v20 }
 0x2ff   : > { %v1591_v32 = vpack.c.bf16 %v1559_v2, %v1559_v2  ;;  %v1329_v40 = vpop.xlane.xlu1 %1328  ;;  %v1496_v30 = vunpack.c.l.bf16 %v1464_v26 }
 0x300   : > { %7209 = vrcp.f32 %v1329_v40 }
 0x301   : > { %v1717_v38 = vunpack.c.l.b16 %v1591_v32  ;;  %v1560_v13 = vmul.f32 %v8713_v25, %v1496_v30  ;;  %v8728_v32 = vunpack.c.h.bf16 %v7067_v3 }
 0x302   : > { %v8706_v11 = vpop.eup %7207  ;;  %v1335_v47 = vpop.xlane.xlu0 %1334 }
 0x303   : > { %7211 = vrcp.f32 %v1335_v47  ;;  %v1375_v63 = vsel %vm1101_vm2, %v8706_v11, 0.0  ;;  %v1718_v56 = vpack.c.b16 %v1717_v38, %v1716_v9  ;;  %11759 = vst [vmem:[#allocation110_spill] sm:$0xff] %v8728_v32  ;;  %v8731_v47 = vunpack.c.l.bf16 %v7067_v3 }
 0x304   : > { %3740 = vrot.lane.b32.xlu1 %v7957_v50, %s7714_s16  ;;  %1376 = vadd.xlane.f32.xlu0 %v1375_v63 }
 0x305   : > { %6731 = vmatmul.msk.bf16.vlgmr.msra.gmra.mxu3 %vm1101_vm2, %v1718_v56  ;;  %11760 = vst [vmem:[#allocation111_spill] sm:$0xff] %v8731_v47 }
 0x306   : > { %v7210_v34 = vpop.eup %7209  ;;  %1882 = vmatpush.bf16.msra.mxu3 %v8209_v60  ;;  %v1592_v60 = vpack.c.bf16 %v1560_v13, %v1560_v13 }
 0x307   : > { %v1433_v33 = vmul.f32 %v7210_v34, %v8536_v53  ;;  %v1332_v55 = vpop.xlane.xlu1 %1331 }
 0x308   : > { %7213 = vrcp.f32 %v1332_v55 }
 0x309   : > { %v7212_v19 = vpop.eup %7211  ;;  %v1465_v46 = vpack.c.bf16 %v1433_v33, %v1433_v33 }
 0x30a   : > { %v1435_v52 = vmul.f32 %v7212_v19, %v8540_v21  ;;  %v8723_v27 = vpop.xlane.xlu0 %1190  ;;  %v1741_v21 = vunpack.c.l.b16 %v1592_v60 }
 0x30b   : > { %v1497_v59 = vunpack.c.l.bf16 %v1465_v46 }
 0x30c   : > { %v1467_v2 = vpack.c.bf16 %v1435_v52, %v1435_v52  ;;  %3714 = vrot.lane.b32.xlu1 %v7940_v37, %s7713_s14 }
 0x30d   : > { %v1561_v53 = vmul.f32 %v8719_v20, %v1497_v59 }
 0x30e   : > { %v7214_v40 = vpop.eup %7213  ;;  %v1499_v9 = vunpack.c.l.bf16 %v1467_v2 }
 0x30f   : > { %v1593_v26 = vpack.c.bf16 %v1561_v53, %v1561_v53  ;;  %v1434_v38 = vmul.f32 %v7214_v40, %v8547_v10  ;;  %v1338_v5 = vpop.xlane.xlu2 %1337  ;;  %v7068_v40 = vld [vmem:[%s8598_s29 + $0x38] sm:$0xff]  }
 0x310   : > { %7215 = vrcp.f32 %v1338_v5  ;;  %v1563_v56 = vmul.f32 %v8728_v32, %v1499_v9  ;;  %v8757_v5 = vunpack.c.h.bf16 %v7068_v40 }
 0x311   : > { %v1742_v63 = vunpack.c.l.b16 %v1593_v26  ;;  %v1466_v30 = vpack.c.bf16 %v1434_v38, %v1434_v38 }
 0x312   : > { %v8734_v34 = vpop.xlane.xlu0 %1193  ;;  %v1595_v19 = vpack.c.bf16 %v1563_v56, %v1563_v56  ;;  %11762 = vst [vmem:[#allocation113_spill] sm:$0xff] %v8757_v5 }
 0x313   : > { %v1498_v33 = vunpack.c.l.bf16 %v1466_v30  ;;  %v1743_v55 = vpack.c.b16 %v1742_v63, %v1741_v21 }
 0x314   : > { %3786 = vrot.lane.b32.xlu1 %v7999_v14, %s7713_s14  ;;  %v1767_v52 = vunpack.c.l.b16 %v1595_v19 }
 0x315   : > { %v1562_v10 = vmul.f32 %v8731_v47, %v1498_v33  ;;  %6732 = vmatmul.msk.bf16.vlgmr.msrb.gmra.mxu1 %vm1101_vm2, %v1743_v55 }
 0x316   : > { %v7216_v13 = vpop.eup %7215  ;;  %3644 = vrot.lane.b32.xlu2 %v7893_v0, %s7714_s16  ;;  %1907 = vmatpush.bf16.msrb.mxu1 %v8300_v23  ;;  %v8751_v23 = vunpack.c.l.bf16 %v7068_v40 }
 0x317   : > { %v1594_v46 = vpack.c.bf16 %v1562_v10, %v1562_v10  ;;  %v1436_v3 = vmul.f32 %v7216_v13, %v8566_v29  ;;  %v1188_v13 = vpop.xlane.xlu1 %1187 }
 0x318   : > { %3692 = vrot.lane.b32.xlu0 %v7929_v24, %s7714_s16  ;;  %11761 = vst [vmem:[#allocation112_spill] sm:$0xff] %v8751_v23 }
 0x319   : > { %v1766_v59 = vunpack.c.l.b16 %v1594_v46  ;;  %v1468_v53 = vpack.c.bf16 %v1436_v3, %v1436_v3  ;;  %v1226_v46 = vsub.f32 %v8563_v58, %v1188_v13  ;;  %v11765_v58 = vld [vmem:[#allocation94_spill] sm:$0xff] }
 0x31a   : > { %v1341_v2 = vpop.xlane.xlu0 %1340 }
 0x31b   : > { %7217 = vrcp.f32 %v1341_v2  ;;  %v1768_v60 = vpack.c.b16 %v1767_v52, %v1766_v59  ;;  %v1500_v29 = vunpack.c.l.bf16 %v1468_v53  ;;  %v1286_v3 = vmul.f32 1.442695, %v1226_v46  ;;  %v11764_v53 = vld [vmem:[#allocation100_spill] sm:$0xff] }
 0x31c   : > { %3762 = vrot.lane.b32.xlu1 %v7974_v62, %s7713_s14 }
 0x31d   : > { %6733 = vmatmul.msk.bf16.vlgmr.msrb.gmra.mxu2 %vm1101_vm2, %v1768_v60  ;;  %v1564_v38 = vmul.f32 %v8751_v23, %v1500_v29  ;;  %v1227_v29 = vsub.f32 %v11765_v58, %v8723_v27 }
 0x31e   : > { %1932 = vmatpush.bf16.msrb.mxu2 %v8316_v8 }
 0x31f   : > { %v1596_v56 = vpack.c.bf16 %v1564_v38, %v1564_v38 }
 0x320   : > { %3666 = vrot.lane.b32.xlu0 %v7912_v12, %s7713_s14 }
 0x321   : > { %v7218_v9 = vpop.eup %7217  ;;  %v1791_v33 = vunpack.c.l.b16 %v1596_v56  ;;  %v1288_v56 = vmul.f32 1.442695, %v1227_v29 }
 0x322   : > { %v1437_v26 = vmul.f32 %v7218_v9, %v8583_v39  ;;  %v1224_v39 = vsub.f32 %v8525_v45, %v8698_v61  ;;  %v1344_v52 = vpop.xlane.xlu0 %1343  ;;  %v8784_v9 = vpop.xlane.xlu1 %1196 }
 0x324   : > { %v1469_v21 = vpack.c.bf16 %v1437_v26, %v1437_v26  ;;  %3836 = vrot.lane.b32.xlu1 %v8042_v49, %s7714_s16  ;;  %v1282_v10 = vmul.f32 1.442695, %v1224_v39 }
 0x326   : > { %v1501_v63 = vunpack.c.l.bf16 %v1469_v21  ;;  %7219 = vpow2.f32 %v1282_v10 }
 0x327   : > { %7221 = vrcp.f32 %v1344_v52 }
 0x328   : > { %v1565_v8 = vmul.f32 %v8757_v5, %v1501_v63  ;;  %3738 = vrot.lane.b32.xlu0 %v7957_v50, %s7713_s14  ;;  %7223 = vpow2.f32 %v1286_v3 }
 0x32a   : > { %v1597_v30 = vpack.c.bf16 %v1565_v8, %v1565_v8  ;;  %v7069_v8 = vld [vmem:[%s8598_s29 + $0x40] sm:$0xff]  }
 0x32b   : > { %v8793_v13 = vunpack.c.h.bf16 %v7069_v8 }
 0x32c   : > { %v1792_v55 = vunpack.c.l.b16 %v1597_v30  ;;  %3812 = vrot.lane.b32.xlu1 %v8020_v31, %s7714_s16  ;;  %v8773_v59 = vpop.eup %7219  ;;  %v8789_v30 = vunpack.c.l.bf16 %v7069_v8 }
 0x32d   : > { %v1372_v45 = vsel %vm1101_vm2, %v8773_v59, 0.0  ;;  %v7222_v61 = vpop.eup %7221  ;;  %11767 = vst [vmem:[#allocation100_spill] sm:$0xff] %v8793_v13 }
 0x32e   : > { %v1793_v19 = vpack.c.b16 %v1792_v55, %v1791_v33  ;;  %v8777_v2 = vpop.eup %7223  ;;  %v1438_v40 = vmul.f32 %v7222_v61, %v11764_v53 }
 0x32f   : > { %v1378_v26 = vsel %vm1101_vm2, %v8777_v2, 0.0 }
 0x330   : > { %6734 = vmatmul.msk.bf16.vlgmr.msrb.gmra.mxu3 %vm1101_vm2, %v1793_v19  ;;  %3764 = vrot.lane.b32.xlu0 %v7974_v62, %s7714_s16  ;;  %v1470_v63 = vpack.c.bf16 %v1438_v40, %v1438_v40 }
 0x331   : > { %1957 = vmatpush.bf16.msrb.mxu3 %v8259_v4  ;;  %v11763_v4 = vld [vmem:[#allocation97_spill] sm:$0xff] }
 0x332   : > { %v1228_v60 = vsub.f32 %v11763_v4, %v8734_v34  ;;  %11766 = vst [vmem:[#allocation97_spill] sm:$0xff] %v8789_v30  ;;  %v1502_v34 = vunpack.c.l.bf16 %v1470_v63 }
 0x334   : > { %v1290_v21 = vmul.f32 1.442695, %v1228_v60  ;;  %v1566_v10 = vmul.f32 %v8789_v30, %v1502_v34 }
 0x336   : > { %v1598_v4 = vpack.c.bf16 %v1566_v10, %v1566_v10 }
 0x338   : > { %v1816_v34 = vunpack.c.l.b16 %v1598_v4 }
 0x33f   : > { %1373 = vadd.xlane.f32.xlu2 %v1372_v45 }
 0x347   : > { %1379 = vadd.xlane.f32.xlu2 %v1378_v26  ;;  %v1347_v38 = vpop.xlane.xlu2 %1346 }
 0x348   : > { %7225 = vrcp.f32 %v1347_v38 }
 0x349   : > { %7227 = vpow2.f32 %v1290_v21 }
 0x34a   : > { %7229 = vpow2.f32 %v1288_v56 }
 0x34e   : > { %v7226_v33 = vpop.eup %7225  ;;  %v1356_v55 = vpop.xlane.xlu1 %1355 }
 0x34f   : > { %v1439_v27 = vmul.f32 %v7226_v33, %v8614_v6  ;;  %7231 = vrcp.f32 %v1356_v55  ;;  %v1350_v39 = vpop.xlane.xlu2 %1349  ;;  %v8795_v3 = vpop.eup %7227  ;;  %v7071_v6 = vld [vmem:[%s8598_s29 + $0x50] sm:$0xff]  }
 0x350   : > { %7233 = vrcp.f32 %v1350_v39  ;;  %v1359_v19 = vpop.xlane.xlu0 %1358  ;;  %v8797_v45 = vpop.eup %7229  ;;  %v1384_v53 = vsel %vm1101_vm2, %v8795_v3, 0.0  ;;  %v8805_v63 = vunpack.c.l.bf16 %v7071_v6 }
 0x351   : > { %v1471_v46 = vpack.c.bf16 %v1439_v27, %v1439_v27  ;;  %7235 = vrcp.f32 %v1359_v19  ;;  %v1381_v27 = vsel %vm1101_vm2, %v8797_v45, 0.0  ;;  %v8811_v19 = vunpack.c.h.bf16 %v7071_v6 }
 0x352   : > { %11768 = vst [vmem:[#allocation94_spill] sm:$0xff] %v8805_v63 }
 0x353   : > { %v1503_v52 = vunpack.c.l.bf16 %v1471_v46  ;;  %11769 = vst [vmem:[#allocation114_spill] sm:$0xff] %v8811_v19 }
 0x355   : > { %v7232_v61 = vpop.eup %7231  ;;  %v1567_v60 = vmul.f32 %v8793_v13, %v1503_v52 }
 0x356   : > { %v7234_v40 = vpop.eup %7233  ;;  %v1442_v58 = vmul.f32 %v7232_v61, %v8627_v36  ;;  %1385 = vadd.xlane.f32.xlu1 %v1384_v53  ;;  %v7070_v36 = vld [vmem:[%s8598_s29 + $0x48] sm:$0xff]  }
 0x357   : > { %v7236_v29 = vpop.eup %7235  ;;  %v1599_v26 = vpack.c.bf16 %v1567_v60, %v1567_v60  ;;  %v1440_v38 = vmul.f32 %v7234_v40, %v8625_v48  ;;  %v1353_v21 = vpop.xlane.xlu2 %1352  ;;  %v8814_v61 = vunpack.c.l.bf16 %v7070_v36  ;;  %v11771_v40 = vld [vmem:[#allocation75_spill] sm:$0xff] }
 0x358   : > { %v1474_v56 = vpack.c.bf16 %v1442_v58, %v1442_v58  ;;  %v1443_v8 = vmul.f32 %v7236_v29, %v8634_v43  ;;  %7237 = vrcp.f32 %v1353_v21  ;;  %v11772_v58 = vld [vmem:[#allocation6_spill] sm:$0xff] }
 0x359   : > { %v1817_v33 = vunpack.c.l.b16 %v1599_v26  ;;  %v1472_v55 = vpack.c.bf16 %v1440_v38, %v1440_v38  ;;  %11770 = vst [vmem:[#allocation115_spill] sm:$0xff] %v8814_v61 }
 0x35a   : > { %v1506_v39 = vunpack.c.l.bf16 %v1474_v56  ;;  %v1475_v10 = vpack.c.bf16 %v1443_v8, %v1443_v8  ;;  %1382 = vadd.xlane.f32.xlu0 %v1381_v27  ;;  %v8823_v56 = vunpack.c.h.bf16 %v7070_v36 }
 0x35b   : > { %v1818_v48 = vpack.c.b16 %v1817_v33, %v1816_v34  ;;  %v1504_v43 = vunpack.c.l.bf16 %v1472_v55 }
 0x35c   : > { %v1570_v46 = vmul.f32 %v8805_v63, %v1506_v39  ;;  %v1507_v52 = vunpack.c.l.bf16 %v1475_v10  ;;  %11773 = vst [vmem:[#allocation75_spill] sm:$0xff] %v8823_v56  ;;  %v11774_v10 = vld [vmem:[#allocation13_spill] sm:$0xff] }
 0x35d   : > { %6735 = vmatmul.msk.bf16.vlgmr.msra.gmra.mxu1 %vm1101_vm2, %v1818_v48  ;;  %v1568_v21 = vmul.f32 %v8814_v61, %v1504_v43  ;;  %v2039_v48 = vsel %vm675_vm1, %v11774_v10, 0  ;;  %v7073_v10 = vld [vmem:[%s8598_s29 + $0x60] sm:$0xff]  }
 0x35e   : > { %v7238_v4 = vpop.eup %7237  ;;  %v1602_v60 = vpack.c.bf16 %v1570_v46, %v1570_v46  ;;  %v1571_v53 = vmul.f32 %v8811_v19, %v1507_v52  ;;  %1982 = vmatpush.bf16.msra.mxu1 %v11771_v40  ;;  %v7072_v40 = vld [vmem:[%s8598_s29 + $0x58] sm:$0xff]  }
 0x35f   : > { %v1441_v6 = vmul.f32 %v7238_v4, %v8644_v54  ;;  %3620 = vrot.lane.b32.xlu2 %v11772_v58, %s7714_s16  ;;  %v1362_v29 = vpop.xlane.xlu0 %1361  ;;  %v1600_v27 = vpack.c.bf16 %v1568_v21, %v1568_v21 }
 0x360   : > { %v1866_v26 = vunpack.c.l.b16 %v1602_v60  ;;  %v1603_v38 = vpack.c.bf16 %v1571_v53, %v1571_v53  ;;  %7239 = vrcp.f32 %v1362_v29  ;;  %v8834_v29 = vunpack.c.l.bf16 %v7072_v40 }
 0x361   : > { %v1473_v8 = vpack.c.bf16 %v1441_v6, %v1441_v6  ;;  %v1841_v43 = vunpack.c.l.b16 %v1600_v27  ;;  %v8846_v27 = vunpack.c.h.bf16 %v7072_v40 }
 0x362   : > { %v1867_v34 = vunpack.c.l.b16 %v1603_v38  ;;  %11775 = vst [vmem:[#allocation13_spill] sm:$0xff] %v8834_v29 }
 0x363   : > { %v1505_v33 = vunpack.c.l.bf16 %v1473_v8 }
 0x364   : > { %v1868_v55 = vpack.c.b16 %v1867_v34, %v1866_v26 }
 0x365   : > { %v1569_v39 = vmul.f32 %v8823_v56, %v1505_v33 }
 0x366   : > { %v7240_v54 = vpop.eup %7239  ;;  %6737 = vmatmul.msk.bf16.vlgmr.msra.gmra.mxu3 %vm1101_vm2, %v1868_v55 }
 0x367   : > { %v1601_v46 = vpack.c.bf16 %v1569_v39, %v1569_v39  ;;  %v1444_v52 = vmul.f32 %v7240_v54, %v8667_v28  ;;  %3618 = vrot.lane.b32.xlu2 %v11772_v58, %s7713_s14  ;;  %2048 = vmatpush.bf16.xpose.msra.mxu3 %v2039_v48  ;;  %v11776_v28 = vld [vmem:[#allocation78_spill] sm:$0xff] }
 0x368   : > { %v1365_v36 = vpop.xlane.xlu0 %1364  ;;  %11777 = vst [vmem:[#allocation78_spill] sm:$0xff] %v8846_v27 }
 0x369   : > { %v1842_v4 = vunpack.c.l.b16 %v1601_v46  ;;  %v1368_v60 = vpop.xlane.xlu2 %1367  ;;  %7241 = vrcp.f32 %v1365_v36  ;;  %v1476_v53 = vpack.c.bf16 %v1444_v52, %v1444_v52  ;;  %v11778_v36 = vld [vmem:[#allocation26_spill] sm:$0xff] }
 0x36a   : > { %7243 = vrcp.f32 %v1368_v60 }
 0x36b   : > { %v1843_v6 = vpack.c.b16 %v1842_v4, %v1841_v43  ;;  %v1508_v26 = vunpack.c.l.bf16 %v1476_v53  ;;  %v8852_v43 = vunpack.c.l.bf16 %v7073_v10 }
 0x36d   : > { %6736 = vmatmul.msk.bf16.vlgmr.msra.gmra.mxu2 %vm1101_vm2, %v1843_v6  ;;  %v1572_v55 = vmul.f32 %v8834_v29, %v1508_v26  ;;  %11779 = vst [vmem:[#allocation116_spill] sm:$0xff] %v8852_v43  ;;  %v8860_v26 = vunpack.c.h.bf16 %v7073_v10 }
 0x36e   : > { %2007 = vmatpush.bf16.msra.mxu2 %v11776_v28  ;;  %3810 = vrot.lane.b32.xlu0 %v8020_v31, %s7713_s14 }
 0x36f   : > { %v7242_v38 = vpop.eup %7241  ;;  %3690 = vrot.lane.b32.xlu2 %v7929_v24, %s7713_s14  ;;  %3834 = vrot.lane.b32.xlu1 %v8042_v49, %s7713_s14  ;;  %v1604_v46 = vpack.c.bf16 %v1572_v55, %v1572_v55  ;;  %11780 = vst [vmem:[#allocation117_spill] sm:$0xff] %v8860_v26 }
 0x370   : > { %v7244_v21 = vpop.eup %7243  ;;  %v1445_v8 = vmul.f32 %v7242_v38, %v8676_v42 }
 0x371   : > { %v1446_v34 = vmul.f32 %v7244_v21, %v8681_v1  ;;  %v1371_v33 = vpop.xlane.xlu2 %1370  ;;  %v1891_v53 = vunpack.c.l.b16 %v1604_v46  ;;  %v11783_v46 = vld [vmem:[#allocation17_spill] sm:$0xff] }
 0x372   : > { %v1477_v39 = vpack.c.bf16 %v1445_v8, %v1445_v8  ;;  %7245 = vrcp.f32 %v1371_v33  ;;  %v11781_v8 = vld [vmem:[#allocation23_spill] sm:$0xff] }
 0x373   : > { %v1478_v54 = vpack.c.bf16 %v1446_v34, %v1446_v34  ;;  %v2063_v34 = vsel %vm675_vm1, %v11781_v8, 0 }
 0x374   : > { %v1509_v48 = vunpack.c.l.bf16 %v1477_v39 }
 0x375   : > { %v1510_v42 = vunpack.c.l.bf16 %v1478_v54 }
 0x376   : > { %v1573_v52 = vmul.f32 %v8846_v27, %v1509_v48  ;;  %3860 = vrot.lane.b32.xlu0 %v11778_v36, %s7714_s16 }
 0x377   : > { %3716 = vrot.lane.b32.xlu2 %v7940_v37, %s7714_s16  ;;  %3858 = vrot.lane.b32.xlu1 %v11778_v36, %s7713_s14  ;;  %v1574_v6 = vmul.f32 %v8852_v43, %v1510_v42  ;;  %v11784_v42 = vld [vmem:[#allocation30_spill] sm:$0xff] }
 0x378   : > { %v7246_v1 = vpop.eup %7245  ;;  %v1605_v4 = vpack.c.bf16 %v1573_v52, %v1573_v52  ;;  %v2087_v52 = vsel %vm675_vm1, %v11783_v46, 0 }
 0x379   : > { %v1447_v60 = vmul.f32 %v7246_v1, %v8693_v35  ;;  %v1606_v33 = vpack.c.bf16 %v1574_v6, %v1574_v6  ;;  %v11782_v35 = vld [vmem:[#allocation38_spill] sm:$0xff]  ;;  %v11785_v1 = vld [vmem:[#allocation35_spill] sm:$0xff]  ;;  %v8903_v8 = vpop.permute.xlu2 %3644 }
 0x37a   : > { %v1892_v40 = vunpack.c.l.b16 %v1605_v4  ;;  %v11786_v4 = vld [vmem:[#allocation99_spill] sm:$0xff] }
 0x37b   : > { %v1479_v28 = vpack.c.bf16 %v1447_v60, %v1447_v60  ;;  %v1916_v54 = vunpack.c.l.b16 %v1606_v33  ;;  %v1229_v60 = vsub.f32 %v11786_v4, %v8784_v9  ;;  %11790 = vst [vmem:[#allocation99_spill] sm:$0xff] %v8903_v8 }
 0x37c   : > { %v1893_v38 = vpack.c.b16 %v1892_v40, %v1891_v53  ;;  %v11787_v40 = vld [vmem:[#allocation5_spill] sm:$0xff] }
 0x37d   : > { %v1511_v21 = vunpack.c.l.bf16 %v1479_v28  ;;  %v1292_v53 = vmul.f32 1.442695, %v1229_v60  ;;  %v1377_v28 = vpop.xlane.xlu0 %1376 }
 0x37e   : > { %6738 = vmatmul.msk.bf16.vlgmr.msrb.gmra.mxu1 %vm1101_vm2, %v1893_v38  ;;  %v8895_v38 = vpop.permute.xlu1 %3642 }
 0x37f   : > { %v1575_v55 = vmul.f32 %v8860_v26, %v1511_v21  ;;  %3788 = vrot.lane.b32.xlu2 %v7999_v14, %s7714_s16  ;;  %2072 = vmatpush.bf16.xpose.msrb.mxu1 %v2063_v34  ;;  %7247 = vpow2.f32 %v1292_v53  ;;  %11788 = vst [vmem:[#allocation23_spill] sm:$0xff] %v8895_v38 }
 0x380   : > { %3932 = vrot.lane.b32.xlu1 %v11782_v35, %s7714_s16  ;;  %7249 = vrcp.f32 %v1377_v28 }
 0x381   : > { %v1607_v39 = vpack.c.bf16 %v1575_v55, %v1575_v55 }
 0x383   : > { %v1917_v10 = vunpack.c.l.b16 %v1607_v39 }
 0x385   : > { %v1918_v48 = vpack.c.b16 %v1917_v10, %v1916_v54  ;;  %v8887_v6 = vpop.eup %7247 }
 0x386   : > { %v1387_v9 = vsel %vm1101_vm2, %v8887_v6, 0.0  ;;  %v7250_v34 = vpop.eup %7249  ;;  %v8905_v33 = vpop.permute.xlu1 %3668 }
 0x387   : > { %3884 = vrot.lane.b32.xlu2 %v11784_v42, %s7714_s16  ;;  %6739 = vmatmul.msk.bf16.vlgmr.msrb.gmra.mxu2 %vm1101_vm2, %v1918_v48  ;;  %11791 = vst [vmem:[#allocation118_spill] sm:$0xff] %v8905_v33  ;;  %v1449_v55 = vmul.f32 %v7250_v34, %v8706_v11  ;;  %v7074_v48 = vld [vmem:[%s8598_s29 + $0x68] sm:$0xff]  }
 0x388   : > { %2096 = vmatpush.bf16.xpose.msrb.mxu2 %v2087_v52  ;;  %3908 = vrot.lane.b32.xlu1 %v11785_v1, %s7714_s16  ;;  %v8919_v46 = vunpack.c.h.bf16 %v7074_v48  ;;  %v8927_v34 = vunpack.c.l.bf16 %v7074_v48 }
 0x389   : > { %v1481_v10 = vpack.c.bf16 %v1449_v55, %v1449_v55 }
 0x38a   : > { %v8897_v21 = vpop.permute.xlu0 %3692  ;;  %11793 = vst [vmem:[#allocation120_spill] sm:$0xff] %v8919_v46 }
 0x38b   : > { %11789 = vst [vmem:[#allocation17_spill] sm:$0xff] %v8897_v21  ;;  %v1513_v52 = vunpack.c.l.bf16 %v1481_v10 }
 0x38c   : > { %11796 = vst [vmem:[#allocation123_spill] sm:$0xff] %v8927_v34 }
 0x38e   : > { %v8921_v11 = vpop.permute.xlu1 %3740 }
 0x38f   : > { %3930 = vrot.lane.b32.xlu2 %v11782_v35, %s7713_s14  ;;  %11794 = vst [vmem:[#allocation121_spill] sm:$0xff] %v8921_v11 }
 0x390   : > { %2925 = vrot.lane.b32.xlu1 %v11772_v58, %s7715_s17 }
 0x392   : > { %v8912_v39 = vpop.permute.xlu0 %3666 }
 0x393   : > { %11792 = vst [vmem:[#allocation119_spill] sm:$0xff] %v8912_v39  ;;  %v7076_v39 = vld [vmem:[%s8598_s29 + $0x78] sm:$0xff]  }
 0x397   : > { %3906 = vrot.lane.b32.xlu2 %v11785_v1, %s7713_s14 }
 0x398   : > { %4463 = vrot.lane.b32.xlu1 %v11787_v40, %s7716_s15 }
 0x39a   : > { %v8924_v28 = vpop.permute.xlu0 %3738 }
 0x39b   : > { %11795 = vst [vmem:[#allocation122_spill] sm:$0xff] %v8924_v28 }
 0x39f   : > { %3025 = vrot.lane.b32.xlu2 %v7940_v37, %s7715_s17 }
 0x3a0   : > { %4488 = vrot.lane.b32.xlu1 %v11772_v58, %s7716_s15  ;;  %1388 = vadd.xlane.f32.xlu0 %v1387_v9  ;;  %v1577_v9 = vmul.f32 %v8919_v46, %v1513_v52 }
 0x3a2   : > { %v1609_v21 = vpack.c.bf16 %v1577_v9, %v1577_v9  ;;  %v8938_v48 = vpop.permute.xlu0 %3764 }
 0x3a3   : > { %11800 = vst [vmem:[#allocation126_spill] sm:$0xff] %v8938_v48  ;;  %v9033_v48 = vpop.f32.mrf.mxu1 }
 0x3a7   : > { %3125 = vrot.lane.b32.xlu2 %v8020_v31, %s7715_s17 }
 0x3a8   : > { %4538 = vrot.lane.b32.xlu1 %v7912_v12, %s7716_s15  ;;  %v11846_v12 = vld [vmem:[#allocation54_spill] sm:$0xff] }
 0x3af   : > { %2900 = vrot.lane.b32.xlu2 %v11787_v40, %s7715_s17 }
 0x3b0   : > { %4663 = vrot.lane.b32.xlu1 %v7999_v14, %s7716_s15 }
 0x3b2   : > { %v1374_v54 = vpop.xlane.xlu2 %1373 }
 0x3b3   : > { %7251 = vrcp.f32 %v1374_v54  ;;  %v11797_v54 = vld [vmem:[#allocation40_spill] sm:$0xff] }
 0x3b4   : > { %3882 = vrot.lane.b32.xlu0 %v11784_v42, %s7713_s14 }
 0x3b7   : > { %4613 = vrot.lane.b32.xlu2 %v7957_v50, %s7716_s15  ;;  %v11813_v50 = vld [vmem:[#allocation25_spill] sm:$0xff] }
 0x3b9   : > { %v7252_v4 = vpop.eup %7251 }
 0x3ba   : > { %v1448_v60 = vmul.f32 %v7252_v4, %v8773_v59  ;;  %v1380_v53 = vpop.xlane.xlu2 %1379  ;;  %v8934_v59 = vpop.permute.xlu1 %3714  ;;  %v1942_v4 = vunpack.c.l.b16 %v1609_v21 }
 0x3bb   : > { %7253 = vrcp.f32 %v1380_v53  ;;  %11799 = vst [vmem:[#allocation125_spill] sm:$0xff] %v8934_v59 }
 0x3bc   : > { %v1480_v55 = vpack.c.bf16 %v1448_v60, %v1448_v60  ;;  %3956 = vrot.lane.b32.xlu0 %v11797_v54, %s7714_s16 }
 0x3be   : > { %v1512_v38 = vunpack.c.l.bf16 %v1480_v55  ;;  %v11801_v55 = vld [vmem:[#allocation21_spill] sm:$0xff] }
 0x3bf   : > { %v2111_v9 = vsel %vm675_vm1, %v11801_v55, 0 }
 0x3c0   : > { %v1576_v10 = vmul.f32 %v8927_v34, %v1512_v38 }
 0x3c1   : > { %v7254_v60 = vpop.eup %7253 }
 0x3c2   : > { %v1608_v26 = vpack.c.bf16 %v1576_v10, %v1576_v10  ;;  %v8932_v11 = vpop.permute.xlu2 %3620  ;;  %v1450_v53 = vmul.f32 %v7254_v60, %v8777_v2 }
 0x3c3   : > { %11798 = vst [vmem:[#allocation124_spill] sm:$0xff] %v8932_v11 }
 0x3c4   : > { %v1941_v28 = vunpack.c.l.b16 %v1608_v26  ;;  %3954 = vrot.lane.b32.xlu0 %v11797_v54, %s7713_s14  ;;  %v8948_v26 = vpop.permute.xlu1 %3786  ;;  %v1482_v10 = vpack.c.bf16 %v1450_v53, %v1450_v53  ;;  %v11808_v53 = vld [vmem:[#allocation39_spill] sm:$0xff] }
 0x3c5   : > { %11803 = vst [vmem:[#allocation127_spill] sm:$0xff] %v8948_v26  ;;  %v2183_v13 = vsel %vm675_vm1, %v11808_v53, 0 }
 0x3c6   : > { %v1943_v52 = vpack.c.b16 %v1942_v4, %v1941_v28  ;;  %v7075_v28 = vld [vmem:[%s8598_s29 + $0x70] sm:$0xff]   ;;  %v1514_v55 = vunpack.c.l.bf16 %v1482_v10  ;;  %s6677_s29 = sshll.u32 %s308_s23, 8 }
 0x3c7   : > { %v8953_v43 = vunpack.c.l.bf16 %v7075_v28  ;;  %v8961_v26 = vunpack.c.h.bf16 %v7075_v28 }
 0x3c8   : > { %6740 = vmatmul.msk.bf16.vlgmr.msrb.gmra.mxu3 %vm1101_vm2, %v1943_v52 }
 0x3c9   : > { %2120 = vmatpush.bf16.xpose.msrb.mxu3 %v2111_v9  ;;  %11805 = vst [vmem:[#allocation129_spill] sm:$0xff] %v8953_v43  ;;  %v1578_v9 = vmul.f32 %v8953_v43, %v1514_v55 }
 0x3ca   : > { %v8943_v38 = vpop.permute.xlu2 %3618  ;;  %11807 = vst [vmem:[#allocation131_spill] sm:$0xff] %v8961_v26 }
 0x3cb   : > { %11802 = vst [vmem:[#allocation21_spill] sm:$0xff] %v8943_v38  ;;  %v1610_v59 = vpack.c.bf16 %v1578_v9, %v1578_v9  ;;  %v11887_v38 = vld [vmem:[#allocation64_spill] sm:$0xff] }
 0x3cc   : > { %3225 = vrot.lane.b32.xlu0 %v11785_v1, %s7715_s17  ;;  %v8958_v60 = vpop.permute.xlu1 %3762 }
 0x3cd   : > { %v1383_v21 = vpop.xlane.xlu0 %1382  ;;  %11806 = vst [vmem:[#allocation130_spill] sm:$0xff] %v8958_v60  ;;  %v1966_v28 = vunpack.c.l.b16 %v1610_v59 }
 0x3ce   : > { %7255 = vrcp.f32 %v1383_v21 }
 0x3d2   : > { %v8951_v4 = vpop.permute.xlu2 %3690 }
 0x3d3   : > { %11804 = vst [vmem:[#allocation128_spill] sm:$0xff] %v8951_v4  ;;  %v11809_v4 = vld [vmem:[#allocation15_spill] sm:$0xff] }
 0x3d4   : > { %v7256_v52 = vpop.eup %7255  ;;  %4513 = vrot.lane.b32.xlu0 %v7893_v0, %s7716_s15 }
 0x3d5   : > { %v1451_v2 = vmul.f32 %v7256_v52, %v8797_v45 }
 0x3d7   : > { %v1483_v21 = vpack.c.bf16 %v1451_v2, %v1451_v2  ;;  %v8972_v2 = vpop.permute.xlu1 %3836 }
 0x3d8   : > { %6743 = vmatmul.msk.bf16.vlgmr.msra.gmra.mxu3 %vm675_vm1, %v11809_v4  ;;  %11811 = vst [vmem:[#allocation15_spill] sm:$0xff] %v8972_v2  ;;  %v2135_v4 = vsel %vm675_vm1, %v11813_v50, 0  ;;  %v11819_v50 = vld [vmem:[#allocation34_spill] sm:$0xff] }
 0x3d9   : > { %v1515_v10 = vunpack.c.l.bf16 %v1483_v21  ;;  %2192 = vmatpush.bf16.xpose.msra.mxu3 %v2183_v13  ;;  %v11814_v13 = vld [vmem:[#allocation47_spill] sm:$0xff]  ;;  %v11815_v21 = vld [vmem:[#allocation32_spill] sm:$0xff] }
 0x3da   : > { %v8967_v30 = vpop.permute.xlu2 %3716  ;;  %v2255_v9 = vsel %vm675_vm1, %v11814_v13, 0  ;;  %v11822_v13 = vld [vmem:[#allocation41_spill] sm:$0xff] }
 0x3db   : > { %11810 = vst [vmem:[#allocation39_spill] sm:$0xff] %v8967_v30  ;;  %v1579_v45 = vmul.f32 %v8961_v26, %v1515_v10 }
 0x3dc   : > { %4563 = vrot.lane.b32.xlu0 %v7929_v24, %s7716_s15 }
 0x3dd   : > { %v1611_v55 = vpack.c.bf16 %v1579_v45, %v1579_v45 }
 0x3df   : > { %v1967_v52 = vunpack.c.l.b16 %v1611_v55  ;;  %v8987_v10 = vpop.permute.xlu1 %3812 }
 0x3e0   : > { %11817 = vst [vmem:[#allocation47_spill] sm:$0xff] %v8987_v10  ;;  %v11835_v10 = vld [vmem:[#allocation69_spill] sm:$0xff] }
 0x3e1   : > { %v1968_v60 = vpack.c.b16 %v1967_v52, %v1966_v28  ;;  %v11820_v28 = vld [vmem:[#allocation22_spill] sm:$0xff]  ;;  %v11821_v52 = vld [vmem:[#allocation55_spill] sm:$0xff] }
 0x3e2   : > { %v8974_v53 = vpop.permute.xlu2 %3788 }
 0x3e3   : > { %11812 = vst [vmem:[#allocation132_spill] sm:$0xff] %v8974_v53  ;;  %6741 = vmatmul.msk.bf16.vlgmr.msra.gmra.mxu1 %vm1101_vm2, %v1968_v60  ;;  %v2207_v60 = vsel %vm675_vm1, %v11819_v50, 0  ;;  %v11826_v50 = vld [vmem:[#allocation61_spill] sm:$0xff]  ;;  %v9007_v53 = vpop.f32.mrf.mxu3 }
 0x3e4   : > { %2144 = vmatpush.bf16.xpose.msra.mxu1 %v2135_v4  ;;  %4588 = vrot.lane.b32.xlu0 %v7940_v37, %s7716_s15  ;;  %v2327_v4 = vsel %vm675_vm1, %v11821_v52, 0  ;;  %v2279_v2 = vsel %vm675_vm1, %v11826_v50, 0  ;;  %11827 = vst [vmem:[#allocation41_spill] sm:$0xff] %v9007_v53  ;;  %v11830_v52 = vld [vmem:[#allocation80_spill] sm:$0xff]  ;;  %v9049_v53 = vpop.f32.mrf.mxu1 }
 0x3e5   : > { %11845 = vst [vmem:[#allocation135_spill] sm:$0xff] %v9049_v53  ;;  %v11880_v53 = vld [vmem:[#allocation51_spill] sm:$0xff] }
 0x3e7   : > { %v1386_v55 = vpop.xlane.xlu1 %1385 }
 0x3e8   : > { %6746 = vmatmul.msk.bf16.vlgmr.msrb.gmra.mxu3 %vm675_vm1, %v11815_v21  ;;  %7257 = vrcp.f32 %v1386_v55  ;;  %v2351_v55 = vsel %vm675_vm1, %v11835_v10, 0 }
 0x3e9   : > { %2264 = vmatpush.bf16.xpose.msrb.mxu3 %v2255_v9 }
 0x3ea   : > { %v8985_v59 = vpop.permute.xlu2 %3884 }
 0x3eb   : > { %11816 = vst [vmem:[#allocation25_spill] sm:$0xff] %v8985_v59 }
 0x3ef   : > { %v9001_v21 = vpop.permute.xlu1 %3834 }
 0x3f0   : > { %11824 = vst [vmem:[#allocation22_spill] sm:$0xff] %v9001_v21 }
 0x3f2   : > { %v8989_v45 = vpop.permute.xlu2 %3930 }
 0x3f3   : > { %11818 = vst [vmem:[#allocation32_spill] sm:$0xff] %v8989_v45  ;;  %6744 = vmatmul.msk.bf16.vlgmr.msrb.gmra.mxu1 %vm675_vm1, %v11820_v28  ;;  %v9003_v45 = vpop.permute.xlu0 %3810 }
 0x3f4   : > { %2216 = vmatpush.bf16.xpose.msrb.mxu1 %v2207_v60  ;;  %11825 = vst [vmem:[#allocation55_spill] sm:$0xff] %v9003_v45  ;;  %v11828_v60 = vld [vmem:[#allocation28_spill] sm:$0xff]  ;;  %v7258_v45 = vpop.eup %7257 }
 0x3f7   : > { %v9011_v28 = vpop.permute.xlu1 %3858 }
 0x3f8   : > { %6749 = vmatmul.msk.bf16.vlgmr.msra.gmra.mxu3 %vm675_vm1, %v11822_v13  ;;  %11829 = vst [vmem:[#allocation61_spill] sm:$0xff] %v9011_v28  ;;  %v11831_v13 = vld [vmem:[#allocation46_spill] sm:$0xff] }
 0x3f9   : > { %2336 = vmatpush.bf16.xpose.msra.mxu3 %v2327_v4  ;;  %v2399_v4 = vsel %vm675_vm1, %v11830_v52, 0  ;;  %v11836_v52 = vld [vmem:[#allocation37_spill] sm:$0xff] }
 0x3fa   : > { %v8999_v9 = vpop.permute.xlu2 %3906  ;;  %11838 = vst [vmem:[#allocation37_spill] sm:$0xff] %v9033_v48 }
 0x3fb   : > { %11823 = vst [vmem:[#allocation34_spill] sm:$0xff] %v8999_v9  ;;  %v9019_v50 = vpop.permute.xlu0 %3860  ;;  %v9021_v9 = vpop.f32.mrf.mxu3 }
 0x3fc   : > { %11832 = vst [vmem:[#allocation28_spill] sm:$0xff] %v9019_v50 }
 0x3fd   : > { %11833 = vst [vmem:[#allocation80_spill] sm:$0xff] %v9021_v9 }
 0x402   : > { %v3026_v59 = vpop.permute.xlu2 %3025 }
 0x403   : > { %6747 = vmatmul.msk.bf16.vlgmr.msra.gmra.mxu1 %vm675_vm1, %v11828_v60  ;;  %v9023_v60 = vpop.permute.xlu1 %3932 }
 0x404   : > { %2288 = vmatpush.bf16.xpose.msra.mxu1 %v2279_v2  ;;  %11834 = vst [vmem:[#allocation46_spill] sm:$0xff] %v9023_v60  ;;  %v1452_v2 = vmul.f32 %v7258_v45, %v8795_v3  ;;  %v11839_v60 = vld [vmem:[#allocation67_spill] sm:$0xff]  ;;  %v9037_v3 = vunpack.c.l.bf16 %v7076_v39 }
 0x406   : > { %v1484_v50 = vpack.c.bf16 %v1452_v2, %v1452_v2  ;;  %11840 = vst [vmem:[#allocation67_spill] sm:$0xff] %v9037_v3 }
 0x408   : > { %6752 = vmatmul.msk.bf16.vlgmr.msrb.gmra.mxu3 %vm675_vm1, %v11831_v13  ;;  %v9030_v13 = vpop.f32.mrf.mxu3  ;;  %v1516_v45 = vunpack.c.l.bf16 %v1484_v50 }
 0x409   : > { %2408 = vmatpush.bf16.xpose.msrb.mxu3 %v2399_v4  ;;  %11837 = vst [vmem:[#allocation69_spill] sm:$0xff] %v9030_v13  ;;  %v9044_v13 = vunpack.c.h.bf16 %v7076_v39 }
 0x40a   : > { %v9017_v21 = vpop.permute.xlu2 %3125 }
 0x40b   : > { %v9039_v10 = vpop.permute.xlu1 %3908 }
 0x40c   : > { %11841 = vst [vmem:[#allocation133_spill] sm:$0xff] %v9039_v10 }
 0x410   : > { %v9046_v8 = vpop.f32.mrf.mxu3 }
 0x411   : > { %11844 = vst [vmem:[#allocation134_spill] sm:$0xff] %v9046_v8 }
 0x412   : > { %v2901_v28 = vpop.permute.xlu2 %2900 }
 0x413   : > { %2913 = vmatpush.bf16.msrb.mxu0 %v2901_v28  ;;  %6750 = vmatmul.msk.bf16.vlgmr.msrb.gmra.mxu1 %vm675_vm1, %v11836_v52  ;;  %v1389_v4 = vpop.xlane.xlu0 %1388  ;;  %v11842_v28 = vld [vmem:[#allocation29_spill] sm:$0xff]  ;;  %v2926_v50 = vpop.permute.xlu1 %2925 }
 0x414   : > { %2360 = vmatpush.bf16.xpose.msrb.mxu1 %v2351_v55  ;;  %7259 = vrcp.f32 %v1389_v4  ;;  %v1580_v4 = vmul.f32 %v9037_v3, %v1516_v45  ;;  %11843 = vst [vmem:[#allocation29_spill] sm:$0xff] %v9044_v13 }
 0x416   : > { %v1612_v9 = vpack.c.bf16 %v1580_v4, %v1580_v4 }
 0x418   : > { %6755 = vmatmul.msk.bf16.vlgmr.msra.gmra.mxu3 %vm675_vm1, %v11839_v60  ;;  %v9053_v45 = vpop.f32.mrf.mxu3 }
 0x419   : > { %2988 = vmatpush.bf16.msra.mxu3 %v11842_v28  ;;  %11847 = vst [vmem:[#allocation54_spill] sm:$0xff] %v9053_v45 }
 0x41a   : > { %v7260_v52 = vpop.eup %7259 }
 0x41b   : > { %v1453_v55 = vmul.f32 %v7260_v52, %v8887_v6  ;;  %v1991_v6 = vunpack.c.l.b16 %v1612_v9  ;;  %v11848_v52 = vld [vmem:[#allocation79_spill] sm:$0xff] }
 0x41c   : > { %v11853_v9 = vld [vmem:[#allocation63_spill] sm:$0xff] }
 0x41d   : > { %v1485_v2 = vpack.c.bf16 %v1453_v55, %v1453_v55  ;;  %v11849_v55 = vld [vmem:[#allocation33_spill] sm:$0xff] }
 0x41e   : > { %v2159_v4 = vsel %vm675_vm1, %v11849_v55, 0 }
 0x41f   : > { %v1517_v48 = vunpack.c.l.bf16 %v1485_v2  ;;  %v9061_v2 = vpop.f32.mrf.mxu1 }
 0x420   : > { %11851 = vst [vmem:[#allocation79_spill] sm:$0xff] %v9061_v2 }
 0x421   : > { %v1581_v60 = vmul.f32 %v9044_v13, %v1517_v48  ;;  %v11850_v48 = vld [vmem:[#allocation43_spill] sm:$0xff]  ;;  %v11900_v13 = vld [vmem:[#allocation58_spill] sm:$0xff] }
 0x423   : > { %v1613_v10 = vpack.c.bf16 %v1581_v60, %v1581_v60  ;;  %6753 = vmatmul.msk.bf16.vlgmr.msra.gmra.mxu1 %vm675_vm1, %v11846_v12  ;;  %v9063_v12 = vpop.f32.mrf.mxu3  ;;  %v11855_v60 = vld [vmem:[#allocation42_spill] sm:$0xff] }
 0x424   : > { %2938 = vmatpush.bf16.msra.mxu1 %v2926_v50  ;;  %11852 = vst [vmem:[#allocation33_spill] sm:$0xff] %v9063_v12  ;;  %v2231_v50 = vsel %vm675_vm1, %v11855_v60, 0 }
 0x425   : > { %v1992_v28 = vunpack.c.l.b16 %v1613_v10 }
 0x427   : > { %v1993_v39 = vpack.c.b16 %v1992_v28, %v1991_v6  ;;  %v9067_v10 = vpop.f32.mrf.mxu1  ;;  %v11857_v28 = vld [vmem:[#allocation19_spill] sm:$0xff] }
 0x428   : > { %6758 = vmatmul.msk.bf16.vlgmr.msrb.gmra.mxu3 %vm675_vm1, %v11848_v52  ;;  %11854 = vst [vmem:[#allocation43_spill] sm:$0xff] %v9067_v10 }
 0x429   : > { %3088 = vmatpush.bf16.msrb.mxu3 %v11850_v48  ;;  %6742 = vmatmul.msk.bf16.vlgmr.msra.gmra.mxu2 %vm1101_vm2, %v1993_v39 }
 0x42a   : > { %2168 = vmatpush.bf16.xpose.msra.mxu2 %v2159_v4  ;;  %v11861_v4 = vld [vmem:[#allocation57_spill] sm:$0xff] }
 0x42b   : > { %v9071_v6 = vpop.f32.mrf.mxu3  ;;  %v2303_v48 = vsel %vm675_vm1, %v11861_v4, 0 }
 0x42c   : > { %11856 = vst [vmem:[#allocation63_spill] sm:$0xff] %v9071_v6  ;;  %v9089_v6 = vpop.f32.mrf.mxu2 }
 0x42d   : > { %11865 = vst [vmem:[#allocation137_spill] sm:$0xff] %v9089_v6 }
 0x42f   : > { %v9075_v39 = vpop.f32.mrf.mxu1 }
 0x430   : > { %11858 = vst [vmem:[#allocation42_spill] sm:$0xff] %v9075_v39  ;;  %v11869_v39 = vld [vmem:[#allocation45_spill] sm:$0xff] }
 0x433   : > { %6756 = vmatmul.msk.bf16.vlgmr.msrb.gmra.mxu1 %vm675_vm1, %v11853_v9  ;;  %v9077_v52 = vpop.f32.mrf.mxu3  ;;  %v11862_v9 = vld [vmem:[#allocation36_spill] sm:$0xff] }
 0x434   : > { %3038 = vmatpush.bf16.msrb.mxu1 %v3026_v59  ;;  %11859 = vst [vmem:[#allocation19_spill] sm:$0xff] %v9077_v52  ;;  %v11868_v52 = vld [vmem:[#allocation72_spill] sm:$0xff]  ;;  %v9099_v4 = vpop.f32.mrf.mxu2 }
 0x435   : > { %11870 = vst [vmem:[#allocation72_spill] sm:$0xff] %v9099_v4 }
 0x437   : > { %v9079_v55 = vpop.f32.mrf.mxu1 }
 0x438   : > { %11860 = vst [vmem:[#allocation136_spill] sm:$0xff] %v9079_v55  ;;  %v2375_v55 = vsel %vm675_vm1, %v11868_v52, 0  ;;  %v11874_v52 = vld [vmem:[#allocation49_spill] sm:$0xff] }
 0x439   : > { %6745 = vmatmul.msk.bf16.vlgmr.msrb.gmra.mxu2 %vm675_vm1, %v11857_v28 }
 0x43a   : > { %2240 = vmatpush.bf16.xpose.msrb.mxu2 %v2231_v50 }
 0x43c   : > { %v9108_v2 = vpop.f32.mrf.mxu2 }
 0x43d   : > { %11873 = vst [vmem:[#allocation140_spill] sm:$0xff] %v9108_v2 }
 0x43f   : > { %v9087_v60 = vpop.f32.mrf.mxu1 }
 0x440   : > { %11864 = vst [vmem:[#allocation36_spill] sm:$0xff] %v9087_v60 }
 0x444   : > { %v9123_v2 = vpop.f32.mrf.mxu2 }
 0x447   : > { %v9093_v28 = vpop.f32.mrf.mxu1 }
 0x448   : > { %11867 = vst [vmem:[#allocation139_spill] sm:$0xff] %v9093_v28  ;;  %v11881_v28 = vld [vmem:[#allocation60_spill] sm:$0xff] }
 0x449   : > { %6748 = vmatmul.msk.bf16.vlgmr.msra.gmra.mxu2 %vm675_vm1, %v11862_v9  ;;  %v11871_v9 = vld [vmem:[#allocation50_spill] sm:$0xff] }
 0x44a   : > { %2312 = vmatpush.bf16.xpose.msra.mxu2 %v2303_v48 }
 0x44b   : > { %v9085_v59 = vpop.f32.mrf.mxu3 }
 0x44c   : > { %11863 = vst [vmem:[#allocation57_spill] sm:$0xff] %v9085_v59  ;;  %v11878_v59 = vld [vmem:[#allocation62_spill] sm:$0xff] }
 0x453   : > { %v9091_v50 = vpop.f32.mrf.mxu3 }
 0x454   : > { %11866 = vst [vmem:[#allocation138_spill] sm:$0xff] %v9091_v50 }
 0x459   : > { %6751 = vmatmul.msk.bf16.vlgmr.msrb.gmra.mxu2 %vm675_vm1, %v11869_v39 }
 0x45a   : > { %2384 = vmatpush.bf16.xpose.msrb.mxu2 %v2375_v55 }
 0x45b   : > { %v2050_v48 = vpop.f32.mrf.mxu3 }
 0x45c   : > { %v9102_v12 = vadd.f32 %v11871_v9, %v2050_v48  ;;  %v11876_v48 = vld [vmem:[#allocation48_spill] sm:$0xff]  ;;  %v11877_v9 = vld [vmem:[#allocation27_spill] sm:$0xff] }
 0x45d   : > { %11879 = vst [vmem:[#allocation48_spill] sm:$0xff] %v9123_v2 }
 0x45e   : > { %v2415_v45 = vsel %vm1101_vm2, %v9102_v12, -inf }
 0x45f   : > { %2416 = vmax.xlane.f32.xlu1 %v2415_v45 }
 0x460   : > { %v9106_v10 = vpop.f32.mrf.mxu1 }
 0x461   : > { %11872 = vst [vmem:[#allocation45_spill] sm:$0xff] %v9106_v10 }
 0x463   : > { %v2052_v8 = vpop.f32.mrf.mxu3 }
 0x464   : > { %v9111_v50 = vadd.f32 %v11874_v52, %v2052_v8 }
 0x466   : > { %v2418_v39 = vsel %vm1101_vm2, %v9111_v50, -inf }
 0x467   : > { %2419 = vmax.xlane.f32.xlu2 %v2418_v39 }
 0x468   : > { %v9115_v55 = vpop.f32.mrf.mxu1 }
 0x469   : > { %11875 = vst [vmem:[#allocation141_spill] sm:$0xff] %v9115_v55  ;;  %6754 = vmatmul.msk.bf16.vlgmr.msra.gmra.mxu2 %vm675_vm1, %v11876_v48 }
 0x46a   : > { %2963 = vmatpush.bf16.msra.mxu2 %v11877_v9 }
 0x46b   : > { %v2122_v45 = vpop.f32.mrf.mxu3 }
 0x46c   : > { %v9121_v10 = vadd.f32 %v11878_v59, %v2122_v45  ;;  %v9135_v45 = vpop.f32.mrf.mxu2 }
 0x46d   : > { %11882 = vst [vmem:[#allocation27_spill] sm:$0xff] %v9135_v45 }
 0x46e   : > { %v2433_v8 = vsel %vm1101_vm2, %v9121_v10, -inf }
 0x46f   : > { %2434 = vmax.xlane.f32.xlu1 %v2433_v8  ;;  %v11883_v8 = vld [vmem:[#allocation53_spill] sm:$0xff] }
 0x470   : > { %v2074_v52 = vpop.f32.mrf.mxu1 }
 0x471   : > { %v9128_v39 = vadd.f32 %v11880_v53, %v2074_v52  ;;  %v11884_v52 = vld [vmem:[#allocation77_spill] sm:$0xff]  ;;  %v11885_v53 = vld [vmem:[#allocation31_spill] sm:$0xff] }
 0x473   : > { %v2124_v55 = vpop.f32.mrf.mxu3  ;;  %v2421_v48 = vsel %vm1101_vm2, %v9128_v39, -inf }
 0x474   : > { %v9133_v9 = vadd.f32 %v11881_v28, %v2124_v55  ;;  %2422 = vmax.xlane.f32.xlu2 %v2421_v48  ;;  %v9147_v48 = vpop.f32.mrf.mxu2 }
 0x475   : > { %11886 = vst [vmem:[#allocation77_spill] sm:$0xff] %v9147_v48  ;;  %v11890_v48 = vld [vmem:[#allocation59_spill] sm:$0xff] }
 0x476   : > { %v2436_v59 = vsel %vm1101_vm2, %v9133_v9, -inf }
 0x477   : > { %2437 = vmax.xlane.f32.xlu1 %v2436_v59  ;;  %v11888_v59 = vld [vmem:[#allocation68_spill] sm:$0xff] }
 0x478   : > { %v2076_v2 = vpop.f32.mrf.mxu1 }
 0x479   : > { %v9140_v60 = vadd.f32 %v11883_v8, %v2076_v2  ;;  %6757 = vmatmul.msk.bf16.vlgmr.msrb.gmra.mxu2 %vm675_vm1, %v11884_v52 }
 0x47a   : > { %3063 = vmatpush.bf16.msrb.mxu2 %v11885_v53 }
 0x47b   : > { %v2424_v55 = vsel %vm1101_vm2, %v9140_v60, -inf  ;;  %v2194_v28 = vpop.f32.mrf.mxu3 }
 0x47c   : > { %2425 = vmax.xlane.f32.xlu0 %v2424_v55  ;;  %v9155_v8 = vadd.f32 %v11888_v59, %v2194_v28  ;;  %v9157_v52 = vpop.f32.mrf.mxu2  ;;  %v11892_v28 = vld [vmem:[#allocation82_spill] sm:$0xff] }
 0x47d   : > { %11889 = vst [vmem:[#allocation31_spill] sm:$0xff] %v9157_v52 }
 0x47e   : > { %v2451_v55 = vsel %vm1101_vm2, %v9155_v8, -inf }
 0x480   : > { %v2146_v45 = vpop.f32.mrf.mxu1 }
 0x481   : > { %v9150_v30 = vadd.f32 %v11887_v38, %v2146_v45 }
 0x483   : > { %v2439_v2 = vsel %vm1101_vm2, %v9150_v30, -inf  ;;  %v2196_v4 = vpop.f32.mrf.mxu3 }
 0x484   : > { %2440 = vmax.xlane.f32.xlu2 %v2439_v2  ;;  %v9164_v45 = vpop.f32.mrf.mxu2 }
 0x485   : > { %11891 = vst [vmem:[#allocation142_spill] sm:$0xff] %v9164_v45 }
 0x488   : > { %v2148_v53 = vpop.f32.mrf.mxu1 }
 0x489   : > { %v9162_v6 = vadd.f32 %v11890_v48, %v2148_v53  ;;  %v11894_v53 = vld [vmem:[#allocation74_spill] sm:$0xff] }
 0x48b   : > { %v2442_v2 = vsel %vm1101_vm2, %v9162_v6, -inf  ;;  %v2266_v26 = vpop.f32.mrf.mxu3 }
 0x48c   : > { %2452 = vmax.xlane.f32.xlu2 %v2451_v55  ;;  %v9169_v59 = vadd.f32 %v11892_v28, %v2266_v26  ;;  %v9171_v52 = vpop.f32.mrf.mxu2 }
 0x48d   : > { %11893 = vst [vmem:[#allocation143_spill] sm:$0xff] %v9171_v52  ;;  %v11898_v52 = vld [vmem:[#allocation56_spill] sm:$0xff] }
 0x48e   : > { %v2469_v33 = vsel %vm1101_vm2, %v9169_v59, -inf }
 0x490   : > { %v2218_v38 = vpop.f32.mrf.mxu1 }
 0x494   : > { %2443 = vmax.xlane.f32.xlu2 %v2442_v2  ;;  %v9180_v43 = vpop.f32.mrf.mxu2 }
 0x495   : > { %11895 = vst [vmem:[#allocation144_spill] sm:$0xff] %v9180_v43 }
 0x498   : > { %v2220_v55 = vpop.f32.mrf.mxu1 }
 0x499   : > { %v9176_v48 = vadd.f32 %v11894_v53, %v2220_v55  ;;  %v11899_v55 = vld [vmem:[#allocation70_spill] sm:$0xff] }
 0x49a   : > { %v9192_v53 = vadd.f32 %v11899_v55, %v2196_v4  ;;  %v11903_v4 = vld [vmem:[#allocation84_spill] sm:$0xff] }
 0x49b   : > { %v2460_v45 = vsel %vm1101_vm2, %v9176_v48, -inf }
 0x49c   : > { %2470 = vmax.xlane.f32.xlu2 %v2469_v33 }
 0x4a4   : > { %2461 = vmax.xlane.f32.xlu2 %v2460_v45  ;;  %v9197_v45 = vpop.permute.xlu0 %3882 }
 0x4a5   : > { %11901 = vst [vmem:[#allocation147_spill] sm:$0xff] %v9197_v45 }
 0x4ac   : > { %v9182_v2 = vpop.f32.mrf.mxu2  ;;  %v9213_v54 = vpop.permute.xlu0 %3956 }
 0x4ad   : > { %11896 = vst [vmem:[#allocation145_spill] sm:$0xff] %v9182_v2  ;;  %v11902_v2 = vld [vmem:[#allocation71_spill] sm:$0xff] }
 0x4ae   : > { %11904 = vst [vmem:[#allocation148_spill] sm:$0xff] %v9213_v54 }
 0x4b4   : > { %v9184_v26 = vpop.f32.mrf.mxu2  ;;  %v9229_v54 = vpop.permute.xlu0 %3954 }
 0x4b5   : > { %11897 = vst [vmem:[#allocation146_spill] sm:$0xff] %v9184_v26 }
 0x4b6   : > { %11908 = vst [vmem:[#allocation150_spill] sm:$0xff] %v9229_v54 }
 0x4bc   : > { %v2098_v28 = vpop.f32.mrf.mxu2 }
 0x4bd   : > { %v9187_v0 = vadd.f32 %v11898_v52, %v2098_v28  ;;  %v2454_v28 = vsel %vm1101_vm2, %v9192_v53, -inf  ;;  %v2268_v52 = vpop.f32.mrf.mxu3 }
 0x4be   : > { %v9207_v55 = vadd.f32 %v11903_v4, %v2268_v52  ;;  %v11907_v4 = vld [vmem:[#allocation66_spill] sm:$0xff] }
 0x4bf   : > { %v2427_v33 = vsel %vm1101_vm2, %v9187_v0, -inf }
 0x4c0   : > { %2428 = vmax.xlane.f32.xlu0 %v2427_v33  ;;  %v9204_v33 = vadd.f32 %v11902_v2, %v2218_v38  ;;  %v2472_v45 = vsel %vm1101_vm2, %v9207_v55, -inf }
 0x4c4   : > { %v2100_v37 = vpop.f32.mrf.mxu2 }
 0x4c5   : > { %v9195_v3 = vadd.f32 %v11900_v13, %v2100_v37  ;;  %v2290_v37 = vpop.f32.mrf.mxu1  ;;  %v2457_v13 = vsel %vm1101_vm2, %v9204_v33, -inf  ;;  %v9220_v2 = vpop.f32.mrf.mxu3 }
 0x4c7   : > { %v2430_v26 = vsel %vm1101_vm2, %v9195_v3, -inf }
 0x4c8   : > { %2431 = vmax.xlane.f32.xlu1 %v2430_v26  ;;  %2455 = vmax.xlane.f32.xlu0 %v2454_v28  ;;  %v9215_v26 = vpop.permute.xlu1 %4463  ;;  %v11906_v28 = vld [vmem:[#allocation65_spill] sm:$0xff] }
 0x4c9   : > { %11905 = vst [vmem:[#allocation149_spill] sm:$0xff] %v9215_v26  ;;  %v11909_v26 = vld [vmem:[#allocation85_spill] sm:$0xff] }
 0x4cc   : > { %v2170_v43 = vpop.f32.mrf.mxu2 }
 0x4cd   : > { %v9218_v38 = vadd.f32 %v11906_v28, %v2170_v43  ;;  %v9232_v43 = vadd.f32 %v11909_v26, %v2290_v37  ;;  %v11910_v28 = vld [vmem:[#allocation86_spill] sm:$0xff]  ;;  %v9248_v26 = vpop.permute.xlu0 %3225 }
 0x4ce   : > { %11914 = vst [vmem:[#allocation153_spill] sm:$0xff] %v9248_v26 }
 0x4cf   : > { %v2475_v27 = vsel %vm1101_vm2, %v9232_v43, -inf }
 0x4d0   : > { %2458 = vmax.xlane.f32.xlu1 %v2457_v13  ;;  %2473 = vmax.xlane.f32.xlu0 %v2472_v45  ;;  %v2445_v13 = vsel %vm1101_vm2, %v9218_v38, -inf  ;;  %v2292_v45 = vpop.f32.mrf.mxu1  ;;  %v9237_v29 = vpop.permute.xlu1 %4488 }
 0x4d1   : > { %v9235_v34 = vadd.f32 %v11910_v28, %v2292_v45  ;;  %11911 = vst [vmem:[#allocation151_spill] sm:$0xff] %v9237_v29  ;;  %v11915_v45 = vld [vmem:[#allocation83_spill] sm:$0xff] }
 0x4d4   : > { %v2172_v52 = vpop.f32.mrf.mxu2 }
 0x4d5   : > { %v9223_v46 = vadd.f32 %v11907_v4, %v2172_v52  ;;  %v9239_v4 = vpop.f32.mrf.mxu3 }
 0x4d7   : > { %v2448_v11 = vsel %vm1101_vm2, %v9223_v46, -inf }
 0x4d8   : > { %2449 = vmax.xlane.f32.xlu2 %v2448_v11  ;;  %2446 = vmax.xlane.f32.xlu1 %v2445_v13  ;;  %v2478_v11 = vsel %vm1101_vm2, %v9235_v34, -inf  ;;  %v11912_v13 = vld [vmem:[#allocation73_spill] sm:$0xff]  ;;  %v9253_v29 = vpop.permute.xlu1 %4538 }
 0x4d9   : > { %11916 = vst [vmem:[#allocation154_spill] sm:$0xff] %v9253_v29 }
 0x4dc   : > { %v2242_v52 = vpop.f32.mrf.mxu2 }
 0x4dd   : > { %v9246_v54 = vadd.f32 %v11912_v13, %v2242_v52  ;;  %v2410_v41 = vpop.f32.mrf.mxu3  ;;  %v11918_v13 = vld [vmem:[#allocation87_spill] sm:$0xff] }
 0x4df   : > { %11913 = vst [vmem:[#allocation152_spill] sm:$0xff] %v9246_v54  ;;  %v2463_v14 = vsel %vm1101_vm2, %v9246_v54, -inf }
 0x4e0   : > { %2476 = vmax.xlane.f32.xlu2 %v2475_v27  ;;  %2479 = vmax.xlane.f32.xlu1 %v2478_v11  ;;  %v11917_v27 = vld [vmem:[#allocation96_spill] sm:$0xff]  ;;  %v9271_v54 = vpop.permute.xlu1 %4663 }
 0x4e1   : > { %v9260_v52 = vadd.f32 %v11917_v27, %v2410_v41  ;;  %11920 = vst [vmem:[#allocation156_spill] sm:$0xff] %v9271_v54  ;;  %v11922_v41 = vld [vmem:[#allocation91_spill] sm:$0xff]  ;;  %v11923_v27 = vld [vmem:[#allocation88_spill] sm:$0xff] }
 0x4e3   : > { %v2505_v29 = vsel %vm1101_vm2, %v9260_v52, -inf }
 0x4e4   : > { %v2244_v37 = vpop.f32.mrf.mxu2 }
 0x4e5   : > { %v9251_v28 = vadd.f32 %v11915_v45, %v2244_v37  ;;  %v2362_v37 = vpop.f32.mrf.mxu1  ;;  %v9265_v45 = vpop.permute.xlu0 %4513 }
 0x4e6   : > { %11919 = vst [vmem:[#allocation155_spill] sm:$0xff] %v9265_v45  ;;  %v2412_v45 = vpop.f32.mrf.mxu3 }
 0x4e7   : > { %v2466_v58 = vsel %vm1101_vm2, %v9251_v28, -inf }
 0x4e8   : > { %2464 = vmax.xlane.f32.xlu2 %v2463_v14  ;;  %2467 = vmax.xlane.f32.xlu1 %v2466_v58  ;;  %v9273_v14 = vpop.permute.xlu2 %4613  ;;  %v9276_v58 = vadd.f32 %v11922_v41, %v2362_v37  ;;  %v2417_v54 = vpop.xlane.xlu1 %2416  ;;  %v11925_v37 = vld [vmem:[#allocation98_spill] sm:$0xff]  ;;  %v11926_v41 = vld [vmem:[#allocation92_spill] sm:$0xff] }
 0x4e9   : > { %11921 = vst [vmem:[#allocation157_spill] sm:$0xff] %v9273_v14  ;;  %v9288_v14 = vadd.f32 %v11925_v37, %v2412_v45  ;;  %v2511_v56 = vsub.f32 %v9102_v12, %v2417_v54 }
 0x4ea   : > { %v2493_v61 = vsel %vm1101_vm2, %v9276_v58, -inf }
 0x4ec   : > { %v2314_v11 = vpop.f32.mrf.mxu2 }
 0x4ed   : > { %v9263_v17 = vadd.f32 %v11918_v13, %v2314_v11  ;;  %v2364_v40 = vpop.f32.mrf.mxu1 }
 0x4ef   : > { %v2481_v19 = vsel %vm1101_vm2, %v9263_v17, -inf }
 0x4f0   : > { %2506 = vmax.xlane.f32.xlu2 %v2505_v29  ;;  %2482 = vmax.xlane.f32.xlu0 %v2481_v19  ;;  %v9285_v19 = vpop.permute.xlu0 %4563  ;;  %v2420_v29 = vpop.xlane.xlu2 %2419 }
 0x4f1   : > { %11924 = vst [vmem:[#allocation158_spill] sm:$0xff] %v9285_v19  ;;  %v2512_v26 = vsub.f32 %v9111_v50, %v2420_v29  ;;  %v2543_v19 = vmul.f32 1.442695, %v2511_v56  ;;  %v11929_v50 = vld [vmem:[#allocation93_spill] sm:$0xff] }
 0x4f3   : > { %v2545_v37 = vmul.f32 1.442695, %v2512_v26  ;;  %7261 = vpow2.f32 %v2543_v19 }
 0x4f4   : > { %v2316_v11 = vpop.f32.mrf.mxu2 }
 0x4f5   : > { %v9279_v13 = vadd.f32 %v11923_v27, %v2316_v11  ;;  %v9291_v11 = vadd.f32 %v11926_v41, %v2364_v40  ;;  %v11928_v40 = vld [vmem:[#allocation95_spill] sm:$0xff]  ;;  %7263 = vpow2.f32 %v2545_v37 }
 0x4f7   : > { %v2484_v63 = vsel %vm1101_vm2, %v9279_v13, -inf  ;;  %v2496_v35 = vsel %vm1101_vm2, %v9291_v11, -inf }
 0x4f8   : > { %2485 = vmax.xlane.f32.xlu1 %v2484_v63  ;;  %2494 = vmax.xlane.f32.xlu0 %v2493_v61  ;;  %v2508_v63 = vsel %vm1101_vm2, %v9288_v14, -inf  ;;  %v2435_v61 = vpop.xlane.xlu1 %2434  ;;  %v2423_v45 = vpop.xlane.xlu2 %2422 }
 0x4f9   : > { %v9299_v20 = vpop.permute.xlu0 %4588  ;;  %v2517_v12 = vsub.f32 %v9121_v10, %v2435_v61  ;;  %v2513_v25 = vsub.f32 %v9128_v39, %v2423_v45  ;;  %v9315_v10 = vpop.eup %7261 }
 0x4fa   : > { %11927 = vst [vmem:[#allocation159_spill] sm:$0xff] %v9299_v20  ;;  %v2607_v45 = vsel %vm1101_vm2, %v9315_v10, 0.0 }
 0x4fb   : > { %v2555_v26 = vmul.f32 1.442695, %v2517_v12  ;;  %v2547_v19 = vmul.f32 1.442695, %v2513_v25 }
 0x4fc   : > { %v2386_v27 = vpop.f32.mrf.mxu2 }
 0x4fd   : > { %v9302_v41 = vadd.f32 %v11928_v40, %v2386_v27  ;;  %7265 = vpow2.f32 %v2555_v26 }
 0x4fe   : > { %7267 = vpow2.f32 %v2547_v19 }
 0x500   : > { %2497 = vmax.xlane.f32.xlu1 %v2496_v35  ;;  %2509 = vmax.xlane.f32.xlu0 %v2508_v63  ;;  %v2499_v35 = vsel %vm1101_vm2, %v9302_v41, -inf  ;;  %v9313_v27 = vpop.xlane.xlu2 %2440  ;;  %v2438_v63 = vpop.xlane.xlu1 %2437 }
 0x501   : > { %v2426_v61 = vpop.xlane.xlu0 %2425  ;;  %v2518_v39 = vsub.f32 %v9133_v9, %v2438_v63 }
 0x502   : > { %v2514_v37 = vsub.f32 %v9140_v60, %v2426_v61 }
 0x503   : > { %v2557_v25 = vmul.f32 1.442695, %v2518_v39 }
 0x504   : > { %v2388_v54 = vpop.f32.mrf.mxu2 }
 0x505   : > { %v9306_v29 = vadd.f32 %v11929_v50, %v2388_v54  ;;  %v9317_v54 = vpop.eup %7263  ;;  %7269 = vpow2.f32 %v2557_v25 }
 0x506   : > { %v2610_v12 = vsel %vm1101_vm2, %v9317_v54, 0.0 }
 0x507   : > { %v2502_v56 = vsel %vm1101_vm2, %v9306_v29, -inf }
 0x508   : > { %2503 = vmax.xlane.f32.xlu2 %v2502_v56  ;;  %2500 = vmax.xlane.f32.xlu0 %v2499_v35  ;;  %v2549_v56 = vmul.f32 1.442695, %v2514_v37  ;;  %v9325_v35 = vpop.eup %7265  ;;  %v2453_v20 = vpop.xlane.xlu2 %2452 }
 0x509   : > { %v9327_v50 = vpop.eup %7267  ;;  %v2523_v9 = vsub.f32 %v9155_v8, %v2453_v20  ;;  %v2625_v60 = vsel %vm1101_vm2, %v9325_v35, 0.0 }
 0x50a   : > { %7271 = vpow2.f32 %v2549_v56  ;;  %v2613_v26 = vsel %vm1101_vm2, %v9327_v50, 0.0 }
 0x50b   : > { %v2567_v19 = vmul.f32 1.442695, %v2523_v9  ;;  %v9334_v63 = vpop.eup %7269 }
 0x50c   : > { %v2628_v39 = vsel %vm1101_vm2, %v9334_v63, 0.0 }
 0x50d   : > { %7273 = vpow2.f32 %v2567_v19 }
 0x510   : > { %2608 = vadd.xlane.f32.xlu2 %v2607_v45  ;;  %2611 = vadd.xlane.f32.xlu0 %v2610_v12  ;;  %v9336_v61 = vpop.eup %7271  ;;  %v9346_v45 = vpop.xlane.xlu2 %2443 }
 0x511   : > { %v2616_v20 = vsel %vm1101_vm2, %v9336_v61, 0.0 }
 0x513   : > { %v9342_v8 = vpop.eup %7273 }
 0x514   : > { %v2643_v37 = vsel %vm1101_vm2, %v9342_v8, 0.0 }
 0x518   : > { %2626 = vadd.xlane.f32.xlu2 %v2625_v60  ;;  %2614 = vadd.xlane.f32.xlu0 %v2613_v26  ;;  %v2471_v9 = vpop.xlane.xlu2 %2470 }
 0x519   : > { %v2529_v40 = vsub.f32 %v9169_v59, %v2471_v9 }
 0x520   : > { %2629 = vadd.xlane.f32.xlu2 %v2628_v39  ;;  %2617 = vadd.xlane.f32.xlu0 %v2616_v20 }
 0x528   : > { %2644 = vadd.xlane.f32.xlu2 %v2643_v37 }
 0x533   : > { %v2429_v12 = vpop.xlane.xlu0 %2428 }
 0x534   : > { %v2515_v25 = vsub.f32 %v9187_v0, %v2429_v12  ;;  %v2579_v0 = vmul.f32 1.442695, %v2529_v40  ;;  %v2462_v12 = vpop.xlane.xlu2 %2461 }
 0x536   : > { %v2551_v56 = vmul.f32 1.442695, %v2515_v25 }
 0x538   : > { %7275 = vpow2.f32 %v2551_v56 }
 0x53b   : > { %v2432_v60 = vpop.xlane.xlu1 %2431  ;;  %v2456_v26 = vpop.xlane.xlu0 %2455 }
 0x53c   : > { %v2516_v19 = vsub.f32 %v9195_v3, %v2432_v60  ;;  %v2524_v39 = vsub.f32 %v9192_v53, %v2456_v26  ;;  %v2519_v53 = vsub.f32 %v9150_v30, %v9313_v27  ;;  %v2526_v60 = vsub.f32 %v9176_v48, %v2462_v12 }
 0x53e   : > { %v9351_v20 = vpop.eup %7275  ;;  %v2553_v5 = vmul.f32 1.442695, %v2516_v19  ;;  %v2569_v37 = vmul.f32 1.442695, %v2524_v39  ;;  %v2573_v26 = vmul.f32 1.442695, %v2526_v60 }
 0x53f   : > { %v2619_v36 = vsel %vm1101_vm2, %v9351_v20, 0.0 }
 0x540   : > { %7277 = vpow2.f32 %v2553_v5  ;;  %2620 = vadd.xlane.f32.xlu1 %v2619_v36 }
 0x541   : > { %7279 = vpow2.f32 %v2569_v37 }
 0x542   : > { %7281 = vpow2.f32 %v2579_v0 }
 0x543   : > { %v2459_v25 = vpop.xlane.xlu1 %2458  ;;  %v2474_v40 = vpop.xlane.xlu0 %2473 }
 0x544   : > { %v2525_v56 = vsub.f32 %v9204_v33, %v2459_v25  ;;  %v2559_v33 = vmul.f32 1.442695, %v2519_v53  ;;  %v2530_v48 = vsub.f32 %v9207_v55, %v2474_v40  ;;  %v2520_v55 = vsub.f32 %v9162_v6, %v9346_v45  ;;  %v11930_v6 = vld [vmem:[#allocation89_spill] sm:$0xff] }
 0x545   : > { %v9396_v45 = vadd.f32 %v11930_v6, %v9220_v2 }
 0x546   : > { %v9357_v3 = vpop.eup %7277  ;;  %v2571_v59 = vmul.f32 1.442695, %v2525_v56  ;;  %v2581_v53 = vmul.f32 1.442695, %v2530_v48 }
 0x547   : > { %v9361_v9 = vpop.eup %7279  ;;  %v2622_v5 = vsel %vm1101_vm2, %v9357_v3, 0.0 }
 0x548   : > { %7283 = vpow2.f32 %v2571_v59  ;;  %2623 = vadd.xlane.f32.xlu0 %v2622_v5  ;;  %v2646_v36 = vsel %vm1101_vm2, %v9361_v9, 0.0  ;;  %v9368_v27 = vpop.eup %7281 }
 0x549   : > { %2647 = vadd.xlane.f32.xlu1 %v2646_v36  ;;  %7285 = vpow2.f32 %v2559_v33  ;;  %v2661_v25 = vsel %vm1101_vm2, %v9368_v27, 0.0 }
 0x54a   : > { %7287 = vpow2.f32 %v2573_v26 }
 0x54b   : > { %v2450_v19 = vpop.xlane.xlu2 %2449  ;;  %v2447_v30 = vpop.xlane.xlu1 %2446 }
 0x54c   : > { %v2521_v39 = vsub.f32 %v9218_v38, %v2447_v30  ;;  %v2522_v12 = vsub.f32 %v9223_v46, %v2450_v19  ;;  %v2561_v19 = vmul.f32 1.442695, %v2520_v55 }
 0x54e   : > { %v9371_v37 = vpop.eup %7283  ;;  %v2563_v0 = vmul.f32 1.442695, %v2521_v39  ;;  %v2565_v38 = vmul.f32 1.442695, %v2522_v12  ;;  %v2487_v12 = vsel %vm1101_vm2, %v9396_v45, -inf }
 0x54f   : > { %v2649_v56 = vsel %vm1101_vm2, %v9371_v37, 0.0  ;;  %v9379_v59 = vpop.eup %7285 }
 0x550   : > { %2662 = vadd.xlane.f32.xlu0 %v2661_v25  ;;  %7289 = vpow2.f32 %v2563_v0  ;;  %v9381_v5 = vpop.eup %7287  ;;  %v2631_v33 = vsel %vm1101_vm2, %v9379_v59, 0.0 }
 0x551   : > { %2650 = vadd.xlane.f32.xlu1 %v2649_v56  ;;  %7291 = vpow2.f32 %v2581_v53  ;;  %v2652_v26 = vsel %vm1101_vm2, %v9381_v5, 0.0  ;;  %v11931_v53 = vld [vmem:[#allocation90_spill] sm:$0xff] }
 0x552   : > { %7293 = vpow2.f32 %v2565_v38  ;;  %v9413_v38 = vadd.f32 %v11931_v53, %v9239_v4 }
 0x553   : > { %v2477_v60 = vpop.xlane.xlu2 %2476  ;;  %7295 = vpow2.f32 %v2561_v19 }
 0x554   : > { %v2531_v36 = vsub.f32 %v9232_v43, %v2477_v60  ;;  %v2480_v43 = vpop.xlane.xlu1 %2479 }
 0x555   : > { %v2532_v0 = vsub.f32 %v9235_v34, %v2480_v43 }
 0x556   : > { %v9385_v46 = vpop.eup %7289  ;;  %v2583_v30 = vmul.f32 1.442695, %v2531_v36 }
 0x557   : > { %v2637_v40 = vsel %vm1101_vm2, %v9385_v46, 0.0  ;;  %v9398_v39 = vpop.eup %7291  ;;  %v2585_v60 = vmul.f32 1.442695, %v2532_v0 }
 0x558   : > { %2632 = vadd.xlane.f32.xlu0 %v2631_v33  ;;  %2638 = vadd.xlane.f32.xlu2 %v2637_v40  ;;  %v9400_v48 = vpop.eup %7293  ;;  %7297 = vpow2.f32 %v2583_v30  ;;  %v2664_v2 = vsel %vm1101_vm2, %v9398_v39, 0.0  ;;  %v2490_v33 = vsel %vm1101_vm2, %v9413_v38, -inf }
 0x559   : > { %2653 = vadd.xlane.f32.xlu1 %v2652_v26  ;;  %v2640_v25 = vsel %vm1101_vm2, %v9400_v48, 0.0  ;;  %v9417_v55 = vpop.eup %7295  ;;  %7299 = vpow2.f32 %v2585_v60 }
 0x55a   : > { %v2634_v40 = vsel %vm1101_vm2, %v9417_v55, 0.0 }
 0x55b   : > { %v9409_v56 = vpop.xlane.xlu2 %2464 }
 0x55e   : > { %v9419_v36 = vpop.eup %7297 }
 0x55f   : > { %v2667_v26 = vsel %vm1101_vm2, %v9419_v36, 0.0  ;;  %v9428_v43 = vpop.eup %7299 }
 0x560   : > { %2488 = vmax.xlane.f32.xlu0 %v2487_v12  ;;  %2665 = vadd.xlane.f32.xlu2 %v2664_v2 }
 0x561   : > { %2641 = vadd.xlane.f32.xlu1 %v2640_v25  ;;  %v2670_v25 = vsel %vm1101_vm2, %v9428_v43, 0.0 }
 0x563   : > { %v9415_v34 = vpop.xlane.xlu0 %2482  ;;  %v2507_v19 = vpop.xlane.xlu2 %2506 }
 0x564   : > { %v2541_v12 = vsub.f32 %v9260_v52, %v2507_v19 }
 0x566   : > { %v2603_v2 = vmul.f32 1.442695, %v2541_v12 }
 0x568   : > { %2491 = vmax.xlane.f32.xlu0 %v2490_v33  ;;  %2668 = vadd.xlane.f32.xlu2 %v2667_v26 }
 0x569   : > { %2635 = vadd.xlane.f32.xlu1 %v2634_v40 }
 0x56b   : > { %v2495_v4 = vpop.xlane.xlu0 %2494 }
 0x56c   : > { %v2537_v30 = vsub.f32 %v9276_v58, %v2495_v4 }
 0x56e   : > { %v2595_v0 = vmul.f32 1.442695, %v2537_v30 }
 0x570   : > { %7301 = vpow2.f32 %v2595_v0 }
 0x571   : > { %2671 = vadd.xlane.f32.xlu1 %v2670_v25  ;;  %7303 = vpow2.f32 %v2603_v2 }
 0x573   : > { %v9433_v60 = vpop.xlane.xlu0 %2509 }
 0x576   : > { %v9435_v33 = vpop.eup %7301 }
 0x577   : > { %11932 = vst [vmem:[#allocation160_spill] sm:$0xff] %v9435_v33  ;;  %v2685_v40 = vsel %vm1101_vm2, %v9435_v33, 0.0  ;;  %v9444_v4 = vpop.eup %7303 }
 0x578   : > { %11933 = vst [vmem:[#allocation161_spill] sm:$0xff] %v9444_v4  ;;  %v2697_v30 = vsel %vm1101_vm2, %v9444_v4, 0.0 }
 0x579   : > { %2686 = vadd.xlane.f32.xlu1 %v2685_v40 }
 0x57b   : > { %v9439_v58 = vpop.xlane.xlu2 %2503  ;;  %v2501_v26 = vpop.xlane.xlu0 %2500 }
 0x57c   : > { %v2539_v52 = vsub.f32 %v9302_v41, %v2501_v26  ;;  %4713 = vrot.lane.b32.xlu0 %v8042_v49, %s7716_s15 }
 0x57e   : > { %v2599_v19 = vmul.f32 1.442695, %v2539_v52 }
 0x580   : > { %7305 = vpow2.f32 %v2599_v19  ;;  %4638 = vrot.lane.b32.xlu2 %v7974_v62, %s7716_s15 }
 0x581   : > { %2698 = vadd.xlane.f32.xlu1 %v2697_v30 }
 0x583   : > { %v2609_v0 = vpop.xlane.xlu2 %2608  ;;  %v2612_v12 = vpop.xlane.xlu0 %2611 }
 0x584   : > { %7307 = vrcp.f32 %v2609_v0  ;;  %4688 = vrot.lane.b32.xlu0 %v8020_v31, %s7716_s15  ;;  %v9458_v0 = vpop.xlane.xlu1 %2467 }
 0x585   : > { %7309 = vrcp.f32 %v2612_v12 }
 0x586   : > { %v9452_v41 = vpop.eup %7305 }
 0x587   : > { %11934 = vst [vmem:[#allocation162_spill] sm:$0xff] %v9452_v41  ;;  %v2691_v25 = vsel %vm1101_vm2, %v9452_v41, 0.0 }
 0x589   : > { %2692 = vadd.xlane.f32.xlu1 %v2691_v25 }
 0x58a   : > { %v7308_v2 = vpop.eup %7307 }
 0x58b   : > { %v7310_v40 = vpop.eup %7309  ;;  %v2735_v26 = vmul.f32 %v7308_v2, %v9315_v10  ;;  %v2627_v52 = vpop.xlane.xlu2 %2626 }
 0x58c   : > { %v2615_v19 = vpop.xlane.xlu0 %2614  ;;  %v2736_v30 = vmul.f32 %v7310_v40, %v9317_v54  ;;  %7311 = vrcp.f32 %v2627_v52 }
 0x58d   : > { %v2767_v53 = vpack.c.bf16 %v2735_v26, %v2735_v26  ;;  %7313 = vrcp.f32 %v2615_v19  ;;  %v2486_v26 = vpop.xlane.xlu1 %2485 }
 0x58e   : > { %v2768_v12 = vpack.c.bf16 %v2736_v30, %v2736_v30 }
 0x58f   : > { %v2799_v6 = vunpack.c.l.bf16 %v2767_v53 }
 0x590   : > { %v2800_v4 = vunpack.c.l.bf16 %v2768_v12 }
 0x591   : > { %v2831_v31 = vmul.f32 %v8606_v57, %v2799_v6  ;;  %v2534_v6 = vsub.f32 %v9279_v13, %v2486_v26 }
 0x592   : > { %v7312_v41 = vpop.eup %7311  ;;  %v2832_v25 = vmul.f32 %v8603_v22, %v2800_v4 }
 0x593   : > { %v7314_v33 = vpop.eup %7313  ;;  %v2863_v49 = vpack.c.bf16 %v2831_v31, %v2831_v31  ;;  %v2741_v10 = vmul.f32 %v7312_v41, %v9325_v35  ;;  %v2630_v2 = vpop.xlane.xlu2 %2629 }
 0x594   : > { %v2618_v62 = vpop.xlane.xlu0 %2617  ;;  %v2864_v54 = vpack.c.bf16 %v2832_v25, %v2832_v25  ;;  %v2737_v40 = vmul.f32 %v7314_v33, %v9327_v50  ;;  %7315 = vrcp.f32 %v2630_v2  ;;  %v2533_v50 = vsub.f32 %v9263_v17, %v9415_v34 }
 0x595   : > { %v2897_v52 = vunpack.c.l.b16 %v2863_v49  ;;  %v2773_v19 = vpack.c.bf16 %v2741_v10, %v2741_v10  ;;  %7317 = vrcp.f32 %v2618_v62  ;;  %v2589_v33 = vmul.f32 1.442695, %v2534_v6  ;;  %v2498_v26 = vpop.xlane.xlu1 %2497 }
 0x596   : > { %v2898_v53 = vunpack.c.l.b16 %v2864_v54  ;;  %v2769_v30 = vpack.c.bf16 %v2737_v40, %v2737_v40  ;;  %v2587_v54 = vmul.f32 1.442695, %v2533_v50  ;;  %v2538_v34 = vsub.f32 %v9291_v11, %v2498_v26 }
 0x597   : > { %v2805_v4 = vunpack.c.l.bf16 %v2773_v19  ;;  %7319 = vpow2.f32 %v2589_v33  ;;  %v2542_v11 = vsub.f32 %v9288_v14, %v9433_v60 }
 0x598   : > { %v2899_v12 = vpack.c.b16 %v2898_v53, %v2897_v52  ;;  %v2801_v31 = vunpack.c.l.bf16 %v2769_v30  ;;  %7321 = vpow2.f32 %v2587_v54 }
 0x599   : > { %v2837_v62 = vmul.f32 %v8664_v16, %v2805_v4 }
 0x59a   : > { %v7316_v22 = vpop.eup %7315  ;;  %6759 = vmatmul.msk.bf16.vlgmr.msrb.gmra.mxu0 %vm1101_vm2, %v2899_v12  ;;  %v2833_v13 = vmul.f32 %v8620_v7, %v2801_v31 }
 0x59b   : > { %v7318_v35 = vpop.eup %7317  ;;  %v2742_v41 = vmul.f32 %v7316_v22, %v9334_v63  ;;  %v2869_v52 = vpack.c.bf16 %v2837_v62, %v2837_v62 }
 0x59c   : > { %v2738_v49 = vmul.f32 %v7318_v35, %v9336_v61  ;;  %v2865_v63 = vpack.c.bf16 %v2833_v13, %v2833_v13  ;;  %v2597_v35 = vmul.f32 1.442695, %v2538_v34 }
 0x59d   : > { %v2774_v25 = vpack.c.bf16 %v2742_v41, %v2742_v41  ;;  %v2972_v53 = vunpack.c.l.b16 %v2869_v52  ;;  %v9477_v6 = vpop.eup %7319 }
 0x59e   : > { %v2770_v10 = vpack.c.bf16 %v2738_v49, %v2738_v49  ;;  %v2922_v12 = vunpack.c.l.b16 %v2865_v63  ;;  %v2676_v50 = vsel %vm1101_vm2, %v9477_v6, 0.0  ;;  %v9482_v33 = vpop.eup %7321  ;;  %v11935_v49 = vld [vmem:[#allocation52_spill] sm:$0xff]  ;;  %7323 = vpow2.f32 %v2597_v35 }
 0x59f   : > { %v2806_v2 = vunpack.c.l.bf16 %v2774_v25  ;;  %v2673_v62 = vsel %vm1101_vm2, %v9482_v33, 0.0  ;;  %v2605_v25 = vmul.f32 1.442695, %v2542_v11 }
 0x5a0   : > { %v2802_v40 = vunpack.c.l.bf16 %v2770_v10  ;;  %v2540_v10 = vsub.f32 %v9306_v29, %v9439_v58  ;;  %v2645_v29 = vpop.xlane.xlu2 %2644 }
 0x5a1   : > { %v2838_v22 = vmul.f32 %v8656_v18, %v2806_v2  ;;  %7325 = vpow2.f32 %v2605_v25 }
 0x5a2   : > { %v2834_v17 = vmul.f32 %v8630_v15, %v2802_v40  ;;  %3000 = vrot.lane.b32.xlu1 %v7929_v24, %s7715_s17  ;;  %v2601_v60 = vmul.f32 1.442695, %v2540_v10  ;;  %v2528_v40 = vsub.f32 %v9251_v28, %v9458_v0 }
 0x5a3   : > { %v2870_v61 = vpack.c.bf16 %v2838_v22, %v2838_v22 }
 0x5a4   : > { %v2866_v19 = vpack.c.bf16 %v2834_v17, %v2834_v17  ;;  %v9491_v13 = vpop.eup %7323  ;;  %v2577_v17 = vmul.f32 1.442695, %v2528_v40 }
 0x5a5   : > { %v2973_v30 = vunpack.c.l.b16 %v2870_v61  ;;  %v2688_v14 = vsel %vm1101_vm2, %v9491_v13, 0.0 }
 0x5a6   : > { %v2923_v4 = vunpack.c.l.b16 %v2866_v19 }
 0x5a7   : > { %v2974_v31 = vpack.c.b16 %v2973_v30, %v2972_v53  ;;  %v9497_v54 = vpop.eup %7325 }
 0x5a8   : > { %v2924_v41 = vpack.c.b16 %v2923_v4, %v2922_v12  ;;  %v2700_v63 = vsel %vm1101_vm2, %v9497_v54, 0.0 }
 0x5a9   : > { %6762 = vmatmul.msk.bf16.vlgmr.msra.gmra.mxu3 %vm1101_vm2, %v2974_v31  ;;  %2677 = vadd.xlane.f32.xlu2 %v2676_v50 }
 0x5aa   : > { %3188 = vmatpush.bf16.msra.mxu3 %v11935_v49  ;;  %6760 = vmatmul.msk.bf16.vlgmr.msra.gmra.mxu1 %vm1101_vm2, %v2924_v41 }
 0x5ab   : > { %3138 = vmatpush.bf16.msra.mxu1 %v9017_v21 }
 0x5ae   : > { %2674 = vadd.xlane.f32.xlu0 %v2673_v62 }
 0x5b3   : > { %v2621_v2 = vpop.xlane.xlu1 %2620 }
 0x5b4   : > { %7327 = vrcp.f32 %v2621_v2 }
 0x5b5   : > { %7329 = vpow2.f32 %v2601_v60 }
 0x5b6   : > { %2689 = vadd.xlane.f32.xlu0 %v2688_v14 }
 0x5ba   : > { %v7328_v21 = vpop.eup %7327 }
 0x5bb   : > { %v2739_v26 = vmul.f32 %v7328_v21, %v9351_v20  ;;  %v2624_v52 = vpop.xlane.xlu0 %2623  ;;  %v9504_v61 = vpop.eup %7329 }
 0x5bc   : > { %v2648_v22 = vpop.xlane.xlu1 %2647  ;;  %7331 = vrcp.f32 %v2624_v52  ;;  %v2694_v4 = vsel %vm1101_vm2, %v9504_v61, 0.0 }
 0x5bd   : > { %v2771_v58 = vpack.c.bf16 %v2739_v26, %v2739_v26  ;;  %7333 = vrcp.f32 %v2648_v22 }
 0x5be   : > { %2701 = vadd.xlane.f32.xlu0 %v2700_v63  ;;  %7335 = vrcp.f32 %v2645_v29  ;;  %v11936_v63 = vld [vmem:[#allocation44_spill] sm:$0xff] }
 0x5bf   : > { %v2803_v34 = vunpack.c.l.bf16 %v2771_v58  ;;  %7337 = vpow2.f32 %v2577_v17 }
 0x5c1   : > { %4763 = vrot.lane.b32.xlu2 %v11784_v42, %s7716_s15  ;;  %v2835_v30 = vmul.f32 %v8651_v51, %v2803_v34  ;;  %v12100_v51 = vld [vmem:[#allocation96_spill] sm:$0xff] }
 0x5c2   : > { %v7332_v19 = vpop.eup %7331 }
 0x5c3   : > { %v2740_v28 = vmul.f32 %v7332_v19, %v9357_v3  ;;  %v2663_v20 = vpop.xlane.xlu0 %2662  ;;  %v7334_v0 = vpop.eup %7333  ;;  %v2867_v3 = vpack.c.bf16 %v2835_v30, %v2835_v30 }
 0x5c4   : > { %v2651_v53 = vpop.xlane.xlu1 %2650  ;;  %v7336_v31 = vpop.eup %7335  ;;  %v2748_v35 = vmul.f32 %v7334_v0, %v9361_v9 }
 0x5c5   : > { %v2772_v12 = vpack.c.bf16 %v2740_v28, %v2740_v28  ;;  %7339 = vrcp.f32 %v2651_v53  ;;  %v9513_v50 = vpop.eup %7337  ;;  %v2747_v49 = vmul.f32 %v7336_v31, %v9342_v8  ;;  %v2947_v40 = vunpack.c.l.b16 %v2867_v3 }
 0x5c6   : > { %2695 = vadd.xlane.f32.xlu0 %v2694_v4  ;;  %v2780_v25 = vpack.c.bf16 %v2748_v35, %v2748_v35  ;;  %v2658_v2 = vsel %vm1101_vm2, %v9513_v50, 0.0 }
 0x5c7   : > { %v2804_v41 = vunpack.c.l.bf16 %v2772_v12  ;;  %v2779_v8 = vpack.c.bf16 %v2747_v49, %v2747_v49 }
 0x5c8   : > { %v2812_v52 = vunpack.c.l.bf16 %v2780_v25  ;;  %v11937_v25 = vld [vmem:[#allocation26_spill] sm:$0xff] }
 0x5c9   : > { %v2836_v11 = vmul.f32 %v8646_v44, %v2804_v41  ;;  %4788 = vrot.lane.b32.xlu2 %v11785_v1, %s7716_s15  ;;  %v2811_v58 = vunpack.c.l.bf16 %v2779_v8 }
 0x5ca   : > { %v2844_v34 = vmul.f32 %v8728_v32, %v2812_v52 }
 0x5cb   : > { %v7340_v62 = vpop.eup %7339  ;;  %v2868_v10 = vpack.c.bf16 %v2836_v11, %v2836_v11  ;;  %v9521_v14 = vpop.xlane.xlu0 %2632  ;;  %v2843_v12 = vmul.f32 %v8731_v47, %v2811_v58 }
 0x5cc   : > { %v2749_v9 = vmul.f32 %v7340_v62, %v9371_v37  ;;  %v2639_v60 = vpop.xlane.xlu2 %2638  ;;  %v2654_v21 = vpop.xlane.xlu1 %2653  ;;  %2659 = vadd.xlane.f32.xlu1 %v2658_v2  ;;  %v2876_v35 = vpack.c.bf16 %v2844_v34, %v2844_v34 }
 0x5cd   : > { %v2948_v26 = vunpack.c.l.b16 %v2868_v10  ;;  %7341 = vrcp.f32 %v2639_v60  ;;  %v2875_v3 = vpack.c.bf16 %v2843_v12, %v2843_v12 }
 0x5ce   : > { %7343 = vrcp.f32 %v2654_v21  ;;  %v2781_v29 = vpack.c.bf16 %v2749_v9, %v2749_v9  ;;  %v3048_v10 = vunpack.c.l.b16 %v2876_v35  ;;  %v11938_v9 = vld [vmem:[#allocation113_spill] sm:$0xff]  ;;  %v11941_v35 = vld [vmem:[#allocation76_spill] sm:$0xff] }
 0x5cf   : > { %v2949_v22 = vpack.c.b16 %v2948_v26, %v2947_v40  ;;  %v3047_v26 = vunpack.c.l.b16 %v2875_v3 }
 0x5d0   : > { %v2813_v37 = vunpack.c.l.bf16 %v2781_v29 }
 0x5d1   : > { %6761 = vmatmul.msk.bf16.vlgmr.msra.gmra.mxu2 %vm1101_vm2, %v2949_v22  ;;  %v11939_v22 = vld [vmem:[#allocation108_spill] sm:$0xff] }
 0x5d2   : > { %3163 = vmatpush.bf16.msra.mxu2 %v11936_v63  ;;  %v2845_v41 = vmul.f32 %v8751_v23, %v2813_v37 }
 0x5d3   : > { %v7342_v17 = vpop.eup %7341  ;;  %v9527_v19 = vpop.xlane.xlu0 %2488 }
 0x5d4   : > { %v7344_v28 = vpop.eup %7343  ;;  %v2745_v0 = vmul.f32 %v7342_v17, %v9385_v46  ;;  %v2642_v53 = vpop.xlane.xlu1 %2641  ;;  %v2877_v2 = vpack.c.bf16 %v2845_v41, %v2845_v41  ;;  %v3049_v17 = vpack.c.b16 %v3048_v10, %v3047_v26 }
 0x5d5   : > { %v2666_v30 = vpop.xlane.xlu2 %2665  ;;  %v2750_v4 = vmul.f32 %v7344_v28, %v9381_v5  ;;  %7345 = vrcp.f32 %v2642_v53 }
 0x5d6   : > { %v2777_v31 = vpack.c.bf16 %v2745_v0, %v2745_v0  ;;  %7347 = vrcp.f32 %v2666_v30  ;;  %v3072_v34 = vunpack.c.l.b16 %v2877_v2 }
 0x5d7   : > { %v2782_v49 = vpack.c.bf16 %v2750_v4, %v2750_v4  ;;  %7349 = vrcp.f32 %v2663_v20  ;;  %v11940_v4 = vld [vmem:[#allocation109_spill] sm:$0xff] }
 0x5d8   : > { %v2809_v62 = vunpack.c.l.bf16 %v2777_v31 }
 0x5d9   : > { %v2814_v11 = vunpack.c.l.bf16 %v2782_v49 }
 0x5da   : > { %4738 = vrot.lane.b32.xlu0 %v11937_v25, %s7716_s15  ;;  %v2841_v29 = vmul.f32 %v11939_v22, %v2809_v62 }
 0x5db   : > { %v7346_v46 = vpop.eup %7345  ;;  %v2846_v60 = vmul.f32 %v11938_v9, %v2814_v11  ;;  %v2492_v58 = vpop.xlane.xlu0 %2491  ;;  %v11942_v11 = vld [vmem:[#allocation81_spill] sm:$0xff] }
 0x5dc   : > { %v2746_v5 = vmul.f32 %v7346_v46, %v9400_v48  ;;  %v2636_v21 = vpop.xlane.xlu1 %2635  ;;  %v7348_v40 = vpop.eup %7347  ;;  %v2536_v48 = vsub.f32 %v9413_v38, %v2492_v58  ;;  %v2873_v12 = vpack.c.bf16 %v2841_v29, %v2841_v29  ;;  %v11943_v46 = vld [vmem:[#allocation38_spill] sm:$0xff]  ;;  %v11944_v29 = vld [vmem:[#allocation153_spill] sm:$0xff] }
 0x5dd   : > { %v2669_v8 = vpop.xlane.xlu2 %2668  ;;  %v2878_v52 = vpack.c.bf16 %v2846_v60, %v2846_v60  ;;  %v7350_v63 = vpop.eup %7349  ;;  %v2754_v0 = vmul.f32 %v7348_v40, %v9398_v39 }
 0x5de   : > { %v2778_v20 = vpack.c.bf16 %v2746_v5, %v2746_v5  ;;  %7351 = vrcp.f32 %v2669_v8  ;;  %v2753_v30 = vmul.f32 %v7350_v63, %v9368_v27  ;;  %v2593_v38 = vmul.f32 1.442695, %v2536_v48  ;;  %v11946_v63 = vld [vmem:[#allocation5_spill] sm:$0xff] }
 0x5df   : > { %v3073_v37 = vunpack.c.l.b16 %v2878_v52  ;;  %v2786_v3 = vpack.c.bf16 %v2754_v0, %v2754_v0  ;;  %v3022_v10 = vunpack.c.l.b16 %v2873_v12  ;;  %v11949_v12 = vld [vmem:[#allocation152_spill] sm:$0xff] }
 0x5e0   : > { %v2810_v28 = vunpack.c.l.bf16 %v2778_v20  ;;  %v2785_v27 = vpack.c.bf16 %v2753_v30, %v2753_v30 }
 0x5e1   : > { %v3074_v53 = vpack.c.b16 %v3073_v37, %v3072_v34  ;;  %6765 = vmatmul.msk.bf16.vlgmr.msrb.gmra.mxu2 %vm1101_vm2, %v3049_v17  ;;  %v2818_v8 = vunpack.c.l.bf16 %v2786_v3  ;;  %v11947_v17 = vld [vmem:[#allocation115_spill] sm:$0xff]  ;;  %v11948_v37 = vld [vmem:[#allocation94_spill] sm:$0xff] }
 0x5e2   : > { %v2842_v31 = vmul.f32 %v11940_v4, %v2810_v28  ;;  %3263 = vmatpush.bf16.msrb.mxu2 %v11941_v35  ;;  %v2817_v40 = vunpack.c.l.bf16 %v2785_v27 }
 0x5e3   : > { %6766 = vmatmul.msk.bf16.vlgmr.msrb.gmra.mxu3 %vm1101_vm2, %v3074_v53 }
 0x5e4   : > { %v7352_v41 = vpop.eup %7351  ;;  %v2874_v49 = vpack.c.bf16 %v2842_v31, %v2842_v31  ;;  %3288 = vmatpush.bf16.msrb.mxu3 %v11942_v11  ;;  %v2672_v39 = vpop.xlane.xlu1 %2671  ;;  %v2849_v34 = vmul.f32 %v11947_v17, %v2817_v40  ;;  %v2527_v31 = vsub.f32 %v11949_v12, %v9409_v56 }
 0x5e5   : > { %v2755_v62 = vmul.f32 %v7352_v41, %v9419_v36  ;;  %7353 = vrcp.f32 %v2672_v39  ;;  %4813 = vrot.lane.b32.xlu1 %v11943_v46, %s7716_s15  ;;  %v11945_v36 = vld [vmem:[#allocation75_spill] sm:$0xff] }
 0x5e6   : > { %v3023_v2 = vunpack.c.l.b16 %v2874_v49  ;;  %7355 = vpow2.f32 %v2593_v38  ;;  %v2850_v20 = vmul.f32 %v11945_v36, %v2818_v8  ;;  %v2881_v35 = vpack.c.bf16 %v2849_v34, %v2849_v34  ;;  %v11950_v49 = vld [vmem:[#allocation114_spill] sm:$0xff] }
 0x5e7   : > { %v2787_v60 = vpack.c.bf16 %v2755_v62, %v2755_v62  ;;  %7357 = vrcp.f32 %v2636_v21  ;;  %v2575_v62 = vmul.f32 1.442695, %v2527_v31 }
 0x5e8   : > { %v3024_v5 = vpack.c.b16 %v3023_v2, %v3022_v10  ;;  %v2882_v48 = vpack.c.bf16 %v2850_v20, %v2850_v20  ;;  %v3122_v38 = vunpack.c.l.b16 %v2881_v35  ;;  %7359 = vrcp.f32 %v9521_v14 }
 0x5e9   : > { %v2819_v26 = vunpack.c.l.bf16 %v2787_v60  ;;  %7361 = vpow2.f32 %v2575_v62 }
 0x5ea   : > { %6764 = vmatmul.msk.bf16.vlgmr.msrb.gmra.mxu1 %vm1101_vm2, %v3024_v5  ;;  %v3123_v11 = vunpack.c.l.b16 %v2882_v48  ;;  %v11951_v48 = vld [vmem:[#allocation107_spill] sm:$0xff] }
 0x5eb   : > { %v7354_v52 = vpop.eup %7353  ;;  %3238 = vmatpush.bf16.msrb.mxu1 %v11944_v29  ;;  %v2851_v28 = vmul.f32 %v11948_v37, %v2819_v26  ;;  %v12032_v37 = vld [vmem:[#allocation121_spill] sm:$0xff] }
 0x5ec   : > { %v2756_v58 = vmul.f32 %v7354_v52, %v9428_v43  ;;  %v9557_v53 = vpop.eup %7355  ;;  %v3124_v2 = vpack.c.b16 %v3123_v11, %v3122_v38  ;;  %v2687_v56 = vpop.xlane.xlu1 %2686 }
 0x5ed   : > { %5050 = vrot.lane.b32.xlu1 %v11946_v63, %s7717_s8  ;;  %v2883_v41 = vpack.c.bf16 %v2851_v28, %v2851_v28  ;;  %v2682_v3 = vsel %vm1101_vm2, %v9557_v53, 0.0  ;;  %v7358_v5 = vpop.eup %7357 }
 0x5ee   : > { %v2788_v0 = vpack.c.bf16 %v2756_v58, %v2756_v58  ;;  %v7360_v8 = vpop.eup %7359  ;;  %v2744_v40 = vmul.f32 %v7358_v5, %v9417_v55  ;;  %v2535_v58 = vsub.f32 %v9396_v45, %v9527_v19  ;;  %v11952_v55 = vld [vmem:[#allocation106_spill] sm:$0xff]  ;;  %v9579_v35 = vpop.permute.xlu0 %4713  ;;  %v11954_v45 = vld [vmem:[#allocation12_spill] sm:$0xff] }
 0x5ef   : > { %v3147_v27 = vunpack.c.l.b16 %v2883_v41  ;;  %v9568_v26 = vpop.eup %7361  ;;  %v2743_v21 = vmul.f32 %v7360_v8, %v9379_v59  ;;  %11953 = vst [vmem:[#allocation52_spill] sm:$0xff] %v9579_v35  ;;  %v12038_v35 = vld [vmem:[#allocation136_spill] sm:$0xff] }
 0x5f0   : > { %v2820_v30 = vunpack.c.l.bf16 %v2788_v0  ;;  %v2776_v52 = vpack.c.bf16 %v2744_v40, %v2744_v40  ;;  %v2655_v14 = vsel %vm1101_vm2, %v9568_v26, 0.0  ;;  %v2591_v0 = vmul.f32 1.442695, %v2535_v58 }
 0x5f1   : > { %v2775_v20 = vpack.c.bf16 %v2743_v21, %v2743_v21 }
 0x5f2   : > { %v2852_v43 = vmul.f32 %v11950_v49, %v2820_v30  ;;  %2683 = vadd.xlane.f32.xlu2 %v2682_v3  ;;  %v2808_v34 = vunpack.c.l.bf16 %v2776_v52  ;;  %7363 = vpow2.f32 %v2591_v0  ;;  %v11957_v52 = vld [vmem:[#allocation160_spill] sm:$0xff] }
 0x5f3   : > { %v2807_v28 = vunpack.c.l.bf16 %v2775_v20  ;;  %7365 = vrcp.f32 %v2687_v56  ;;  %v11958_v56 = vld [vmem:[#allocation16_spill] sm:$0xff] }
 0x5f4   : > { %v2884_v39 = vpack.c.bf16 %v2852_v43, %v2852_v43  ;;  %v2699_v29 = vpop.xlane.xlu1 %2698  ;;  %v2840_v30 = vmul.f32 %v11951_v48, %v2808_v34  ;;  %v12045_v48 = vld [vmem:[#allocation122_spill] sm:$0xff] }
 0x5f5   : > { %v2839_v59 = vmul.f32 %v11952_v55, %v2807_v28  ;;  %v12044_v55 = vld [vmem:[#allocation15_spill] sm:$0xff] }
 0x5f6   : > { %v3148_v10 = vunpack.c.l.b16 %v2884_v39  ;;  %v2872_v31 = vpack.c.bf16 %v2840_v30, %v2840_v30  ;;  %v9585_v39 = vpop.permute.xlu2 %4638 }
 0x5f7   : > { %v2871_v41 = vpack.c.bf16 %v2839_v59, %v2839_v59  ;;  %v11959_v59 = vld [vmem:[#allocation78_spill] sm:$0xff] }
 0x5f8   : > { %v3149_v60 = vpack.c.b16 %v3148_v10, %v3147_v27  ;;  %v2998_v43 = vunpack.c.l.b16 %v2872_v31  ;;  %v9581_v3 = vpop.eup %7363  ;;  %v11955_v27 = vld [vmem:[#allocation6_spill] sm:$0xff]  ;;  %v9592_v10 = vpop.permute.xlu0 %4688 }
 0x5f9   : > { %v2997_v19 = vunpack.c.l.b16 %v2871_v41  ;;  %v2679_v38 = vsel %vm1101_vm2, %v9581_v3, 0.0  ;;  %v7366_v8 = vpop.eup %7365 }
 0x5fa   : > { %6768 = vmatmul.msk.bf16.vlgmr.msra.gmra.mxu1 %vm1101_vm2, %v3124_v2  ;;  %6769 = vmatmul.msk.bf16.vlgmr.msra.gmra.mxu2 %vm1101_vm2, %v3149_v60  ;;  %v11956_v2 = vld [vmem:[#allocation24_spill] sm:$0xff] }
 0x5fb   : > { %v2999_v62 = vpack.c.b16 %v2998_v43, %v2997_v19  ;;  %v11960_v43 = vld [vmem:[#allocation20_spill] sm:$0xff] }
 0x5fc   : > { %v2693_v12 = vpop.xlane.xlu1 %2692 }
 0x604   : > { %2656 = vadd.xlane.f32.xlu0 %v2655_v14  ;;  %v2761_v14 = vmul.f32 %v7366_v8, %v11957_v52 }
 0x606   : > { %v2793_v30 = vpack.c.bf16 %v2761_v14, %v2761_v14  ;;  %v11963_v14 = vld [vmem:[#allocation123_spill] sm:$0xff] }
 0x60a   : > { %3200 = vrot.lane.b32.xlu2 %v11784_v42, %s7715_s17 }
 0x612   : > { %5216 = vrot.lane.b32.xlu2 %v11954_v45, %s7718_s9 }
 0x614   : > { %v3001_v11 = vpop.permute.xlu1 %3000 }
 0x615   : > { %3013 = vmatpush.bf16.msra.mxu0 %v3001_v11  ;;  %v2825_v11 = vunpack.c.l.bf16 %v2793_v30 }
 0x617   : > { %2680 = vadd.xlane.f32.xlu1 %v2679_v38 }
 0x618   : > { %6763 = vmatmul.msk.bf16.vlgmr.msra.gmra.mxu0 %vm1101_vm2, %v2999_v62  ;;  %5074 = vrot.lane.b32.xlu0 %v11955_v27, %s7717_s8  ;;  %v11961_v62 = vld [vmem:[#allocation161_spill] sm:$0xff] }
 0x61a   : > { %5290 = vrot.lane.b32.xlu2 %v11956_v2, %s7717_s8 }
 0x61c   : > { %v2678_v60 = vpop.xlane.xlu2 %2677 }
 0x61d   : > { %7367 = vrcp.f32 %v2678_v60 }
 0x620   : > { %5048 = vrot.lane.b32.xlu0 %v11946_v63, %s7718_s9  ;;  %v12013_v63 = vld [vmem:[#allocation43_spill] sm:$0xff] }
 0x621   : > { %v2675_v5 = vpop.xlane.xlu0 %2674 }
 0x622   : > { %7369 = vrcp.f32 %v2675_v5  ;;  %5288 = vrot.lane.b32.xlu2 %v11956_v2, %s7718_s9  ;;  %v11962_v5 = vld [vmem:[#allocation13_spill] sm:$0xff] }
 0x623   : > { %v7368_v40 = vpop.eup %7367  ;;  %7371 = vrcp.f32 %v2699_v29  ;;  %v2030_v29 = vld [vmem:[%s11467_s5] sm:$0xf] }
 0x624   : > { %v2758_v21 = vmul.f32 %v7368_v40, %v9477_v6 }
 0x626   : > { %v2790_v20 = vpack.c.bf16 %v2758_v21, %v2758_v21 }
 0x628   : > { %v7370_v58 = vpop.eup %7369  ;;  %3100 = vrot.lane.b32.xlu0 %v11958_v56, %s7715_s17  ;;  %v2822_v34 = vunpack.c.l.bf16 %v2790_v20  ;;  %v2857_v20 = vmul.f32 %v11963_v14, %v2825_v11  ;;  %v12101_v14 = vld [vmem:[#allocation59_spill] sm:$0xff]  ;;  %s6583_s17 = scalar_lea.hbm %s11469_s7, %s6918_s13 }
 0x629   : > { %v2757_v28 = vmul.f32 %v7370_v58, %v9482_v33  ;;  %v2690_v0 = vpop.xlane.xlu0 %2689  ;;  %v7372_v6 = vpop.eup %7371  ;;  %v3503_v33 = vsel %vm3361_vm3, %v2030_v29, 0  ;;  %s6586_s18 = sshll.u32 %s6583_s17, 4  ;;  %s6587_s18 = int_to_ptr.hbm [resolvable:$true] %s6586_s18 }
 0x62a   : > { %7373 = vrcp.f32 %v2690_v0  ;;  %v2854_v31 = vmul.f32 %v11959_v59, %v2822_v34  ;;  %5266 = vrot.lane.b32.xlu2 %v11960_v43, %s7717_s8  ;;  %v2765_v38 = vmul.f32 %v7372_v6, %v11961_v62  ;;  %3512 = vmatpush.bf16.msra.mxu1 %v3503_v33  ;;  %v2889_v6 = vpack.c.bf16 %v2857_v20, %v2857_v20  ;;  %v11968_v20 = vld [vmem:[#allocation67_spill] sm:$0xff] }
 0x62b   : > { %v2789_v41 = vpack.c.bf16 %v2757_v28, %v2757_v28  ;;  %7375 = vrcp.f32 %v2693_v12  ;;  %7077 = vmatpush.bf16.msra.mxu2 %v3503_v33 }
 0x62c   : > { %v2886_v60 = vpack.c.bf16 %v2854_v31, %v2854_v31  ;;  %v2797_v58 = vpack.c.bf16 %v2765_v38, %v2765_v38 }
 0x62d   : > { %v2821_v19 = vunpack.c.l.bf16 %v2789_v41 }
 0x62e   : > { %v3173_v34 = vunpack.c.l.b16 %v2886_v60  ;;  %v2829_v33 = vunpack.c.l.bf16 %v2797_v58 }
 0x62f   : > { %v2853_v8 = vmul.f32 %v11962_v5, %v2821_v19  ;;  %v11964_v19 = vld [vmem:[#allocation124_spill] sm:$0xff] }
 0x630   : > { %v7374_v40 = vpop.eup %7373  ;;  %5146 = vrot.lane.b32.xlu1 %v7929_v24, %s7717_s8  ;;  %5072 = vrot.lane.b32.xlu0 %v11955_v27, %s7718_s9  ;;  %v3626_v29 = vsel %vm675_vm1, %v11964_v19, 0  ;;  %v2861_v58 = vmul.f32 %v11968_v20, %v2829_v33  ;;  %v11971_v33 = vld [vmem:[#allocation7_spill] sm:$0xff]  ;;  %v12061_v20 = vld [vmem:[#allocation65_spill] sm:$0xff] }
 0x631   : > { %v2885_v21 = vpack.c.bf16 %v2853_v8, %v2853_v8  ;;  %v2762_v52 = vmul.f32 %v7374_v40, %v9491_v13  ;;  %v2702_v12 = vpop.xlane.xlu0 %2701  ;;  %v7376_v30 = vpop.eup %7375  ;;  %v11965_v13 = vld [vmem:[#allocation162_spill] sm:$0xff]  ;;  %v11966_v8 = vld [vmem:[#allocation120_spill] sm:$0xff] }
 0x632   : > { %7377 = vrcp.f32 %v2702_v12  ;;  %5312 = vrot.lane.b32.xlu2 %v11937_v25, %s7718_s9  ;;  %v2763_v62 = vmul.f32 %v7376_v30, %v11965_v13  ;;  %v3222_v12 = vunpack.c.l.b16 %v2889_v6  ;;  %v11969_v13 = vld [vmem:[#allocation29_spill] sm:$0xff] }
 0x633   : > { %v3172_v28 = vunpack.c.l.b16 %v2885_v21  ;;  %v2794_v0 = vpack.c.bf16 %v2762_v52, %v2762_v52  ;;  %v11967_v21 = vld [vmem:[#allocation40_spill] sm:$0xff] }
 0x635   : > { %v3174_v31 = vpack.c.b16 %v3173_v34, %v3172_v28  ;;  %v2826_v41 = vunpack.c.l.bf16 %v2794_v0  ;;  %v2795_v34 = vpack.c.bf16 %v2763_v62, %v2763_v62 }
 0x637   : > { %v2858_v11 = vmul.f32 %v11966_v8, %v2826_v41  ;;  %6770 = vmatmul.msk.bf16.vlgmr.msra.gmra.mxu3 %vm1101_vm2, %v3174_v31  ;;  %v2893_v41 = vpack.c.bf16 %v2861_v58, %v2861_v58  ;;  %v2827_v19 = vunpack.c.l.bf16 %v2795_v34 }
 0x638   : > { %v7378_v38 = vpop.eup %7377  ;;  %5218 = vrot.lane.b32.xlu1 %v11954_v45, %s7717_s8  ;;  %3635 = vmatpush.bf16.xpose.msra.mxu3 %v3626_v29 }
 0x639   : > { %v2890_v60 = vpack.c.bf16 %v2858_v11, %v2858_v11  ;;  %v2766_v40 = vmul.f32 %v7378_v38, %v9497_v54  ;;  %4838 = vrot.lane.b32.xlu0 %v11967_v21, %s7716_s15  ;;  %v2696_v52 = vpop.xlane.xlu0 %2695  ;;  %v11970_v11 = vld [vmem:[#allocation10_spill] sm:$0xff]  ;;  %v3272_v62 = vunpack.c.l.b16 %v2893_v41  ;;  %s7665_s15 = scalar_lea.hbm %s11469_s7, 512 }
 0x63a   : > { %7379 = vrcp.f32 %v2696_v52 }
 0x63b   : > { %v3223_v28 = vunpack.c.l.b16 %v2890_v60  ;;  %v2798_v0 = vpack.c.bf16 %v2766_v40, %v2766_v40  ;;  %v11972_v60 = vld [vmem:[#allocation129_spill] sm:$0xff] }
 0x63c   : > { %v2859_v40 = vmul.f32 %v11972_v60, %v2827_v19 }
 0x63d   : > { %v3224_v30 = vpack.c.b16 %v3223_v28, %v3222_v12  ;;  %v2830_v31 = vunpack.c.l.bf16 %v2798_v0  ;;  %v11973_v28 = vld [vmem:[#allocation118_spill] sm:$0xff] }
 0x63e   : > { %v3674_v0 = vsel %vm675_vm1, %v11973_v28, 0  ;;  %v11981_v28 = vld [vmem:[#allocation8_spill] sm:$0xff] }
 0x63f   : > { %v2862_v29 = vmul.f32 %v11969_v13, %v2830_v31  ;;  %6772 = vmatmul.msk.bf16.vlgmr.msrb.gmra.mxu1 %vm1101_vm2, %v3224_v30  ;;  %v2891_v30 = vpack.c.bf16 %v2859_v40, %v2859_v40  ;;  %v11974_v31 = vld [vmem:[#allocation131_spill] sm:$0xff] }
 0x640   : > { %v7380_v54 = vpop.eup %7379  ;;  %5170 = vrot.lane.b32.xlu1 %v11970_v11, %s7717_s8 }
 0x641   : > { %v2894_v38 = vpack.c.bf16 %v2862_v29, %v2862_v29  ;;  %v2764_v6 = vmul.f32 %v7380_v54, %v9504_v61  ;;  %5098 = vrot.lane.b32.xlu0 %v11971_v33, %s7717_s8  ;;  %v3247_v41 = vunpack.c.l.b16 %v2891_v30  ;;  %v11975_v29 = vld [vmem:[#allocation137_spill] sm:$0xff]  ;;  %v11976_v54 = vld [vmem:[#allocation72_spill] sm:$0xff] }
 0x642   : > { %v11983_v30 = vld [vmem:[#allocation80_spill] sm:$0xff] }
 0x643   : > { %v3273_v52 = vunpack.c.l.b16 %v2894_v38  ;;  %v2796_v12 = vpack.c.bf16 %v2764_v6, %v2764_v6  ;;  %v2014_v38 = vpack.c.bf16 %v11976_v54, %v11975_v29  ;;  %v11986_v54 = vld [vmem:[#allocation99_spill] sm:$0xff] }
 0x645   : > { %v3274_v58 = vpack.c.b16 %v3273_v52, %v3272_v62  ;;  %v2828_v34 = vunpack.c.l.bf16 %v2796_v12  ;;  %v11977_v62 = vld [vmem:[#allocation18_spill] sm:$0xff]  ;;  %v2660_v52 = vpop.xlane.xlu1 %2659 }
 0x646   : > { %v3602_v40 = vsel %vm675_vm1, %v11977_v62, 0 }
 0x647   : > { %v2860_v2 = vmul.f32 %v11974_v31, %v2828_v34  ;;  %6774 = vmatmul.msk.bf16.vlgmr.msrb.gmra.mxu3 %vm1101_vm2, %v3274_v58  ;;  %v11980_v34 = vld [vmem:[#allocation21_spill] sm:$0xff]  ;;  %v12022_v31 = vld [vmem:[#allocation27_spill] sm:$0xff] }
 0x648   : > { %5168 = vrot.lane.b32.xlu1 %v11970_v11, %s7718_s9  ;;  %3683 = vmatpush.bf16.xpose.msrb.mxu3 %v3674_v0  ;;  %v11982_v0 = vld [vmem:[#allocation41_spill] sm:$0xff] }
 0x649   : > { %v2892_v61 = vpack.c.bf16 %v2860_v2, %v2860_v2  ;;  %5144 = vrot.lane.b32.xlu0 %v7929_v24, %s7718_s9  ;;  %v11978_v2 = vld [vmem:[#allocation39_spill] sm:$0xff] }
 0x64a   : > { %v3722_v12 = vsel %vm675_vm1, %v11978_v2, 0 }
 0x64b   : > { %v3248_v19 = vunpack.c.l.b16 %v2892_v61  ;;  %v2015_v61 = vpack.c.bf16 %v11983_v30, %v11982_v0  ;;  %v11990_v0 = vld [vmem:[#allocation37_spill] sm:$0xff]  ;;  %v11991_v30 = vld [vmem:[#allocation135_spill] sm:$0xff] }
 0x64d   : > { %v3249_v6 = vpack.c.b16 %v3248_v19, %v3247_v41  ;;  %v11984_v41 = vld [vmem:[#allocation36_spill] sm:$0xff]  ;;  %v11985_v19 = vld [vmem:[#allocation139_spill] sm:$0xff] }
 0x64e   : > { %v2025_v29 = vpack.c.bf16 %v11985_v19, %v11984_v41  ;;  %v11992_v41 = vld [vmem:[#allocation143_spill] sm:$0xff]  ;;  %v11993_v19 = vld [vmem:[#allocation144_spill] sm:$0xff] }
 0x64f   : > { %6773 = vmatmul.msk.bf16.vlgmr.msrb.gmra.mxu2 %vm1101_vm2, %v3249_v6  ;;  %6792 = vmatmul.msk.bf16.vlgmr.msra.gmra.mxu1 %vm675_vm1, %v2014_v38  ;;  %v3650_v38 = vsel %vm675_vm1, %v11986_v54, 0  ;;  %v9694_v54 = vpop.permute.xlu0 %4738 }
 0x650   : > { %5242 = vrot.lane.b32.xlu1 %v11958_v56, %s7717_s8  ;;  %3611 = vmatpush.bf16.xpose.msrb.mxu2 %v3602_v40  ;;  %v11987_v40 = vld [vmem:[#allocation126_spill] sm:$0xff] }
 0x651   : > { %5096 = vrot.lane.b32.xlu0 %v11971_v33, %s7718_s9  ;;  %v3770_v2 = vsel %vm675_vm1, %v11987_v40, 0  ;;  %v11996_v40 = vld [vmem:[#allocation125_spill] sm:$0xff] }
 0x657   : > { %v9661_v58 = vpop.permute.xlu1 %4813  ;;  %6809 = vmatmul.msk.bf16.vlgmr.msra.gmra.mxu3 %vm675_vm1, %v11980_v34  ;;  %v11989_v34 = vld [vmem:[#allocation11_spill] sm:$0xff] }
 0x658   : > { %11979 = vst [vmem:[#allocation44_spill] sm:$0xff] %v9661_v58  ;;  %5240 = vrot.lane.b32.xlu1 %v11958_v56, %s7718_s9  ;;  %3731 = vmatpush.bf16.xpose.msra.mxu3 %v3722_v12  ;;  %v11988_v12 = vld [vmem:[#allocation119_spill] sm:$0xff]  ;;  %v12031_v58 = vld [vmem:[#allocation33_spill] sm:$0xff] }
 0x659   : > { %5122 = vrot.lane.b32.xlu0 %v11981_v28, %s7717_s8 }
 0x65f   : > { %v5051_v6 = vpop.permute.xlu1 %5050  ;;  %6793 = vmatmul.msk.bf16.gmra.mxu1 %vm675_vm1, %v2015_v61  ;;  %6803 = vmatmul.msk.bf16.vlgmr.msra.gmra.mxu2 %vm675_vm1, %v2025_v29  ;;  %v2016_v61 = vpack.c.bf16 %v11991_v30, %v11990_v0  ;;  %v2026_v29 = vpack.c.bf16 %v11993_v19, %v11992_v41  ;;  %v11998_v0 = vld [vmem:[#allocation48_spill] sm:$0xff]  ;;  %v12000_v41 = vld [vmem:[#allocation138_spill] sm:$0xff] }
 0x660   : > { %v5056_v62 = vsel %vm675_vm1, %v5051_v6, 0  ;;  %5264 = vrot.lane.b32.xlu1 %v11960_v43, %s7718_s9  ;;  %3659 = vmatpush.bf16.xpose.msra.mxu2 %v3650_v38  ;;  %v11994_v38 = vld [vmem:[#allocation47_spill] sm:$0xff] }
 0x661   : > { %5120 = vrot.lane.b32.xlu0 %v11981_v28, %s7718_s9  ;;  %5065 = vmatpush.bf16.xpose.msrb.mxu1 %v5056_v62  ;;  %v3818_v6 = vsel %vm675_vm1, %v11994_v38, 0  ;;  %v9700_v62 = vpop.permute.xlu2 %4763  ;;  %v12005_v28 = vld [vmem:[#allocation134_spill] sm:$0xff] }
 0x662   : > { %11995 = vst [vmem:[#allocation76_spill] sm:$0xff] %v9700_v62  ;;  %v12033_v62 = vld [vmem:[#allocation23_spill] sm:$0xff] }
 0x667   : > { %6811 = vmatmul.msk.bf16.vlgmr.msrb.gmra.mxu3 %vm675_vm1, %v11988_v12  ;;  %v11997_v12 = vld [vmem:[#allocation140_spill] sm:$0xff] }
 0x668   : > { %3779 = vmatpush.bf16.xpose.msrb.mxu3 %v3770_v2  ;;  %v2017_v30 = vpack.c.bf16 %v11998_v0, %v11997_v12  ;;  %v12001_v0 = vld [vmem:[#allocation28_spill] sm:$0xff] }
 0x669   : > { %5194 = vrot.lane.b32.xlu0 %v11989_v34, %s7717_s8  ;;  %v9712_v38 = vpop.permute.xlu2 %4788 }
 0x66f   : > { %6794 = vmatmul.msk.bf16.gmra.mxu1 %vm675_vm1, %v2016_v61  ;;  %6804 = vmatmul.msk.bf16.gmra.mxu2 %vm675_vm1, %v2026_v29  ;;  %v11999_v61 = vld [vmem:[#allocation57_spill] sm:$0xff] }
 0x670   : > { %v2027_v19 = vpack.c.bf16 %v12000_v41, %v11999_v61  ;;  %v12002_v61 = vld [vmem:[#allocation130_spill] sm:$0xff] }
 0x671   : > { %5192 = vrot.lane.b32.xlu0 %v11989_v34, %s7718_s9  ;;  %v2684_v41 = vpop.xlane.xlu2 %2683  ;;  %v12004_v34 = vld [vmem:[#allocation69_spill] sm:$0xff] }
 0x677   : > { %6813 = vmatmul.msk.bf16.vlgmr.msra.gmra.mxu3 %vm675_vm1, %v11996_v40  ;;  %v2657_v2 = vpop.xlane.xlu0 %2656  ;;  %v9716_v40 = vpop.f32.mrf.mxu1 }
 0x678   : > { %3827 = vmatpush.bf16.xpose.msra.mxu3 %v3818_v6  ;;  %7381 = vrcp.f32 %v2657_v2 }
 0x679   : > { %5314 = vrot.lane.b32.xlu0 %v11937_v25, %s7717_s8  ;;  %7383 = vrcp.f32 %v2660_v52  ;;  %v3866_v52 = vsel %vm675_vm1, %v12001_v0, 0  ;;  %v3201_v27 = vpop.permute.xlu2 %3200 }
 0x67e   : > { %v7382_v29 = vpop.eup %7381 }
 0x67f   : > { %6795 = vmatmul.msk.bf16.gmra.mxu1 %vm675_vm1, %v2017_v30  ;;  %6805 = vmatmul.msk.bf16.gmra.mxu2 %vm675_vm1, %v2027_v19  ;;  %v7384_v6 = vpop.eup %7383  ;;  %v2751_v2 = vmul.f32 %v7382_v29, %v9568_v26  ;;  %v2018_v26 = vpack.c.bf16 %v12005_v28, %v12004_v34  ;;  %v12006_v29 = vld [vmem:[#allocation45_spill] sm:$0xff]  ;;  %v9730_v0 = vpop.f32.mrf.mxu1 }
 0x680   : > { %v2752_v12 = vmul.f32 %v7384_v6, %v9513_v50  ;;  %v12007_v50 = vld [vmem:[#allocation141_spill] sm:$0xff] }
 0x681   : > { %5338 = vrot.lane.b32.xlu0 %v11784_v42, %s7717_s8  ;;  %v2783_v30 = vpack.c.bf16 %v2751_v2, %v2751_v2  ;;  %v2028_v6 = vpack.c.bf16 %v12007_v50, %v12006_v29  ;;  %v12008_v2 = vld [vmem:[#allocation97_spill] sm:$0xff]  ;;  %v9739_v29 = vpop.f32.mrf.mxu3 }
 0x682   : > { %v2784_v19 = vpack.c.bf16 %v2752_v12, %v2752_v12 }
 0x683   : > { %v2815_v56 = vunpack.c.l.bf16 %v2783_v30 }
 0x684   : > { %v2816_v33 = vunpack.c.l.bf16 %v2784_v19 }
 0x685   : > { %v2847_v12 = vmul.f32 %v12008_v2, %v2815_v56  ;;  %v12011_v56 = vld [vmem:[#allocation55_spill] sm:$0xff]  ;;  %v12037_v2 = vld [vmem:[#allocation42_spill] sm:$0xff] }
 0x686   : > { %v2022_v32 = vpack.c.bf16 %v12038_v35, %v12037_v2  ;;  %v3842_v35 = vsel %vm675_vm1, %v12044_v55, 0 }
 0x687   : > { %6815 = vmatmul.msk.bf16.vlgmr.msrb.gmra.mxu3 %vm675_vm1, %v12002_v61  ;;  %v12009_v61 = vld [vmem:[#allocation100_spill] sm:$0xff]  ;;  %v2879_v28 = vpack.c.bf16 %v2847_v12, %v2847_v12  ;;  %v9742_v50 = vpop.f32.mrf.mxu1  ;;  %v9748_v12 = vpop.f32.mrf.mxu2 }
 0x688   : > { %3875 = vmatpush.bf16.xpose.msrb.mxu3 %v3866_v52 }
 0x68a   : > { %v2681_v43 = vpop.xlane.xlu1 %2680  ;;  %v9724_v25 = vpop.permute.xlu0 %5074 }
 0x68b   : > { %12003 = vst [vmem:[#allocation81_spill] sm:$0xff] %v9724_v25  ;;  %7385 = vrcp.f32 %v2681_v43  ;;  %v2848_v43 = vmul.f32 %v12009_v61, %v2816_v33  ;;  %v3097_v33 = vunpack.c.l.b16 %v2879_v28  ;;  %v12014_v28 = vld [vmem:[#allocation145_spill] sm:$0xff] }
 0x68c   : > { %7387 = vrcp.f32 %v2684_v41  ;;  %v12023_v25 = vld [vmem:[#allocation77_spill] sm:$0xff] }
 0x68d   : > { %v2880_v41 = vpack.c.bf16 %v2848_v43, %v2848_v43 }
 0x68f   : > { %6796 = vmatmul.msk.bf16.gmra.mxu1 %vm675_vm1, %v2018_v26  ;;  %6806 = vmatmul.msk.bf16.gmra.mxu2 %vm675_vm1, %v2028_v6  ;;  %v12010_v26 = vld [vmem:[#allocation133_spill] sm:$0xff]  ;;  %v3098_v24 = vunpack.c.l.b16 %v2880_v41 }
 0x690   : > { %v3914_v6 = vsel %vm675_vm1, %v12010_v26, 0  ;;  %v12012_v26 = vld [vmem:[#allocation79_spill] sm:$0xff] }
 0x691   : > { %v7386_v52 = vpop.eup %7385 }
 0x692   : > { %v9736_v30 = vpop.permute.xlu0 %5048  ;;  %v7388_v11 = vpop.eup %7387  ;;  %v2759_v34 = vmul.f32 %v7386_v52, %v9581_v3 }
 0x693   : > { %v2760_v19 = vmul.f32 %v7388_v11, %v9557_v53  ;;  %v6775_v53 = vld [vmem:[%s11467_s5 + $0x4] sm:$0xf]  ;;  %v3099_v11 = vpack.c.b16 %v3098_v24, %v3097_v33  ;;  %v9763_v24 = vpop.f32.mrf.mxu1 }
 0x694   : > { %v2791_v45 = vpack.c.bf16 %v2759_v34, %v2759_v34  ;;  %v12015_v34 = vld [vmem:[#allocation146_spill] sm:$0xff]  ;;  %v3363_v41 = vsel %vm3361_vm3, %v6775_v53, 0 }
 0x695   : > { %v2792_v3 = vpack.c.bf16 %v2760_v19, %v2760_v19  ;;  %v9761_v19 = vpop.f32.mrf.mxu3 }
 0x696   : > { %v2823_v43 = vunpack.c.l.bf16 %v2791_v45  ;;  %v12016_v45 = vld [vmem:[#allocation116_spill] sm:$0xff]  ;;  %v3298_v55 = vpack.c.bf16 %v9761_v19, %v9739_v29  ;;  %v12054_v19 = vld [vmem:[#allocation127_spill] sm:$0xff] }
 0x697   : > { %6817 = vmatmul.msk.bf16.vlgmr.msra.gmra.mxu3 %vm675_vm1, %v12011_v56  ;;  %v2019_v56 = vpack.c.bf16 %v12013_v63, %v12012_v26  ;;  %v2824_v60 = vunpack.c.l.bf16 %v2792_v3  ;;  %v12017_v63 = vld [vmem:[#allocation117_spill] sm:$0xff]  ;;  %v9769_v26 = vpop.f32.mrf.mxu2 }
 0x698   : > { %3923 = vmatpush.bf16.xpose.msra.mxu3 %v3914_v6  ;;  %v2029_v6 = vpack.c.bf16 %v12015_v34, %v12014_v28  ;;  %v12020_v28 = vld [vmem:[#allocation61_spill] sm:$0xff] }
 0x699   : > { %v2856_v33 = vmul.f32 %v12017_v63, %v2824_v60  ;;  %v12030_v63 = vld [vmem:[#allocation54_spill] sm:$0xff] }
 0x69a   : > { %v3101_v52 = vpop.permute.xlu0 %3100  ;;  %v2021_v49 = vpack.c.bf16 %v12031_v58, %v12030_v63  ;;  %v12035_v63 = vld [vmem:[#allocation150_spill] sm:$0xff]  ;;  %v12039_v58 = vld [vmem:[#allocation132_spill] sm:$0xff] }
 0x69b   : > { %3113 = vmatpush.bf16.msrb.mxu0 %v3101_v52  ;;  %v2888_v53 = vpack.c.bf16 %v2856_v33, %v2856_v33 }
 0x69d   : > { %v9775_v34 = vpop.f32.mrf.mxu3 }
 0x69e   : > { %6767 = vmatmul.msk.bf16.vlgmr.msrb.gmra.mxu0 %vm1101_vm2, %v3099_v11  ;;  %v12019_v11 = vld [vmem:[#allocation148_spill] sm:$0xff] }
 0x69f   : > { %3213 = vmatpush.bf16.msra.mxu0 %v3201_v27  ;;  %6797 = vmatmul.msk.bf16.gmra.mxu1 %vm675_vm1, %v2019_v56  ;;  %v2855_v27 = vmul.f32 %v12016_v45, %v2823_v43  ;;  %v3962_v56 = vsel %vm675_vm1, %v12019_v11, 0  ;;  %v3198_v43 = vunpack.c.l.b16 %v2888_v53  ;;  %v9783_v33 = vpop.f32.mrf.mxu2  ;;  %v12024_v11 = vld [vmem:[#allocation17_spill] sm:$0xff]  ;;  %v2915_v45 = vpop.f32.mrf.mxu0 }
 0x6a0   : > { %6807 = vmatmul.msk.bf16.gmra.mxu2 %vm675_vm1, %v2029_v6 }
 0x6a1   : > { %v2887_v3 = vpack.c.bf16 %v2855_v27, %v2855_v27  ;;  %v2020_v27 = vpack.c.bf16 %v12023_v25, %v12022_v31  ;;  %v12027_v25 = vld [vmem:[#allocation34_spill] sm:$0xff] }
 0x6a2   : > { %v9767_v52 = vpop.permute.xlu0 %5072 }
 0x6a3   : > { %3372 = vmatpush.bf16.msrb.mxu0 %v3363_v41  ;;  %12018 = vst [vmem:[#allocation153_spill] sm:$0xff] %v9767_v52  ;;  %v3197_v6 = vunpack.c.l.b16 %v2887_v3  ;;  %v9777_v41 = vpop.f32.mrf.mxu1  ;;  %v12025_v3 = vld [vmem:[#allocation14_spill] sm:$0xff] }
 0x6a5   : > { %v3199_v52 = vpack.c.b16 %v3198_v43, %v3197_v6  ;;  %v9791_v53 = vpop.f32.mrf.mxu3 }
 0x6a7   : > { %6819 = vmatmul.msk.bf16.vlgmr.msrb.gmra.mxu3 %vm675_vm1, %v12020_v28  ;;  %v3698_v28 = vsel %vm675_vm1, %v12024_v11, 0  ;;  %v9799_v31 = vpop.f32.mrf.mxu2  ;;  %v2917_v43 = vpop.f32.mrf.mxu0 }
 0x6a8   : > { %3971 = vmatpush.bf16.xpose.msrb.mxu3 %v3962_v56 }
 0x6ab   : > { %v9779_v60 = vpop.permute.xlu0 %4838  ;;  %v9795_v6 = vpop.f32.mrf.mxu1 }
 0x6ac   : > { %12021 = vst [vmem:[#allocation75_spill] sm:$0xff] %v9779_v60 }
 0x6ae   : > { %6771 = vmatmul.msk.bf16.vlgmr.msra.gmra.mxu0 %vm1101_vm2, %v3199_v52  ;;  %v12028_v52 = vld [vmem:[#allocation151_spill] sm:$0xff] }
 0x6af   : > { %6798 = vmatmul.msk.bf16.gmra.mxu1 %vm675_vm1, %v2020_v27 }
 0x6b0   : > { %6808 = vmatmul.msk.bf16.vlgmr.msrb.gmra.mxu2 %vm675_vm1, %v12025_v3  ;;  %v3295_v3 = vpack.c.bf16 %v2917_v43, %v2915_v45 }
 0x6b1   : > { %3707 = vmatpush.bf16.xpose.msrb.mxu2 %v3698_v28 }
 0x6b3   : > { %v9793_v56 = vpop.permute.xlu0 %5098 }
 0x6b4   : > { %12026 = vst [vmem:[#allocation115_spill] sm:$0xff] %v9793_v56 }
 0x6b7   : > { %6821 = vmatmul.msk.bf16.vlgmr.msra.gmra.mxu3 %vm675_vm1, %v12027_v25  ;;  %v3746_v25 = vsel %vm675_vm1, %v12032_v37, 0  ;;  %v12036_v37 = vld [vmem:[#allocation154_spill] sm:$0xff] }
 0x6b8   : > { %4501 = vmatpush.bf16.msra.mxu3 %v12028_v52  ;;  %v9816_v52 = vpop.f32.mrf.mxu2 }
 0x6ba   : > { %v9802_v11 = vpop.f32.mrf.mxu3 }
 0x6bb   : > { %v9804_v27 = vpop.permute.xlu0 %5144 }
 0x6bc   : > { %12029 = vst [vmem:[#allocation152_spill] sm:$0xff] %v9804_v27  ;;  %v9806_v28 = vpop.f32.mrf.mxu1 }
 0x6be   : > { %6776 = vmatmul.msk.bf16.vlgmr.msrb.gmra.mxu0 %vm675_vm1, %v3295_v3 }
 0x6bf   : > { %6799 = vmatmul.msk.bf16.gmra.mxu1 %vm675_vm1, %v2021_v49 }
 0x6c0   : > { %6810 = vmatmul.msk.bf16.vlgmr.msra.gmra.mxu2 %vm675_vm1, %v12033_v62  ;;  %v9829_v49 = vpop.f32.mrf.mxu2 }
 0x6c1   : > { %3755 = vmatpush.bf16.xpose.msra.mxu2 %v3746_v25  ;;  %v3296_v25 = vpack.c.bf16 %v9730_v0, %v9716_v40 }
 0x6c2   : > { %v9818_v27 = vpop.f32.mrf.mxu3 }
 0x6c3   : > { %v9820_v45 = vpop.permute.xlu0 %5096 }
 0x6c4   : > { %12034 = vst [vmem:[#allocation160_spill] sm:$0xff] %v9820_v45  ;;  %v9822_v43 = vpop.f32.mrf.mxu1  ;;  %v9883_v45 = vpop.permute.xlu2 %5216 }
 0x6c5   : > { %12052 = vst [vmem:[#allocation162_spill] sm:$0xff] %v9883_v45  ;;  %v12057_v45 = vld [vmem:[#allocation60_spill] sm:$0xff] }
 0x6c7   : > { %6823 = vmatmul.msk.bf16.vlgmr.msrb.gmra.mxu3 %vm675_vm1, %v12035_v63  ;;  %v3794_v63 = vsel %vm675_vm1, %v12039_v58, 0  ;;  %v12041_v58 = vld [vmem:[#allocation51_spill] sm:$0xff] }
 0x6c8   : > { %4551 = vmatpush.bf16.msrb.mxu3 %v12036_v37  ;;  %v12040_v37 = vld [vmem:[#allocation128_spill] sm:$0xff] }
 0x6ca   : > { %v9831_v62 = vpop.f32.mrf.mxu3 }
 0x6cb   : > { %v5123_v3 = vpop.permute.xlu0 %5122 }
 0x6cc   : > { %v5128_v61 = vsel %vm675_vm1, %v5123_v3, 0  ;;  %v9911_v56 = vpop.f32.mrf.mxu1 }
 0x6cd   : > { %5137 = vmatpush.bf16.xpose.msra.mxu1 %v5128_v61  ;;  %v3297_v61 = vpack.c.bf16 %v9769_v26, %v9748_v12  ;;  %12062 = vst [vmem:[#allocation21_spill] sm:$0xff] %v9911_v56 }
 0x6ce   : > { %6777 = vmatmul.msk.bf16.gmra.mxu0 %vm675_vm1, %v3296_v25  ;;  %v12043_v25 = vld [vmem:[#allocation142_spill] sm:$0xff] }
 0x6cf   : > { %6800 = vmatmul.msk.bf16.gmra.mxu1 %vm675_vm1, %v2022_v32  ;;  %v12042_v32 = vld [vmem:[#allocation31_spill] sm:$0xff] }
 0x6d0   : > { %6812 = vmatmul.msk.bf16.vlgmr.msrb.gmra.mxu2 %vm675_vm1, %v12040_v37  ;;  %v2023_v37 = vpack.c.bf16 %v12043_v25, %v12042_v32 }
 0x6d1   : > { %3803 = vmatpush.bf16.xpose.msrb.mxu2 %v3794_v63 }
 0x6d2   : > { %v9844_v47 = vpop.f32.mrf.mxu2  ;;  %v9846_v40 = vpop.f32.mrf.mxu3 }
 0x6da   : > { %v9848_v0 = vpop.f32.mrf.mxu2  ;;  %v3637_v2 = vpop.f32.mrf.mxu3 }
 0x6db   : > { %v9855_v3 = vadd.f32 %v12041_v58, %v3637_v2  ;;  %v12047_v2 = vld [vmem:[#allocation53_spill] sm:$0xff] }
 0x6dd   : > { %v3984_v63 = vsel %vm1101_vm2, %v9855_v3, -inf }
 0x6de   : > { %6778 = vmatmul.msk.bf16.gmra.mxu0 %vm675_vm1, %v3297_v61  ;;  %3985 = vmax.xlane.f32.xlu0 %v3984_v63  ;;  %v12049_v63 = vld [vmem:[#allocation62_spill] sm:$0xff] }
 0x6df   : > { %6801 = vmatmul.msk.bf16.gmra.mxu1 %vm675_vm1, %v2023_v37 }
 0x6e0   : > { %6814 = vmatmul.msk.bf16.vlgmr.msra.gmra.mxu2 %vm675_vm1, %v12045_v48  ;;  %v12050_v48 = vld [vmem:[#allocation63_spill] sm:$0xff] }
 0x6e1   : > { %3851 = vmatpush.bf16.xpose.msra.mxu2 %v3842_v35  ;;  %v12051_v35 = vld [vmem:[#allocation19_spill] sm:$0xff] }
 0x6e2   : > { %v9867_v12 = vpop.f32.mrf.mxu2  ;;  %v3639_v26 = vpop.f32.mrf.mxu3 }
 0x6e3   : > { %12046 = vst [vmem:[#allocation161_spill] sm:$0xff] %v9867_v12  ;;  %v9870_v32 = vadd.f32 %v12047_v2, %v3639_v26  ;;  %v2024_v12 = vpack.c.bf16 %v12051_v35, %v12050_v48  ;;  %v5121_v48 = vpop.permute.xlu0 %5120 }
 0x6e5   : > { %v3987_v25 = vsel %vm1101_vm2, %v9870_v32, -inf }
 0x6e6   : > { %3988 = vmax.xlane.f32.xlu1 %v3987_v25  ;;  %v3015_v25 = vpop.f32.mrf.mxu0 }
 0x6ea   : > { %v9874_v61 = vpop.f32.mrf.mxu2  ;;  %v3685_v37 = vpop.f32.mrf.mxu3 }
 0x6eb   : > { %12048 = vst [vmem:[#allocation124_spill] sm:$0xff] %v9874_v61  ;;  %v9879_v58 = vadd.f32 %v12049_v63, %v3685_v37  ;;  %v12053_v61 = vld [vmem:[#allocation25_spill] sm:$0xff]  ;;  %v9893_v37 = vpop.permute.xlu1 %5146 }
 0x6ec   : > { %v3890_v29 = vsel %vm675_vm1, %v12053_v61, 0  ;;  %12055 = vst [vmem:[#allocation118_spill] sm:$0xff] %v9893_v37 }
 0x6ed   : > { %v3996_v26 = vsel %vm1101_vm2, %v9879_v58, -inf }
 0x6ee   : > { %6779 = vmatmul.msk.bf16.gmra.mxu0 %vm675_vm1, %v3298_v55  ;;  %3997 = vmax.xlane.f32.xlu1 %v3996_v26  ;;  %v3017_v61 = vpop.f32.mrf.mxu0 }
 0x6ef   : > { %6802 = vmatmul.msk.bf16.gmra.mxu1 %vm675_vm1, %v2024_v12  ;;  %v9902_v12 = vpop.permute.xlu2 %5290  ;;  %v3299_v13 = vpack.c.bf16 %v3017_v61, %v3015_v25  ;;  %v12063_v25 = vld [vmem:[#allocation46_spill] sm:$0xff] }
 0x6f0   : > { %6816 = vmatmul.msk.bf16.vlgmr.msrb.gmra.mxu2 %vm675_vm1, %v12054_v19  ;;  %12058 = vst [vmem:[#allocation72_spill] sm:$0xff] %v9902_v12  ;;  %v3938_v61 = vsel %vm675_vm1, %v12063_v25, 0 }
 0x6f1   : > { %3899 = vmatpush.bf16.xpose.msrb.mxu2 %v3890_v29  ;;  %v5195_v29 = vpop.permute.xlu0 %5194 }
 0x6f2   : > { %v9895_v35 = vpop.f32.mrf.mxu2  ;;  %v3687_v2 = vpop.f32.mrf.mxu3 }
 0x6f3   : > { %12056 = vst [vmem:[#allocation137_spill] sm:$0xff] %v9895_v35  ;;  %v9898_v63 = vadd.f32 %v12057_v45, %v3687_v2  ;;  %v9906_v37 = vpop.permute.xlu1 %5218 }
 0x6f4   : > { %12060 = vst [vmem:[#allocation39_spill] sm:$0xff] %v9906_v37 }
 0x6f5   : > { %v3999_v55 = vsel %vm1101_vm2, %v9898_v63, -inf }
 0x6f6   : > { %4000 = vmax.xlane.f32.xlu2 %v3999_v55  ;;  %v5200_v55 = vsel %vm675_vm1, %v5195_v29, 0 }
 0x6f9   : > { %v5193_v25 = vpop.permute.xlu0 %5192 }
 0x6fa   : > { %v9904_v26 = vpop.f32.mrf.mxu2  ;;  %v3733_v19 = vpop.f32.mrf.mxu3 }
 0x6fb   : > { %12059 = vst [vmem:[#allocation18_spill] sm:$0xff] %v9904_v26  ;;  %v9909_v35 = vadd.f32 %v12061_v20, %v3733_v19  ;;  %v12064_v26 = vld [vmem:[#allocation22_spill] sm:$0xff]  ;;  %v9923_v19 = vpop.permute.xlu2 %5288  ;;  %v9930_v29 = vpop.permute.xlu1 %5170 }
 0x6fc   : > { %12065 = vst [vmem:[#allocation41_spill] sm:$0xff] %v9923_v19  ;;  %v12071_v19 = vld [vmem:[#allocation71_spill] sm:$0xff] }
 0x6fd   : > { %v4008_v2 = vsel %vm1101_vm2, %v9909_v35, -inf  ;;  %12068 = vst [vmem:[#allocation36_spill] sm:$0xff] %v9930_v29 }
 0x6fe   : > { %6780 = vmatmul.msk.bf16.gmra.mxu0 %vm675_vm1, %v3299_v13  ;;  %4009 = vmax.xlane.f32.xlu2 %v4008_v2  ;;  %v12067_v13 = vld [vmem:[#allocation66_spill] sm:$0xff]  ;;  %v9934_v2 = vpop.f32.mrf.mxu1 }
 0x6ff   : > { %6857 = vmatmul.msk.bf16.vlgmr.msrb.gmra.mxu1 %vm675_vm1, %v9736_v30  ;;  %12069 = vst [vmem:[#allocation139_spill] sm:$0xff] %v9934_v2 }
 0x700   : > { %6818 = vmatmul.msk.bf16.vlgmr.msra.gmra.mxu2 %vm675_vm1, %v12064_v26  ;;  %5209 = vmatpush.bf16.xpose.msrb.mxu1 %v5200_v55 }
 0x701   : > { %3947 = vmatpush.bf16.xpose.msra.mxu2 %v3938_v61  ;;  %v3300_v61 = vpack.c.bf16 %v9763_v24, %v9742_v50  ;;  %v12075_v24 = vld [vmem:[#allocation149_spill] sm:$0xff] }
 0x702   : > { %v9925_v20 = vpop.f32.mrf.mxu2  ;;  %v3735_v56 = vpop.f32.mrf.mxu3 }
 0x703   : > { %12066 = vst [vmem:[#allocation80_spill] sm:$0xff] %v9925_v20  ;;  %v9928_v12 = vadd.f32 %v12067_v13, %v3735_v56  ;;  %v5267_v20 = vpop.permute.xlu2 %5266 }
 0x704   : > { %v5272_v13 = vsel %vm675_vm1, %v5267_v20, 0 }
 0x705   : > { %v4011_v30 = vsel %vm1101_vm2, %v9928_v12, -inf }
 0x706   : > { %4012 = vmax.xlane.f32.xlu0 %v4011_v30  ;;  %v9948_v30 = vpop.permute.xlu1 %5168  ;;  %v9952_v50 = vpop.f32.mrf.mxu1 }
 0x707   : > { %12072 = vst [vmem:[#allocation126_spill] sm:$0xff] %v9948_v30 }
 0x708   : > { %12074 = vst [vmem:[#allocation119_spill] sm:$0xff] %v9952_v50 }
 0x70a   : > { %v9936_v26 = vpop.f32.mrf.mxu2  ;;  %v3781_v55 = vpop.f32.mrf.mxu3 }
 0x70b   : > { %12070 = vst [vmem:[#allocation99_spill] sm:$0xff] %v9936_v26  ;;  %v9941_v37 = vadd.f32 %v12071_v19, %v3781_v55  ;;  %v12073_v26 = vld [vmem:[#allocation147_spill] sm:$0xff]  ;;  %v9955_v55 = vpop.permute.xlu0 %5314  ;;  %v12078_v19 = vld [vmem:[#allocation74_spill] sm:$0xff] }
 0x70c   : > { %12076 = vst [vmem:[#allocation37_spill] sm:$0xff] %v9955_v55 }
 0x70d   : > { %v4020_v56 = vsel %vm1101_vm2, %v9941_v37, -inf }
 0x70e   : > { %6781 = vmatmul.msk.bf16.gmra.mxu0 %vm675_vm1, %v3300_v61  ;;  %4021 = vmax.xlane.f32.xlu2 %v4020_v56  ;;  %v9964_v56 = vpop.permute.xlu1 %5242 }
 0x70f   : > { %6860 = vmatmul.msk.bf16.vlgmr.msra.gmra.mxu1 %vm675_vm1, %v5121_v48  ;;  %12079 = vst [vmem:[#allocation143_spill] sm:$0xff] %v9964_v56 }
 0x710   : > { %6820 = vmatmul.msk.bf16.vlgmr.msrb.gmra.mxu2 %vm675_vm1, %v12073_v26  ;;  %5281 = vmatpush.bf16.xpose.msra.mxu1 %v5272_v13  ;;  %v9968_v13 = vpop.f32.mrf.mxu1 }
 0x711   : > { %4476 = vmatpush.bf16.msrb.mxu2 %v12075_v24  ;;  %12081 = vst [vmem:[#allocation47_spill] sm:$0xff] %v9968_v13  ;;  %v3301_v24 = vpack.c.bf16 %v9799_v31, %v9783_v33  ;;  %v12084_v13 = vld [vmem:[#allocation155_spill] sm:$0xff] }
 0x712   : > { %v9957_v2 = vpop.f32.mrf.mxu2  ;;  %v3783_v61 = vpop.f32.mrf.mxu3 }
 0x713   : > { %12077 = vst [vmem:[#allocation135_spill] sm:$0xff] %v9957_v2  ;;  %v9960_v20 = vadd.f32 %v12078_v19, %v3783_v61  ;;  %v5339_v30 = vpop.permute.xlu0 %5338  ;;  %v12082_v2 = vld [vmem:[#allocation82_spill] sm:$0xff]  ;;  %v12087_v19 = vld [vmem:[#allocation84_spill] sm:$0xff] }
 0x715   : > { %v4023_v48 = vsel %vm1101_vm2, %v9960_v20, -inf }
 0x716   : > { %4024 = vmax.xlane.f32.xlu0 %v4023_v48  ;;  %v5344_v48 = vsel %vm675_vm1, %v5339_v30, 0 }
 0x71a   : > { %v9966_v26 = vpop.f32.mrf.mxu2  ;;  %v3829_v50 = vpop.f32.mrf.mxu3 }
 0x71b   : > { %12080 = vst [vmem:[#allocation144_spill] sm:$0xff] %v9966_v26  ;;  %v9973_v55 = vadd.f32 %v12082_v2, %v3829_v50  ;;  %v12083_v26 = vld [vmem:[#allocation32_spill] sm:$0xff]  ;;  %v9985_v50 = vpop.permute.xlu1 %5240 }
 0x71c   : > { %12086 = vst [vmem:[#allocation140_spill] sm:$0xff] %v9985_v50 }
 0x71d   : > { %v4032_v61 = vsel %vm1101_vm2, %v9973_v55, -inf }
 0x71e   : > { %6782 = vmatmul.msk.bf16.gmra.mxu0 %vm675_vm1, %v3301_v24  ;;  %4033 = vmax.xlane.f32.xlu0 %v4032_v61  ;;  %v9990_v24 = vpop.f32.mrf.mxu1 }
 0x71f   : > { %6863 = vmatmul.msk.bf16.vlgmr.msrb.gmra.mxu1 %vm675_vm1, %v5193_v25  ;;  %12088 = vst [vmem:[#allocation48_spill] sm:$0xff] %v9990_v24  ;;  %v12091_v24 = vld [vmem:[#allocation50_spill] sm:$0xff] }
 0x720   : > { %6822 = vmatmul.msk.bf16.vlgmr.msra.gmra.mxu2 %vm675_vm1, %v12083_v26  ;;  %5353 = vmatpush.bf16.xpose.msrb.mxu1 %v5344_v48 }
 0x721   : > { %4526 = vmatpush.bf16.msra.mxu2 %v12084_v13  ;;  %v3302_v13 = vpack.c.bf16 %v9791_v53, %v9775_v34 }
 0x722   : > { %v3831_v31 = vpop.f32.mrf.mxu3 }
 0x723   : > { %v9983_v33 = vpop.f32.mrf.mxu2  ;;  %v9988_v2 = vadd.f32 %v12087_v19, %v3831_v31  ;;  %v5265_v61 = vpop.permute.xlu1 %5264 }
 0x724   : > { %12085 = vst [vmem:[#allocation125_spill] sm:$0xff] %v9983_v33  ;;  %v3115_v31 = vpop.f32.mrf.mxu0 }
 0x725   : > { %v4035_v30 = vsel %vm1101_vm2, %v9988_v2, -inf }
 0x726   : > { %4036 = vmax.xlane.f32.xlu2 %v4035_v30  ;;  %v9999_v48 = vpop.f32.mrf.mxu1 }
 0x727   : > { %12090 = vst [vmem:[#allocation138_spill] sm:$0xff] %v9999_v48 }
 0x72a   : > { %v3877_v26 = vpop.f32.mrf.mxu3 }
 0x72b   : > { %v9994_v25 = vpop.f32.mrf.mxu2 }
 0x72c   : > { %12089 = vst [vmem:[#allocation57_spill] sm:$0xff] %v9994_v25  ;;  %v12092_v25 = vld [vmem:[#allocation87_spill] sm:$0xff]  ;;  %v3117_v34 = vpop.f32.mrf.mxu0 }
 0x72d   : > { %v10008_v56 = vadd.f32 %v12092_v25, %v3877_v26 }
 0x72e   : > { %6783 = vmatmul.msk.bf16.gmra.mxu0 %vm675_vm1, %v3302_v13  ;;  %v12093_v13 = vld [vmem:[#allocation49_spill] sm:$0xff] }
 0x72f   : > { %6866 = vmatmul.msk.bf16.vlgmr.msra.gmra.mxu1 %vm675_vm1, %v5265_v61  ;;  %v3303_v61 = vpack.c.bf16 %v3117_v34, %v3115_v31 }
 0x732   : > { %v3879_v50 = vpop.f32.mrf.mxu3 }
 0x733   : > { %v3613_v33 = vpop.f32.mrf.mxu2 }
 0x734   : > { %v10003_v19 = vadd.f32 %v12091_v24, %v3613_v33  ;;  %v4044_v33 = vsel %vm1101_vm2, %v10008_v56, -inf  ;;  %v12095_v24 = vld [vmem:[#allocation56_spill] sm:$0xff] }
 0x736   : > { %v3978_v30 = vsel %vm1101_vm2, %v10003_v19, -inf }
 0x737   : > { %3979 = vmax.xlane.f32.xlu0 %v3978_v30  ;;  %v12094_v30 = vld [vmem:[#allocation88_spill] sm:$0xff] }
 0x738   : > { %v10019_v26 = vadd.f32 %v12094_v30, %v3879_v50 }
 0x73a   : > { %v3925_v48 = vpop.f32.mrf.mxu3 }
 0x73b   : > { %v3615_v53 = vpop.f32.mrf.mxu2 }
 0x73c   : > { %v10011_v45 = vadd.f32 %v12093_v13, %v3615_v53  ;;  %v12096_v13 = vld [vmem:[#allocation92_spill] sm:$0xff] }
 0x73e   : > { %v3981_v29 = vsel %vm1101_vm2, %v10011_v45, -inf  ;;  %6784 = vmatmul.msk.bf16.gmra.mxu0 %vm675_vm1, %v3303_v61  ;;  %v12097_v61 = vld [vmem:[#allocation91_spill] sm:$0xff] }
 0x73f   : > { %3982 = vmax.xlane.f32.xlu2 %v3981_v29  ;;  %4045 = vmax.xlane.f32.xlu0 %v4044_v33  ;;  %v4047_v29 = vsel %vm1101_vm2, %v10019_v26, -inf  ;;  %v10034_v33 = vadd.f32 %v12097_v61, %v3925_v48 }
 0x742   : > { %v3927_v53 = vpop.f32.mrf.mxu3 }
 0x743   : > { %v3661_v25 = vpop.f32.mrf.mxu2  ;;  %v10025_v31 = vadd.f32 %v12096_v13, %v3927_v53  ;;  %v3304_v53 = vpack.c.bf16 %v9795_v6, %v9777_v41 }
 0x744   : > { %v10022_v44 = vadd.f32 %v12095_v24, %v3661_v25  ;;  %v12098_v24 = vld [vmem:[#allocation58_spill] sm:$0xff] }
 0x745   : > { %v4059_v50 = vsel %vm1101_vm2, %v10025_v31, -inf }
 0x746   : > { %v3990_v34 = vsel %vm1101_vm2, %v10022_v44, -inf }
 0x747   : > { %3991 = vmax.xlane.f32.xlu1 %v3990_v34  ;;  %4048 = vmax.xlane.f32.xlu2 %v4047_v29  ;;  %v4056_v34 = vsel %vm1101_vm2, %v10034_v33, -inf }
 0x748   : > { %4060 = vmax.xlane.f32.xlu0 %v4059_v50  ;;  %v12099_v50 = vld [vmem:[#allocation64_spill] sm:$0xff] }
 0x74b   : > { %v3663_v25 = vpop.f32.mrf.mxu2 }
 0x74c   : > { %v10037_v30 = vadd.f32 %v12098_v24, %v3663_v25  ;;  %v10049_v25 = vpop.f32.mrf.mxu0  ;;  %v3973_v24 = vpop.f32.mrf.mxu3 }
 0x74e   : > { %v3993_v13 = vsel %vm1101_vm2, %v10037_v30, -inf  ;;  %6785 = vmatmul.msk.bf16.gmra.mxu0 %vm675_vm1, %v3304_v53 }
 0x74f   : > { %3994 = vmax.xlane.f32.xlu1 %v3993_v13  ;;  %4057 = vmax.xlane.f32.xlu2 %v4056_v34  ;;  %v10055_v13 = vadd.f32 %v12100_v51, %v3973_v24 }
 0x751   : > { %v3986_v29 = vpop.xlane.xlu0 %3985 }
 0x752   : > { %v4076_v41 = vsub.f32 %v9855_v3, %v3986_v29  ;;  %v4068_v29 = vsel %vm1101_vm2, %v10055_v13, -inf }
 0x753   : > { %v3709_v48 = vpop.f32.mrf.mxu2 }
 0x754   : > { %v10047_v61 = vadd.f32 %v12099_v50, %v3709_v48  ;;  %v4110_v8 = vmul.f32 1.442695, %v4076_v41  ;;  %v3305_v50 = vpack.c.bf16 %v9829_v49, %v9816_v52  ;;  %v3217_v24 = vpop.f32.mrf.mxu0  ;;  %v10073_v52 = vpop.permute.xlu2 %5312 }
 0x755   : > { %12103 = vst [vmem:[#allocation28_spill] sm:$0xff] %v10073_v52 }
 0x756   : > { %v4002_v6 = vsel %vm1101_vm2, %v10047_v61, -inf  ;;  %7389 = vpow2.f32 %v4110_v8 }
 0x757   : > { %4003 = vmax.xlane.f32.xlu1 %v4002_v6  ;;  %v3975_v6 = vpop.f32.mrf.mxu3 }
 0x759   : > { %v3989_v34 = vpop.xlane.xlu1 %3988 }
 0x75a   : > { %v4077_v21 = vsub.f32 %v9870_v32, %v3989_v34  ;;  %v12102_v32 = vld [vmem:[#allocation98_spill] sm:$0xff] }
 0x75b   : > { %v3711_v53 = vpop.f32.mrf.mxu2  ;;  %v10069_v34 = vadd.f32 %v12102_v32, %v3975_v6  ;;  %v12106_v32 = vld [vmem:[#allocation70_spill] sm:$0xff] }
 0x75c   : > { %v10059_v48 = vadd.f32 %v12101_v14, %v3711_v53  ;;  %v4112_v3 = vmul.f32 1.442695, %v4077_v21  ;;  %v10071_v8 = vpop.eup %7389 }
 0x75e   : > { %v4005_v41 = vsel %vm1101_vm2, %v10059_v48, -inf  ;;  %7391 = vpow2.f32 %v4112_v3  ;;  %6786 = vmatmul.msk.bf16.gmra.mxu0 %vm675_vm1, %v3305_v50  ;;  %v4176_v50 = vsel %vm1101_vm2, %v10071_v8, 0.0 }
 0x75f   : > { %4069 = vmax.xlane.f32.xlu1 %v4068_v29  ;;  %4006 = vmax.xlane.f32.xlu2 %v4005_v41  ;;  %v4071_v29 = vsel %vm1101_vm2, %v10069_v34, -inf  ;;  %v10084_v41 = vpop.f32.mrf.mxu0 }
 0x760   : > { %12104 = vst [vmem:[#allocation130_spill] sm:$0xff] %v10084_v41 }
 0x761   : > { %v3998_v21 = vpop.xlane.xlu1 %3997 }
 0x762   : > { %v4080_v49 = vsub.f32 %v9879_v58, %v3998_v21  ;;  %v12105_v58 = vld [vmem:[#allocation68_spill] sm:$0xff] }
 0x763   : > { %v3757_v53 = vpop.f32.mrf.mxu2 }
 0x764   : > { %v10076_v51 = vpop.eup %7391  ;;  %v4118_v14 = vmul.f32 1.442695, %v4080_v49  ;;  %v10087_v6 = vadd.f32 %v12105_v58, %v3757_v53 }
 0x765   : > { %v4179_v3 = vsel %vm1101_vm2, %v10076_v51, 0.0 }
 0x766   : > { %7393 = vpow2.f32 %v4118_v14  ;;  %4180 = vadd.xlane.f32.xlu0 %v4179_v3 }
 0x767   : > { %4072 = vmax.xlane.f32.xlu1 %v4071_v29  ;;  %4177 = vadd.xlane.f32.xlu2 %v4176_v50  ;;  %v3306_v29 = vpack.c.bf16 %v9818_v27, %v9802_v11  ;;  %v4014_v50 = vsel %vm1101_vm2, %v10087_v6, -inf  ;;  %v10103_v3 = vpop.f32.mrf.mxu0  ;;  %v12108_v27 = vld [vmem:[#allocation73_spill] sm:$0xff] }
 0x768   : > { %12107 = vst [vmem:[#allocation69_spill] sm:$0xff] %v10103_v3  ;;  %v12110_v3 = vld [vmem:[#allocation83_spill] sm:$0xff] }
 0x769   : > { %v4001_v21 = vpop.xlane.xlu2 %4000 }
 0x76a   : > { %v4081_v58 = vsub.f32 %v9898_v63, %v4001_v21 }
 0x76b   : > { %v3759_v49 = vpop.f32.mrf.mxu2 }
 0x76c   : > { %v10090_v52 = vadd.f32 %v12106_v32, %v3759_v49  ;;  %v10092_v60 = vpop.eup %7393 }
 0x76d   : > { %v4188_v14 = vsel %vm1101_vm2, %v10092_v60, 0.0 }
 0x76e   : > { %v4017_v53 = vsel %vm1101_vm2, %v10090_v52, -inf  ;;  %4189 = vadd.xlane.f32.xlu0 %v4188_v14  ;;  %6787 = vmatmul.msk.bf16.gmra.mxu0 %vm675_vm1, %v3306_v29  ;;  %v4120_v14 = vmul.f32 1.442695, %v4081_v58 }
 0x76f   : > { %4015 = vmax.xlane.f32.xlu1 %v4014_v50  ;;  %4018 = vmax.xlane.f32.xlu2 %v4017_v53  ;;  %v10112_v53 = vpop.f32.mrf.mxu0 }
 0x770   : > { %12109 = vst [vmem:[#allocation134_spill] sm:$0xff] %v10112_v53  ;;  %v12123_v53 = vld [vmem:[#allocation93_spill] sm:$0xff] }
 0x771   : > { %v4010_v49 = vpop.xlane.xlu2 %4009 }
 0x772   : > { %v4084_v41 = vsub.f32 %v9909_v35, %v4010_v49  ;;  %v3307_v49 = vpack.c.bf16 %v3217_v24, %v10049_v25 }
 0x773   : > { %v3805_v11 = vpop.f32.mrf.mxu2 }
 0x774   : > { %v10107_v32 = vadd.f32 %v12108_v27, %v3805_v11  ;;  %v4126_v50 = vmul.f32 1.442695, %v4084_v41 }
 0x776   : > { %v4026_v46 = vsel %vm1101_vm2, %v10107_v32, -inf  ;;  %7395 = vpow2.f32 %v4126_v50 }
 0x777   : > { %4027 = vmax.xlane.f32.xlu1 %v4026_v46  ;;  %7397 = vpow2.f32 %v4120_v14  ;;  %v10128_v50 = vpop.f32.mrf.mxu0 }
 0x778   : > { %12111 = vst [vmem:[#allocation45_spill] sm:$0xff] %v10128_v50 }
 0x779   : > { %v4013_v46 = vpop.xlane.xlu0 %4012 }
 0x77a   : > { %v4085_v11 = vsub.f32 %v9928_v12, %v4013_v46  ;;  %v12114_v46 = vpack.c.bf16 %v9822_v43, %v9806_v28 }
 0x77b   : > { %v3807_v29 = vpop.f32.mrf.mxu2 }
 0x77c   : > { %v10115_v59 = vadd.f32 %v12110_v3, %v3807_v29  ;;  %v10117_v35 = vpop.eup %7395  ;;  %v4128_v24 = vmul.f32 1.442695, %v4085_v11  ;;  %v12112_v29 = vld [vmem:[#allocation85_spill] sm:$0xff] }
 0x77d   : > { %v4200_v63 = vsel %vm1101_vm2, %v10117_v35, 0.0  ;;  %v10125_v21 = vpop.eup %7397 }
 0x77e   : > { %v4029_v41 = vsel %vm1101_vm2, %v10115_v59, -inf  ;;  %6788 = vmatmul.msk.bf16.gmra.mxu0 %vm675_vm1, %v3307_v49  ;;  %v4191_v25 = vsel %vm1101_vm2, %v10125_v21, 0.0  ;;  %v12113_v49 = vld [vmem:[#allocation86_spill] sm:$0xff]  ;;  %7399 = vpow2.f32 %v4128_v24 }
 0x77f   : > { %4201 = vadd.xlane.f32.xlu1 %v4200_v63  ;;  %4030 = vmax.xlane.f32.xlu2 %v4029_v41  ;;  %v10147_v11 = vpop.f32.mrf.mxu0 }
 0x780   : > { %12115 = vst [vmem:[#allocation141_spill] sm:$0xff] %v10147_v11 }
 0x781   : > { %v4022_v14 = vpop.xlane.xlu2 %4021 }
 0x782   : > { %v4088_v3 = vsub.f32 %v9941_v37, %v4022_v14  ;;  %v12116_v14 = vld [vmem:[#allocation89_spill] sm:$0xff] }
 0x783   : > { %v3853_v58 = vpop.f32.mrf.mxu2 }
 0x784   : > { %v10133_v27 = vadd.f32 %v12112_v29, %v3853_v58  ;;  %v10149_v24 = vpop.eup %7399 }
 0x785   : > { %v4203_v43 = vsel %vm1101_vm2, %v10149_v24, 0.0 }
 0x786   : > { %v4038_v58 = vsel %vm1101_vm2, %v10133_v27, -inf }
 0x787   : > { %4192 = vadd.xlane.f32.xlu2 %v4191_v25  ;;  %v4134_v25 = vmul.f32 1.442695, %v4088_v3  ;;  %v10159_v3 = vpop.f32.mrf.mxu0 }
 0x788   : > { %12117 = vst [vmem:[#allocation133_spill] sm:$0xff] %v10159_v3 }
 0x789   : > { %7401 = vpow2.f32 %v4134_v25 }
 0x78b   : > { %v3855_v63 = vpop.f32.mrf.mxu2 }
 0x78c   : > { %v10136_v41 = vadd.f32 %v12113_v49, %v3855_v63  ;;  %v4025_v63 = vpop.xlane.xlu0 %4024 }
 0x78e   : > { %v4041_v12 = vsel %vm1101_vm2, %v10136_v41, -inf  ;;  %6789 = vmatmul.msk.bf16.gmra.mxu0 %vm675_vm1, %v12114_v46 }
 0x78f   : > { %4042 = vmax.xlane.f32.xlu0 %v4041_v12  ;;  %4039 = vmax.xlane.f32.xlu2 %v4038_v58  ;;  %v4089_v12 = vsub.f32 %v9960_v20, %v4025_v63  ;;  %v10161_v58 = vpop.eup %7401 }
 0x790   : > { %v4212_v63 = vsel %vm1101_vm2, %v10161_v58, 0.0 }
 0x791   : > { %v4136_v46 = vmul.f32 1.442695, %v4089_v12  ;;  %v12119_v12 = vpack.c.bf16 %v9848_v0, %v9844_v47 }
 0x793   : > { %v3901_v37 = vpop.f32.mrf.mxu2  ;;  %7403 = vpow2.f32 %v4136_v46  ;;  %v12120_v46 = vld [vmem:[#allocation95_spill] sm:$0xff] }
 0x794   : > { %v10152_v50 = vadd.f32 %v12116_v14, %v3901_v37  ;;  %v4034_v49 = vpop.xlane.xlu0 %4033  ;;  %v12118_v37 = vld [vmem:[#allocation90_spill] sm:$0xff] }
 0x795   : > { %v4092_v20 = vsub.f32 %v9973_v55, %v4034_v49  ;;  %v10180_v55 = vpop.f32.mrf.mxu0 }
 0x796   : > { %v4050_v28 = vsel %vm1101_vm2, %v10152_v50, -inf  ;;  %12121 = vst [vmem:[#allocation55_spill] sm:$0xff] %v10180_v55 }
 0x797   : > { %4204 = vadd.xlane.f32.xlu0 %v4203_v43  ;;  %4051 = vmax.xlane.f32.xlu2 %v4050_v28  ;;  %v4142_v28 = vmul.f32 1.442695, %v4092_v20 }
 0x799   : > { %v10175_v43 = vpop.eup %7403  ;;  %7405 = vpow2.f32 %v4142_v28  ;;  %v4037_v0 = vpop.xlane.xlu2 %4036 }
 0x79a   : > { %v4215_v47 = vsel %vm1101_vm2, %v10175_v43, 0.0  ;;  %v4093_v28 = vsub.f32 %v9988_v2, %v4037_v0 }
 0x79b   : > { %v3903_v29 = vpop.f32.mrf.mxu2 }
 0x79c   : > { %v10164_v11 = vadd.f32 %v12118_v37, %v3903_v29 }
 0x79e   : > { %v4053_v25 = vsel %vm1101_vm2, %v10164_v11, -inf  ;;  %6790 = vmatmul.msk.bf16.gmra.mxu0 %vm675_vm1, %v12119_v12 }
 0x79f   : > { %4213 = vadd.xlane.f32.xlu0 %v4212_v63  ;;  %4054 = vmax.xlane.f32.xlu2 %v4053_v25  ;;  %v10187_v63 = vpop.eup %7405 }
 0x7a3   : > { %v3949_v29 = vpop.f32.mrf.mxu2 }
 0x7a4   : > { %v10178_v3 = vadd.f32 %v12120_v46, %v3949_v29  ;;  %v3310_v29 = vpack.c.bf16 %v9846_v40, %v9831_v62  ;;  %v10192_v46 = vpop.f32.mrf.mxu0 }
 0x7a5   : > { %12122 = vst [vmem:[#allocation79_spill] sm:$0xff] %v10192_v46 }
 0x7a6   : > { %v4062_v49 = vsel %vm1101_vm2, %v10178_v3, -inf }
 0x7a7   : > { %4216 = vadd.xlane.f32.xlu0 %v4215_v47  ;;  %4063 = vmax.xlane.f32.xlu2 %v4062_v49  ;;  %v4224_v49 = vsel %vm1101_vm2, %v10187_v63, 0.0 }
 0x7aa   : > { %v3980_v25 = vpop.xlane.xlu0 %3979 }
 0x7ab   : > { %v4074_v20 = vsub.f32 %v10003_v19, %v3980_v25  ;;  %v3951_v47 = vpop.f32.mrf.mxu2  ;;  %v4144_v25 = vmul.f32 1.442695, %v4093_v28 }
 0x7ac   : > { %v10199_v14 = vadd.f32 %v12123_v53, %v3951_v47 }
 0x7ad   : > { %v4106_v12 = vmul.f32 1.442695, %v4074_v20 }
 0x7ae   : > { %6791 = vmatmul.msk.bf16.gmra.mxu0 %vm675_vm1, %v3310_v29 }
 0x7af   : > { %7407 = vpow2.f32 %v4106_v12  ;;  %4225 = vadd.xlane.f32.xlu2 %v4224_v49  ;;  %v4065_v12 = vsel %vm1101_vm2, %v10199_v14, -inf }
 0x7b0   : > { %7409 = vpow2.f32 %v4144_v25 }
 0x7b2   : > { %v3983_v55 = vpop.xlane.xlu2 %3982  ;;  %v4046_v19 = vpop.xlane.xlu0 %4045 }
 0x7b3   : > { %v4096_v20 = vsub.f32 %v10008_v56, %v4046_v19  ;;  %v4075_v2 = vsub.f32 %v10011_v45, %v3983_v55 }
 0x7b5   : > { %v10201_v62 = vpop.eup %7407  ;;  %v4150_v40 = vmul.f32 1.442695, %v4096_v20  ;;  %v4108_v29 = vmul.f32 1.442695, %v4075_v2 }
 0x7b6   : > { %v4170_v0 = vsel %vm1101_vm2, %v10201_v62, 0.0  ;;  %v10210_v20 = vpop.eup %7409 }
 0x7b7   : > { %4171 = vadd.xlane.f32.xlu0 %v4170_v0  ;;  %7411 = vpow2.f32 %v4150_v40  ;;  %4066 = vmax.xlane.f32.xlu2 %v4065_v12  ;;  %v10217_v0 = vpop.f32.mrf.mxu1 }
 0x7b8   : > { %7413 = vpow2.f32 %v4108_v29  ;;  %12124 = vst [vmem:[#allocation43_spill] sm:$0xff] %v10217_v0 }
 0x7ba   : > { %v3992_v56 = vpop.xlane.xlu1 %3991  ;;  %v4049_v28 = vpop.xlane.xlu2 %4048 }
 0x7bb   : > { %v4078_v49 = vsub.f32 %v10022_v44, %v3992_v56  ;;  %v4061_v47 = vpop.xlane.xlu0 %4060  ;;  %v4097_v25 = vsub.f32 %v10019_v26, %v4049_v28  ;;  %v4227_v44 = vsel %vm1101_vm2, %v10210_v20, 0.0 }
 0x7bc   : > { %v4101_v19 = vsub.f32 %v10025_v31, %v4061_v47 }
 0x7bd   : > { %v4114_v45 = vmul.f32 1.442695, %v4078_v49  ;;  %v10212_v55 = vpop.eup %7411  ;;  %v4152_v31 = vmul.f32 1.442695, %v4097_v25 }
 0x7be   : > { %v4160_v40 = vmul.f32 1.442695, %v4101_v19  ;;  %v4236_v2 = vsel %vm1101_vm2, %v10212_v55, 0.0  ;;  %v10221_v49 = vpop.eup %7413 }
 0x7bf   : > { %7415 = vpow2.f32 %v4114_v45  ;;  %4237 = vadd.xlane.f32.xlu1 %v4236_v2  ;;  %4228 = vadd.xlane.f32.xlu2 %v4227_v44  ;;  %v4173_v19 = vsel %vm1101_vm2, %v10221_v49, 0.0  ;;  %v10234_v25 = vpop.f32.mrf.mxu1 }
 0x7c0   : > { %7417 = vpow2.f32 %v4160_v40  ;;  %12125 = vst [vmem:[#allocation145_spill] sm:$0xff] %v10234_v25 }
 0x7c1   : > { %7419 = vpow2.f32 %v4152_v31 }
 0x7c2   : > { %v3995_v12 = vpop.xlane.xlu1 %3994  ;;  %v4058_v56 = vpop.xlane.xlu2 %4057 }
 0x7c3   : > { %v4100_v26 = vsub.f32 %v10034_v33, %v4058_v56  ;;  %v4079_v44 = vsub.f32 %v10037_v30, %v3995_v12 }
 0x7c5   : > { %v10223_v29 = vpop.eup %7415  ;;  %v4158_v40 = vmul.f32 1.442695, %v4100_v26  ;;  %v4116_v56 = vmul.f32 1.442695, %v4079_v44 }
 0x7c6   : > { %v4182_v28 = vsel %vm1101_vm2, %v10223_v29, 0.0  ;;  %v10228_v47 = vpop.eup %7417 }
 0x7c7   : > { %4183 = vadd.xlane.f32.xlu0 %v4182_v28  ;;  %4174 = vadd.xlane.f32.xlu1 %v4173_v19  ;;  %v4251_v45 = vsel %vm1101_vm2, %v10228_v47, 0.0  ;;  %v10238_v33 = vpop.eup %7419  ;;  %7421 = vpow2.f32 %v4158_v40  ;;  %v10246_v25 = vpop.f32.mrf.mxu1 }
 0x7c8   : > { %4252 = vadd.xlane.f32.xlu2 %v4251_v45  ;;  %v4239_v31 = vsel %vm1101_vm2, %v10238_v33, 0.0  ;;  %12126 = vst [vmem:[#allocation146_spill] sm:$0xff] %v10246_v25  ;;  %7423 = vpow2.f32 %v4116_v56 }
 0x7ca   : > { %v10236_v2 = vpop.xlane.xlu1 %4003 }
 0x7cd   : > { %v10244_v45 = vpop.eup %7421 }
 0x7ce   : > { %v4248_v30 = vsel %vm1101_vm2, %v10244_v45, 0.0  ;;  %v10251_v0 = vpop.eup %7423 }
 0x7cf   : > { %4240 = vadd.xlane.f32.xlu1 %v4239_v31 }
 0x7d2   : > { %v4070_v28 = vpop.xlane.xlu1 %4069  ;;  %v4007_v19 = vpop.xlane.xlu2 %4006 }
 0x7d3   : > { %v4104_v46 = vsub.f32 %v10055_v13, %v4070_v28  ;;  %v4083_v53 = vsub.f32 %v10059_v48, %v4007_v19  ;;  %v10256_v48 = vpop.f32.mrf.mxu1 }
 0x7d4   : > { %12127 = vst [vmem:[#allocation148_spill] sm:$0xff] %v10256_v48 }
 0x7d5   : > { %v4166_v26 = vmul.f32 1.442695, %v4104_v46  ;;  %v4124_v12 = vmul.f32 1.442695, %v4083_v53  ;;  %v4185_v53 = vsel %vm1101_vm2, %v10251_v0, 0.0 }
 0x7d7   : > { %7425 = vpow2.f32 %v4166_v26  ;;  %4249 = vadd.xlane.f32.xlu1 %v4248_v30 }
 0x7d9   : > { %v4181_v31 = vpop.xlane.xlu0 %4180 }
 0x7da   : > { %v4073_v40 = vpop.xlane.xlu1 %4072  ;;  %v4178_v44 = vpop.xlane.xlu2 %4177 }
 0x7db   : > { %7427 = vrcp.f32 %v4178_v44  ;;  %v4105_v46 = vsub.f32 %v10069_v34, %v4073_v40 }
 0x7dc   : > { %7429 = vrcp.f32 %v4181_v31 }
 0x7dd   : > { %v10253_v13 = vpop.eup %7425  ;;  %7431 = vpow2.f32 %v4124_v12  ;;  %v4168_v19 = vmul.f32 1.442695, %v4105_v46  ;;  %v10269_v46 = vpop.f32.mrf.mxu1 }
 0x7de   : > { %v4260_v56 = vsel %vm1101_vm2, %v10253_v13, 0.0  ;;  %12128 = vst [vmem:[#allocation61_spill] sm:$0xff] %v10269_v46 }
 0x7df   : > { %4261 = vadd.xlane.f32.xlu2 %v4260_v56  ;;  %4186 = vadd.xlane.f32.xlu1 %v4185_v53  ;;  %7433 = vpow2.f32 %v4168_v19 }
 0x7e1   : > { %v7428_v28 = vpop.eup %7427 }
 0x7e2   : > { %v7430_v26 = vpop.eup %7429  ;;  %v4300_v30 = vmul.f32 %v7428_v28, %v10071_v8  ;;  %v4019_v40 = vpop.xlane.xlu2 %4018 }
 0x7e3   : > { %v10263_v44 = vpop.eup %7431  ;;  %v4301_v12 = vmul.f32 %v7430_v26, %v10076_v51  ;;  %v4087_v48 = vsub.f32 %v10090_v52, %v4019_v40  ;;  %v10273_v51 = vpop.xlane.xlu1 %4015 }
 0x7e4   : > { %v4332_v34 = vpack.c.bf16 %v4300_v30, %v4300_v30  ;;  %v4197_v56 = vsel %vm1101_vm2, %v10263_v44, 0.0 }
 0x7e5   : > { %v4333_v31 = vpack.c.bf16 %v4301_v12, %v4301_v12  ;;  %v4132_v37 = vmul.f32 1.442695, %v4087_v48  ;;  %v10275_v26 = vpop.eup %7433 }
 0x7e6   : > { %v4364_v25 = vunpack.c.l.bf16 %v4332_v34  ;;  %v4190_v34 = vpop.xlane.xlu0 %4189  ;;  %v4263_v48 = vsel %vm1101_vm2, %v10275_v26, 0.0 }
 0x7e7   : > { %v4365_v53 = vunpack.c.l.bf16 %v4333_v31  ;;  %4198 = vadd.xlane.f32.xlu2 %v4197_v56  ;;  %7435 = vpow2.f32 %v4132_v37  ;;  %v10284_v37 = vpop.f32.mrf.mxu1  ;;  %v12130_v56 = vld [vmem:[#allocation159_spill] sm:$0xff] }
 0x7e8   : > { %v4396_v8 = vmul.f32 %v8620_v7, %v4364_v25  ;;  %7437 = vrcp.f32 %v4190_v34  ;;  %12129 = vst [vmem:[#allocation27_spill] sm:$0xff] %v10284_v37 }
 0x7e9   : > { %v4397_v28 = vmul.f32 %v8630_v15, %v4365_v53 }
 0x7ea   : > { %v4428_v19 = vpack.c.bf16 %v4396_v8, %v4396_v8 }
 0x7eb   : > { %v4429_v52 = vpack.c.bf16 %v4397_v28, %v4397_v28  ;;  %v10287_v53 = vpop.xlane.xlu1 %4027 }
 0x7ec   : > { %v4485_v30 = vunpack.c.l.b16 %v4428_v19 }
 0x7ed   : > { %v4486_v12 = vunpack.c.l.b16 %v4429_v52  ;;  %v10279_v40 = vpop.eup %7435 }
 0x7ee   : > { %v4209_v25 = vsel %vm1101_vm2, %v10279_v40, 0.0  ;;  %v7438_v19 = vpop.eup %7437 }
 0x7ef   : > { %v4487_v31 = vpack.c.b16 %v4486_v12, %v4485_v30  ;;  %4264 = vadd.xlane.f32.xlu2 %v4263_v48  ;;  %4210 = vadd.xlane.f32.xlu0 %v4209_v25  ;;  %v4304_v30 = vmul.f32 %v7438_v19, %v10092_v60  ;;  %v10293_v12 = vpop.f32.mrf.mxu1 }
 0x7f0   : > { %12131 = vst [vmem:[#allocation77_spill] sm:$0xff] %v10293_v12 }
 0x7f1   : > { %6825 = vmatmul.msk.bf16.vlgmr.msra.gmra.mxu3 %vm1101_vm2, %v4487_v31  ;;  %v4336_v31 = vpack.c.bf16 %v4304_v30, %v4304_v30 }
 0x7f2   : > { %4601 = vmatpush.bf16.msra.mxu3 %v12130_v56  ;;  %v4031_v8 = vpop.xlane.xlu2 %4030 }
 0x7f3   : > { %v4091_v28 = vsub.f32 %v10115_v59, %v4031_v8  ;;  %v4202_v48 = vpop.xlane.xlu1 %4201  ;;  %v4368_v56 = vunpack.c.l.bf16 %v4336_v31 }
 0x7f5   : > { %v4140_v52 = vmul.f32 1.442695, %v4091_v28  ;;  %v4400_v30 = vmul.f32 %v8664_v16, %v4368_v56 }
 0x7f7   : > { %7439 = vpow2.f32 %v4140_v52  ;;  %v10303_v7 = vpop.f32.mrf.mxu1  ;;  %v4432_v31 = vpack.c.bf16 %v4400_v30, %v4400_v30 }
 0x7f8   : > { %5336 = vrot.lane.b32.xlu1 %v11784_v42, %s7718_s9  ;;  %12132 = vst [vmem:[#allocation17_spill] sm:$0xff] %v10303_v7 }
 0x7f9   : > { %v4535_v7 = vunpack.c.l.b16 %v4432_v31 }
 0x7fa   : > { %v4193_v34 = vpop.xlane.xlu2 %4192 }
 0x7fb   : > { %7441 = vrcp.f32 %v4193_v34 }
 0x7fc   : > { %7443 = vrcp.f32 %v4202_v48 }
 0x7fd   : > { %v10295_v25 = vpop.eup %7439 }
 0x7fe   : > { %v4221_v59 = vsel %vm1101_vm2, %v10295_v25, 0.0 }
 0x7ff   : > { %4222 = vadd.xlane.f32.xlu2 %v4221_v59 }
 0x801   : > { %v7442_v8 = vpop.eup %7441 }
 0x802   : > { %v4043_v28 = vpop.xlane.xlu0 %4042  ;;  %v4305_v52 = vmul.f32 %v7442_v8, %v10125_v21  ;;  %v10300_v37 = vpop.xlane.xlu2 %4039 }
 0x803   : > { %v4095_v60 = vsub.f32 %v10136_v41, %v4043_v28  ;;  %v7444_v19 = vpop.eup %7443 }
 0x804   : > { %v4337_v34 = vpack.c.bf16 %v4305_v52, %v4305_v52  ;;  %v4308_v59 = vmul.f32 %v7444_v19, %v10117_v35 }
 0x805   : > { %v4148_v48 = vmul.f32 1.442695, %v4095_v60 }
 0x806   : > { %v4369_v15 = vunpack.c.l.bf16 %v4337_v34  ;;  %v4340_v46 = vpack.c.bf16 %v4308_v59, %v4308_v59  ;;  %v10313_v34 = vpop.f32.mrf.mxu1 }
 0x807   : > { %7445 = vpow2.f32 %v4148_v48 }
 0x808   : > { %v4401_v42 = vmul.f32 %v8656_v18, %v4369_v15  ;;  %v4082_v15 = vsub.f32 %v10047_v61, %v10236_v2 }
 0x80a   : > { %v4205_v12 = vpop.xlane.xlu0 %4204  ;;  %v4433_v21 = vpack.c.bf16 %v4401_v42, %v4401_v42  ;;  %v4052_v8 = vpop.xlane.xlu2 %4051  ;;  %v4372_v42 = vunpack.c.l.bf16 %v4340_v46  ;;  %v4122_v48 = vmul.f32 1.442695, %v4082_v15 }
 0x80b   : > { %7447 = vrcp.f32 %v4205_v12  ;;  %v4098_v41 = vsub.f32 %v10152_v50, %v4052_v8 }
 0x80c   : > { %v4536_v56 = vunpack.c.l.b16 %v4433_v21 }
 0x80d   : > { %v10309_v28 = vpop.eup %7445  ;;  %v4154_v52 = vmul.f32 1.442695, %v4098_v41 }
 0x80e   : > { %v4233_v60 = vsel %vm1101_vm2, %v10309_v28, 0.0  ;;  %v4537_v35 = vpack.c.b16 %v4536_v56, %v4535_v7  ;;  %v4404_v7 = vmul.f32 %v11939_v22, %v4372_v42  ;;  %v10330_v8 = vpop.f32.mrf.mxu1 }
 0x80f   : > { %4234 = vadd.xlane.f32.xlu0 %v4233_v60  ;;  %7449 = vpow2.f32 %v4154_v52  ;;  %12133 = vst [vmem:[#allocation14_spill] sm:$0xff] %v10330_v8 }
 0x810   : > { %6827 = vmatmul.msk.bf16.vlgmr.msrb.gmra.mxu3 %vm1101_vm2, %v4537_v35  ;;  %v4436_v46 = vpack.c.bf16 %v4404_v7, %v4404_v7 }
 0x811   : > { %v7448_v12 = vpop.eup %7447  ;;  %4651 = vmatpush.bf16.msrb.mxu3 %v9585_v39 }
 0x812   : > { %v4309_v50 = vmul.f32 %v7448_v12, %v10149_v24  ;;  %v4214_v19 = vpop.xlane.xlu0 %4213  ;;  %v10320_v30 = vpop.xlane.xlu2 %4054  ;;  %v4086_v24 = vsub.f32 %v10087_v6, %v10273_v51  ;;  %v4585_v15 = vunpack.c.l.b16 %v4436_v46  ;;  %v4090_v51 = vsub.f32 %v10107_v32, %v10287_v53 }
 0x813   : > { %7451 = vrcp.f32 %v4214_v19 }
 0x814   : > { %v4341_v59 = vpack.c.bf16 %v4309_v50, %v4309_v50  ;;  %7453 = vpow2.f32 %v4122_v48  ;;  %v4130_v35 = vmul.f32 1.442695, %v4086_v24 }
 0x815   : > { %v10323_v31 = vpop.eup %7449 }
 0x816   : > { %v4373_v61 = vunpack.c.l.bf16 %v4341_v59  ;;  %v4242_v2 = vsel %vm1101_vm2, %v10323_v31, 0.0  ;;  %v10344_v59 = vpop.f32.mrf.mxu1 }
 0x817   : > { %4243 = vadd.xlane.f32.xlu2 %v4242_v2 }
 0x818   : > { %v4405_v39 = vmul.f32 %v11940_v4, %v4373_v61  ;;  %v4138_v61 = vmul.f32 1.442695, %v4090_v51 }
 0x819   : > { %v7452_v21 = vpop.eup %7451 }
 0x81a   : > { %v4437_v41 = vpack.c.bf16 %v4405_v39, %v4405_v39  ;;  %v4312_v56 = vmul.f32 %v7452_v21, %v10161_v58  ;;  %v4217_v52 = vpop.xlane.xlu0 %4216  ;;  %v10333_v60 = vpop.xlane.xlu2 %4063 }
 0x81b   : > { %7455 = vrcp.f32 %v4217_v52  ;;  %v10335_v50 = vpop.eup %7453 }
 0x81c   : > { %v4586_v42 = vunpack.c.l.b16 %v4437_v41  ;;  %v4344_v12 = vpack.c.bf16 %v4312_v56, %v4312_v56  ;;  %7457 = vpow2.f32 %v4130_v35  ;;  %v4194_v58 = vsel %vm1101_vm2, %v10335_v50, 0.0 }
 0x81d   : > { %7459 = vpow2.f32 %v4138_v61 }
 0x81e   : > { %v4587_v6 = vpack.c.b16 %v4586_v42, %v4585_v15  ;;  %v4376_v19 = vunpack.c.l.bf16 %v4344_v12 }
 0x820   : > { %6829 = vmatmul.msk.bf16.vlgmr.msra.gmra.mxu3 %vm1101_vm2, %v4587_v6  ;;  %v4408_v32 = vmul.f32 %v8751_v23, %v4376_v19  ;;  %v10360_v6 = vpop.f32.mrf.mxu1 }
 0x821   : > { %v7456_v48 = vpop.eup %7455  ;;  %4701 = vmatpush.bf16.msra.mxu3 %v9592_v10  ;;  %12134 = vst [vmem:[#allocation34_spill] sm:$0xff] %v10360_v6  ;;  %v12165_v6 = vld [vmem:[#allocation82_spill] sm:$0xff] }
 0x822   : > { %v4313_v7 = vmul.f32 %v7456_v48, %v10175_v43  ;;  %4195 = vadd.xlane.f32.xlu1 %v4194_v58  ;;  %v4226_v2 = vpop.xlane.xlu2 %4225  ;;  %v10349_v24 = vpop.eup %7457  ;;  %v4094_v43 = vsub.f32 %v10133_v27, %v10300_v37  ;;  %v4440_v39 = vpack.c.bf16 %v4408_v32, %v4408_v32 }
 0x823   : > { %5360 = vrot.lane.b32.xlu0 %v11785_v1, %s7718_s9  ;;  %7461 = vrcp.f32 %v4226_v2  ;;  %v4206_v21 = vsel %vm1101_vm2, %v10349_v24, 0.0  ;;  %v10358_v12 = vpop.eup %7459 }
 0x824   : > { %v4345_v53 = vpack.c.bf16 %v4313_v7, %v4313_v7  ;;  %v4146_v52 = vmul.f32 1.442695, %v4094_v43  ;;  %v4635_v35 = vunpack.c.l.b16 %v4440_v39  ;;  %v4218_v19 = vsel %vm1101_vm2, %v10358_v12, 0.0 }
 0x826   : > { %v4377_v46 = vunpack.c.l.bf16 %v4345_v53 }
 0x828   : > { %v4409_v10 = vmul.f32 %v11938_v9, %v4377_v46  ;;  %v10371_v32 = vpop.f32.mrf.mxu1  ;;  %v12173_v9 = vld [vmem:[#allocation28_spill] sm:$0xff] }
 0x829   : > { %v7462_v27 = vpop.eup %7461 }
 0x82a   : > { %v4441_v41 = vpack.c.bf16 %v4409_v10, %v4409_v10  ;;  %4207 = vadd.xlane.f32.xlu1 %v4206_v21  ;;  %v10356_v56 = vpop.xlane.xlu2 %4066  ;;  %v4172_v42 = vpop.xlane.xlu0 %4171  ;;  %v4316_v51 = vmul.f32 %v7462_v27, %v10187_v63 }
 0x82b   : > { %7463 = vrcp.f32 %v4172_v42 }
 0x82c   : > { %v4636_v15 = vunpack.c.l.b16 %v4441_v41  ;;  %7465 = vpow2.f32 %v4146_v52  ;;  %v4348_v61 = vpack.c.bf16 %v4316_v51, %v4316_v51 }
 0x82e   : > { %v4637_v37 = vpack.c.b16 %v4636_v15, %v4635_v35  ;;  %v4380_v53 = vunpack.c.l.bf16 %v4348_v61 }
 0x82f   : > { %5362 = vrot.lane.b32.xlu2 %v11785_v1, %s7717_s8 }
 0x830   : > { %6831 = vmatmul.msk.bf16.vlgmr.msrb.gmra.mxu3 %vm1101_vm2, %v4637_v37  ;;  %v4412_v52 = vmul.f32 %v11947_v17, %v4380_v53  ;;  %v10381_v51 = vpop.f32.mrf.mxu1 }
 0x831   : > { %4751 = vmatpush.bf16.msrb.mxu3 %v9694_v54  ;;  %v7464_v7 = vpop.eup %7463  ;;  %v4099_v54 = vsub.f32 %v10164_v11, %v10320_v30  ;;  %12135 = vst [vmem:[#allocation151_spill] sm:$0xff] %v10381_v51 }
 0x832   : > { %4219 = vadd.xlane.f32.xlu1 %v4218_v19  ;;  %v4238_v48 = vpop.xlane.xlu1 %4237  ;;  %v4229_v58 = vpop.xlane.xlu2 %4228  ;;  %v4298_v63 = vmul.f32 %v7464_v7, %v10201_v62  ;;  %v4444_v19 = vpack.c.bf16 %v4412_v52, %v4412_v52 }
 0x833   : > { %7467 = vrcp.f32 %v4229_v58  ;;  %v10369_v2 = vpop.eup %7465  ;;  %v4156_v15 = vmul.f32 1.442695, %v4099_v54 }
 0x834   : > { %7469 = vrcp.f32 %v4238_v48  ;;  %v4230_v46 = vsel %vm1101_vm2, %v10369_v2, 0.0  ;;  %v4330_v21 = vpack.c.bf16 %v4298_v63, %v4298_v63  ;;  %v4685_v53 = vunpack.c.l.b16 %v4444_v19 }
 0x836   : > { %v4362_v42 = vunpack.c.l.bf16 %v4330_v21 }
 0x838   : > { %v4394_v7 = vmul.f32 %v8606_v57, %v4362_v42 }
 0x839   : > { %v7468_v43 = vpop.eup %7467 }
 0x83a   : > { %4231 = vadd.xlane.f32.xlu1 %v4230_v46  ;;  %v4175_v39 = vpop.xlane.xlu1 %4174  ;;  %v4317_v10 = vmul.f32 %v7468_v43, %v10210_v20  ;;  %v7470_v41 = vpop.eup %7469  ;;  %v4102_v20 = vsub.f32 %v10178_v3, %v10333_v60 }
 0x83b   : > { %7471 = vrcp.f32 %v4175_v39  ;;  %v4320_v27 = vmul.f32 %v7470_v41, %v10212_v55  ;;  %v4184_v55 = vpop.xlane.xlu0 %4183  ;;  %v4253_v43 = vpop.xlane.xlu2 %4252  ;;  %v12136_v41 = vld [vmem:[#allocation101_spill] sm:$0xff] }
 0x83c   : > { %v4349_v35 = vpack.c.bf16 %v4317_v10, %v4317_v10  ;;  %7473 = vpow2.f32 %v4156_v15  ;;  %v4162_v54 = vmul.f32 1.442695, %v4102_v20  ;;  %v4103_v10 = vsub.f32 %v10199_v14, %v10356_v56  ;;  %v10396_v14 = vpop.f32.mrf.mxu1 }
 0x83d   : > { %v4352_v61 = vpack.c.bf16 %v4320_v27, %v4320_v27  ;;  %12137 = vst [vmem:[#allocation54_spill] sm:$0xff] %v10396_v14 }
 0x83e   : > { %v4381_v62 = vunpack.c.l.bf16 %v4349_v35  ;;  %v4164_v56 = vmul.f32 1.442695, %v4103_v10 }
 0x83f   : > { %v4384_v60 = vunpack.c.l.bf16 %v4352_v61 }
 0x840   : > { %v4413_v11 = vmul.f32 %v11945_v36, %v4381_v62 }
 0x841   : > { %v7472_v37 = vpop.eup %7471  ;;  %v4416_v19 = vmul.f32 %v11962_v5, %v4384_v60 }
 0x842   : > { %v4299_v30 = vmul.f32 %v7472_v37, %v10221_v49  ;;  %v4241_v48 = vpop.xlane.xlu1 %4240  ;;  %v4445_v58 = vpack.c.bf16 %v4413_v11, %v4413_v11  ;;  %v10390_v3 = vpop.eup %7473  ;;  %v4426_v49 = vpack.c.bf16 %v4394_v7, %v4394_v7 }
 0x843   : > { %7475 = vrcp.f32 %v4241_v48  ;;  %v4245_v27 = vsel %vm1101_vm2, %v10390_v3, 0.0  ;;  %v4448_v7 = vpack.c.bf16 %v4416_v19, %v4416_v19 }
 0x844   : > { %v4331_v63 = vpack.c.bf16 %v4299_v30, %v4299_v30  ;;  %v4686_v46 = vunpack.c.l.b16 %v4445_v58  ;;  %7477 = vrcp.f32 %v4184_v55  ;;  %v4460_v37 = vunpack.c.l.b16 %v4426_v49  ;;  %v12140_v49 = vld [vmem:[#allocation38_spill] sm:$0xff] }
 0x845   : > { %7479 = vrcp.f32 %v4253_v43  ;;  %v12139_v43 = vld [vmem:[#allocation158_spill] sm:$0xff]  ;;  %v4735_v60 = vunpack.c.l.b16 %v4448_v7  ;;  %v12144_v7 = vld [vmem:[#allocation40_spill] sm:$0xff] }
 0x846   : > { %v4363_v39 = vunpack.c.l.bf16 %v4331_v63  ;;  %v4687_v21 = vpack.c.b16 %v4686_v46, %v4685_v53  ;;  %7481 = vpow2.f32 %v4162_v54  ;;  %v12138_v63 = vld [vmem:[#allocation78_spill] sm:$0xff] }
 0x848   : > { %v4395_v52 = vmul.f32 %v12136_v41, %v4363_v39  ;;  %6833 = vmatmul.msk.bf16.vlgmr.msra.gmra.mxu3 %vm1101_vm2, %v4687_v21 }
 0x849   : > { %v7476_v35 = vpop.eup %7475  ;;  %4801 = vmatpush.bf16.msra.mxu3 %v9712_v38 }
 0x84a   : > { %v4427_v15 = vpack.c.bf16 %v4395_v52, %v4395_v52  ;;  %v4321_v62 = vmul.f32 %v7476_v35, %v10238_v33  ;;  %v4250_v42 = vpop.xlane.xlu1 %4249  ;;  %v7478_v30 = vpop.eup %7477 }
 0x84b   : > { %7483 = vrcp.f32 %v4250_v42  ;;  %v7480_v48 = vpop.eup %7479  ;;  %v4302_v61 = vmul.f32 %v7478_v30, %v10223_v29 }
 0x84c   : > { %v4461_v11 = vunpack.c.l.b16 %v4427_v15  ;;  %v4353_v20 = vpack.c.bf16 %v4321_v62, %v4321_v62  ;;  %7485 = vpow2.f32 %v4164_v56  ;;  %v10401_v38 = vpop.eup %7481  ;;  %v4325_v46 = vmul.f32 %v7480_v48, %v10228_v47  ;;  %v10415_v47 = vpop.f32.mrf.mxu1  ;;  %v12142_v48 = vld [vmem:[#allocation75_spill] sm:$0xff] }
 0x84d   : > { %4246 = vadd.xlane.f32.xlu0 %v4245_v27  ;;  %v4254_v29 = vsel %vm1101_vm2, %v10401_v38, 0.0  ;;  %v4334_v52 = vpack.c.bf16 %v4302_v61, %v4302_v61  ;;  %12141 = vst [vmem:[#allocation33_spill] sm:$0xff] %v10415_v47 }
 0x84e   : > { %v4462_v58 = vpack.c.b16 %v4461_v11, %v4460_v37  ;;  %v4385_v33 = vunpack.c.l.bf16 %v4353_v20  ;;  %v4357_v42 = vpack.c.bf16 %v4325_v46, %v4325_v46 }
 0x84f   : > { %v4366_v27 = vunpack.c.l.bf16 %v4334_v52 }
 0x850   : > { %v4417_v55 = vmul.f32 %v12138_v63, %v4385_v33  ;;  %6824 = vmatmul.msk.bf16.vlgmr.msrb.gmra.mxu2 %vm1101_vm2, %v4462_v58  ;;  %v4389_v11 = vunpack.c.l.bf16 %v4357_v42  ;;  %v12143_v58 = vld [vmem:[#allocation123_spill] sm:$0xff] }
 0x851   : > { %v7484_v53 = vpop.eup %7483  ;;  %4576 = vmatpush.bf16.msrb.mxu2 %v12139_v43  ;;  %v12146_v43 = vld [vmem:[#allocation120_spill] sm:$0xff] }
 0x852   : > { %v4262_v54 = vpop.xlane.xlu2 %4261  ;;  %v4449_v39 = vpack.c.bf16 %v4417_v55, %v4417_v55  ;;  %v4324_v10 = vmul.f32 %v7484_v53, %v10244_v45  ;;  %v4187_v21 = vpop.xlane.xlu1 %4186  ;;  %v12145_v55 = vld [vmem:[#allocation105_spill] sm:$0xff] }
 0x853   : > { %7487 = vrcp.f32 %v4187_v21  ;;  %5386 = vrot.lane.b32.xlu1 %v12140_v49, %s7717_s8  ;;  %v10413_v62 = vpop.eup %7485  ;;  %v4398_v53 = vmul.f32 %v12145_v55, %v4366_v27 }
 0x854   : > { %v4736_v35 = vunpack.c.l.b16 %v4449_v39  ;;  %v4356_v15 = vpack.c.bf16 %v4324_v10, %v4324_v10  ;;  %7489 = vrcp.f32 %v4262_v54  ;;  %v4257_v37 = vsel %vm1101_vm2, %v10413_v62, 0.0  ;;  %v5067_v10 = vpop.f32.mrf.mxu1 }
 0x855   : > { %4255 = vadd.xlane.f32.xlu0 %v4254_v29  ;;  %v4421_v54 = vmul.f32 %v12146_v43, %v4389_v11 }
 0x856   : > { %v4737_v56 = vpack.c.b16 %v4736_v35, %v4735_v60  ;;  %v4388_v45 = vunpack.c.l.bf16 %v4356_v15  ;;  %v4430_v60 = vpack.c.bf16 %v4398_v53, %v4398_v53 }
 0x857   : > { %v4453_v35 = vpack.c.bf16 %v4421_v54, %v4421_v54  ;;  %v12149_v54 = vld [vmem:[#allocation157_spill] sm:$0xff] }
 0x858   : > { %4258 = vadd.xlane.f32.xlu2 %v4257_v37  ;;  %6835 = vmatmul.msk.bf16.vlgmr.msrb.gmra.mxu3 %vm1101_vm2, %v4737_v56  ;;  %v4420_v33 = vmul.f32 %v12143_v58, %v4388_v45  ;;  %v4510_v37 = vunpack.c.l.b16 %v4430_v60 }
 0x859   : > { %v7488_v19 = vpop.eup %7487  ;;  %4851 = vmatpush.bf16.msrb.mxu3 %v12142_v48  ;;  %v4786_v27 = vunpack.c.l.b16 %v4453_v35 }
 0x85a   : > { %v4199_v20 = vpop.xlane.xlu2 %4198  ;;  %v4303_v30 = vmul.f32 %v7488_v19, %v10251_v0  ;;  %v7490_v61 = vpop.eup %7489  ;;  %v4452_v21 = vpack.c.bf16 %v4420_v33, %v4420_v33  ;;  %v12147_v0 = vld [vmem:[#allocation104_spill] sm:$0xff]  ;;  %v12148_v33 = vld [vmem:[#allocation115_spill] sm:$0xff] }
 0x85b   : > { %5408 = vrot.lane.b32.xlu1 %v12144_v7, %s7718_s9  ;;  %v4328_v29 = vmul.f32 %v7490_v61, %v10253_v13  ;;  %v5104_v13 = vsel %vm675_vm1, %v12148_v33, 0 }
 0x85c   : > { %v4335_v46 = vpack.c.bf16 %v4303_v30, %v4303_v30  ;;  %v4785_v56 = vunpack.c.l.b16 %v4452_v21  ;;  %v5069_v61 = vpop.f32.mrf.mxu1  ;;  %v12150_v21 = vld [vmem:[#allocation67_spill] sm:$0xff] }
 0x85d   : > { %v4360_v45 = vpack.c.bf16 %v4328_v29, %v4328_v29 }
 0x85e   : > { %v4367_v39 = vunpack.c.l.bf16 %v4335_v46  ;;  %v4787_v48 = vpack.c.b16 %v4786_v27, %v4785_v56 }
 0x85f   : > { %v4392_v11 = vunpack.c.l.bf16 %v4360_v45 }
 0x860   : > { %v4399_v52 = vmul.f32 %v12147_v0, %v4367_v39 }
 0x861   : > { %v4424_v29 = vmul.f32 %v12150_v21, %v4392_v11 }
 0x862   : > { %v4265_v15 = vpop.xlane.xlu2 %4264  ;;  %v4431_v42 = vpack.c.bf16 %v4399_v52, %v4399_v52  ;;  %v10439_v52 = vpop.f32.mrf.mxu0 }
 0x863   : > { %7491 = vrcp.f32 %v4265_v15  ;;  %v4456_v15 = vpack.c.bf16 %v4424_v29, %v4424_v29  ;;  %v12155_v29 = vld [vmem:[#allocation143_spill] sm:$0xff] }
 0x864   : > { %v4511_v19 = vunpack.c.l.b16 %v4431_v42  ;;  %v12151_v42 = vld [vmem:[#allocation29_spill] sm:$0xff]  ;;  %v5139_v45 = vpop.f32.mrf.mxu1  ;;  %7493 = vrcp.f32 %v4199_v20  ;;  %v12160_v20 = vld [vmem:[#allocation68_spill] sm:$0xff] }
 0x866   : > { %v4512_v30 = vpack.c.b16 %v4511_v19, %v4510_v37  ;;  %v4835_v37 = vunpack.c.l.b16 %v4456_v15 }
 0x868   : > { %6826 = vmatmul.msk.bf16.vlgmr.msra.gmra.mxu2 %vm1101_vm2, %v4512_v30  ;;  %6837 = vmatmul.msk.bf16.vlgmr.msra.gmra.mxu3 %vm1101_vm2, %v4787_v48  ;;  %v12153_v48 = vld [vmem:[#allocation36_spill] sm:$0xff] }
 0x869   : > { %v7492_v46 = vpop.eup %7491  ;;  %4626 = vmatpush.bf16.msra.mxu2 %v12149_v54  ;;  %5113 = vmatpush.bf16.xpose.msra.mxu3 %v5104_v13  ;;  %v5176_v11 = vsel %vm675_vm1, %v12153_v48, 0  ;;  %v12154_v13 = vld [vmem:[#allocation60_spill] sm:$0xff] }
 0x86a   : > { %v4329_v53 = vmul.f32 %v7492_v46, %v10275_v26  ;;  %5410 = vrot.lane.b32.xlu0 %v12144_v7, %s7717_s8  ;;  %v5337_v39 = vpop.permute.xlu1 %5336  ;;  %v10444_v30 = vpop.f32.mrf.mxu0 }
 0x86b   : > { %6869 = vmatmul.msk.bf16.vlgmr.msrb.gmra.mxu1 %vm675_vm1, %v5337_v39  ;;  %12152 = vst [vmem:[#allocation121_spill] sm:$0xff] %v10444_v30 }
 0x86c   : > { %v4361_v60 = vpack.c.bf16 %v4329_v53, %v4329_v53  ;;  %v5141_v46 = vpop.f32.mrf.mxu1 }
 0x86d   : > { %v10452_v53 = vadd.f32 %v12154_v13, %v5141_v46  ;;  %v12159_v46 = vld [vmem:[#allocation50_spill] sm:$0xff] }
 0x86e   : > { %v4393_v35 = vunpack.c.l.bf16 %v4361_v60  ;;  %v5248_v60 = vsel %vm675_vm1, %v12155_v29, 0  ;;  %v10473_v13 = vadd.f32 %v12159_v46, %v5067_v10 }
 0x86f   : > { %v5453_v54 = vsel %vm1101_vm2, %v10452_v53, -inf }
 0x870   : > { %v4425_v26 = vmul.f32 %v12151_v42, %v4393_v35  ;;  %5384 = vrot.lane.b32.xlu2 %v12140_v49, %s7718_s9  ;;  %v12156_v35 = vld [vmem:[#allocation160_spill] sm:$0xff]  ;;  %s11263_s9 = scalar_lea.vmem [#allocation2], %s6677_s29 }
 0x871   : > { %s6584_s28 = sshll.u32 %s11263_s9, 4  ;;  %s6585_s28 = int_to_ptr.vmem [resolvable:$true] %s6584_s28 }
 0x872   : > { %v4457_v56 = vpack.c.bf16 %v4425_v26, %v4425_v26  ;;  %v10449_v33 = vpop.f32.mrf.mxu0  ;;  %v12158_v26 = vld [vmem:[#allocation49_spill] sm:$0xff]  ;;  %v4223_v30 = vpop.xlane.xlu2 %4222 }
 0x874   : > { %v4836_v19 = vunpack.c.l.b16 %v4457_v56  ;;  %v5211_v39 = vpop.f32.mrf.mxu1  ;;  %v10463_v56 = vadd.f32 %v12158_v26, %v5069_v61  ;;  %v12161_v26 = vld [vmem:[#allocation37_spill] sm:$0xff] }
 0x875   : > { %v10476_v29 = vadd.f32 %v12160_v20, %v5211_v39 }
 0x876   : > { %v4837_v27 = vpack.c.b16 %v4836_v19, %v4835_v37  ;;  %v7494_v37 = vpop.eup %7493  ;;  %v5435_v48 = vsel %vm1101_vm2, %v10463_v56, -inf }
 0x877   : > { %v5468_v39 = vsel %vm1101_vm2, %v10476_v29, -inf }
 0x878   : > { %6839 = vmatmul.msk.bf16.vlgmr.msrb.gmra.mxu3 %vm1101_vm2, %v4837_v27  ;;  %v4307_v27 = vmul.f32 %v7494_v37, %v10263_v44  ;;  %v5320_v44 = vsel %vm675_vm1, %v12161_v26, 0  ;;  %v12162_v37 = vld [vmem:[#allocation126_spill] sm:$0xff] }
 0x879   : > { %5185 = vmatpush.bf16.xpose.msrb.mxu3 %v5176_v11 }
 0x87a   : > { %v10460_v15 = vpop.f32.mrf.mxu0  ;;  %v4339_v61 = vpack.c.bf16 %v4307_v27, %v4307_v27 }
 0x87b   : > { %12157 = vst [vmem:[#allocation23_spill] sm:$0xff] %v10460_v15 }
 0x87c   : > { %v10465_v19 = vpop.f32.mrf.mxu1  ;;  %v4371_v10 = vunpack.c.l.bf16 %v4339_v61 }
 0x882   : > { %v10470_v11 = vpop.f32.mrf.mxu0 }
 0x884   : > { %v5283_v46 = vpop.f32.mrf.mxu1 }
 0x885   : > { %5454 = vmax.xlane.f32.xlu1 %v5453_v54 }
 0x888   : > { %6859 = vmatmul.msk.bf16.vlgmr.msra.gmra.mxu3 %vm675_vm1, %v12156_v35  ;;  %v10478_v35 = vpop.f32.mrf.mxu3 }
 0x889   : > { %5257 = vmatpush.bf16.xpose.msra.mxu3 %v5248_v60  ;;  %v4211_v60 = vpop.xlane.xlu0 %4210 }
 0x890   : > { %v10498_v15 = vpop.f32.mrf.mxu3 }
 0x894   : > { %5436 = vmax.xlane.f32.xlu0 %v5435_v48  ;;  %v5432_v48 = vsel %vm1101_vm2, %v10473_v13, -inf }
 0x895   : > { %v4196_v54 = vpop.xlane.xlu1 %4195 }
 0x896   : > { %7495 = vrcp.f32 %v4196_v54  ;;  %v12163_v54 = vld [vmem:[#allocation62_spill] sm:$0xff] }
 0x897   : > { %7497 = vrcp.f32 %v4211_v60  ;;  %v10489_v20 = vadd.f32 %v12163_v54, %v5139_v45  ;;  %v10495_v60 = vadd.f32 %v12165_v6, %v5283_v46 }
 0x898   : > { %6862 = vmatmul.msk.bf16.vlgmr.msrb.gmra.mxu3 %vm675_vm1, %v12162_v37  ;;  %v10492_v37 = vpop.f32.mrf.mxu0 }
 0x899   : > { %5329 = vmatpush.bf16.xpose.msrb.mxu3 %v5320_v44  ;;  %5433 = vmax.xlane.f32.xlu2 %v5432_v48  ;;  %12164 = vst [vmem:[#allocation150_spill] sm:$0xff] %v10492_v37  ;;  %v12166_v44 = vld [vmem:[#allocation107_spill] sm:$0xff]  ;;  %v5450_v45 = vsel %vm1101_vm2, %v10489_v20, -inf  ;;  %v5486_v6 = vsel %vm1101_vm2, %v10495_v60, -inf }
 0x89a   : > { %v4403_v61 = vmul.f32 %v12166_v44, %v4371_v10 }
 0x89c   : > { %v7496_v27 = vpop.eup %7495  ;;  %5469 = vmax.xlane.f32.xlu0 %v5468_v39  ;;  %v4435_v39 = vpack.c.bf16 %v4403_v61, %v4403_v61  ;;  %v12168_v61 = vld [vmem:[#allocation140_spill] sm:$0xff] }
 0x89d   : > { %v4306_v26 = vmul.f32 %v7496_v27, %v10335_v50  ;;  %v4208_v51 = vpop.xlane.xlu1 %4207  ;;  %v7498_v8 = vpop.eup %7497  ;;  %v12167_v27 = vld [vmem:[#allocation106_spill] sm:$0xff] }
 0x89e   : > { %7499 = vrcp.f32 %v4208_v51  ;;  %v4311_v50 = vmul.f32 %v7498_v8, %v10279_v40  ;;  %v4561_v37 = vunpack.c.l.b16 %v4435_v39  ;;  %v10509_v40 = vpop.f32.mrf.mxu3  ;;  %v12170_v39 = vld [vmem:[#allocation111_spill] sm:$0xff] }
 0x89f   : > { %v4338_v48 = vpack.c.bf16 %v4306_v26, %v4306_v26 }
 0x8a1   : > { %v4370_v47 = vunpack.c.l.bf16 %v4338_v48  ;;  %5451 = vmax.xlane.f32.xlu2 %v5450_v45  ;;  %v4343_v48 = vpack.c.bf16 %v4311_v50, %v4311_v50  ;;  %v10507_v45 = vpop.f32.mrf.mxu0 }
 0x8a3   : > { %v4402_v54 = vmul.f32 %v12167_v27, %v4370_v47 }
 0x8a4   : > { %v7500_v51 = vpop.eup %7499  ;;  %5487 = vmax.xlane.f32.xlu0 %v5486_v6 }
 0x8a5   : > { %v4434_v10 = vpack.c.bf16 %v4402_v54, %v4402_v54  ;;  %v4310_v46 = vmul.f32 %v7500_v51, %v10349_v24  ;;  %v4220_v26 = vpop.xlane.xlu1 %4219  ;;  %v4375_v54 = vunpack.c.l.bf16 %v4343_v48  ;;  %v12169_v24 = vld [vmem:[#allocation156_spill] sm:$0xff]  ;;  %v12171_v51 = vld [vmem:[#allocation110_spill] sm:$0xff]  ;;  %v4235_v48 = vpop.xlane.xlu0 %4234 }
 0x8a6   : > { %7501 = vrcp.f32 %v4220_v26 }
 0x8a7   : > { %v4560_v14 = vunpack.c.l.b16 %v4434_v10  ;;  %v4342_v42 = vpack.c.bf16 %v4310_v46, %v4310_v46  ;;  %7503 = vrcp.f32 %v4223_v30  ;;  %v4407_v10 = vmul.f32 %v12171_v51, %v4375_v54  ;;  %v10521_v30 = vpop.f32.mrf.mxu3 }
 0x8a8   : > { %6865 = vmatmul.msk.bf16.vlgmr.msra.gmra.mxu3 %vm675_vm1, %v12168_v61 }
 0x8a9   : > { %v4562_v8 = vpack.c.b16 %v4561_v37, %v4560_v14  ;;  %v4374_v47 = vunpack.c.l.bf16 %v4342_v42  ;;  %v10518_v14 = vpop.f32.mrf.mxu0  ;;  %v4439_v42 = vpack.c.bf16 %v4407_v10, %v4407_v10 }
 0x8aa   : > { %12172 = vst [vmem:[#allocation154_spill] sm:$0xff] %v10518_v14 }
 0x8ab   : > { %6828 = vmatmul.msk.bf16.vlgmr.msrb.gmra.mxu2 %vm1101_vm2, %v4562_v8  ;;  %v4406_v50 = vmul.f32 %v12170_v39, %v4374_v47  ;;  %v4611_v43 = vunpack.c.l.b16 %v4439_v42 }
 0x8ac   : > { %4676 = vmatpush.bf16.msrb.mxu2 %v12169_v24  ;;  %v7502_v6 = vpop.eup %7501 }
 0x8ad   : > { %v7504_v46 = vpop.eup %7503  ;;  %v4438_v26 = vpack.c.bf16 %v4406_v50, %v4406_v50  ;;  %v4314_v21 = vmul.f32 %v7502_v6, %v10358_v12  ;;  %v4232_v24 = vpop.xlane.xlu1 %4231 }
 0x8ae   : > { %v4315_v37 = vmul.f32 %v7504_v46, %v10295_v25  ;;  %7505 = vrcp.f32 %v4232_v24  ;;  %v4244_v12 = vpop.xlane.xlu2 %4243  ;;  %v6840_v25 = vld [vmem:[%s11467_s5 + $0x8] sm:$0xf] }
 0x8af   : > { %v4610_v8 = vunpack.c.l.b16 %v4438_v26  ;;  %v4346_v61 = vpack.c.bf16 %v4314_v21, %v4314_v21  ;;  %7507 = vrcp.f32 %v4235_v48  ;;  %v12174_v21 = vld [vmem:[#allocation52_spill] sm:$0xff]  ;;  %v4925_v10 = vsel %vm3361_vm3, %v6840_v25, 0  ;;  %v10535_v46 = vpop.f32.mrf.mxu3 }
 0x8b0   : > { %v4347_v47 = vpack.c.bf16 %v4315_v37, %v4315_v37  ;;  %4934 = vmatpush.bf16.msra.mxu0 %v4925_v10  ;;  %v12176_v37 = vld [vmem:[#allocation100_spill] sm:$0xff] }
 0x8b1   : > { %v4612_v58 = vpack.c.b16 %v4611_v43, %v4610_v8  ;;  %v4378_v54 = vunpack.c.l.bf16 %v4346_v61  ;;  %v10529_v6 = vpop.f32.mrf.mxu0  ;;  %v10533_v43 = vpop.permute.xlu0 %5360 }
 0x8b2   : > { %v4379_v50 = vunpack.c.l.bf16 %v4347_v47 }
 0x8b4   : > { %v7506_v42 = vpop.eup %7505 }
 0x8b5   : > { %v7508_v48 = vpop.eup %7507  ;;  %v4318_v61 = vmul.f32 %v7506_v42, %v10369_v2 }
 0x8b6   : > { %v4319_v47 = vmul.f32 %v7508_v48, %v10309_v28  ;;  %v12179_v48 = vld [vmem:[#allocation94_spill] sm:$0xff] }
 0x8b7   : > { %v4350_v14 = vpack.c.bf16 %v4318_v61, %v4318_v61 }
 0x8b8   : > { %6868 = vmatmul.msk.bf16.vlgmr.msrb.gmra.mxu3 %vm675_vm1, %v12173_v9  ;;  %v12175_v9 = vld [vmem:[#allocation97_spill] sm:$0xff]  ;;  %v4351_v44 = vpack.c.bf16 %v4319_v47, %v4319_v47 }
 0x8b9   : > { %v4410_v26 = vmul.f32 %v12175_v9, %v4378_v54  ;;  %v10543_v49 = vpop.f32.mrf.mxu0  ;;  %v12224_v9 = vld [vmem:[#allocation7_spill] sm:$0xff] }
 0x8ba   : > { %12177 = vst [vmem:[#allocation42_spill] sm:$0xff] %v10543_v49  ;;  %v4383_v28 = vunpack.c.l.bf16 %v4351_v44  ;;  %v12180_v49 = vld [vmem:[#allocation114_spill] sm:$0xff] }
 0x8bb   : > { %6830 = vmatmul.msk.bf16.vlgmr.msra.gmra.mxu2 %vm1101_vm2, %v4612_v58  ;;  %v4411_v58 = vmul.f32 %v12176_v37, %v4379_v50  ;;  %v4442_v8 = vpack.c.bf16 %v4410_v26, %v4410_v26  ;;  %v10546_v50 = vpop.f32.mrf.mxu3  ;;  %v4382_v26 = vunpack.c.l.bf16 %v4350_v14 }
 0x8bc   : > { %4726 = vmatpush.bf16.msra.mxu2 %v12174_v21  ;;  %v10541_v21 = vpop.permute.xlu2 %5362 }
 0x8bd   : > { %v4443_v24 = vpack.c.bf16 %v4411_v58, %v4411_v58  ;;  %v4660_v25 = vunpack.c.l.b16 %v4442_v8  ;;  %v12178_v58 = vld [vmem:[#allocation76_spill] sm:$0xff]  ;;  %v4414_v8 = vmul.f32 %v12179_v48, %v4382_v26 }
 0x8bf   : > { %v4661_v10 = vunpack.c.l.b16 %v4443_v24  ;;  %v4446_v27 = vpack.c.bf16 %v4414_v8, %v4414_v8 }
 0x8c0   : > { %v4247_v23 = vpop.xlane.xlu0 %4246 }
 0x8c1   : > { %7509 = vrcp.f32 %v4247_v23  ;;  %v4662_v2 = vpack.c.b16 %v4661_v10, %v4660_v25  ;;  %v10552_v47 = vpop.f32.mrf.mxu0 }
 0x8c2   : > { %7511 = vrcp.f32 %v4244_v12 }
 0x8c5   : > { %v5387_v7 = vpop.permute.xlu1 %5386 }
 0x8c6   : > { %v5392_v54 = vsel %vm675_vm1, %v5387_v7, 0  ;;  %v4415_v7 = vmul.f32 %v12180_v49, %v4383_v28 }
 0x8c7   : > { %5401 = vmatpush.bf16.xpose.msra.mxu3 %v5392_v54  ;;  %v7510_v61 = vpop.eup %7509  ;;  %v10554_v54 = vpop.f32.mrf.mxu3 }
 0x8c8   : > { %v7512_v24 = vpop.eup %7511  ;;  %v4323_v23 = vmul.f32 %v7510_v61, %v10390_v3  ;;  %v4447_v14 = vpack.c.bf16 %v4415_v7, %v4415_v7  ;;  %v4256_v25 = vpop.xlane.xlu0 %4255  ;;  %v12182_v7 = vld [vmem:[#allocation44_spill] sm:$0xff] }
 0x8c9   : > { %v4322_v44 = vmul.f32 %v7512_v24, %v10323_v31  ;;  %v10559_v8 = vpop.f32.mrf.mxu0  ;;  %v12183_v24 = vld [vmem:[#allocation117_spill] sm:$0xff] }
 0x8ca   : > { %v4711_v26 = vunpack.c.l.b16 %v4447_v14  ;;  %12181 = vst [vmem:[#allocation136_spill] sm:$0xff] %v10559_v8 }
 0x8cb   : > { %6832 = vmatmul.msk.bf16.vlgmr.msrb.gmra.mxu2 %vm1101_vm2, %v4662_v2  ;;  %v4259_v42 = vpop.xlane.xlu2 %4258  ;;  %v4710_v2 = vunpack.c.l.b16 %v4446_v27  ;;  %v4354_v28 = vpack.c.bf16 %v4322_v44, %v4322_v44  ;;  %v12184_v44 = vld [vmem:[#allocation116_spill] sm:$0xff] }
 0x8cc   : > { %4776 = vmatpush.bf16.msrb.mxu2 %v12178_v58  ;;  %v4355_v58 = vpack.c.bf16 %v4323_v23, %v4323_v23  ;;  %7513 = vrcp.f32 %v4259_v42 }
 0x8cd   : > { %v4712_v48 = vpack.c.b16 %v4711_v26, %v4710_v2  ;;  %7515 = vrcp.f32 %v4256_v25  ;;  %v4386_v63 = vunpack.c.l.bf16 %v4354_v28  ;;  %v10569_v2 = vpop.f32.mrf.mxu1 }
 0x8ce   : > { %v4387_v49 = vunpack.c.l.bf16 %v4355_v58 }
 0x8cf   : > { %v10561_v3 = vpop.f32.mrf.mxu3  ;;  %v4418_v25 = vmul.f32 %v12184_v44, %v4386_v63  ;;  %v12186_v44 = vld [vmem:[#allocation81_spill] sm:$0xff] }
 0x8d0   : > { %v4419_v23 = vmul.f32 %v12183_v24, %v4387_v49  ;;  %v5409_v49 = vpop.permute.xlu1 %5408 }
 0x8d2   : > { %v7514_v42 = vpop.eup %7513  ;;  %v4451_v58 = vpack.c.bf16 %v4419_v23, %v4419_v23 }
 0x8d3   : > { %v4478_v12 = vpop.f32.mrf.mxu2  ;;  %v5385_v10 = vpop.permute.xlu2 %5384 }
 0x8d4   : > { %6871 = vmatmul.msk.bf16.vlgmr.msra.gmra.mxu3 %vm675_vm1, %v5385_v10  ;;  %v7516_v10 = vpop.eup %7515 }
 0x8d5   : > { %v4326_v26 = vmul.f32 %v7516_v10, %v10401_v38  ;;  %v4859_v38 = vpack.c.bf16 %v10498_v15, %v10478_v35 }
 0x8d7   : > { %v10573_v28 = vpop.f32.mrf.mxu3  ;;  %v4358_v63 = vpack.c.bf16 %v4326_v26, %v4326_v26 }
 0x8db   : > { %v4480_v61 = vpop.f32.mrf.mxu2  ;;  %6834 = vmatmul.msk.bf16.vlgmr.msra.gmra.mxu2 %vm1101_vm2, %v4712_v48  ;;  %v4327_v48 = vmul.f32 %v7514_v42, %v10413_v62  ;;  %v5080_v62 = vsel %vm675_vm1, %v12186_v44, 0  ;;  %v4390_v42 = vunpack.c.l.bf16 %v4358_v63 }
 0x8dc   : > { %v4858_v31 = vpack.c.bf16 %v4480_v61, %v4478_v12  ;;  %4826 = vmatpush.bf16.msra.mxu2 %v12182_v7  ;;  %v5411_v27 = vpop.permute.xlu0 %5410  ;;  %v4450_v12 = vpack.c.bf16 %v4418_v25, %v4418_v25  ;;  %v10575_v61 = vpop.f32.mrf.mxu0  ;;  %v4761_v7 = vunpack.c.l.b16 %v4451_v58  ;;  %v12187_v25 = vld [vmem:[#allocation131_spill] sm:$0xff] }
 0x8dd   : > { %v5416_v14 = vsel %vm675_vm1, %v5411_v27, 0  ;;  %12185 = vst [vmem:[#allocation132_spill] sm:$0xff] %v10575_v61  ;;  %v4359_v27 = vpack.c.bf16 %v4327_v48, %v4327_v48 }
 0x8de   : > { %5425 = vmatpush.bf16.xpose.msra.mxu1 %v5416_v14  ;;  %6841 = vmatmul.msk.bf16.vlgmr.msra.gmra.mxu0 %vm675_vm1, %v4858_v31  ;;  %v4760_v31 = vunpack.c.l.b16 %v4450_v12  ;;  %v12189_v12 = vld [vmem:[#allocation129_spill] sm:$0xff] }
 0x8df   : > { %v4391_v23 = vunpack.c.l.bf16 %v4359_v27  ;;  %v10586_v58 = vpop.f32.mrf.mxu3  ;;  %v4422_v26 = vmul.f32 %v12189_v12, %v4390_v42  ;;  %v12190_v27 = vld [vmem:[#allocation90_spill] sm:$0xff] }
 0x8e0   : > { %v4762_v8 = vpack.c.b16 %v4761_v7, %v4760_v31 }
 0x8e1   : > { %v4423_v10 = vmul.f32 %v12187_v25, %v4391_v23 }
 0x8e3   : > { %v4455_v44 = vpack.c.bf16 %v4423_v10, %v4423_v10  ;;  %v12192_v10 = vld [vmem:[#allocation118_spill] sm:$0xff] }
 0x8e4   : > { %v10589_v48 = vpop.f32.mrf.mxu0 }
 0x8e5   : > { %6872 = vmatmul.msk.bf16.vlgmr.msra.gmra.mxu1 %vm675_vm1, %v5409_v49  ;;  %12188 = vst [vmem:[#allocation128_spill] sm:$0xff] %v10589_v48  ;;  %v4811_v35 = vunpack.c.l.b16 %v4455_v44 }
 0x8e7   : > { %v10597_v23 = vpop.f32.mrf.mxu3 }
 0x8e8   : > { %v10578_v14 = vpop.f32.mrf.mxu1 }
 0x8eb   : > { %6836 = vmatmul.msk.bf16.vlgmr.msrb.gmra.mxu2 %vm1101_vm2, %v4762_v8  ;;  %v4528_v49 = vpop.f32.mrf.mxu2  ;;  %v4454_v8 = vpack.c.bf16 %v4422_v26, %v4422_v26 }
 0x8ec   : > { %5089 = vmatpush.bf16.xpose.msrb.mxu2 %v5080_v62 }
 0x8ed   : > { %v4810_v63 = vunpack.c.l.b16 %v4454_v8 }
 0x8ee   : > { %6842 = vmatmul.msk.bf16.gmra.mxu0 %vm675_vm1, %v4859_v38  ;;  %v10599_v38 = vpop.f32.mrf.mxu0 }
 0x8ef   : > { %12191 = vst [vmem:[#allocation31_spill] sm:$0xff] %v10599_v38  ;;  %v4812_v48 = vpack.c.b16 %v4811_v35, %v4810_v63  ;;  %v10606_v44 = vpop.f32.mrf.mxu3 }
 0x8f0   : > { %v5357_v7 = vpop.f32.mrf.mxu1 }
 0x8f1   : > { %v10593_v31 = vadd.f32 %v12190_v27, %v5357_v7  ;;  %v5152_v7 = vsel %vm675_vm1, %v12192_v10, 0  ;;  %v4861_v10 = vpack.c.bf16 %v10521_v30, %v10509_v40 }
 0x8f3   : > { %v5507_v15 = vsel %vm1101_vm2, %v10593_v31, -inf  ;;  %v4530_v42 = vpop.f32.mrf.mxu2 }
 0x8f4   : > { %5508 = vmax.xlane.f32.xlu0 %v5507_v15  ;;  %v4860_v26 = vpack.c.bf16 %v4530_v42, %v4528_v49  ;;  %v12195_v42 = vld [vmem:[#allocation153_spill] sm:$0xff] }
 0x8f6   : > { %v10610_v15 = vpop.f32.mrf.mxu0 }
 0x8f7   : > { %12193 = vst [vmem:[#allocation142_spill] sm:$0xff] %v10610_v15  ;;  %v4863_v15 = vpack.c.bf16 %v10546_v50, %v10535_v46 }
 0x8f8   : > { %v5455_v62 = vpop.xlane.xlu1 %5454 }
 0x8f9   : > { %v5535_v61 = vsub.f32 %v10452_v53, %v5455_v62  ;;  %v10617_v62 = vpop.f32.mrf.mxu3 }
 0x8fb   : > { %v5574_v27 = vmul.f32 1.442695, %v5535_v61  ;;  %6838 = vmatmul.msk.bf16.vlgmr.msra.gmra.mxu2 %vm1101_vm2, %v4812_v48  ;;  %v12194_v48 = vld [vmem:[#allocation39_spill] sm:$0xff] }
 0x8fc   : > { %5161 = vmatpush.bf16.xpose.msra.mxu2 %v5152_v7  ;;  %v5224_v49 = vsel %vm675_vm1, %v12194_v48, 0 }
 0x8fd   : > { %7517 = vpow2.f32 %v5574_v27 }
 0x8fe   : > { %6843 = vmatmul.msk.bf16.gmra.mxu0 %vm675_vm1, %v4860_v26  ;;  %v10623_v7 = vpop.f32.mrf.mxu0 }
 0x8ff   : > { %12196 = vst [vmem:[#allocation15_spill] sm:$0xff] %v10623_v7 }
 0x901   : > { %v10632_v30 = vpop.f32.mrf.mxu3 }
 0x903   : > { %v10608_v8 = vpop.eup %7517 }
 0x904   : > { %v5645_v53 = vsel %vm1101_vm2, %v10608_v8, 0.0 }
 0x905   : > { %5646 = vadd.xlane.f32.xlu0 %v5645_v53 }
 0x907   : > { %v5437_v35 = vpop.xlane.xlu0 %5436 }
 0x908   : > { %v5529_v61 = vsub.f32 %v10463_v56, %v5437_v35 }
 0x90a   : > { %v5562_v63 = vmul.f32 1.442695, %v5529_v61 }
 0x90b   : > { %6858 = vmatmul.msk.bf16.vlgmr.msrb.gmra.mxu2 %vm675_vm1, %v12195_v42 }
 0x90c   : > { %7519 = vpow2.f32 %v5562_v63  ;;  %5233 = vmatpush.bf16.xpose.msrb.mxu2 %v5224_v49  ;;  %v5434_v27 = vpop.xlane.xlu2 %5433  ;;  %v10634_v63 = vpop.f32.mrf.mxu0 }
 0x90d   : > { %v5528_v26 = vsub.f32 %v10473_v13, %v5434_v27  ;;  %12197 = vst [vmem:[#allocation122_spill] sm:$0xff] %v10634_v63  ;;  %v12199_v27 = vld [vmem:[#allocation152_spill] sm:$0xff] }
 0x90e   : > { %6844 = vmatmul.msk.bf16.gmra.mxu0 %vm675_vm1, %v4861_v10  ;;  %v12202_v63 = vld [vmem:[#allocation84_spill] sm:$0xff] }
 0x90f   : > { %v5470_v56 = vpop.xlane.xlu0 %5469  ;;  %v5560_v53 = vmul.f32 1.442695, %v5528_v26 }
 0x910   : > { %v5540_v35 = vsub.f32 %v10476_v29, %v5470_v56  ;;  %v12198_v29 = vld [vmem:[#allocation72_spill] sm:$0xff]  ;;  %v12200_v56 = vld [vmem:[#allocation70_spill] sm:$0xff] }
 0x911   : > { %7521 = vpow2.f32 %v5560_v53  ;;  %v5296_v10 = vsel %vm675_vm1, %v12198_v29, 0  ;;  %v10650_v53 = vadd.f32 %v12200_v56, %v10465_v19 }
 0x912   : > { %v10628_v61 = vpop.eup %7519  ;;  %v5584_v48 = vmul.f32 1.442695, %v5540_v35 }
 0x913   : > { %v5627_v40 = vsel %vm1101_vm2, %v10628_v61, 0.0  ;;  %v5471_v29 = vsel %vm1101_vm2, %v10650_v53, -inf }
 0x914   : > { %7523 = vpow2.f32 %v5584_v48  ;;  %5628 = vadd.xlane.f32.xlu1 %v5627_v40  ;;  %v5452_v35 = vpop.xlane.xlu2 %5451  ;;  %v10652_v48 = vpop.f32.mrf.mxu3 }
 0x915   : > { %v5534_v40 = vsub.f32 %v10489_v20, %v5452_v35  ;;  %v5368_v20 = vsel %vm675_vm1, %v10541_v21, 0  ;;  %v12204_v35 = vld [vmem:[#allocation162_spill] sm:$0xff] }
 0x916   : > { %v12207_v21 = vld [vmem:[#allocation6_spill] sm:$0xff] }
 0x917   : > { %v10636_v13 = vpop.eup %7521  ;;  %v5488_v0 = vpop.xlane.xlu0 %5487 }
 0x918   : > { %v5624_v49 = vsel %vm1101_vm2, %v10636_v13, 0.0 }
 0x919   : > { %5625 = vadd.xlane.f32.xlu2 %v5624_v49  ;;  %v10655_v49 = vpop.f32.mrf.mxu0 }
 0x91a   : > { %v10640_v42 = vpop.eup %7523  ;;  %12201 = vst [vmem:[#allocation63_spill] sm:$0xff] %v10655_v49 }
 0x91b   : > { %6861 = vmatmul.msk.bf16.vlgmr.msra.gmra.mxu2 %vm675_vm1, %v12199_v27  ;;  %v5660_v26 = vsel %vm1101_vm2, %v10640_v42, 0.0  ;;  %v5572_v27 = vmul.f32 1.442695, %v5534_v40 }
 0x91c   : > { %5305 = vmatpush.bf16.xpose.msra.mxu2 %v5296_v10  ;;  %5661 = vadd.xlane.f32.xlu0 %v5660_v26  ;;  %v10661_v10 = vadd.f32 %v12202_v63, %v10569_v2  ;;  %v10663_v26 = vpop.f32.mrf.mxu3  ;;  %v12205_v2 = vld [vmem:[#allocation5_spill] sm:$0xff] }
 0x91d   : > { %7525 = vpow2.f32 %v5572_v27 }
 0x91e   : > { %v5489_v19 = vsel %vm1101_vm2, %v10661_v10, -inf }
 0x921   : > { %5472 = vmax.xlane.f32.xlu2 %v5471_v29  ;;  %v10667_v56 = vpop.f32.mrf.mxu0 }
 0x922   : > { %12203 = vst [vmem:[#allocation19_spill] sm:$0xff] %v10667_v56  ;;  %v12208_v56 = vld [vmem:[#allocation41_spill] sm:$0xff] }
 0x923   : > { %v10675_v63 = vpop.eup %7525 }
 0x924   : > { %v5642_v29 = vsel %vm1101_vm2, %v10675_v63, 0.0  ;;  %v10679_v27 = vpop.f32.mrf.mxu3 }
 0x929   : > { %5490 = vmax.xlane.f32.xlu2 %v5489_v19  ;;  %v10681_v19 = vpop.f32.mrf.mxu0 }
 0x92a   : > { %12206 = vst [vmem:[#allocation25_spill] sm:$0xff] %v10681_v19 }
 0x92b   : > { %6864 = vmatmul.msk.bf16.vlgmr.msrb.gmra.mxu2 %vm675_vm1, %v12204_v35 }
 0x92c   : > { %5377 = vmatpush.bf16.xpose.msrb.mxu2 %v5368_v20 }
 0x92d   : > { %5917 = vrot.lane.b32.xlu1 %v12205_v2, %s7719_s20  ;;  %v10688_v2 = vpop.f32.mrf.mxu3 }
 0x92e   : > { %v4578_v40 = vpop.f32.mrf.mxu2 }
 0x931   : > { %5643 = vadd.xlane.f32.xlu2 %v5642_v29  ;;  %v10690_v7 = vpop.f32.mrf.mxu0 }
 0x932   : > { %12209 = vst [vmem:[#allocation127_spill] sm:$0xff] %v10690_v7 }
 0x935   : > { %5942 = vrot.lane.b32.xlu1 %v12207_v21, %s7719_s20  ;;  %v10694_v19 = vpop.f32.mrf.mxu3 }
 0x936   : > { %v4580_v35 = vpop.f32.mrf.mxu2 }
 0x937   : > { %v4862_v20 = vpack.c.bf16 %v4580_v35, %v4578_v40  ;;  %v12211_v40 = vld [vmem:[#allocation9_spill] sm:$0xff]  ;;  %v12212_v35 = vld [vmem:[#allocation12_spill] sm:$0xff] }
 0x939   : > { %6845 = vmatmul.msk.bf16.gmra.mxu0 %vm675_vm1, %v4862_v20  ;;  %v10696_v38 = vpop.f32.mrf.mxu0 }
 0x93a   : > { %12210 = vst [vmem:[#allocation46_spill] sm:$0xff] %v10696_v38  ;;  %v12214_v38 = vld [vmem:[#allocation130_spill] sm:$0xff] }
 0x93b   : > { %6867 = vmatmul.msk.bf16.vlgmr.msra.gmra.mxu2 %vm675_vm1, %v12208_v56 }
 0x93d   : > { %v10703_v21 = vpop.f32.mrf.mxu3 }
 0x93e   : > { %v4628_v49 = vpop.f32.mrf.mxu2 }
 0x941   : > { %v10707_v20 = vpop.f32.mrf.mxu0 }
 0x942   : > { %12213 = vst [vmem:[#allocation22_spill] sm:$0xff] %v10707_v20 }
 0x945   : > { %v10718_v12 = vpop.f32.mrf.mxu3 }
 0x946   : > { %v4630_v29 = vpop.f32.mrf.mxu2 }
 0x947   : > { %v4864_v50 = vpack.c.bf16 %v4630_v29, %v4628_v49 }
 0x949   : > { %6846 = vmatmul.msk.bf16.gmra.mxu0 %vm675_vm1, %v4863_v15  ;;  %6017 = vrot.lane.b32.xlu2 %v12211_v40, %s7719_s20  ;;  %v12215_v15 = vld [vmem:[#allocation21_spill] sm:$0xff] }
 0x94a   : > { %v3515_v7 = vadd.f32 %v12215_v15, %v12214_v38  ;;  %v12216_v40 = vld [vmem:[#allocation89_spill] sm:$0xff]  ;;  %v12220_v15 = vld [vmem:[#allocation134_spill] sm:$0xff] }
 0x94b   : > { %6870 = vmatmul.msk.bf16.vlgmr.msrb.gmra.mxu2 %vm675_vm1, %v10533_v43  ;;  %v10714_v25 = vadd.f32 %v12216_v40, %v10578_v14  ;;  %v12217_v43 = vld [vmem:[#allocation10_spill] sm:$0xff]  ;;  %v4865_v14 = vpack.c.bf16 %v10561_v3, %v10554_v54  ;;  %v12221_v40 = vld [vmem:[#allocation119_spill] sm:$0xff]  ;;  %v12225_v3 = vld [vmem:[#allocation141_spill] sm:$0xff] }
 0x94d   : > { %v5504_v49 = vsel %vm1101_vm2, %v10714_v25, -inf  ;;  %v5261_v38 = vpop.f32.mrf.mxu3 }
 0x94e   : > { %v4678_v56 = vpop.f32.mrf.mxu2 }
 0x951   : > { %6092 = vrot.lane.b32.xlu2 %v12212_v35, %s7719_s20 }
 0x955   : > { %v10737_v5 = vpop.f32.mrf.mxu3 }
 0x956   : > { %v4680_v46 = vpop.f32.mrf.mxu2 }
 0x957   : > { %v4866_v37 = vpack.c.bf16 %v4680_v46, %v4678_v56  ;;  %v12231_v46 = vld [vmem:[#allocation88_spill] sm:$0xff] }
 0x959   : > { %6847 = vmatmul.msk.bf16.gmra.mxu0 %vm675_vm1, %v4864_v50  ;;  %6042 = vrot.lane.b32.xlu2 %v12217_v43, %s7719_s20  ;;  %v3520_v43 = vadd.f32 %v12221_v40, %v12220_v15 }
 0x95b   : > { %v4936_v24 = vpop.f32.mrf.mxu0 }
 0x95c   : > { %v10720_v35 = vadd.f32 %v4936_v24, %v3515_v7 }
 0x95d   : > { %v5333_v54 = vpop.f32.mrf.mxu3 }
 0x95e   : > { %12218 = vst [vmem:[#allocation147_spill] sm:$0xff] %v10720_v35  ;;  %v10722_v20 = vpop.f32.mrf.mxu2 }
 0x95f   : > { %5505 = vmax.xlane.f32.xlu1 %v5504_v49 }
 0x963   : > { %v10726_v29 = vpop.f32.mrf.mxu0 }
 0x964   : > { %12219 = vst [vmem:[#allocation149_spill] sm:$0xff] %v10726_v29 }
 0x965   : > { %v10757_v56 = vpop.f32.mrf.mxu3 }
 0x966   : > { %v4730_v50 = vpop.f32.mrf.mxu2 }
 0x969   : > { %6848 = vmatmul.msk.bf16.gmra.mxu0 %vm675_vm1, %v4865_v14  ;;  %v12226_v14 = vld [vmem:[#allocation48_spill] sm:$0xff] }
 0x96a   : > { %v3525_v15 = vadd.f32 %v12226_v14, %v12225_v3  ;;  %v10764_v3 = vadd.f32 %v12231_v46, %v5333_v54 }
 0x96b   : > { %v4941_v24 = vpop.f32.mrf.mxu0 }
 0x96c   : > { %v10733_v7 = vadd.f32 %v4941_v24, %v3520_v43  ;;  %v12228_v24 = vld [vmem:[#allocation83_spill] sm:$0xff] }
 0x96d   : > { %v5405_v54 = vpop.f32.mrf.mxu3 }
 0x96e   : > { %12222 = vst [vmem:[#allocation32_spill] sm:$0xff] %v10733_v7  ;;  %v10735_v35 = vpop.f32.mrf.mxu2  ;;  %v10751_v7 = vadd.f32 %v12228_v24, %v5261_v38  ;;  %v4867_v38 = vpack.c.bf16 %v10586_v58, %v10573_v28  ;;  %v12233_v24 = vld [vmem:[#allocation43_spill] sm:$0xff]  ;;  %v12235_v58 = vld [vmem:[#allocation93_spill] sm:$0xff] }
 0x96f   : > { %v10780_v1 = vadd.f32 %v12235_v58, %v5405_v54 }
 0x973   : > { %v10739_v49 = vpop.f32.mrf.mxu0 }
 0x974   : > { %12223 = vst [vmem:[#allocation155_spill] sm:$0xff] %v10739_v49  ;;  %v12229_v49 = vld [vmem:[#allocation24_spill] sm:$0xff] }
 0x976   : > { %v10741_v29 = vpop.f32.mrf.mxu2 }
 0x978   : > { %5967 = vrot.lane.b32.xlu1 %v12224_v9, %s7719_s20  ;;  %v5483_v9 = vsel %vm1101_vm2, %v10751_v7, -inf }
 0x979   : > { %6849 = vmatmul.msk.bf16.gmra.mxu0 %vm675_vm1, %v4866_v37 }
 0x97b   : > { %v4946_v40 = vpop.f32.mrf.mxu0 }
 0x97c   : > { %v10748_v43 = vadd.f32 %v4946_v40, %v3525_v15  ;;  %v12232_v40 = vld [vmem:[#allocation55_spill] sm:$0xff] }
 0x97e   : > { %12227 = vst [vmem:[#allocation159_spill] sm:$0xff] %v10748_v43  ;;  %v10753_v22 = vpop.f32.mrf.mxu2 }
 0x980   : > { %6167 = vrot.lane.b32.xlu1 %v12229_v49, %s7719_s20 }
 0x982   : > { %5484 = vmax.xlane.f32.xlu2 %v5483_v9  ;;  %v3530_v9 = vadd.f32 %v12233_v24, %v12232_v40  ;;  %v5519_v40 = vsel %vm1101_vm2, %v10780_v1, -inf }
 0x983   : > { %v10761_v37 = vpop.f32.mrf.mxu0 }
 0x984   : > { %12230 = vst [vmem:[#allocation101_spill] sm:$0xff] %v10761_v37  ;;  %v5501_v37 = vsel %vm1101_vm2, %v10764_v3, -inf }
 0x986   : > { %v10766_v14 = vpop.f32.mrf.mxu2 }
 0x987   : > { %v5629_v49 = vpop.xlane.xlu1 %5628 }
 0x988   : > { %7527 = vrcp.f32 %v5629_v49 }
 0x989   : > { %6850 = vmatmul.msk.bf16.gmra.mxu0 %vm675_vm1, %v4867_v38 }
 0x98a   : > { %5502 = vmax.xlane.f32.xlu2 %v5501_v37 }
 0x98b   : > { %v4951_v46 = vpop.f32.mrf.mxu0 }
 0x98c   : > { %v10777_v43 = vadd.f32 %v4951_v46, %v3530_v9  ;;  %v5626_v4 = vpop.xlane.xlu2 %5625 }
 0x98d   : > { %7529 = vrcp.f32 %v5626_v4  ;;  %v4868_v4 = vpack.c.bf16 %v4730_v50, %v10722_v20 }
 0x98e   : > { %12234 = vst [vmem:[#allocation158_spill] sm:$0xff] %v10777_v43  ;;  %v7528_v28 = vpop.eup %7527  ;;  %v10782_v49 = vpop.f32.mrf.mxu2 }
 0x98f   : > { %v5753_v38 = vmul.f32 %v7528_v28, %v10628_v61  ;;  %v12236_v61 = vld [vmem:[#allocation53_spill] sm:$0xff] }
 0x991   : > { %v5785_v15 = vpack.c.bf16 %v5753_v38, %v5753_v38  ;;  %v5546_v38 = vsub.f32 %v10495_v60, %v5488_v0 }
 0x992   : > { %5520 = vmax.xlane.f32.xlu2 %v5519_v40 }
 0x993   : > { %v5817_v24 = vunpack.c.l.bf16 %v5785_v15  ;;  %v7530_v37 = vpop.eup %7529  ;;  %v5596_v20 = vmul.f32 1.442695, %v5546_v38  ;;  %v4869_v38 = vpack.c.bf16 %v10606_v44, %v10597_v23  ;;  %v10823_v23 = vpop.f32.mrf.mxu0 }
 0x994   : > { %v5752_v9 = vmul.f32 %v7530_v37, %v10636_v13  ;;  %v5473_v46 = vpop.xlane.xlu2 %5472 }
 0x995   : > { %v5541_v43 = vsub.f32 %v10650_v53, %v5473_v46  ;;  %v5849_v58 = vmul.f32 %v12136_v41, %v5817_v24 }
 0x996   : > { %v5093_v54 = vpop.f32.mrf.mxu2  ;;  %v5784_v55 = vpack.c.bf16 %v5752_v9, %v5752_v9 }
 0x997   : > { %v10792_v28 = vadd.f32 %v12236_v61, %v5093_v54  ;;  %v5586_v15 = vmul.f32 1.442695, %v5541_v43  ;;  %v5881_v53 = vpack.c.bf16 %v5849_v58, %v5849_v58 }
 0x998   : > { %v5816_v40 = vunpack.c.l.bf16 %v5784_v55 }
 0x999   : > { %6851 = vmatmul.msk.bf16.gmra.mxu0 %vm675_vm1, %v4868_v4  ;;  %v5441_v13 = vsel %vm1101_vm2, %v10792_v28, -inf  ;;  %7531 = vpow2.f32 %v5586_v15  ;;  %v5915_v9 = vunpack.c.l.b16 %v5881_v53  ;;  %v12237_v15 = vld [vmem:[#allocation59_spill] sm:$0xff] }
 0x99a   : > { %v5848_v37 = vmul.f32 %v8606_v57, %v5816_v40  ;;  %5442 = vmax.xlane.f32.xlu2 %v5441_v13  ;;  %7533 = vpow2.f32 %v5596_v20 }
 0x99c   : > { %v5880_v41 = vpack.c.bf16 %v5848_v37, %v5848_v37  ;;  %v5491_v50 = vpop.xlane.xlu2 %5490 }
 0x99d   : > { %v5547_v55 = vsub.f32 %v10661_v10, %v5491_v50  ;;  %v12238_v50 = vld [vmem:[#allocation146_spill] sm:$0xff] }
 0x99e   : > { %v10799_v24 = vpop.f32.mrf.mxu2  ;;  %v5914_v46 = vunpack.c.l.b16 %v5880_v41 }
 0x99f   : > { %v5918_v0 = vpop.permute.xlu1 %5917  ;;  %v10801_v60 = vpop.eup %7531  ;;  %v5598_v57 = vmul.f32 1.442695, %v5547_v55  ;;  %v12240_v55 = vld [vmem:[#allocation8_spill] sm:$0xff] }
 0x9a0   : > { %5930 = vmatpush.bf16.msra.mxu2 %v5918_v0  ;;  %v5916_v43 = vpack.c.b16 %v5915_v9, %v5914_v46  ;;  %v5663_v54 = vsel %vm1101_vm2, %v10801_v60, 0.0  ;;  %v10809_v58 = vpop.eup %7533  ;;  %v3535_v9 = vadd.f32 %v12238_v50, %v10439_v52  ;;  %v12239_v46 = vld [vmem:[#allocation56_spill] sm:$0xff]  ;;  %v12245_v50 = vld [vmem:[#allocation95_spill] sm:$0xff] }
 0x9a1   : > { %5664 = vadd.xlane.f32.xlu0 %v5663_v54  ;;  %7535 = vpow2.f32 %v5598_v57  ;;  %v5678_v13 = vsel %vm1101_vm2, %v10809_v58, 0.0  ;;  %v10833_v0 = vadd.f32 %v12239_v46, %v10679_v27  ;;  %v4870_v57 = vpack.c.bf16 %v10741_v29, %v10735_v35  ;;  %v12243_v35 = vld [vmem:[#allocation11_spill] sm:$0xff] }
 0x9a3   : > { %6873 = vmatmul.msk.bf16.vlgmr.msra.gmra.mxu2 %vm1101_vm2, %v5916_v43  ;;  %v5444_v52 = vsel %vm1101_vm2, %v10833_v0, -inf }
 0x9a4   : > { %v10807_v4 = vpop.xlane.xlu2 %5643 }
 0x9a6   : > { %v5165_v61 = vpop.f32.mrf.mxu2 }
 0x9a7   : > { %v10814_v40 = vadd.f32 %v12237_v15, %v5165_v61  ;;  %v5943_v10 = vpop.permute.xlu1 %5942  ;;  %v10821_v20 = vpop.eup %7535 }
 0x9a8   : > { %5955 = vmatpush.bf16.msrb.mxu3 %v5943_v10  ;;  %v5681_v41 = vsel %vm1101_vm2, %v10821_v20, 0.0  ;;  %v12242_v10 = vld [vmem:[#allocation65_spill] sm:$0xff] }
 0x9a9   : > { %6852 = vmatmul.msk.bf16.gmra.mxu0 %vm675_vm1, %v4869_v38  ;;  %v5459_v53 = vsel %vm1101_vm2, %v10814_v40, -inf  ;;  %v12241_v38 = vld [vmem:[#allocation74_spill] sm:$0xff] }
 0x9aa   : > { %5679 = vadd.xlane.f32.xlu1 %v5678_v13  ;;  %5460 = vmax.xlane.f32.xlu2 %v5459_v53  ;;  %v10851_v13 = vadd.f32 %v12242_v10, %v10694_v19  ;;  %v4871_v19 = vpack.c.bf16 %v10632_v30, %v10617_v62  ;;  %v12247_v62 = vld [vmem:[#allocation77_spill] sm:$0xff] }
 0x9ab   : > { %v3545_v30 = vadd.f32 %v12247_v62, %v10470_v11 }
 0x9ac   : > { %v6018_v37 = vpop.permute.xlu2 %6017  ;;  %v5462_v53 = vsel %vm1101_vm2, %v10851_v13, -inf }
 0x9ad   : > { %6030 = vmatpush.bf16.msra.mxu3 %v6018_v37  ;;  %v12244_v37 = vld [vmem:[#allocation61_spill] sm:$0xff] }
 0x9ae   : > { %v10825_v44 = vpop.f32.mrf.mxu2 }
 0x9b2   : > { %5682 = vadd.xlane.f32.xlu1 %v5681_v41  ;;  %v3540_v41 = vadd.f32 %v12244_v37, %v10449_v33 }
 0x9b5   : > { %5992 = vrot.lane.b32.xlu0 %v12240_v55, %s7719_s20 }
 0x9b6   : > { %v4956_v43 = vpop.f32.mrf.mxu0  ;;  %v5237_v54 = vpop.f32.mrf.mxu2 }
 0x9b7   : > { %v10839_v61 = vadd.f32 %v4956_v43, %v3535_v9  ;;  %v10842_v15 = vadd.f32 %v12241_v38, %v5237_v54  ;;  %v10863_v9 = vadd.f32 %v12245_v50, %v10757_v56  ;;  %v12246_v54 = vld [vmem:[#allocation51_spill] sm:$0xff]  ;;  %v12250_v50 = vld [vmem:[#allocation58_spill] sm:$0xff] }
 0x9b9   : > { %6853 = vmatmul.msk.bf16.gmra.mxu0 %vm675_vm1, %v4870_v57  ;;  %v5477_v27 = vsel %vm1101_vm2, %v10842_v15, -inf  ;;  %v5516_v43 = vsel %vm1101_vm2, %v10863_v9, -inf  ;;  %v10874_v57 = vadd.f32 %v12246_v54, %v10782_v49  ;;  %v12249_v49 = vpack.c.bf16 %v10766_v14, %v10753_v22 }
 0x9ba   : > { %5445 = vmax.xlane.f32.xlu1 %v5444_v52  ;;  %5478 = vmax.xlane.f32.xlu2 %v5477_v27  ;;  %v12248_v52 = vld [vmem:[#allocation85_spill] sm:$0xff]  ;;  %v4873_v14 = vpack.c.bf16 %v10663_v26, %v10652_v48 }
 0x9bb   : > { %v5438_v56 = vsel %vm1101_vm2, %v10874_v57, -inf  ;;  %v12252_v48 = vld [vmem:[#allocation73_spill] sm:$0xff] }
 0x9bc   : > { %v10922_v26 = vadd.f32 %v12252_v48, %v10718_v12  ;;  %v10935_v12 = vpop.xlane.xlu0 %5508 }
 0x9bd   : > { %6067 = vrot.lane.b32.xlu0 %v12243_v35, %s7719_s20 }
 0x9be   : > { %v10855_v29 = vpop.f32.mrf.mxu0  ;;  %v5307_v38 = vpop.f32.mrf.mxu2 }
 0x9bf   : > { %v10883_v27 = vadd.f32 %v12248_v52, %v5307_v38  ;;  %v12251_v38 = vld [vmem:[#allocation66_spill] sm:$0xff] }
 0x9c2   : > { %5463 = vmax.xlane.f32.xlu1 %v5462_v53  ;;  %v5492_v53 = vsel %vm1101_vm2, %v10883_v27, -inf }
 0x9c6   : > { %v4961_v46 = vpop.f32.mrf.mxu0 }
 0x9c7   : > { %v10867_v55 = vadd.f32 %v4961_v46, %v3540_v41  ;;  %v10895_v41 = vpop.permute.xlu2 %6092  ;;  %v10901_v46 = vadd.f32 %v12250_v50, %v10688_v2  ;;  %v10914_v2 = vadd.f32 %v12251_v38, %v10703_v21  ;;  %v3560_v38 = vadd.f32 %v10371_v32, %v10552_v47 }
 0x9c9   : > { %6854 = vmatmul.msk.bf16.gmra.mxu0 %vm675_vm1, %v4871_v19  ;;  %v3550_v19 = vadd.f32 %v10313_v34, %v10507_v45  ;;  %v5447_v54 = vsel %vm1101_vm2, %v10901_v46, -inf  ;;  %v5465_v45 = vsel %vm1101_vm2, %v10914_v2, -inf }
 0x9ca   : > { %5517 = vmax.xlane.f32.xlu1 %v5516_v43 }
 0x9ce   : > { %v10876_v33 = vpop.f32.mrf.mxu0 }
 0x9cf   : > { %v6043_v62 = vpop.permute.xlu2 %6042 }
 0x9d2   : > { %5439 = vmax.xlane.f32.xlu1 %v5438_v56  ;;  %v10897_v11 = vpop.xlane.xlu1 %5505 }
 0x9d6   : > { %v4966_v10 = vpop.f32.mrf.mxu0 }
 0x9d7   : > { %v10885_v35 = vadd.f32 %v4966_v10, %v3545_v30  ;;  %v3555_v30 = vadd.f32 %v10344_v59, %v10529_v6 }
 0x9d9   : > { %6855 = vmatmul.msk.bf16.gmra.mxu0 %vm675_vm1, %v12249_v49 }
 0x9da   : > { %5493 = vmax.xlane.f32.xlu1 %v5492_v53  ;;  %v5480_v53 = vsel %vm1101_vm2, %v10922_v26, -inf }
 0x9de   : > { %v10893_v37 = vpop.f32.mrf.mxu0 }
 0x9e6   : > { %v4971_v22 = vpop.f32.mrf.mxu0 }
 0x9e7   : > { %v10907_v43 = vadd.f32 %v4971_v22, %v3550_v19  ;;  %5448 = vmax.xlane.f32.xlu0 %v5447_v54  ;;  %v12253_v19 = vld [vmem:[#allocation87_spill] sm:$0xff] }
 0x9e8   : > { %v10933_v22 = vadd.f32 %v12253_v19, %v10737_v5 }
 0x9e9   : > { %6856 = vmatmul.msk.bf16.gmra.mxu0 %vm675_vm1, %v4873_v14 }
 0x9ea   : > { %v5968_v56 = vpop.permute.xlu1 %5967  ;;  %v5498_v6 = vsel %vm1101_vm2, %v10933_v22, -inf }
 0x9eb   : > { %5980 = vmatpush.bf16.msrb.mxu1 %v5968_v56  ;;  %v12254_v56 = vld [vmem:[#allocation64_spill] sm:$0xff] }
 0x9ec   : > { %v10949_v5 = vadd.f32 %v12254_v56, %v10799_v24  ;;  %v12256_v24 = vld [vmem:[#allocation71_spill] sm:$0xff] }
 0x9ee   : > { %v10916_v34 = vpop.f32.mrf.mxu0 }
 0x9ef   : > { %6055 = vmatpush.bf16.msra.mxu1 %v6043_v62  ;;  %5466 = vmax.xlane.f32.xlu0 %v5465_v45  ;;  %v5647_v62 = vpop.xlane.xlu0 %5646 }
 0x9f2   : > { %v10969_v56 = vpop.permute.xlu1 %6167 }
 0x9f5   : > { %v5485_v52 = vpop.xlane.xlu2 %5484 }
 0x9f6   : > { %v4976_v10 = vpop.f32.mrf.mxu0  ;;  %v5545_v21 = vsub.f32 %v10751_v7, %v5485_v52  ;;  %v5456_v52 = vsel %vm1101_vm2, %v10949_v5, -inf }
 0x9f7   : > { %v10927_v49 = vadd.f32 %v4976_v10, %v3555_v30  ;;  %5481 = vmax.xlane.f32.xlu0 %v5480_v53  ;;  %v10962_v10 = vadd.f32 %v12256_v24, %v10825_v44 }
 0x9f8   : > { %v5594_v50 = vmul.f32 1.442695, %v5545_v21  ;;  %v5662_v21 = vpop.xlane.xlu0 %5661 }
 0x9fa   : > { %7537 = vpow2.f32 %v5594_v50  ;;  %v5474_v50 = vsel %vm1101_vm2, %v10962_v10, -inf }
 0x9fb   : > { %7539 = vrcp.f32 %v10807_v4 }
 0x9fc   : > { %7541 = vrcp.f32 %v5647_v62 }
 0x9fd   : > { %v10937_v14 = vpop.xlane.xlu2 %5502 }
 0x9fe   : > { %v10939_v59 = vpop.f32.mrf.mxu0 }
 0x9ff   : > { %5499 = vmax.xlane.f32.xlu0 %v5498_v6 }
 0xa00   : > { %v10943_v7 = vpop.eup %7537 }
 0xa01   : > { %v5675_v54 = vsel %vm1101_vm2, %v10943_v7, 0.0  ;;  %v7540_v32 = vpop.eup %7539 }
 0xa02   : > { %5676 = vadd.xlane.f32.xlu1 %v5675_v54  ;;  %v7542_v19 = vpop.eup %7541  ;;  %v5758_v54 = vmul.f32 %v7540_v32, %v10675_v63 }
 0xa03   : > { %v5759_v4 = vmul.f32 %v7542_v19, %v10608_v8 }
 0xa04   : > { %v5790_v44 = vpack.c.bf16 %v5758_v54, %v5758_v54 }
 0xa05   : > { %v10953_v45 = vpop.xlane.xlu2 %5520  ;;  %v5791_v62 = vpack.c.bf16 %v5759_v4, %v5759_v4 }
 0xa06   : > { %v4981_v48 = vpop.f32.mrf.mxu0 }
 0xa07   : > { %v10955_v30 = vadd.f32 %v4981_v48, %v3560_v38  ;;  %5457 = vmax.xlane.f32.xlu0 %v5456_v52  ;;  %v5823_v24 = vunpack.c.l.bf16 %v5791_v62 }
 0xa09   : > { %12255 = vst [vmem:[#allocation75_spill] sm:$0xff] %v10955_v30  ;;  %v5855_v32 = vmul.f32 %v8656_v18, %v5823_v24 }
 0xa0b   : > { %v5887_v54 = vpack.c.bf16 %v5855_v32, %v5855_v32 }
 0xa0d   : > { %v5443_v53 = vpop.xlane.xlu2 %5442 }
 0xa0e   : > { %v5531_v47 = vsub.f32 %v10792_v28, %v5443_v53  ;;  %v5822_v28 = vunpack.c.l.bf16 %v5790_v44 }
 0xa0f   : > { %5475 = vmax.xlane.f32.xlu0 %v5474_v50 }
 0xa10   : > { %v5566_v6 = vmul.f32 1.442695, %v5531_v47  ;;  %v5854_v63 = vmul.f32 %v8664_v16, %v5822_v28  ;;  %v5990_v16 = vunpack.c.l.b16 %v5887_v54 }
 0xa12   : > { %7543 = vpow2.f32 %v5566_v6  ;;  %v5886_v50 = vpack.c.bf16 %v5854_v63, %v5854_v63 }
 0xa14   : > { %v5665_v38 = vpop.xlane.xlu0 %5664 }
 0xa15   : > { %7545 = vrcp.f32 %v5665_v38  ;;  %v5989_v38 = vunpack.c.l.b16 %v5886_v50 }
 0xa16   : > { %7547 = vrcp.f32 %v5662_v21 }
 0xa17   : > { %v5991_v18 = vpack.c.b16 %v5990_v16, %v5989_v38 }
 0xa18   : > { %v10971_v48 = vpop.eup %7543 }
 0xa19   : > { %v5633_v52 = vsel %vm1101_vm2, %v10971_v48, 0.0 }
 0xa1a   : > { %5634 = vadd.xlane.f32.xlu1 %v5633_v52 }
 0xa1b   : > { %v7546_v8 = vpop.eup %7545 }
 0xa1c   : > { %v7548_v47 = vpop.eup %7547  ;;  %v5765_v19 = vmul.f32 %v7546_v8, %v10801_v60 }
 0xa1d   : > { %v5680_v53 = vpop.xlane.xlu1 %5679  ;;  %v5764_v4 = vmul.f32 %v7548_v47, %v10640_v42 }
 0xa1e   : > { %7549 = vrcp.f32 %v5680_v53  ;;  %v5797_v62 = vpack.c.bf16 %v5765_v19, %v5765_v19 }
 0xa1f   : > { %v5796_v28 = vpack.c.bf16 %v5764_v4, %v5764_v4 }
 0xa20   : > { %v5829_v24 = vunpack.c.l.bf16 %v5797_v62 }
 0xa21   : > { %v5828_v60 = vunpack.c.l.bf16 %v5796_v28 }
 0xa23   : > { %v5860_v19 = vmul.f32 %v12170_v39, %v5828_v60  ;;  %v12258_v60 = vld [vmem:[#allocation86_spill] sm:$0xff] }
 0xa24   : > { %v7550_v6 = vpop.eup %7549 }
 0xa25   : > { %v5770_v44 = vmul.f32 %v7550_v6, %v10809_v58  ;;  %v5683_v21 = vpop.xlane.xlu1 %5682  ;;  %v5861_v58 = vmul.f32 %v12171_v51, %v5829_v24 }
 0xa26   : > { %7551 = vrcp.f32 %v5683_v21 }
 0xa27   : > { %v5802_v52 = vpack.c.bf16 %v5770_v44, %v5770_v44  ;;  %v5993_v53 = vpop.permute.xlu0 %5992  ;;  %v5893_v44 = vpack.c.bf16 %v5861_v58, %v5861_v58 }
 0xa28   : > { %6005 = vmatpush.bf16.msrb.mxu2 %v5993_v53 }
 0xa29   : > { %v5834_v63 = vunpack.c.l.bf16 %v5802_v52  ;;  %v6065_v62 = vunpack.c.l.b16 %v5893_v44 }
 0xa2b   : > { %6876 = vmatmul.msk.bf16.vlgmr.msrb.gmra.mxu2 %vm1101_vm2, %v5991_v18  ;;  %v5866_v47 = vmul.f32 %v11947_v17, %v5834_v63  ;;  %v5309_v18 = vpop.f32.mrf.mxu2 }
 0xa2c   : > { %v7552_v30 = vpop.eup %7551 }
 0xa2d   : > { %v5771_v42 = vmul.f32 %v7552_v30, %v10821_v20  ;;  %v5446_v8 = vpop.xlane.xlu1 %5445  ;;  %v5898_v21 = vpack.c.bf16 %v5866_v47, %v5866_v47  ;;  %v5892_v20 = vpack.c.bf16 %v5860_v19, %v5860_v19  ;;  %v12257_v30 = vld [vmem:[#allocation16_spill] sm:$0xff]  ;;  %v11012_v19 = vpop.f32.mrf.mxu1 }
 0xa2e   : > { %v5532_v32 = vsub.f32 %v10833_v0, %v5446_v8 }
 0xa2f   : > { %v5803_v50 = vpack.c.bf16 %v5771_v42, %v5771_v42  ;;  %v6068_v54 = vpop.permute.xlu0 %6067  ;;  %v10989_v17 = vunpack.c.l.b16 %v5898_v21  ;;  %v6064_v16 = vunpack.c.l.b16 %v5892_v20  ;;  %v11002_v42 = vadd.f32 %v12258_v60, %v5309_v18 }
 0xa30   : > { %v5568_v6 = vmul.f32 1.442695, %v5532_v32  ;;  %6080 = vmatpush.bf16.msra.mxu2 %v6068_v54  ;;  %v5551_v60 = vsub.f32 %v10764_v3, %v10937_v14 }
 0xa31   : > { %v5835_v4 = vunpack.c.l.bf16 %v5803_v50  ;;  %v6066_v24 = vpack.c.b16 %v6065_v62, %v6064_v16 }
 0xa32   : > { %7553 = vpow2.f32 %v5568_v6  ;;  %v12259_v6 = vld [vmem:[#allocation91_spill] sm:$0xff] }
 0xa33   : > { %v5867_v38 = vmul.f32 %v11945_v36, %v5835_v4  ;;  %6117 = vrot.lane.b32.xlu1 %v12257_v30, %s7719_s20  ;;  %v5379_v50 = vpop.f32.mrf.mxu2  ;;  %v12260_v30 = vld [vmem:[#allocation98_spill] sm:$0xff] }
 0xa34   : > { %v11015_v54 = vadd.f32 %v12259_v6, %v5379_v50  ;;  %v5606_v50 = vmul.f32 1.442695, %v5551_v60  ;;  %v12261_v6 = vld [vmem:[#allocation92_spill] sm:$0xff] }
 0xa35   : > { %v5899_v51 = vpack.c.bf16 %v5867_v38, %v5867_v38  ;;  %v5464_v0 = vpop.xlane.xlu1 %5463  ;;  %v5429_v38 = vpop.f32.mrf.mxu1 }
 0xa36   : > { %v5538_v28 = vsub.f32 %v10851_v13, %v5464_v0  ;;  %v5495_v13 = vsel %vm1101_vm2, %v11002_v42, -inf  ;;  %v5510_v44 = vsel %vm1101_vm2, %v11015_v54, -inf }
 0xa37   : > { %v10991_v52 = vunpack.c.l.b16 %v5899_v51  ;;  %v11021_v51 = vadd.f32 %v12260_v30, %v5429_v38 }
 0xa38   : > { %v10993_v39 = vpop.eup %7553  ;;  %v5580_v63 = vmul.f32 1.442695, %v5538_v28 }
 0xa39   : > { %v6141_v53 = vpack.c.b16 %v10991_v52, %v10989_v17  ;;  %v5636_v36 = vsel %vm1101_vm2, %v10993_v39, 0.0  ;;  %v5525_v16 = vsel %vm1101_vm2, %v11021_v51, -inf }
 0xa3a   : > { %5637 = vadd.xlane.f32.xlu0 %v5636_v36  ;;  %7555 = vpow2.f32 %v5580_v63 }
 0xa3b   : > { %6879 = vmatmul.msk.bf16.vlgmr.msra.gmra.mxu2 %vm1101_vm2, %v6066_v24 }
 0xa3d   : > { %v11004_v8 = vpop.xlane.xlu1 %5517 }
 0xa40   : > { %v11008_v58 = vpop.eup %7555 }
 0xa41   : > { %v5654_v47 = vsel %vm1101_vm2, %v11008_v58, 0.0 }
 0xa42   : > { %5496 = vmax.xlane.f32.xlu0 %v5495_v13 }
 0xa45   : > { %v5440_v32 = vpop.xlane.xlu1 %5439 }
 0xa46   : > { %v5530_v3 = vsub.f32 %v10874_v57, %v5440_v32 }
 0xa48   : > { %v5564_v30 = vmul.f32 1.442695, %v5530_v3 }
 0xa4a   : > { %5655 = vadd.xlane.f32.xlu0 %v5654_v47  ;;  %v5381_v47 = vpop.f32.mrf.mxu2 }
 0xa4d   : > { %v5494_v4 = vpop.xlane.xlu1 %5493 }
 0xa4e   : > { %v5548_v21 = vsub.f32 %v10883_v27, %v5494_v4  ;;  %v11038_v4 = vadd.f32 %v12261_v6, %v5381_v47  ;;  %v12262_v6 = vld [vmem:[#allocation96_spill] sm:$0xff] }
 0xa50   : > { %v5600_v20 = vmul.f32 1.442695, %v5548_v21  ;;  %v5513_v38 = vsel %vm1101_vm2, %v11038_v4, -inf }
 0xa52   : > { %5511 = vmax.xlane.f32.xlu0 %v5510_v44  ;;  %7557 = vpow2.f32 %v5600_v20 }
 0xa58   : > { %v11026_v36 = vpop.eup %7557 }
 0xa59   : > { %v5684_v24 = vsel %vm1101_vm2, %v11026_v36, 0.0 }
 0xa5a   : > { %v5449_v0 = vpop.xlane.xlu0 %5448 }
 0xa5b   : > { %v5533_v62 = vsub.f32 %v10901_v46, %v5449_v0 }
 0xa5d   : > { %v5570_v28 = vmul.f32 1.442695, %v5533_v62  ;;  %5526 = vmax.xlane.f32.xlu1 %v5525_v16 }
 0xa5f   : > { %7559 = vpow2.f32 %v5570_v28 }
 0xa62   : > { %v5467_v18 = vpop.xlane.xlu0 %5466 }
 0xa63   : > { %v5539_v27 = vsub.f32 %v10914_v2, %v5467_v18 }
 0xa65   : > { %v11031_v63 = vpop.eup %7559  ;;  %v5582_v46 = vmul.f32 1.442695, %v5539_v27  ;;  %5685 = vadd.xlane.f32.xlu1 %v5684_v24 }
 0xa66   : > { %v5639_v13 = vsel %vm1101_vm2, %v11031_v63, 0.0 }
 0xa67   : > { %7561 = vpow2.f32 %v5582_v46  ;;  %5640 = vadd.xlane.f32.xlu2 %v5639_v13 }
 0xa68   : > { %7563 = vpow2.f32 %v5606_v50 }
 0xa6a   : > { %v5482_v2 = vpop.xlane.xlu0 %5481 }
 0xa6b   : > { %v5544_v44 = vsub.f32 %v10922_v26, %v5482_v2  ;;  %v11070_v2 = vadd.f32 %v12262_v6, %v11012_v19  ;;  %v5553_v19 = vsub.f32 %v10593_v31, %v10935_v12  ;;  %v12263_v31 = vld [vmem:[#allocation26_spill] sm:$0xff] }
 0xa6d   : > { %v11041_v21 = vpop.eup %7561  ;;  %v5592_v14 = vmul.f32 1.442695, %v5544_v44 }
 0xa6e   : > { %v5657_v20 = vsel %vm1101_vm2, %v11041_v21, 0.0  ;;  %v11048_v62 = vpop.eup %7563 }
 0xa6f   : > { %7565 = vpow2.f32 %v5592_v14  ;;  %5514 = vmax.xlane.f32.xlu2 %v5513_v38  ;;  %5658 = vadd.xlane.f32.xlu0 %v5657_v20  ;;  %v5693_v32 = vsel %vm1101_vm2, %v11048_v62, 0.0 }
 0xa70   : > { %7567 = vpow2.f32 %v5564_v30 }
 0xa72   : > { %v5500_v0 = vpop.xlane.xlu0 %5499 }
 0xa73   : > { %v5550_v26 = vsub.f32 %v10933_v22, %v5500_v0  ;;  %v5552_v22 = vsub.f32 %v10714_v25, %v10897_v11  ;;  %v5522_v11 = vsel %vm1101_vm2, %v11070_v2, -inf }
 0xa75   : > { %v11051_v16 = vpop.eup %7565  ;;  %v5604_v57 = vmul.f32 1.442695, %v5550_v26  ;;  %v5608_v50 = vmul.f32 1.442695, %v5552_v22 }
 0xa76   : > { %v5672_v28 = vsel %vm1101_vm2, %v11051_v16, 0.0  ;;  %v11057_v27 = vpop.eup %7567 }
 0xa77   : > { %7569 = vpow2.f32 %v5604_v57  ;;  %5694 = vadd.xlane.f32.xlu2 %v5693_v32  ;;  %5673 = vadd.xlane.f32.xlu0 %v5672_v28  ;;  %v5630_v13 = vsel %vm1101_vm2, %v11057_v27, 0.0 }
 0xa7a   : > { %v5458_v18 = vpop.xlane.xlu0 %5457 }
 0xa7b   : > { %v5536_v24 = vsub.f32 %v10949_v5, %v5458_v18  ;;  %v5461_v5 = vpop.xlane.xlu2 %5460 }
 0xa7c   : > { %v5537_v25 = vsub.f32 %v10814_v40, %v5461_v5  ;;  %v5610_v40 = vmul.f32 1.442695, %v5553_v19 }
 0xa7d   : > { %v11060_v60 = vpop.eup %7569  ;;  %v5576_v46 = vmul.f32 1.442695, %v5536_v24 }
 0xa7e   : > { %v5690_v47 = vsel %vm1101_vm2, %v11060_v60, 0.0  ;;  %v5578_v14 = vmul.f32 1.442695, %v5537_v25  ;;  %v12264_v25 = vld [vmem:[#allocation20_spill] sm:$0xff] }
 0xa7f   : > { %7571 = vpow2.f32 %v5576_v46  ;;  %5631 = vadd.xlane.f32.xlu2 %v5630_v13  ;;  %5691 = vadd.xlane.f32.xlu0 %v5690_v47 }
 0xa80   : > { %7573 = vpow2.f32 %v5608_v50 }
 0xa81   : > { %7575 = vpow2.f32 %v5578_v14 }
 0xa82   : > { %v5476_v30 = vpop.xlane.xlu0 %5475  ;;  %7577 = vpow2.f32 %v5610_v40 }
 0xa83   : > { %v5542_v26 = vsub.f32 %v10962_v10, %v5476_v30  ;;  %v5479_v22 = vpop.xlane.xlu2 %5478 }
 0xa84   : > { %v5543_v46 = vsub.f32 %v10842_v15, %v5479_v22  ;;  %v12265_v22 = vld [vmem:[#allocation30_spill] sm:$0xff] }
 0xa85   : > { %v11072_v44 = vpop.eup %7571  ;;  %v5588_v32 = vmul.f32 1.442695, %v5542_v26 }
 0xa86   : > { %v5648_v3 = vsel %vm1101_vm2, %v11072_v44, 0.0  ;;  %v11079_v38 = vpop.eup %7573  ;;  %v5590_v47 = vmul.f32 1.442695, %v5543_v46 }
 0xa87   : > { %5523 = vmax.xlane.f32.xlu2 %v5522_v11  ;;  %5649 = vadd.xlane.f32.xlu0 %v5648_v3  ;;  %v5696_v20 = vsel %vm1101_vm2, %v11079_v38, 0.0  ;;  %v11085_v0 = vpop.eup %7575  ;;  %7579 = vpow2.f32 %v5588_v32  ;;  %v5677_v32 = vpop.xlane.xlu1 %5676 }
 0xa88   : > { %v5651_v57 = vsel %vm1101_vm2, %v11085_v0, 0.0  ;;  %v11090_v28 = vpop.eup %7577  ;;  %7581 = vpow2.f32 %v5590_v47 }
 0xa89   : > { %v5699_v12 = vsel %vm1101_vm2, %v11090_v28, 0.0 }
 0xa8d   : > { %v11096_v18 = vpop.eup %7579 }
 0xa8e   : > { %v5666_v10 = vsel %vm1101_vm2, %v11096_v18, 0.0  ;;  %v11104_v11 = vpop.eup %7581 }
 0xa8f   : > { %5697 = vadd.xlane.f32.xlu2 %v5696_v20  ;;  %v5669_v14 = vsel %vm1101_vm2, %v11104_v11, 0.0  ;;  %v5635_v47 = vpop.xlane.xlu1 %5634 }
 0xa97   : > { %5652 = vadd.xlane.f32.xlu2 %v5651_v57 }
 0xa9b   : > { %6192 = vrot.lane.b32.xlu0 %v12263_v31, %s7719_s20 }
 0xa9f   : > { %5700 = vadd.xlane.f32.xlu2 %v5699_v12 }
 0xaa7   : > { %5667 = vadd.xlane.f32.xlu2 %v5666_v10 }
 0xaad   : > { %v5638_v24 = vpop.xlane.xlu0 %5637 }
 0xab5   : > { %v5497_v13 = vpop.xlane.xlu0 %5496 }
 0xab6   : > { %v5549_v50 = vsub.f32 %v11002_v42, %v5497_v13 }
 0xab8   : > { %v5602_v5 = vmul.f32 1.442695, %v5549_v50 }
 0xaba   : > { %7583 = vpow2.f32 %v5602_v5  ;;  %v12266_v5 = vld [vmem:[#allocation105_spill] sm:$0xff] }
 0xabd   : > { %v5656_v6 = vpop.xlane.xlu0 %5655 }
 0xabf   : > { %6142 = vrot.lane.b32.xlu2 %v12264_v25, %s7719_s20 }
 0xac0   : > { %v11109_v20 = vpop.eup %7583 }
 0xac1   : > { %v5687_v42 = vsel %vm1101_vm2, %v11109_v20, 0.0 }
 0xac5   : > { %v5512_v3 = vpop.xlane.xlu0 %5511  ;;  %5670 = vadd.xlane.f32.xlu0 %v5669_v14 }
 0xac6   : > { %v5554_v19 = vsub.f32 %v11015_v54, %v5512_v3 }
 0xac8   : > { %v5612_v15 = vmul.f32 1.442695, %v5554_v19 }
 0xaca   : > { %7585 = vpow2.f32 %v5612_v15 }
 0xacb   : > { %7587 = vrcp.f32 %v5638_v24 }
 0xacd   : > { %5688 = vadd.xlane.f32.xlu0 %v5687_v42  ;;  %v12267_v42 = vld [vmem:[#allocation104_spill] sm:$0xff] }
 0xad0   : > { %v11113_v40 = vpop.eup %7585 }
 0xad1   : > { %v5702_v30 = vsel %vm1101_vm2, %v11113_v40, 0.0  ;;  %v7588_v26 = vpop.eup %7587 }
 0xad2   : > { %5703 = vadd.xlane.f32.xlu1 %v5702_v30  ;;  %v5756_v57 = vmul.f32 %v7588_v26, %v10993_v39 }
 0xad4   : > { %v5788_v31 = vpack.c.bf16 %v5756_v57, %v5756_v57 }
 0xad6   : > { %v5820_v12 = vunpack.c.l.bf16 %v5788_v31 }
 0xad8   : > { %v5852_v39 = vmul.f32 %v12266_v5, %v5820_v12  ;;  %v6118_v5 = vpop.permute.xlu1 %6117 }
 0xada   : > { %v5641_v54 = vpop.xlane.xlu2 %5640  ;;  %v5884_v19 = vpack.c.bf16 %v5852_v39, %v5852_v39 }
 0xadb   : > { %7589 = vrcp.f32 %v5641_v54 }
 0xadc   : > { %7591 = vrcp.f32 %v5656_v6 }
 0xae1   : > { %v7590_v10 = vpop.eup %7589  ;;  %6217 = vrot.lane.b32.xlu0 %v12265_v22, %s7719_s20 }
 0xae2   : > { %v5757_v46 = vmul.f32 %v7590_v10, %v11031_v63  ;;  %v5515_v24 = vpop.xlane.xlu2 %5514  ;;  %v5659_v13 = vpop.xlane.xlu0 %5658  ;;  %v5964_v10 = vunpack.c.l.b16 %v5884_v19 }
 0xae3   : > { %v5555_v50 = vsub.f32 %v11038_v4, %v5515_v24  ;;  %7593 = vrcp.f32 %v5659_v13  ;;  %v7592_v3 = vpop.eup %7591  ;;  %v12268_v4 = vld [vmem:[#allocation35_spill] sm:$0xff] }
 0xae4   : > { %v5789_v25 = vpack.c.bf16 %v5757_v46, %v5757_v46  ;;  %7595 = vrcp.f32 %v5635_v47  ;;  %v5762_v15 = vmul.f32 %v7592_v3, %v11008_v58 }
 0xae5   : > { %v5614_v14 = vmul.f32 1.442695, %v5555_v50 }
 0xae6   : > { %v5821_v6 = vunpack.c.l.bf16 %v5789_v25  ;;  %v5794_v22 = vpack.c.bf16 %v5762_v15, %v5762_v15  ;;  %v12269_v25 = vld [vmem:[#allocation109_spill] sm:$0xff] }
 0xae7   : > { %7597 = vpow2.f32 %v5614_v14 }
 0xae8   : > { %v5853_v30 = vmul.f32 %v12267_v42, %v5821_v6  ;;  %v5826_v39 = vunpack.c.l.bf16 %v5794_v22  ;;  %v12270_v42 = vld [vmem:[#allocation108_spill] sm:$0xff] }
 0xae9   : > { %v7594_v63 = vpop.eup %7593 }
 0xaea   : > { %v5885_v26 = vpack.c.bf16 %v5853_v30, %v5853_v30  ;;  %v5763_v57 = vmul.f32 %v7594_v63, %v11041_v21  ;;  %v5695_v54 = vpop.xlane.xlu2 %5694  ;;  %v5674_v31 = vpop.xlane.xlu0 %5673  ;;  %v5858_v30 = vmul.f32 %v12270_v42, %v5826_v39 }
 0xaeb   : > { %6242 = vrot.lane.b32.xlu1 %v12268_v4, %s7719_s20  ;;  %v7596_v12 = vpop.eup %7595  ;;  %7599 = vrcp.f32 %v5674_v31 }
 0xaec   : > { %v5965_v46 = vunpack.c.l.b16 %v5885_v26  ;;  %v5795_v24 = vpack.c.bf16 %v5763_v57, %v5763_v57  ;;  %7601 = vrcp.f32 %v5677_v32  ;;  %v5755_v21 = vmul.f32 %v7596_v12, %v10971_v48 }
 0xaed   : > { %v11128_v13 = vpop.eup %7597  ;;  %v5890_v4 = vpack.c.bf16 %v5858_v30, %v5858_v30  ;;  %v5556_v12 = vsub.f32 %v10863_v9, %v11004_v8 }
 0xaee   : > { %v5966_v58 = vpack.c.b16 %v5965_v46, %v5964_v10  ;;  %v5827_v47 = vunpack.c.l.bf16 %v5795_v24  ;;  %v5705_v50 = vsel %vm1101_vm2, %v11128_v13, 0.0  ;;  %v5787_v15 = vpack.c.bf16 %v5755_v21, %v5755_v21  ;;  %v5527_v10 = vpop.xlane.xlu1 %5526 }
 0xaef   : > { %5706 = vadd.xlane.f32.xlu2 %v5705_v50  ;;  %v6039_v39 = vunpack.c.l.b16 %v5890_v4  ;;  %v12274_v4 = vld [vmem:[#allocation100_spill] sm:$0xff] }
 0xaf0   : > { %6875 = vmatmul.msk.bf16.vlgmr.msrb.gmra.mxu1 %vm1101_vm2, %v5966_v58  ;;  %v5859_v3 = vmul.f32 %v12269_v25, %v5827_v47  ;;  %v5819_v57 = vunpack.c.l.bf16 %v5787_v15  ;;  %v5616_v25 = vmul.f32 1.442695, %v5556_v12  ;;  %v12272_v15 = vld [vmem:[#allocation102_spill] sm:$0xff] }
 0xaf1   : > { %6130 = vmatpush.bf16.msrb.mxu1 %v6118_v5  ;;  %v7600_v19 = vpop.eup %7599  ;;  %v12271_v5 = vld [vmem:[#allocation103_spill] sm:$0xff] }
 0xaf2   : > { %v5632_v14 = vpop.xlane.xlu2 %5631  ;;  %v5692_v6 = vpop.xlane.xlu0 %5691  ;;  %v5891_v63 = vpack.c.bf16 %v5859_v3, %v5859_v3  ;;  %v5768_v26 = vmul.f32 %v7600_v19, %v11051_v16  ;;  %v5851_v16 = vmul.f32 %v12271_v5, %v5819_v57  ;;  %v5559_v3 = vsub.f32 %v11021_v51, %v5527_v10  ;;  %v12273_v51 = vld [vmem:[#allocation97_spill] sm:$0xff] }
 0xaf3   : > { %7603 = vrcp.f32 %v5632_v14  ;;  %v7602_v32 = vpop.eup %7601 }
 0xaf4   : > { %v5769_v48 = vmul.f32 %v7602_v32, %v10943_v7  ;;  %v6040_v22 = vunpack.c.l.b16 %v5891_v63  ;;  %v5800_v46 = vpack.c.bf16 %v5768_v26, %v5768_v26  ;;  %7605 = vrcp.f32 %v5695_v54 }
 0xaf5   : > { %7607 = vrcp.f32 %v5692_v6  ;;  %v5883_v32 = vpack.c.bf16 %v5851_v16, %v5851_v16  ;;  %v5557_v54 = vsub.f32 %v10780_v1, %v10953_v45  ;;  %v5622_v42 = vmul.f32 1.442695, %v5559_v3 }
 0xaf6   : > { %v5801_v47 = vpack.c.bf16 %v5769_v48, %v5769_v48  ;;  %v6041_v8 = vpack.c.b16 %v6040_v22, %v6039_v39  ;;  %v5832_v14 = vunpack.c.l.bf16 %v5800_v46 }
 0xaf7   : > { %v5940_v12 = vunpack.c.l.b16 %v5883_v32  ;;  %v5618_v46 = vmul.f32 1.442695, %v5557_v54 }
 0xaf8   : > { %v5864_v6 = vmul.f32 %v12273_v51, %v5832_v14 }
 0xaf9   : > { %v7604_v31 = vpop.eup %7603 }
 0xafa   : > { %v5754_v24 = vmul.f32 %v7604_v31, %v11057_v27  ;;  %v5524_v58 = vpop.xlane.xlu2 %5523  ;;  %v5650_v21 = vpop.xlane.xlu0 %5649  ;;  %v5833_v27 = vunpack.c.l.bf16 %v5801_v47 }
 0xafb   : > { %v5558_v50 = vsub.f32 %v11070_v2, %v5524_v58  ;;  %7609 = vrcp.f32 %v5650_v21  ;;  %v7606_v30 = vpop.eup %7605 }
 0xafc   : > { %v5786_v7 = vpack.c.bf16 %v5754_v24, %v5754_v24  ;;  %v7608_v48 = vpop.eup %7607  ;;  %v5865_v31 = vmul.f32 %v12274_v4, %v5833_v27  ;;  %v5896_v24 = vpack.c.bf16 %v5864_v6, %v5864_v6  ;;  %v5775_v21 = vmul.f32 %v7606_v30, %v11048_v62  ;;  %v12276_v6 = vld [vmem:[#allocation78_spill] sm:$0xff] }
 0xafd   : > { %v5620_v9 = vmul.f32 1.442695, %v5558_v50  ;;  %v5774_v45 = vmul.f32 %v7608_v48, %v11060_v60  ;;  %v12277_v48 = vld [vmem:[#allocation106_spill] sm:$0xff] }
 0xafe   : > { %v5818_v19 = vunpack.c.l.bf16 %v5786_v7  ;;  %v5897_v50 = vpack.c.bf16 %v5865_v31, %v5865_v31  ;;  %v6114_v16 = vunpack.c.l.b16 %v5896_v24  ;;  %v12278_v24 = vld [vmem:[#allocation107_spill] sm:$0xff] }
 0xaff   : > { %7611 = vpow2.f32 %v5620_v9  ;;  %v5806_v39 = vpack.c.bf16 %v5774_v45, %v5774_v45  ;;  %v5807_v9 = vpack.c.bf16 %v5775_v21, %v5775_v21 }
 0xb00   : > { %v5850_v2 = vmul.f32 %v12272_v15, %v5818_v19  ;;  %6878 = vmatmul.msk.bf16.vlgmr.msra.gmra.mxu1 %vm1101_vm2, %v6041_v8  ;;  %7613 = vpow2.f32 %v5616_v25  ;;  %v6115_v3 = vunpack.c.l.b16 %v5897_v50 }
 0xb01   : > { %v7610_v57 = vpop.eup %7609  ;;  %7615 = vpow2.f32 %v5622_v42  ;;  %v5838_v14 = vunpack.c.l.bf16 %v5806_v39  ;;  %v5839_v27 = vunpack.c.l.bf16 %v5807_v9 }
 0xb02   : > { %v5882_v63 = vpack.c.bf16 %v5850_v2, %v5850_v2  ;;  %v11149_v26 = vpop.xlane.xlu2 %5697  ;;  %v5760_v5 = vmul.f32 %v7610_v57, %v11072_v44  ;;  %7617 = vpow2.f32 %v5618_v46  ;;  %v6116_v44 = vpack.c.b16 %v6115_v3, %v6114_v16  ;;  %v12275_v2 = vld [vmem:[#allocation13_spill] sm:$0xff]  ;;  %v12280_v3 = vld [vmem:[#allocation40_spill] sm:$0xff] }
 0xb03   : > { %v5870_v54 = vmul.f32 %v12275_v2, %v5838_v14 }
 0xb04   : > { %v5939_v10 = vunpack.c.l.b16 %v5882_v63  ;;  %v5792_v62 = vpack.c.bf16 %v5760_v5, %v5760_v5  ;;  %v5871_v63 = vmul.f32 %v12276_v6, %v5839_v27 }
 0xb05   : > { %v11152_v22 = vpop.eup %7611  ;;  %v5902_v31 = vpack.c.bf16 %v5870_v54, %v5870_v54 }
 0xb06   : > { %v5941_v1 = vpack.c.b16 %v5940_v12, %v5939_v10  ;;  %v5714_v58 = vsel %vm1101_vm2, %v11152_v22, 0.0  ;;  %v11157_v47 = vpop.eup %7613  ;;  %v5824_v32 = vunpack.c.l.bf16 %v5792_v62  ;;  %v5903_v10 = vpack.c.bf16 %v5871_v63, %v5871_v63 }
 0xb07   : > { %5715 = vadd.xlane.f32.xlu2 %v5714_v58  ;;  %v5708_v60 = vsel %vm1101_vm2, %v11157_v47, 0.0  ;;  %v11165_v25 = vpop.eup %7615  ;;  %v6189_v45 = vunpack.c.l.b16 %v5902_v31 }
 0xb08   : > { %6874 = vmatmul.msk.bf16.vlgmr.msrb.gmra.mxu3 %vm1101_vm2, %v5941_v1  ;;  %v11169_v19 = vpop.eup %7617  ;;  %v5856_v57 = vmul.f32 %v12277_v48, %v5824_v32 }
 0xb09   : > { %6105 = vmatpush.bf16.msrb.mxu3 %v10895_v41  ;;  %v5717_v41 = vsel %vm1101_vm2, %v11165_v25, 0.0  ;;  %v5711_v51 = vsel %vm1101_vm2, %v11169_v19, 0.0 }
 0xb0a   : > { %v5653_v7 = vpop.xlane.xlu2 %5652  ;;  %v5888_v46 = vpack.c.bf16 %v5856_v57, %v5856_v57 }
 0xb0b   : > { %7619 = vrcp.f32 %v5653_v7  ;;  %5709 = vadd.xlane.f32.xlu0 %v5708_v60  ;;  %v12279_v7 = vld [vmem:[#allocation38_spill] sm:$0xff] }
 0xb0c   : > { %v6014_v21 = vunpack.c.l.b16 %v5888_v46 }
 0xb0d   : > { %v6193_v8 = vpop.permute.xlu0 %6192 }
 0xb0e   : > { %6205 = vmatpush.bf16.msra.mxu1 %v6193_v8 }
 0xb0f   : > { %5718 = vadd.xlane.f32.xlu2 %v5717_v41 }
 0xb10   : > { %6881 = vmatmul.msk.bf16.vlgmr.msrb.gmra.mxu1 %vm1101_vm2, %v6116_v44  ;;  %v5686_v44 = vpop.xlane.xlu1 %5685 }
 0xb11   : > { %v7620_v15 = vpop.eup %7619 }
 0xb12   : > { %v5761_v42 = vmul.f32 %v7620_v15, %v11085_v0  ;;  %v5701_v30 = vpop.xlane.xlu2 %5700  ;;  %v6190_v0 = vunpack.c.l.b16 %v5903_v10 }
 0xb14   : > { %v5793_v4 = vpack.c.bf16 %v5761_v42, %v5761_v42  ;;  %v6191_v16 = vpack.c.b16 %v6190_v0, %v6189_v45 }
 0xb15   : > { %5712 = vadd.xlane.f32.xlu1 %v5711_v51 }
 0xb16   : > { %v5825_v12 = vunpack.c.l.bf16 %v5793_v4 }
 0xb18   : > { %v5857_v1 = vmul.f32 %v12278_v24, %v5825_v12  ;;  %v12283_v12 = vld [vmem:[#allocation117_spill] sm:$0xff] }
 0xb1a   : > { %v5889_v58 = vpack.c.bf16 %v5857_v1, %v5857_v1  ;;  %v5668_v50 = vpop.xlane.xlu2 %5667 }
 0xb1b   : > { %7621 = vrcp.f32 %v5668_v50 }
 0xb1c   : > { %v6015_v5 = vunpack.c.l.b16 %v5889_v58  ;;  %7623 = vrcp.f32 %v5701_v30  ;;  %v12284_v58 = vld [vmem:[#allocation116_spill] sm:$0xff] }
 0xb1d   : > { %7625 = vrcp.f32 %v11149_v26  ;;  %v12281_v26 = vld [vmem:[#allocation112_spill] sm:$0xff] }
 0xb1e   : > { %v6016_v39 = vpack.c.b16 %v6015_v5, %v6014_v21 }
 0xb1f   : > { %6267 = vrot.lane.b32.xlu0 %v12279_v7, %s7719_s20 }
 0xb20   : > { %6877 = vmatmul.msk.bf16.vlgmr.msra.gmra.mxu3 %vm1101_vm2, %v6016_v39  ;;  %6884 = vmatmul.msk.bf16.vlgmr.msra.gmra.mxu1 %vm1101_vm2, %v6191_v16  ;;  %v12285_v39 = vld [vmem:[#allocation114_spill] sm:$0xff] }
 0xb21   : > { %6180 = vmatpush.bf16.msra.mxu3 %v10969_v56  ;;  %v7622_v9 = vpop.eup %7621 }
 0xb22   : > { %v6143_v60 = vpop.permute.xlu2 %6142  ;;  %v5766_v62 = vmul.f32 %v7622_v9, %v11096_v18  ;;  %v7624_v56 = vpop.eup %7623 }
 0xb23   : > { %6155 = vmatpush.bf16.msrb.mxu2 %v6143_v60  ;;  %v7626_v41 = vpop.eup %7625  ;;  %v5777_v17 = vmul.f32 %v7624_v56, %v11090_v28  ;;  %v12282_v28 = vld [vmem:[#allocation113_spill] sm:$0xff] }
 0xb24   : > { %v5798_v14 = vpack.c.bf16 %v5766_v62, %v5766_v62  ;;  %v5776_v27 = vmul.f32 %v7626_v41, %v11079_v38 }
 0xb25   : > { %v5809_v2 = vpack.c.bf16 %v5777_v17, %v5777_v17 }
 0xb26   : > { %6882 = vmatmul.msk.bf16.vlgmr.msrb.gmra.mxu2 %vm1101_vm2, %v6141_v53  ;;  %v5830_v52 = vunpack.c.l.bf16 %v5798_v14  ;;  %v5808_v30 = vpack.c.bf16 %v5776_v27, %v5776_v27 }
 0xb27   : > { %6292 = vrot.lane.b32.xlu2 %v12280_v3, %s7719_s20  ;;  %v5841_v6 = vunpack.c.l.bf16 %v5809_v2  ;;  %v12286_v3 = vld [vmem:[#allocation94_spill] sm:$0xff]  ;;  %s7659_s20 = sshra.s32 %s6587_s18, 4  ;;  %s7660_s20 = int_to_ptr.hbm [resolvable:$true] %s7659_s20 }
 0xb28   : > { %v5862_v18 = vmul.f32 %v12281_v26, %v5830_v52  ;;  %v5840_v31 = vunpack.c.l.bf16 %v5808_v30  ;;  %s7661_s21 = scalar_lea.hbm %s7660_s20, 256  ;;  %p7666_p0 = scmp.lt.s32.totalorder %s7660_s20, %s11469_s7 }
 0xb29   : > { %v5873_v10 = vmul.f32 %v12283_v12, %v5841_v6  ;;  %p7662_p11 = scmp.ne.s32.totalorder %s7660_s20, %s7661_s21  ;;  %p7667_p1 = scmp.lt.s32.totalorder %s7665_s15, %s7661_s21 }
 0xb2a   : > { %v5894_v48 = vpack.c.bf16 %v5862_v18, %v5862_v18  ;;  %v5872_v50 = vmul.f32 %v12284_v58, %v5840_v31 }
 0xb2b   : > { %v5905_v5 = vpack.c.bf16 %v5873_v10, %v5873_v10  ;;  %p7663_p12 = pnand %p7662_p11, %p7800_p5  ;;  %p7668_p2 = por %p7667_p1, %p7666_p0 }
 0xb2c   : > { %v6089_v24 = vunpack.c.l.b16 %v5894_v48  ;;  %v5904_v16 = vpack.c.bf16 %v5872_v50, %v5872_v50  ;;  %v12288_v48 = vld [vmem:[#allocation120_spill] sm:$0xff] }
 0xb2d   : > { %v6215_v60 = vunpack.c.l.b16 %v5905_v5  ;;  %p7664_p13 = pneg %p7663_p12 }
 0xb2e   : > { %v6214_v9 = vunpack.c.l.b16 %v5904_v16  ;;  %v6889_v16 = vld [vmem:[%s11467_s5 + $0xc] sm:$0xf] }
 0xb2f   : > { %p7669_p3 = pnand %p7668_p2, %p7664_p13 }
 0xb38   : > { %v5671_v8 = vpop.xlane.xlu0 %5670 }
 0xb39   : > { %7627 = vrcp.f32 %v5671_v8 }
 0xb3a   : > { %7629 = vrcp.f32 %v5686_v44  ;;  %v6216_v44 = vpack.c.b16 %v6215_v60, %v6214_v9  ;;  %v12289_v60 = vld [vmem:[#allocation67_spill] sm:$0xff] }
 0xb3f   : > { %v7628_v53 = vpop.eup %7627 }
 0xb40   : > { %v5767_v32 = vmul.f32 %v7628_v53, %v11104_v11  ;;  %v5689_v15 = vpop.xlane.xlu0 %5688  ;;  %v7630_v42 = vpop.eup %7629 }
 0xb41   : > { %7631 = vrcp.f32 %v5689_v15  ;;  %v5772_v63 = vmul.f32 %v7630_v42, %v11026_v36  ;;  %v12287_v42 = vld [vmem:[#allocation123_spill] sm:$0xff] }
 0xb42   : > { %v5799_v54 = vpack.c.bf16 %v5767_v32, %v5767_v32 }
 0xb43   : > { %v5804_v46 = vpack.c.bf16 %v5772_v63, %v5772_v63 }
 0xb44   : > { %v5831_v51 = vunpack.c.l.bf16 %v5799_v54 }
 0xb45   : > { %v5836_v36 = vunpack.c.l.bf16 %v5804_v46  ;;  %v5704_v56 = vpop.xlane.xlu1 %5703 }
 0xb46   : > { %v5863_v57 = vmul.f32 %v12282_v28, %v5831_v51  ;;  %7633 = vrcp.f32 %v5704_v56 }
 0xb47   : > { %v7632_v4 = vpop.eup %7631 }
 0xb48   : > { %v5895_v38 = vpack.c.bf16 %v5863_v57, %v5863_v57  ;;  %v5773_v11 = vmul.f32 %v7632_v4, %v11109_v20  ;;  %v5868_v20 = vmul.f32 %v12286_v3, %v5836_v36  ;;  %v11210_v57 = vpop.f32.mrf.mxu2 }
 0xb4a   : > { %v6090_v1 = vunpack.c.l.b16 %v5895_v38  ;;  %v5805_v45 = vpack.c.bf16 %v5773_v11, %v5773_v11  ;;  %v5900_v14 = vpack.c.bf16 %v5868_v20, %v5868_v20 }
 0xb4c   : > { %v6091_v0 = vpack.c.b16 %v6090_v1, %v6089_v24  ;;  %v5837_v21 = vunpack.c.l.bf16 %v5805_v45  ;;  %v6164_v17 = vunpack.c.l.b16 %v5900_v14  ;;  %v7634_v27 = vpop.eup %7633  ;;  %v12290_v14 = vld [vmem:[#allocation29_spill] sm:$0xff] }
 0xb4d   : > { %v5778_v32 = vmul.f32 %v7634_v27, %v11113_v40 }
 0xb4e   : > { %6880 = vmatmul.msk.bf16.vlgmr.msrb.gmra.mxu3 %vm1101_vm2, %v6091_v0  ;;  %v5869_v7 = vmul.f32 %v12285_v39, %v5837_v21 }
 0xb4f   : > { %v5810_v2 = vpack.c.bf16 %v5778_v32, %v5778_v32 }
 0xb50   : > { %v5901_v8 = vpack.c.bf16 %v5869_v7, %v5869_v7  ;;  %v5934_v12 = vpop.f32.mrf.mxu2  ;;  %v6379_v7 = vsel %vm3361_vm3, %v6889_v16, 0 }
 0xb51   : > { %v5842_v26 = vunpack.c.l.bf16 %v5810_v2 }
 0xb52   : > { %v6165_v41 = vunpack.c.l.b16 %v5901_v8 }
 0xb53   : > { %v6218_v62 = vpop.permute.xlu0 %6217  ;;  %v5874_v30 = vmul.f32 %v12287_v42, %v5842_v26 }
 0xb54   : > { %6230 = vmatpush.bf16.msra.mxu2 %v6218_v62  ;;  %v6166_v52 = vpack.c.b16 %v6165_v41, %v6164_v17  ;;  %v12291_v17 = vld [vmem:[#allocation129_spill] sm:$0xff] }
 0xb55   : > { %v5906_v63 = vpack.c.bf16 %v5874_v30, %v5874_v30 }
 0xb57   : > { %6885 = vmatmul.msk.bf16.vlgmr.msra.gmra.mxu2 %vm1101_vm2, %v6216_v44  ;;  %v6239_v31 = vunpack.c.l.b16 %v5906_v63 }
 0xb58   : > { %v11214_v1 = vpop.f32.mrf.mxu2 }
 0xb5d   : > { %v6243_v53 = vpop.permute.xlu1 %6242 }
 0xb5e   : > { %6255 = vmatpush.bf16.msrb.mxu3 %v6243_v53 }
 0xb5f   : > { %6883 = vmatmul.msk.bf16.vlgmr.msra.gmra.mxu3 %vm1101_vm2, %v6166_v52 }
 0xb62   : > { %v5707_v15 = vpop.xlane.xlu2 %5706  ;;  %7078 = vmatpush.bf16.msra.mxu3 %v6379_v7 }
 0xb63   : > { %7635 = vrcp.f32 %v5707_v15 }
 0xb69   : > { %v7636_v18 = vpop.eup %7635 }
 0xb6a   : > { %v5779_v54 = vmul.f32 %v7636_v18, %v11128_v13  ;;  %v12292_v18 = vld [vmem:[#allocation131_spill] sm:$0xff] }
 0xb6c   : > { %v5811_v51 = vpack.c.bf16 %v5779_v54, %v5779_v54 }
 0xb6e   : > { %v5843_v6 = vunpack.c.l.bf16 %v5811_v51 }
 0xb70   : > { %v5875_v28 = vmul.f32 %v12288_v48, %v5843_v6 }
 0xb72   : > { %v5907_v4 = vpack.c.bf16 %v5875_v28, %v5875_v28 }
 0xb74   : > { %v6240_v38 = vunpack.c.l.b16 %v5907_v4  ;;  %v6312_v4 = vpack.c.bf16 %v5934_v12, %v11210_v57 }
 0xb76   : > { %v6241_v40 = vpack.c.b16 %v6240_v38, %v6239_v31  ;;  %v5982_v38 = vpop.f32.mrf.mxu1 }
 0xb78   : > { %6886 = vmatmul.msk.bf16.vlgmr.msrb.gmra.mxu3 %vm1101_vm2, %v6241_v40 }
 0xb7a   : > { %v5716_v11 = vpop.xlane.xlu2 %5715 }
 0xb7b   : > { %7637 = vrcp.f32 %v5716_v11 }
 0xb7e   : > { %v5710_v10 = vpop.xlane.xlu0 %5709 }
 0xb7f   : > { %7639 = vrcp.f32 %v5710_v10 }
 0xb81   : > { %v7638_v13 = vpop.eup %7637 }
 0xb82   : > { %v5782_v46 = vmul.f32 %v7638_v13, %v11152_v22  ;;  %v5719_v24 = vpop.xlane.xlu2 %5718  ;;  %v5984_v13 = vpop.f32.mrf.mxu1 }
 0xb83   : > { %7641 = vrcp.f32 %v5719_v24 }
 0xb84   : > { %v5814_v45 = vpack.c.bf16 %v5782_v46, %v5782_v46 }
 0xb85   : > { %v7640_v58 = vpop.eup %7639 }
 0xb86   : > { %v5780_v50 = vmul.f32 %v7640_v58, %v11157_v47  ;;  %v5846_v21 = vunpack.c.l.bf16 %v5814_v45  ;;  %v6009_v47 = vpop.f32.mrf.mxu2 }
 0xb88   : > { %v5713_v0 = vpop.xlane.xlu1 %5712  ;;  %v5812_v36 = vpack.c.bf16 %v5780_v50, %v5780_v50  ;;  %v5878_v3 = vmul.f32 %v12289_v60, %v5846_v21  ;;  %v6314_v50 = vpack.c.bf16 %v5984_v13, %v5982_v38 }
 0xb89   : > { %7643 = vrcp.f32 %v5713_v0  ;;  %v7642_v5 = vpop.eup %7641 }
 0xb8a   : > { %v5783_v39 = vmul.f32 %v7642_v5, %v11165_v25  ;;  %v6293_v22 = vpop.permute.xlu2 %6292  ;;  %v5844_v9 = vunpack.c.l.bf16 %v5812_v36  ;;  %v5910_v44 = vpack.c.bf16 %v5878_v3, %v5878_v3  ;;  %v6057_v45 = vpop.f32.mrf.mxu1  ;;  %v6315_v36 = vpack.c.bf16 %v6009_v47, %v11214_v1 }
 0xb8b   : > { %6305 = vmatpush.bf16.msrb.mxu2 %v6293_v22  ;;  %v5957_v31 = vpop.f32.mrf.mxu3 }
 0xb8c   : > { %v5815_v20 = vpack.c.bf16 %v5783_v39, %v5783_v39  ;;  %v5876_v52 = vmul.f32 %v12291_v17, %v5844_v9  ;;  %v6289_v15 = vunpack.c.l.b16 %v5910_v44 }
 0xb8e   : > { %v5847_v8 = vunpack.c.l.bf16 %v5815_v20  ;;  %v5908_v26 = vpack.c.bf16 %v5876_v52, %v5876_v52  ;;  %v6082_v30 = vpop.f32.mrf.mxu2 }
 0xb8f   : > { %v7644_v62 = vpop.eup %7643 }
 0xb90   : > { %v5781_v56 = vmul.f32 %v7644_v62, %v11169_v19  ;;  %v5879_v41 = vmul.f32 %v12290_v14, %v5847_v8  ;;  %v6264_v19 = vunpack.c.l.b16 %v5908_v26 }
 0xb91   : > { %v6268_v53 = vpop.permute.xlu0 %6267 }
 0xb92   : > { %v5813_v25 = vpack.c.bf16 %v5781_v56, %v5781_v56  ;;  %v5911_v27 = vpack.c.bf16 %v5879_v41, %v5879_v41  ;;  %6280 = vmatpush.bf16.msrb.mxu1 %v6268_v53  ;;  %v6059_v57 = vpop.f32.mrf.mxu1 }
 0xb93   : > { %v5959_v10 = vpop.f32.mrf.mxu3  ;;  %v6317_v62 = vpack.c.bf16 %v6059_v57, %v6057_v45  ;;  %v12299_v45 = vld [vmem:[#allocation47_spill] sm:$0xff] }
 0xb94   : > { %v5845_v32 = vunpack.c.l.bf16 %v5813_v25  ;;  %v6290_v2 = vunpack.c.l.b16 %v5911_v27  ;;  %v6313_v46 = vpack.c.bf16 %v5959_v10, %v5957_v31  ;;  %v11255_v25 = vld [vmem:[%s11468_s6] ss:$0 sm:$0xff]  ;;  %v12297_v10 = vld [vmem:[#allocation32_spill] sm:$0xff] }
 0xb96   : > { %6388 = vmatpush.bf16.msra.mxu1 %v6379_v7  ;;  %v5877_v54 = vmul.f32 %v12292_v18, %v5845_v32  ;;  %v6291_v42 = vpack.c.b16 %v6290_v2, %v6289_v15  ;;  %v6084_v48 = vpop.f32.mrf.mxu2  ;;  %v12293_v15 = vld [vmem:[#allocation147_spill] sm:$0xff] }
 0xb97   : > { %v6318_v56 = vpack.c.bf16 %v6084_v48, %v6082_v30 }
 0xb98   : > { %v5909_v51 = vpack.c.bf16 %v5877_v54, %v5877_v54  ;;  %6888 = vmatmul.msk.bf16.vlgmr.msrb.gmra.mxu2 %vm1101_vm2, %v6291_v42  ;;  %v12294_v54 = vld [vmem:[#allocation69_spill] sm:$0xff]  ;;  %v12295_v42 = vld [vmem:[#allocation139_spill] sm:$0xff] }
 0xb99   : > { %v3517_v30 = vadd.f32 %v12295_v42, %v12294_v54  ;;  %v12309_v54 = vld [vmem:[#allocation54_spill] sm:$0xff] }
 0xb9a   : > { %v6265_v6 = vunpack.c.l.b16 %v5909_v51  ;;  %v6132_v0 = vpop.f32.mrf.mxu1  ;;  %v12296_v51 = vld [vmem:[#allocation149_spill] sm:$0xff] }
 0xb9c   : > { %v6266_v63 = vpack.c.b16 %v6265_v6, %v6264_v19  ;;  %v5017_v19 = vadd.f32 %v12296_v51, %v3517_v30 }
 0xb9e   : > { %6887 = vmatmul.msk.bf16.vlgmr.msrb.gmra.mxu1 %vm1101_vm2, %v6266_v63 }
 0xba2   : > { %v6134_v39 = vpop.f32.mrf.mxu1 }
 0xba3   : > { %v6032_v24 = vpop.f32.mrf.mxu3  ;;  %v6320_v32 = vpack.c.bf16 %v6134_v39, %v6132_v0  ;;  %v12303_v39 = vld [vmem:[#allocation138_spill] sm:$0xff] }
 0xba9   : > { %v11229_v28 = vpop.f32.mrf.mxu2 }
 0xbaa   : > { %v6207_v3 = vpop.f32.mrf.mxu1 }
 0xbab   : > { %v6034_v58 = vpop.f32.mrf.mxu3 }
 0xbac   : > { %v6316_v60 = vpack.c.bf16 %v6034_v58, %v6032_v24  ;;  %v12298_v24 = vld [vmem:[#allocation45_spill] sm:$0xff] }
 0xbad   : > { %v3522_v58 = vadd.f32 %v12299_v45, %v12298_v24 }
 0xbae   : > { %6890 = vmatmul.msk.bf16.vlgmr.msra.gmra.mxu1 %vm675_vm1, %v6312_v4 }
 0xbb1   : > { %v11233_v40 = vpop.f32.mrf.mxu2 }
 0xbb2   : > { %v6321_v11 = vpack.c.bf16 %v11233_v40, %v11229_v28  ;;  %v6209_v20 = vpop.f32.mrf.mxu1  ;;  %v12301_v28 = vld [vmem:[#allocation159_spill] sm:$0xff] }
 0xbb3   : > { %v6323_v9 = vpack.c.bf16 %v6209_v20, %v6207_v3 }
 0xbbe   : > { %6891 = vmatmul.msk.bf16.gmra.mxu1 %vm675_vm1, %v6313_v46 }
 0xbce   : > { %6892 = vmatmul.msk.bf16.gmra.mxu1 %vm675_vm1, %v6314_v50  ;;  %v12300_v50 = vld [vmem:[#allocation155_spill] sm:$0xff] }
 0xbcf   : > { %v5019_v57 = vadd.f32 %v12300_v50, %v3522_v58 }
 0xbd1   : > { %v6107_v12 = vpop.f32.mrf.mxu3 }
 0xbd9   : > { %v6109_v21 = vpop.f32.mrf.mxu3 }
 0xbda   : > { %v6319_v5 = vpack.c.bf16 %v6109_v21, %v6107_v12  ;;  %v6232_v1 = vpop.f32.mrf.mxu2 }
 0xbde   : > { %6893 = vmatmul.msk.bf16.gmra.mxu1 %vm675_vm1, %v6315_v36  ;;  %v11286_v36 = vpop.f32.mrf.mxu0 }
 0xbe2   : > { %v6182_v16 = vpop.f32.mrf.mxu3  ;;  %v6234_v47 = vpop.f32.mrf.mxu2 }
 0xbe3   : > { %v6324_v8 = vpack.c.bf16 %v6234_v47, %v6232_v1  ;;  %v12305_v47 = vld [vmem:[#allocation158_spill] sm:$0xff] }
 0xbea   : > { %v6184_v22 = vpop.f32.mrf.mxu3 }
 0xbeb   : > { %v6322_v7 = vpack.c.bf16 %v6184_v22, %v6182_v16  ;;  %v12302_v16 = vld [vmem:[#allocation133_spill] sm:$0xff] }
 0xbec   : > { %v3527_v22 = vadd.f32 %v12303_v39, %v12302_v16  ;;  %v12316_v39 = vld [vmem:[#allocation23_spill] sm:$0xff] }
 0xbed   : > { %6900 = vmatmul.msk.bf16.vlgmr.msra.gmra.mxu3 %vm675_vm1, %v6322_v7  ;;  %v12304_v7 = vld [vmem:[#allocation101_spill] sm:$0xff] }
 0xbee   : > { %6894 = vmatmul.msk.bf16.gmra.mxu1 %vm675_vm1, %v6316_v60  ;;  %v5021_v60 = vadd.f32 %v12304_v7, %v3527_v22  ;;  %v12317_v22 = vld [vmem:[#allocation27_spill] sm:$0xff] }
 0xbef   : > { %v3542_v7 = vadd.f32 %v12317_v22, %v12316_v39  ;;  %v12330_v22 = vld [vmem:[#allocation19_spill] sm:$0xff] }
 0xbfb   : > { %v6257_v44 = vpop.f32.mrf.mxu3 }
 0xbfd   : > { %6901 = vmatmul.msk.bf16.gmra.mxu3 %vm675_vm1, %v6323_v9  ;;  %v4986_v9 = vpop.f32.mrf.mxu0 }
 0xbfe   : > { %6895 = vmatmul.msk.bf16.gmra.mxu1 %vm675_vm1, %v6317_v62 }
 0xc03   : > { %v6259_v14 = vpop.f32.mrf.mxu3 }
 0xc04   : > { %v6325_v41 = vpack.c.bf16 %v6259_v14, %v6257_v44  ;;  %v12306_v44 = vld [vmem:[#allocation79_spill] sm:$0xff]  ;;  %v12307_v14 = vld [vmem:[#allocation145_spill] sm:$0xff] }
 0xc0d   : > { %6902 = vmatmul.msk.bf16.gmra.mxu3 %vm675_vm1, %v6324_v8 }
 0xc0e   : > { %6896 = vmatmul.msk.bf16.gmra.mxu1 %vm675_vm1, %v6318_v56 }
 0xc1b   : > { %v6282_v17 = vpop.f32.mrf.mxu1  ;;  %v6307_v26 = vpop.f32.mrf.mxu2 }
 0xc1d   : > { %6903 = vmatmul.msk.bf16.gmra.mxu3 %vm675_vm1, %v6325_v41  ;;  %v3532_v41 = vadd.f32 %v12307_v14, %v12306_v44 }
 0xc1e   : > { %6897 = vmatmul.msk.bf16.gmra.mxu1 %vm675_vm1, %v6319_v5 }
 0xc23   : > { %v6284_v52 = vpop.f32.mrf.mxu1  ;;  %v6309_v4 = vpop.f32.mrf.mxu2 }
 0xc24   : > { %v6326_v53 = vpack.c.bf16 %v6284_v52, %v6282_v17  ;;  %v6327_v31 = vpack.c.bf16 %v6309_v4, %v6307_v26  ;;  %v4988_v17 = vpop.f32.mrf.mxu0  ;;  %v5023_v52 = vadd.f32 %v10823_v23, %v3532_v41  ;;  %v12311_v23 = vld [vmem:[#allocation148_spill] sm:$0xff] }
 0xc2b   : > { %v6390_v27 = vpop.f32.mrf.mxu1 }
 0xc2c   : > { %v6470_v2 = vadd.f32 %v6390_v27, %v12293_v15  ;;  %v4991_v15 = vpop.f32.mrf.mxu0 }
 0xc2d   : > { %6904 = vmatmul.msk.bf16.gmra.mxu3 %vm675_vm1, %v6326_v53 }
 0xc2e   : > { %v6506_v18 = vadd.f32 %v11255_v25, %v6470_v2  ;;  %6898 = vmatmul.msk.bf16.gmra.mxu1 %vm675_vm1, %v6320_v32 }
 0xc30   : > { %6538 = vst.msk [vmem:[%s11263_s9] sm:$0xff] %vm402_vm0, %v6506_v18  ;;  %v12308_v18 = vld [vmem:[#allocation132_spill] sm:$0xff] }
 0xc31   : > { %v3565_v42 = vadd.f32 %v12309_v54, %v12308_v18  ;;  %v12322_v18 = vld [vmem:[#allocation150_spill] sm:$0xff]  ;;  %v12323_v54 = vld [vmem:[#allocation17_spill] sm:$0xff] }
 0xc33   : > { %v6392_v6 = vpop.f32.mrf.mxu1  ;;  %v5036_v51 = vadd.f32 %v4986_v9, %v3565_v42  ;;  %v3547_v42 = vadd.f32 %v12323_v54, %v12322_v18  ;;  %v12336_v18 = vld [vmem:[#allocation127_spill] sm:$0xff]  ;;  %v12337_v54 = vld [vmem:[#allocation144_spill] sm:$0xff] }
 0xc34   : > { %v6471_v63 = vadd.f32 %v6392_v6, %v5017_v19  ;;  %v12310_v19 = vld [vmem:[#allocation121_spill] sm:$0xff] }
 0xc35   : > { %v3537_v6 = vadd.f32 %v12311_v23, %v12310_v19  ;;  %v5029_v19 = vadd.f32 %v10893_v37, %v3547_v42  ;;  %v3587_v42 = vadd.f32 %v12337_v54, %v12336_v18 }
 0xc36   : > { %v6507_v48 = vadd.f32 %v11255_v25, %v6471_v63 }
 0xc37   : > { %v5025_v4 = vadd.f32 %v10855_v29, %v3537_v6 }
 0xc38   : > { %6539 = vst.msk [vmem:[%s11263_s9 + $0x8] sm:$0xff] %vm402_vm0, %v6507_v48 }
 0xc3b   : > { %v6395_v38 = vpop.f32.mrf.mxu1 }
 0xc3c   : > { %v6472_v13 = vadd.f32 %v6395_v38, %v12297_v10  ;;  %v4993_v38 = vpop.f32.mrf.mxu0 }
 0xc3d   : > { %6905 = vmatmul.msk.bf16.gmra.mxu3 %vm675_vm1, %v6327_v31 }
 0xc3e   : > { %v6508_v46 = vadd.f32 %v11255_v25, %v6472_v13  ;;  %6899 = vmatmul.msk.bf16.gmra.mxu1 %vm675_vm1, %v6321_v11  ;;  %v12312_v13 = vld [vmem:[#allocation128_spill] sm:$0xff] }
 0xc40   : > { %6540 = vst.msk [vmem:[%s11263_s9 + $0x10] sm:$0xff] %vm402_vm0, %v6508_v46  ;;  %v12313_v46 = vld [vmem:[#allocation33_spill] sm:$0xff] }
 0xc41   : > { %v3567_v24 = vadd.f32 %v12313_v46, %v12312_v13 }
 0xc43   : > { %v6397_v12 = vpop.f32.mrf.mxu1  ;;  %v5037_v58 = vadd.f32 %v4988_v17, %v3567_v24 }
 0xc44   : > { %v6473_v0 = vadd.f32 %v6397_v12, %v5019_v57 }
 0xc46   : > { %v6509_v21 = vadd.f32 %v11255_v25, %v6473_v0 }
 0xc48   : > { %6541 = vst.msk [vmem:[%s11263_s9 + $0x18] sm:$0xff] %vm402_vm0, %v6509_v21  ;;  %v12314_v21 = vld [vmem:[#allocation31_spill] sm:$0xff] }
 0xc4b   : > { %v6400_v5 = vpop.f32.mrf.mxu1 }
 0xc4c   : > { %v6474_v40 = vadd.f32 %v6400_v5, %v12301_v28  ;;  %v12315_v5 = vld [vmem:[#allocation161_spill] sm:$0xff] }
 0xc4d   : > { %v3570_v28 = vadd.f32 %v12315_v5, %v12314_v21  ;;  %v12329_v21 = vld [vmem:[#allocation14_spill] sm:$0xff] }
 0xc4e   : > { %v6510_v11 = vadd.f32 %v11255_v25, %v6474_v40  ;;  %v4996_v40 = vpop.f32.mrf.mxu0 }
 0xc4f   : > { %v5038_v16 = vadd.f32 %v4991_v15, %v3570_v28 }
 0xc50   : > { %6542 = vst.msk [vmem:[%s11263_s9 + $0x20] sm:$0xff] %vm402_vm0, %v6510_v11 }
 0xc53   : > { %v6402_v3 = vpop.f32.mrf.mxu1 }
 0xc54   : > { %v6475_v20 = vadd.f32 %v6402_v3, %v5021_v60 }
 0xc56   : > { %v6511_v62 = vadd.f32 %v11255_v25, %v6475_v20  ;;  %v5027_v20 = vadd.f32 %v10876_v33, %v3542_v7  ;;  %v4998_v14 = vpop.f32.mrf.mxu0  ;;  %v12331_v7 = vld [vmem:[#allocation99_spill] sm:$0xff] }
 0xc58   : > { %6543 = vst.msk [vmem:[%s11263_s9 + $0x28] sm:$0xff] %vm402_vm0, %v6511_v62 }
 0xc5b   : > { %v6405_v1 = vpop.f32.mrf.mxu1 }
 0xc5c   : > { %v6476_v8 = vadd.f32 %v6405_v1, %v12305_v47  ;;  %v12318_v1 = vld [vmem:[#allocation142_spill] sm:$0xff]  ;;  %v12319_v47 = vld [vmem:[#allocation124_spill] sm:$0xff] }
 0xc5e   : > { %v6512_v56 = vadd.f32 %v11255_v25, %v6476_v8  ;;  %v3572_v8 = vadd.f32 %v12319_v47, %v12318_v1  ;;  %v5001_v23 = vpop.f32.mrf.mxu0 }
 0xc60   : > { %6544 = vst.msk [vmem:[%s11263_s9 + $0x30] sm:$0xff] %vm402_vm0, %v6512_v56  ;;  %v5039_v44 = vadd.f32 %v4993_v38, %v3572_v8  ;;  %v12332_v8 = vld [vmem:[#allocation25_spill] sm:$0xff] }
 0xc63   : > { %v6407_v53 = vpop.f32.mrf.mxu1 }
 0xc64   : > { %v6477_v27 = vadd.f32 %v6407_v53, %v5023_v52 }
 0xc66   : > { %v6513_v32 = vadd.f32 %v11255_v25, %v6477_v27  ;;  %v12320_v27 = vld [vmem:[#allocation15_spill] sm:$0xff]  ;;  %v5003_v24 = vpop.f32.mrf.mxu0 }
 0xc68   : > { %6545 = vst.msk [vmem:[%s11263_s9 + $0x38] sm:$0xff] %vm402_vm0, %v6513_v32  ;;  %v12321_v32 = vld [vmem:[#allocation137_spill] sm:$0xff] }
 0xc69   : > { %v3575_v15 = vadd.f32 %v12321_v32, %v12320_v27 }
 0xc6b   : > { %v6410_v2 = vpop.f32.mrf.mxu1 }
 0xc6c   : > { %v6478_v26 = vadd.f32 %v6410_v2, %v10839_v61 }
 0xc6e   : > { %v6514_v30 = vadd.f32 %v11255_v25, %v6478_v26  ;;  %v5040_v26 = vadd.f32 %v4996_v40, %v3575_v15 }
 0xc70   : > { %6546 = vst.msk [vmem:[%s11263_s9 + $0x40] sm:$0xff] %vm402_vm0, %v6514_v30  ;;  %v6440_v63 = vpop.f32.mrf.mxu3 }
 0xc71   : > { %v6490_v48 = vadd.f32 %v6440_v63, %v5036_v51 }
 0xc73   : > { %v6526_v31 = vadd.f32 %v11255_v25, %v6490_v48  ;;  %v6412_v61 = vpop.f32.mrf.mxu1  ;;  %v12324_v48 = vld [vmem:[#allocation122_spill] sm:$0xff] }
 0xc74   : > { %v6479_v10 = vadd.f32 %v6412_v61, %v5025_v4  ;;  %v12325_v4 = vld [vmem:[#allocation18_spill] sm:$0xff] }
 0xc75   : > { %6558 = vst.msk [vmem:[%s11263_s9 + $0xa0] sm:$0xff] %vm402_vm0, %v6526_v31  ;;  %v3577_v31 = vadd.f32 %v12325_v4, %v12324_v48  ;;  %v12339_v4 = vld [vmem:[#allocation46_spill] sm:$0xff] }
 0xc76   : > { %v6515_v45 = vadd.f32 %v11255_v25, %v6479_v10 }
 0xc77   : > { %v5041_v38 = vadd.f32 %v4998_v14, %v3577_v31  ;;  %v12340_v31 = vld [vmem:[#allocation125_spill] sm:$0xff] }
 0xc78   : > { %6547 = vst.msk [vmem:[%s11263_s9 + $0x48] sm:$0xff] %vm402_vm0, %v6515_v45  ;;  %v6442_v50 = vpop.f32.mrf.mxu3 }
 0xc79   : > { %v6491_v57 = vadd.f32 %v6442_v50, %v5037_v58  ;;  %v12326_v58 = vld [vmem:[#allocation63_spill] sm:$0xff]  ;;  %v12327_v50 = vld [vmem:[#allocation80_spill] sm:$0xff] }
 0xc7b   : > { %v6527_v29 = vadd.f32 %v11255_v25, %v6491_v57  ;;  %v6415_v12 = vpop.f32.mrf.mxu1  ;;  %v3580_v57 = vadd.f32 %v12327_v50, %v12326_v58 }
 0xc7c   : > { %v6480_v0 = vadd.f32 %v6415_v12, %v10867_v55 }
 0xc7d   : > { %6559 = vst.msk [vmem:[%s11263_s9 + $0xa8] sm:$0xff] %vm402_vm0, %v6527_v29  ;;  %v5042_v12 = vadd.f32 %v5001_v23, %v3580_v57 }
 0xc7e   : > { %v6516_v11 = vadd.f32 %v11255_v25, %v6480_v0  ;;  %v12328_v0 = vld [vmem:[#allocation154_spill] sm:$0xff] }
 0xc7f   : > { %v3552_v5 = vadd.f32 %v12329_v21, %v12328_v0  ;;  %v12343_v0 = vld [vmem:[#allocation22_spill] sm:$0xff]  ;;  %v12344_v21 = vld [vmem:[#allocation57_spill] sm:$0xff] }
 0xc80   : > { %6548 = vst.msk [vmem:[%s11263_s9 + $0x50] sm:$0xff] %vm402_vm0, %v6516_v11  ;;  %v6445_v60 = vpop.f32.mrf.mxu3 }
 0xc81   : > { %v6492_v3 = vadd.f32 %v6445_v60, %v5038_v16  ;;  %v5031_v11 = vadd.f32 %v10916_v34, %v3552_v5  ;;  %v3582_v60 = vadd.f32 %v12331_v7, %v12330_v22  ;;  %v3592_v5 = vadd.f32 %v12344_v21, %v12343_v0 }
 0xc83   : > { %v6528_v55 = vadd.f32 %v11255_v25, %v6492_v3  ;;  %v6417_v9 = vpop.f32.mrf.mxu1  ;;  %v5006_v3 = vpop.f32.mrf.mxu0 }
 0xc84   : > { %v6481_v62 = vadd.f32 %v6417_v9, %v5027_v20 }
 0xc85   : > { %6560 = vst.msk [vmem:[%s11263_s9 + $0xb0] sm:$0xff] %vm402_vm0, %v6528_v55  ;;  %v5043_v55 = vadd.f32 %v5003_v24, %v3582_v60 }
 0xc86   : > { %v6517_v56 = vadd.f32 %v11255_v25, %v6481_v62 }
 0xc88   : > { %6549 = vst.msk [vmem:[%s11263_s9 + $0x58] sm:$0xff] %vm402_vm0, %v6517_v56  ;;  %v6447_v41 = vpop.f32.mrf.mxu3  ;;  %v12333_v56 = vld [vmem:[#allocation135_spill] sm:$0xff] }
 0xc89   : > { %v6493_v17 = vadd.f32 %v6447_v41, %v5039_v44  ;;  %v3585_v44 = vadd.f32 %v12333_v56, %v12332_v8 }
 0xc8b   : > { %v6529_v33 = vadd.f32 %v11255_v25, %v6493_v17  ;;  %v6420_v52 = vpop.f32.mrf.mxu1  ;;  %v5044_v41 = vadd.f32 %v5006_v3, %v3585_v44  ;;  %v12334_v17 = vld [vmem:[#allocation42_spill] sm:$0xff] }
 0xc8c   : > { %v6482_v53 = vadd.f32 %v6420_v52, %v10885_v35 }
 0xc8d   : > { %6561 = vst.msk [vmem:[%s11263_s9 + $0xb8] sm:$0xff] %vm402_vm0, %v6529_v33  ;;  %v12335_v33 = vld [vmem:[#allocation34_spill] sm:$0xff] }
 0xc8e   : > { %v6518_v2 = vadd.f32 %v11255_v25, %v6482_v53  ;;  %v3557_v52 = vadd.f32 %v12335_v33, %v12334_v17  ;;  %v5008_v53 = vpop.f32.mrf.mxu0 }
 0xc90   : > { %6550 = vst.msk [vmem:[%s11263_s9 + $0x60] sm:$0xff] %vm402_vm0, %v6518_v2  ;;  %v6450_v30 = vpop.f32.mrf.mxu3  ;;  %v5033_v15 = vadd.f32 %v10939_v59, %v3557_v52 }
 0xc91   : > { %v6494_v51 = vadd.f32 %v6450_v30, %v5040_v26 }
 0xc93   : > { %v6530_v35 = vadd.f32 %v11255_v25, %v6494_v51  ;;  %v6422_v6 = vpop.f32.mrf.mxu1  ;;  %v5045_v51 = vadd.f32 %v5008_v53, %v3587_v42 }
 0xc94   : > { %v6483_v63 = vadd.f32 %v6422_v6, %v5029_v19 }
 0xc95   : > { %6562 = vst.msk [vmem:[%s11263_s9 + $0xc0] sm:$0xff] %vm402_vm0, %v6530_v35 }
 0xc96   : > { %v6519_v61 = vadd.f32 %v11255_v25, %v6483_v63  ;;  %v5011_v59 = vpop.f32.mrf.mxu0  ;;  %v12338_v63 = vld [vmem:[#allocation75_spill] sm:$0xff] }
 0xc98   : > { %6551 = vst.msk [vmem:[%s11263_s9 + $0x68] sm:$0xff] %vm402_vm0, %v6519_v61  ;;  %v6452_v10 = vpop.f32.mrf.mxu3  ;;  %v3590_v61 = vadd.f32 %v12340_v31, %v12339_v4 }
 0xc99   : > { %v6495_v13 = vadd.f32 %v6452_v10, %v5041_v38 }
 0xc9a   : > { %v5046_v10 = vadd.f32 %v5011_v59, %v3590_v61 }
 0xc9b   : > { %v6531_v37 = vadd.f32 %v11255_v25, %v6495_v13  ;;  %v6425_v46 = vpop.f32.mrf.mxu1  ;;  %v12341_v13 = vld [vmem:[#allocation136_spill] sm:$0xff] }
 0xc9c   : > { %v6484_v45 = vadd.f32 %v6425_v46, %v10907_v43 }
 0xc9d   : > { %6563 = vst.msk [vmem:[%s11263_s9 + $0xc8] sm:$0xff] %vm402_vm0, %v6531_v37  ;;  %v12342_v37 = vld [vmem:[#allocation151_spill] sm:$0xff] }
 0xc9e   : > { %v6520_v29 = vadd.f32 %v11255_v25, %v6484_v45  ;;  %v3562_v46 = vadd.f32 %v12342_v37, %v12341_v13 }
 0xca0   : > { %6552 = vst.msk [vmem:[%s11263_s9 + $0x70] sm:$0xff] %vm402_vm0, %v6520_v29  ;;  %v6455_v28 = vpop.f32.mrf.mxu3  ;;  %v5035_v58 = vadd.f32 %v11286_v36, %v3562_v46  ;;  %v5013_v29 = vpop.f32.mrf.mxu0 }
 0xca1   : > { %v6496_v40 = vadd.f32 %v6455_v28, %v5042_v12  ;;  %v5047_v36 = vadd.f32 %v5013_v29, %v3592_v5 }
 0xca3   : > { %v6532_v43 = vadd.f32 %v11255_v25, %v6496_v40  ;;  %v6427_v16 = vpop.f32.mrf.mxu1 }
 0xca4   : > { %v6485_v39 = vadd.f32 %v6427_v16, %v5031_v11 }
 0xca5   : > { %6564 = vst.msk [vmem:[%s11263_s9 + $0xd0] sm:$0xff] %vm402_vm0, %v6532_v43 }
 0xca6   : > { %v6521_v20 = vadd.f32 %v11255_v25, %v6485_v39 }
 0xca8   : > { %6553 = vst.msk [vmem:[%s11263_s9 + $0x78] sm:$0xff] %vm402_vm0, %v6521_v20  ;;  %v6457_v9 = vpop.f32.mrf.mxu3 }
 0xca9   : > { %v6497_v62 = vadd.f32 %v6457_v9, %v5043_v55 }
 0xcab   : > { %v6533_v34 = vadd.f32 %v11255_v25, %v6497_v62  ;;  %v6430_v1 = vpop.f32.mrf.mxu1 }
 0xcac   : > { %v6486_v47 = vadd.f32 %v6430_v1, %v10927_v49 }
 0xcad   : > { %6565 = vst.msk [vmem:[%s11263_s9 + $0xd8] sm:$0xff] %vm402_vm0, %v6533_v34 }
 0xcae   : > { %v6522_v14 = vadd.f32 %v11255_v25, %v6486_v47 }
 0xcb0   : > { %6554 = vst.msk [vmem:[%s11263_s9 + $0x80] sm:$0xff] %vm402_vm0, %v6522_v14  ;;  %v6460_v27 = vpop.f32.mrf.mxu3 }
 0xcb1   : > { %v6498_v32 = vadd.f32 %v6460_v27, %v5044_v41 }
 0xcb3   : > { %v6534_v49 = vadd.f32 %v11255_v25, %v6498_v32  ;;  %v6432_v2 = vpop.f32.mrf.mxu1 }
 0xcb4   : > { %v6487_v26 = vadd.f32 %v6432_v2, %v5033_v15 }
 0xcb5   : > { %6566 = vst.msk [vmem:[%s11263_s9 + $0xe0] sm:$0xff] %vm402_vm0, %v6534_v49 }
 0xcb6   : > { %v6523_v30 = vadd.f32 %v11255_v25, %v6487_v26 }
 0xcb8   : > { %6555 = vst.msk [vmem:[%s11263_s9 + $0x88] sm:$0xff] %vm402_vm0, %v6523_v30  ;;  %v6462_v19 = vpop.f32.mrf.mxu3 }
 0xcb9   : > { %v6499_v23 = vadd.f32 %v6462_v19, %v5045_v51 }
 0xcbb   : > { %v6535_v35 = vadd.f32 %v11255_v25, %v6499_v23  ;;  %v6435_v6 = vpop.f32.mrf.mxu1 }
 0xcbc   : > { %v6488_v48 = vadd.f32 %v6435_v6, %v12338_v63 }
 0xcbd   : > { %6567 = vst.msk [vmem:[%s11263_s9 + $0xe8] sm:$0xff] %vm402_vm0, %v6535_v35 }
 0xcbe   : > { %v6524_v38 = vadd.f32 %v11255_v25, %v6488_v48 }
 0xcc0   : > { %6556 = vst.msk [vmem:[%s11263_s9 + $0x90] sm:$0xff] %vm402_vm0, %v6524_v38  ;;  %v6465_v24 = vpop.f32.mrf.mxu3 }
 0xcc1   : > { %v6500_v45 = vadd.f32 %v6465_v24, %v5046_v10 }
 0xcc3   : > { %v6536_v50 = vadd.f32 %v11255_v25, %v6500_v45  ;;  %v6437_v57 = vpop.f32.mrf.mxu1 }
 0xcc4   : > { %v6489_v12 = vadd.f32 %v6437_v57, %v5035_v58 }
 0xcc5   : > { %6568 = vst.msk [vmem:[%s11263_s9 + $0xf0] sm:$0xff] %vm402_vm0, %v6536_v50 }
 0xcc6   : > { %v6525_v28 = vadd.f32 %v11255_v25, %v6489_v12 }
 0xcc8   : > { %6557 = vst.msk [vmem:[%s11263_s9 + $0x98] sm:$0xff] %vm402_vm0, %v6525_v28  ;;  %v6467_v40 = vpop.f32.mrf.mxu3 }
 0xcc9   : > { %v6501_v11 = vadd.f32 %v6467_v40, %v5047_v36 }
 0xccb   : > { %v6537_v43 = vadd.f32 %v11255_v25, %v6501_v11 }
 0xccd   : > { %6569 = vst.msk [vmem:[%s11263_s9 + $0xf8] sm:$0xff] %vm402_vm0, %v6537_v43 }
 0xcce   : > { %7672 = shalt.err (!%p7669_p3)
}
 0xccf   : > { %s7720_s23 = smov 128   ;;  %s7721_s9 = smov 8  }
 0xcd0   : > { %7079 = dma.vmem_to_hbm [thread:$0]  (%p7800_p5), %s6585_s28, 4096, %s6587_s18, %s6571_s19, %s7720_s23, %s7720_s23, %s7721_s9  }
 0xcd1 PF: > { %p7085_p4 = scmp.ge.s32.totalorder %s7707_s27, 2  ;;  %s6601_s14 = sand.u32 1, %s7695_s24  }
 0xcd2   : > { %s6602_s16 = scalar_lea.sflag [#allocation3], %s6601_s14 }
 0xcd3   : > { %p7082_p7 = pnand %p7085_p4, %p7804_p6 }
 0xcd5   : > { %p7083_p8 = pneg %p7082_p7 }
 0xcd7   : > { %7690 = dma.done.wait (%p7083_p8), %s6602_s16, 4096  }
 0xcd8   : > { %7692 = vsyncadd (%p7083_p8), %s6602_s16, 4294963200  ;;  %p17_p9 = scmp.ge.s32.totalorder %s7787_s30, 4   ;;  %s12345_s24 = smov %s7699_s25 }
 0xcd9   : > { %s12346_s25 = smov %s7703_s26  ;;  %s12347_s26 = smov %s7798_s10 }
 0xcda   : > { %s12348_s27 = smov %s7787_s30  ;;  %19 = sbr.rel (!%p17_p9) target bundleno = 3 (0x3), region = 92 }
 0xcdf   :  { %6608 = vsyncpa [#allocation3], 1 }
 0xce0   :  { %6610 = vsyncpa [#allocation3 + $0x1], 1 }

</bundles_post_ra>
